<compile_context>
chip_gen: v7x
topology: tpu7x:2x2x1
jax: 0.10.0
libtpu: 0.0.40
codegen_flags: <defaults>
</compile_context>

<pallas_src>
import math
import functools

import jax
import jax.numpy as jnp
from jax.experimental import pallas as pl
from jax.experimental.pallas import tpu as pltpu

BN_EPS = 1e-5
LANE = 128
VMEM_LIMIT = 48 * 1024 * 1024


# ------------------------------ small helpers ------------------------------ #

def _round_up(n, m):
    return ((n + m - 1) // m) * m


def _pad_axis(a, axis, size):
    pad = size - a.shape[axis]
    if pad == 0:
        return a
    widths = [(0, 0)] * a.ndim
    widths[axis] = (0, pad)
    return jnp.pad(a, widths)


def _bn_fold(gamma, beta, mean, var, cp):
    scale = gamma / jnp.sqrt(var + BN_EPS)
    bias = beta - mean * scale
    return _pad_axis(scale, 0, cp), _pad_axis(bias, 0, cp)


def _prep_spatial_w(w, cpin, cpout):
    # w: (k, k, Cin, Cout) -> (k*k, cpin, cpout) bf16, zero-padded channels.
    k = w.shape[0]
    w = _pad_axis(_pad_axis(w, 2, cpin), 3, cpout)
    return w.reshape(k * k, cpin, cpout).astype(jnp.bfloat16)


def _prep_temporal_w(w, cpin, cpout):
    # w: (k, Cin, Cout) -> (k, cpin, cpout) bf16, zero-padded channels.
    w = _pad_axis(_pad_axis(w, 1, cpin), 2, cpout)
    return w.astype(jnp.bfloat16)


def _pick_frames_per_block(num_frames, per_frame_bytes, target_bytes=1 << 20):
    """Largest divisor of num_frames whose block stays under ~1 MiB and leaves
    >= 2 grid steps (so v7x's two TensorCores both get work)."""
    best = 1
    for d in range(1, num_frames + 1):
        if num_frames % d != 0:
            continue
        if d * per_frame_bytes > target_bytes:
            break
        if num_frames // d >= 2 or num_frames == 1:
            best = d
    return best


# --------------------------- spatial conv kernel ---------------------------- #

def _spatial_kernel_factory(fb, tap_offsets, lout):
    def kernel(x_ref, w_ref, s_ref, b_ref, o_ref):
        for f in range(fb):
            acc = None
            for t, off in enumerate(tap_offsets):
                lhs = x_ref[f, pl.ds(off, lout), :]        # (lout, Cpin) bf16
                part = jnp.dot(lhs, w_ref[t],
                               preferred_element_type=jnp.float32)
                acc = part if acc is None else acc + part
            y = acc * s_ref[...] + b_ref[...]              # f32 epilogue
            o_ref[f] = jnp.maximum(y, 0.0).astype(o_ref.dtype)
    return kernel


def spatial_conv_bn_relu(a, w_taps, scale, bias, k, out_dtype):
    """a: (B, H, W, Cpin) bf16; w_taps: (k*k, Cpin, Cpout) bf16;
    scale/bias: (Cpout,) f32. Returns (B, H, W, Cpout) out_dtype."""
    B, H, W, cpin = a.shape
    cpout = w_taps.shape[-1]
    p = k // 2
    Hp, Wp = H + 2 * p, W + 2 * p
    lout = H * Wp                        # outputs computed on the padded grid
    lin = Hp * Wp + 2 * p                # covers max tap offset, no OOB reads

    ap = jnp.pad(a, ((0, 0), (p, p), (p, p), (0, 0)))
    af = ap.reshape(B, Hp * Wp, cpin)
    af = jnp.pad(af, ((0, 0), (0, lin - Hp * Wp), (0, 0)))

    s2 = scale.reshape(1, cpout).astype(jnp.float32)
    b2 = bias.reshape(1, cpout).astype(jnp.float32)

    out_isize = jnp.dtype(out_dtype).itemsize
    per_frame_bytes = lin * cpin * 2 + lout * cpout * out_isize
    fb = _pick_frames_per_block(B, per_frame_bytes)
    grid = (B // fb,)
    tap_offsets = [dh * Wp + dw for dh in range(k) for dw in range(k)]

    flops = 2 * B * lout * len(tap_offsets) * cpin * cpout
    bytes_accessed = int(B * lin * cpin * 2 + w_taps.size * 2
                         + B * lout * cpout * out_isize + 2 * cpout * 4)

    out = pl.pallas_call(
        _spatial_kernel_factory(fb, tap_offsets, lout),
        out_shape=jax.ShapeDtypeStruct((B, lout, cpout), out_dtype),
        grid=grid,
        in_specs=[
            pl.BlockSpec((fb, lin, cpin), lambda i: (i, 0, 0)),
            pl.BlockSpec((k * k, cpin, cpout), lambda i: (0, 0, 0)),
            pl.BlockSpec((1, cpout), lambda i: (0, 0)),
            pl.BlockSpec((1, cpout), lambda i: (0, 0)),
        ],
        out_specs=pl.BlockSpec((fb, lout, cpout), lambda i: (i, 0, 0)),
        compiler_params=pltpu.CompilerParams(
            dimension_semantics=("parallel",),
            vmem_limit_bytes=VMEM_LIMIT),
        cost_estimate=pl.CostEstimate(flops=flops, transcendentals=0,
                                      bytes_accessed=bytes_accessed),
    )(af, w_taps, s2, b2)

    # Drop the junk columns that live on the padded-width grid.
    return out.reshape(B, H, Wp, cpout)[:, :, :W, :]


# --------------------------- temporal conv kernel --------------------------- #

def _temporal_kernel_factory(k, with_residual):
    def kernel(*refs):
        x_refs = refs[:k]
        w_ref, s_ref, b_ref = refs[k:k + 3]
        if with_residual:
            r_ref, o_ref = refs[k + 3], refs[k + 4]
        else:
            r_ref, o_ref = None, refs[k + 3]
        acc = None
        for dt in range(k):
            part = jnp.dot(x_refs[dt][...], w_ref[dt],
                           preferred_element_type=jnp.float32)
            acc = part if acc is None else acc + part
        y = acc * s_ref[...] + b_ref[...]
        if r_ref is not None:
            y = y + r_ref[...].astype(jnp.float32)
        o_ref[...] = jnp.maximum(y, 0.0).astype(o_ref.dtype)
    return kernel


def temporal_conv_bn_relu(a, w_taps, scale, bias, k, N, T,
                          residual=None, out_dtype=jnp.bfloat16):
    """a: (N*T, H, W, Cpin) bf16; w_taps: (k, Cpin, Cpout) bf16;
    residual: (N*T, H, W, Cpout) bf16 or None."""
    B, H, W, cpin = a.shape
    cpout = w_taps.shape[-1]
    R = H * W
    p = k // 2
    Tp = T + 2 * p

    at = a.reshape(N, T, R, cpin)
    at = jnp.pad(at, ((0, 0), (p, p), (0, 0), (0, 0)))
    xt = at.reshape(N * Tp, R, cpin)

    s2 = scale.reshape(1, cpout).astype(jnp.float32)
    b2 = bias.reshape(1, cpout).astype(jnp.float32)

    # k shifted BlockSpecs over the padded frame axis: tap dt reads frame
    # n*Tp + t + dt.  Block size 1 along frames => block index == frame index.
    in_specs = [pl.BlockSpec((None, R, cpin),
                             (lambda n, t, dt=dt: (n * Tp + t + dt, 0, 0)))
                for dt in range(k)]
    args = [xt] * k + [w_taps, s2, b2]
    in_specs += [
        pl.BlockSpec((k, cpin, cpout), lambda n, t: (0, 0, 0)),
        pl.BlockSpec((1, cpout), lambda n, t: (0, 0)),
        pl.BlockSpec((1, cpout), lambda n, t: (0, 0)),
    ]
    if residual is not None:
        in_specs.append(pl.BlockSpec((None, R, cpout),
                                     lambda n, t: (n * T + t, 0, 0)))
        args.append(residual.reshape(B, R, cpout))

    out_isize = jnp.dtype(out_dtype).itemsize
    flops = 2 * B * R * k * cpin * cpout
    bytes_accessed = int(k * B * R * cpin * 2 + w_taps.size * 2
                         + B * R * cpout * out_isize
                         + (B * R * cpout * 2 if residual is not None else 0))

    out = pl.pallas_call(
        _temporal_kernel_factory(k, residual is not None),
        out_shape=jax.ShapeDtypeStruct((B, R, cpout), out_dtype),
        grid=(N, T),
        in_specs=in_specs,
        out_specs=pl.BlockSpec((None, R, cpout), lambda n, t: (n * T + t, 0, 0)),
        compiler_params=pltpu.CompilerParams(
            dimension_semantics=("parallel", "parallel"),
            vmem_limit_bytes=VMEM_LIMIT),
        cost_estimate=pl.CostEstimate(flops=flops, transcendentals=0,
                                      bytes_accessed=bytes_accessed),
    )(*args)

    return out.reshape(B, H, W, cpout)


# ------------------------------ block forward ------------------------------- #

def spatio_temporal_res_block(x, params, kernel_size=3):
    """x: (N, C, T, H, W) float32 (PyTorch NCDHW). downsample=False path."""
    N, cin, T, H, W = x.shape
    k = kernel_size
    cm1 = params["conv1_w_spatial"].shape[-1]
    cout = params["conv1_w_temporal"].shape[-1]
    cm2 = params["conv2_w_spatial"].shape[-1]
    assert cin == cout, "residual path (downsample=False) needs Cin == Cout"

    cp_in = _round_up(cin, LANE)
    cp_m1 = _round_up(cm1, LANE)
    cp_out = _round_up(cout, LANE)
    cp_m2 = _round_up(cm2, LANE)

    # NCDHW -> per-frame channels-last, channel-padded, bf16.
    a0 = jnp.transpose(x, (0, 2, 3, 4, 1)).reshape(N * T, H, W, cin)
    a0 = _pad_axis(a0, 3, cp_in).astype(jnp.bfloat16)

    # conv1.spatial_conv -> conv1.bn -> conv1.relu
    s, b = _bn_fold(*params["conv1_bn_s"], cp_m1)
    w = _prep_spatial_w(params["conv1_w_spatial"], cp_in, cp_m1)
    h = spatial_conv_bn_relu(a0, w, s, b, k, out_dtype=jnp.bfloat16)

    # conv1.temporal_conv -> bn1 -> relu1
    s, b = _bn_fold(*params["bn1"], cp_out)
    w = _prep_temporal_w(params["conv1_w_temporal"], cp_m1, cp_out)
    h = temporal_conv_bn_relu(h, w, s, b, k, N, T, out_dtype=jnp.bfloat16)

    # conv2.spatial_conv -> conv2.bn -> conv2.relu
    s, b = _bn_fold(*params["conv2_bn_s"], cp_m2)
    w = _prep_spatial_w(params["conv2_w_spatial"], cp_out, cp_m2)
    h = spatial_conv_bn_relu(h, w, s, b, k, out_dtype=jnp.bfloat16)

    # conv2.temporal_conv -> bn2 -> (+ x) -> outrelu
    s, b = _bn_fold(*params["bn2"], cp_out)
    w = _prep_temporal_w(params["conv2_w_temporal"], cp_m2, cp_out)
    out = temporal_conv_bn_relu(h, w, s, b, k, N, T,
                                residual=a0, out_dtype=jnp.float32)

    out = out[..., :cout].reshape(N, T, H, W, cout)
    return jnp.transpose(out, (0, 4, 1, 2, 3))


# --------------------------- pure-JAX reference ----------------------------- #

def spatio_temporal_res_block_ref(x, params, kernel_size=3):
    """Reference with the same math (bf16 operands, f32 accumulate/epilogue,
    bf16 inter-layer activations) so agreement with the kernels is tight."""
    N, cin, T, H, W = x.shape
    k = kernel_size
    p = k // 2
    cout = params["conv1_w_temporal"].shape[-1]

    def r(v):
        return v.astype(jnp.bfloat16).astype(jnp.float32)

    def fold(t):
        g, be, m, v = t
        s = g / jnp.sqrt(v + BN_EPS)
        return s, be - m * s

    def spatial(h, w, s, b):
        B, hh, ww, _ = h.shape
        hp = jnp.pad(h, ((0, 0), (p, p), (p, p), (0, 0)))
        acc = 0.0
        for dh in range(k):
            for dw in range(k):
                acc = acc + jnp.einsum("bhwc,cd->bhwd",
                                       r(hp[:, dh:dh + hh, dw:dw + ww, :]),
                                       r(w[dh, dw]))
        return jnp.maximum(acc * s + b, 0.0)

    def temporal(h, w, s, b, residual=None):
        B, hh, ww, c = h.shape
        ht = h.reshape(N, T, hh, ww, c)
        htp = jnp.pad(ht, ((0, 0), (p, p), (0, 0), (0, 0), (0, 0)))
        acc = 0.0
        for dt in range(k):
            acc = acc + jnp.einsum("nthwc,cd->nthwd",
                                   r(htp[:, dt:dt + T]), r(w[dt]))
        y = (acc * s + b).reshape(B, hh, ww, -1)
        if residual is not None:
            y = y + residual
        return jnp.maximum(y, 0.0)

    a = r(jnp.transpose(x, (0, 2, 3, 4, 1)).reshape(N * T, H, W, cin))
    s, b = fold(params["conv1_bn_s"])
    h = r(spatial(a, params["conv1_w_spatial"], s, b))
    s, b = fold(params["bn1"])
    h = r(temporal(h, params["conv1_w_temporal"], s, b))
    s, b = fold(params["conv2_bn_s"])
    h = r(spatial(h, params["conv2_w_spatial"], s, b))
    s, b = fold(params["bn2"])
    out = temporal(h, params["conv2_w_temporal"], s, b, residual=a)
    out = out.reshape(N, T, H, W, cout)
    return jnp.transpose(out, (0, 4, 1, 2, 3))


# --------------------------- parameter setup -------------------------------- #

def init_params(key, in_channels, out_channels, kernel_size):
    k = kernel_size

    def intermed(cin, cout):
        return int(math.floor(k * k * k * cin * cout / (k * k * cin + k * cout)))

    cm1 = intermed(in_channels, out_channels)
    cm2 = intermed(out_channels, out_channels)

    keys = jax.random.split(key, 8)

    def bn_params(kk, c):
        k1, k2, k3, k4 = jax.random.split(kk, 4)
        gamma = 1.0 + 0.1 * jax.random.normal(k1, (c,), jnp.float32)
        beta = 0.1 * jax.random.normal(k2, (c,), jnp.float32)
        mean = 0.1 * jax.random.normal(k3, (c,), jnp.float32)
        var = 0.5 + jax.random.uniform(k4, (c,), jnp.float32)
        return gamma, beta, mean, var

    return {
        "conv1_w_spatial": 0.1 * jax.random.normal(
            keys[0], (k, k, in_channels, cm1), jnp.float32),
        "conv1_bn_s": bn_params(keys[1], cm1),
        "conv1_w_temporal": 0.1 * jax.random.normal(
            keys[2], (k, cm1, out_channels), jnp.float32),
        "bn1": bn_params(keys[3], out_channels),
        "conv2_w_spatial": 0.1 * jax.random.normal(
            keys[4], (k, k, out_channels, cm2), jnp.float32),
        "conv2_bn_s": bn_params(keys[5], cm2),
        "conv2_w_temporal": 0.1 * jax.random.normal(
            keys[6], (k, cm2, out_channels), jnp.float32),
        "bn2": bn_params(keys[7], out_channels),
    }


# --------------------------------- main ------------------------------------- #

if __name__ == "__main__":
    key = jax.random.PRNGKey(0)
    kx, kp = jax.random.split(key)

    # downsample=False => in_channels must equal out_channels for the residual.
    N, C, T, H, W = 2, 4, 8, 16, 16
    kernel_size = 3

    x = jax.random.normal(kx, (N, C, T, H, W), jnp.float32)
    params = init_params(kp, C, C, kernel_size)

    fwd = jax.jit(functools.partial(spatio_temporal_res_block,
                                    kernel_size=kernel_size))
    out = jax.block_until_ready(fwd(x, params))

    ref = spatio_temporal_res_block_ref(x, params, kernel_size=kernel_size)
    assert out.shape == (N, C, T, H, W), out.shape
    max_err = float(jnp.max(jnp.abs(out - ref)))
    assert max_err < 1e-2, f"mismatch vs reference: {max_err}"

    print("KERNEL_OK")
</pallas_src>

<mosaic_0001>
module attributes {stable_mosaic.version = 11 : i64} {
  func.func @kernel(%arg0: i32, %arg1: memref<4x326x128xbf16, #tpu.memory_space<vmem>>, %arg2: memref<9x128x128xbf16, #tpu.memory_space<vmem>>, %arg3: memref<1x128xf32, #tpu.memory_space<vmem>>, %arg4: memref<1x128xf32, #tpu.memory_space<vmem>>, %arg5: memref<4x288x128xbf16, #tpu.memory_space<vmem>>) attributes {dimension_semantics = [#tpu.dimension_semantics<parallel>], iteration_bounds = array<i64: 4>, scalar_prefetch = 0 : i64, scratch_operands = 0 : i64, tpu.core_type = #tpu.core_type<tc>, window_params = [{transform_indices = @transform_0, window_bounds = array<i64: 4, 326, 128>}, {pipeline_mode = #tpu.pipeline_mode<synchronous>, transform_indices = @transform_1, window_bounds = array<i64: 9, 128, 128>}, {pipeline_mode = #tpu.pipeline_mode<synchronous>, transform_indices = @transform_2, window_bounds = array<i64: 1, 128>}, {pipeline_mode = #tpu.pipeline_mode<synchronous>, transform_indices = @transform_3, window_bounds = array<i64: 1, 128>}, {transform_indices = @transform_4, window_bounds = array<i64: 4, 288, 128>}]} {
    %c0 = arith.constant 0 : index
    %c0_0 = arith.constant 0 : index
    %c0_1 = arith.constant 0 : index
    %0 = vector.load %arg1[%c0, %c0_0, %c0_1] : memref<4x326x128xbf16, #tpu.memory_space<vmem>>, vector<1x288x128xbf16>
    %1 = vector.shape_cast %0 : vector<1x288x128xbf16> to vector<288x128xbf16>
    %c0_2 = arith.constant 0 : index
    %c0_3 = arith.constant 0 : index
    %c0_4 = arith.constant 0 : index
    %2 = vector.load %arg2[%c0_2, %c0_3, %c0_4] : memref<9x128x128xbf16, #tpu.memory_space<vmem>>, vector<1x128x128xbf16>
    %3 = vector.shape_cast %2 : vector<1x128x128xbf16> to vector<128x128xbf16>
    %cst = arith.constant dense<0.000000e+00> : vector<288x128xf32>
    %4 = tpu.matmul %1, %3, %cst {dimension_numbers = #tpu.dot_dimension_numbers<[1], [0], [0], [1], [0, 0, 1, 1], [], []>} : vector<288x128xbf16>, vector<128x128xbf16>, vector<288x128xf32> -> vector<288x128xf32>
    %c0_5 = arith.constant 0 : index
    %c1 = arith.constant 1 : index
    %c0_6 = arith.constant 0 : index
    %5 = vector.load %arg1[%c0_5, %c1, %c0_6] : memref<4x326x128xbf16, #tpu.memory_space<vmem>>, vector<1x288x128xbf16>
    %6 = vector.shape_cast %5 : vector<1x288x128xbf16> to vector<288x128xbf16>
    %c1_7 = arith.constant 1 : index
    %c0_8 = arith.constant 0 : index
    %c0_9 = arith.constant 0 : index
    %7 = vector.load %arg2[%c1_7, %c0_8, %c0_9] : memref<9x128x128xbf16, #tpu.memory_space<vmem>>, vector<1x128x128xbf16>
    %8 = vector.shape_cast %7 : vector<1x128x128xbf16> to vector<128x128xbf16>
    %cst_10 = arith.constant dense<0.000000e+00> : vector<288x128xf32>
    %9 = tpu.matmul %6, %8, %cst_10 {dimension_numbers = #tpu.dot_dimension_numbers<[1], [0], [0], [1], [0, 0, 1, 1], [], []>} : vector<288x128xbf16>, vector<128x128xbf16>, vector<288x128xf32> -> vector<288x128xf32>
    %10 = arith.addf %4, %9 : vector<288x128xf32>
    %c0_11 = arith.constant 0 : index
    %c2 = arith.constant 2 : index
    %c0_12 = arith.constant 0 : index
    %11 = vector.load %arg1[%c0_11, %c2, %c0_12] : memref<4x326x128xbf16, #tpu.memory_space<vmem>>, vector<1x288x128xbf16>
    %12 = vector.shape_cast %11 : vector<1x288x128xbf16> to vector<288x128xbf16>
    %c2_13 = arith.constant 2 : index
    %c0_14 = arith.constant 0 : index
    %c0_15 = arith.constant 0 : index
    %13 = vector.load %arg2[%c2_13, %c0_14, %c0_15] : memref<9x128x128xbf16, #tpu.memory_space<vmem>>, vector<1x128x128xbf16>
    %14 = vector.shape_cast %13 : vector<1x128x128xbf16> to vector<128x128xbf16>
    %cst_16 = arith.constant dense<0.000000e+00> : vector<288x128xf32>
    %15 = tpu.matmul %12, %14, %cst_16 {dimension_numbers = #tpu.dot_dimension_numbers<[1], [0], [0], [1], [0, 0, 1, 1], [], []>} : vector<288x128xbf16>, vector<128x128xbf16>, vector<288x128xf32> -> vector<288x128xf32>
    %16 = arith.addf %10, %15 : vector<288x128xf32>
    %c0_17 = arith.constant 0 : index
    %c18 = arith.constant 18 : index
    %c0_18 = arith.constant 0 : index
    %17 = vector.load %arg1[%c0_17, %c18, %c0_18] : memref<4x326x128xbf16, #tpu.memory_space<vmem>>, vector<1x288x128xbf16>
    %18 = vector.shape_cast %17 : vector<1x288x128xbf16> to vector<288x128xbf16>
    %c3 = arith.constant 3 : index
    %c0_19 = arith.constant 0 : index
    %c0_20 = arith.constant 0 : index
    %19 = vector.load %arg2[%c3, %c0_19, %c0_20] : memref<9x128x128xbf16, #tpu.memory_space<vmem>>, vector<1x128x128xbf16>
    %20 = vector.shape_cast %19 : vector<1x128x128xbf16> to vector<128x128xbf16>
    %cst_21 = arith.constant dense<0.000000e+00> : vector<288x128xf32>
    %21 = tpu.matmul %18, %20, %cst_21 {dimension_numbers = #tpu.dot_dimension_numbers<[1], [0], [0], [1], [0, 0, 1, 1], [], []>} : vector<288x128xbf16>, vector<128x128xbf16>, vector<288x128xf32> -> vector<288x128xf32>
    %22 = arith.addf %16, %21 : vector<288x128xf32>
    %c0_22 = arith.constant 0 : index
    %c19 = arith.constant 19 : index
    %c0_23 = arith.constant 0 : index
    %23 = vector.load %arg1[%c0_22, %c19, %c0_23] : memref<4x326x128xbf16, #tpu.memory_space<vmem>>, vector<1x288x128xbf16>
    %24 = vector.shape_cast %23 : vector<1x288x128xbf16> to vector<288x128xbf16>
    %c4 = arith.constant 4 : index
    %c0_24 = arith.constant 0 : index
    %c0_25 = arith.constant 0 : index
    %25 = vector.load %arg2[%c4, %c0_24, %c0_25] : memref<9x128x128xbf16, #tpu.memory_space<vmem>>, vector<1x128x128xbf16>
    %26 = vector.shape_cast %25 : vector<1x128x128xbf16> to vector<128x128xbf16>
    %cst_26 = arith.constant dense<0.000000e+00> : vector<288x128xf32>
    %27 = tpu.matmul %24, %26, %cst_26 {dimension_numbers = #tpu.dot_dimension_numbers<[1], [0], [0], [1], [0, 0, 1, 1], [], []>} : vector<288x128xbf16>, vector<128x128xbf16>, vector<288x128xf32> -> vector<288x128xf32>
    %28 = arith.addf %22, %27 : vector<288x128xf32>
    %c0_27 = arith.constant 0 : index
    %c20 = arith.constant 20 : index
    %c0_28 = arith.constant 0 : index
    %29 = vector.load %arg1[%c0_27, %c20, %c0_28] : memref<4x326x128xbf16, #tpu.memory_space<vmem>>, vector<1x288x128xbf16>
    %30 = vector.shape_cast %29 : vector<1x288x128xbf16> to vector<288x128xbf16>
    %c5 = arith.constant 5 : index
    %c0_29 = arith.constant 0 : index
    %c0_30 = arith.constant 0 : index
    %31 = vector.load %arg2[%c5, %c0_29, %c0_30] : memref<9x128x128xbf16, #tpu.memory_space<vmem>>, vector<1x128x128xbf16>
    %32 = vector.shape_cast %31 : vector<1x128x128xbf16> to vector<128x128xbf16>
    %cst_31 = arith.constant dense<0.000000e+00> : vector<288x128xf32>
    %33 = tpu.matmul %30, %32, %cst_31 {dimension_numbers = #tpu.dot_dimension_numbers<[1], [0], [0], [1], [0, 0, 1, 1], [], []>} : vector<288x128xbf16>, vector<128x128xbf16>, vector<288x128xf32> -> vector<288x128xf32>
    %34 = arith.addf %28, %33 : vector<288x128xf32>
    %c0_32 = arith.constant 0 : index
    %c36 = arith.constant 36 : index
    %c0_33 = arith.constant 0 : index
    %35 = vector.load %arg1[%c0_32, %c36, %c0_33] : memref<4x326x128xbf16, #tpu.memory_space<vmem>>, vector<1x288x128xbf16>
    %36 = vector.shape_cast %35 : vector<1x288x128xbf16> to vector<288x128xbf16>
    %c6 = arith.constant 6 : index
    %c0_34 = arith.constant 0 : index
    %c0_35 = arith.constant 0 : index
    %37 = vector.load %arg2[%c6, %c0_34, %c0_35] : memref<9x128x128xbf16, #tpu.memory_space<vmem>>, vector<1x128x128xbf16>
    %38 = vector.shape_cast %37 : vector<1x128x128xbf16> to vector<128x128xbf16>
    %cst_36 = arith.constant dense<0.000000e+00> : vector<288x128xf32>
    %39 = tpu.matmul %36, %38, %cst_36 {dimension_numbers = #tpu.dot_dimension_numbers<[1], [0], [0], [1], [0, 0, 1, 1], [], []>} : vector<288x128xbf16>, vector<128x128xbf16>, vector<288x128xf32> -> vector<288x128xf32>
    %40 = arith.addf %34, %39 : vector<288x128xf32>
    %c0_37 = arith.constant 0 : index
    %c37 = arith.constant 37 : index
    %c0_38 = arith.constant 0 : index
    %41 = vector.load %arg1[%c0_37, %c37, %c0_38] : memref<4x326x128xbf16, #tpu.memory_space<vmem>>, vector<1x288x128xbf16>
    %42 = vector.shape_cast %41 : vector<1x288x128xbf16> to vector<288x128xbf16>
    %c7 = arith.constant 7 : index
    %c0_39 = arith.constant 0 : index
    %c0_40 = arith.constant 0 : index
    %43 = vector.load %arg2[%c7, %c0_39, %c0_40] : memref<9x128x128xbf16, #tpu.memory_space<vmem>>, vector<1x128x128xbf16>
    %44 = vector.shape_cast %43 : vector<1x128x128xbf16> to vector<128x128xbf16>
    %cst_41 = arith.constant dense<0.000000e+00> : vector<288x128xf32>
    %45 = tpu.matmul %42, %44, %cst_41 {dimension_numbers = #tpu.dot_dimension_numbers<[1], [0], [0], [1], [0, 0, 1, 1], [], []>} : vector<288x128xbf16>, vector<128x128xbf16>, vector<288x128xf32> -> vector<288x128xf32>
    %46 = arith.addf %40, %45 : vector<288x128xf32>
    %c0_42 = arith.constant 0 : index
    %c38 = arith.constant 38 : index
    %c0_43 = arith.constant 0 : index
    %47 = vector.load %arg1[%c0_42, %c38, %c0_43] : memref<4x326x128xbf16, #tpu.memory_space<vmem>>, vector<1x288x128xbf16>
    %48 = vector.shape_cast %47 : vector<1x288x128xbf16> to vector<288x128xbf16>
    %c8 = arith.constant 8 : index
    %c0_44 = arith.constant 0 : index
    %c0_45 = arith.constant 0 : index
    %49 = vector.load %arg2[%c8, %c0_44, %c0_45] : memref<9x128x128xbf16, #tpu.memory_space<vmem>>, vector<1x128x128xbf16>
    %50 = vector.shape_cast %49 : vector<1x128x128xbf16> to vector<128x128xbf16>
    %cst_46 = arith.constant dense<0.000000e+00> : vector<288x128xf32>
    %51 = tpu.matmul %48, %50, %cst_46 {dimension_numbers = #tpu.dot_dimension_numbers<[1], [0], [0], [1], [0, 0, 1, 1], [], []>} : vector<288x128xbf16>, vector<128x128xbf16>, vector<288x128xf32> -> vector<288x128xf32>
    %52 = arith.addf %46, %51 : vector<288x128xf32>
    %c0_47 = arith.constant 0 : index
    %c0_48 = arith.constant 0 : index
    %53 = vector.load %arg3[%c0_47, %c0_48] : memref<1x128xf32, #tpu.memory_space<vmem>>, vector<1x128xf32>
    %54 = vector.broadcast %53 : vector<1x128xf32> to vector<288x128xf32>
    %55 = arith.mulf %52, %54 : vector<288x128xf32>
    %c0_49 = arith.constant 0 : index
    %c0_50 = arith.constant 0 : index
    %56 = vector.load %arg4[%c0_49, %c0_50] : memref<1x128xf32, #tpu.memory_space<vmem>>, vector<1x128xf32>
    %57 = vector.broadcast %56 : vector<1x128xf32> to vector<288x128xf32>
    %58 = arith.addf %55, %57 : vector<288x128xf32>
    %cst_51 = arith.constant 0.000000e+00 : f32
    %59 = vector.broadcast %cst_51 : f32 to vector<288x128xf32>
    %60 = arith.maximumf %58, %59 : vector<288x128xf32>
    %61 = arith.truncf %60 : vector<288x128xf32> to vector<288x128xbf16>
    %c0_52 = arith.constant 0 : index
    %c0_53 = arith.constant 0 : index
    %c0_54 = arith.constant 0 : index
    %62 = vector.load %arg5[%c0_52, %c0_53, %c0_54] : memref<4x288x128xbf16, #tpu.memory_space<vmem>>, vector<1x288x128xbf16>
    %63 = vector.shape_cast %62 : vector<1x288x128xbf16> to vector<288x128xbf16>
    %64 = vector.shape_cast %61 : vector<288x128xbf16> to vector<1x288x128xbf16>
    tpu.vector_store %arg5[%c0_52, %c0_53, %c0_54], %64 {strides = array<i32>} : memref<4x288x128xbf16, #tpu.memory_space<vmem>>, vector<1x288x128xbf16>,
    %c1_55 = arith.constant 1 : index
    %c0_56 = arith.constant 0 : index
    %c0_57 = arith.constant 0 : index
    %65 = vector.load %arg1[%c1_55, %c0_56, %c0_57] : memref<4x326x128xbf16, #tpu.memory_space<vmem>>, vector<1x288x128xbf16>
    %66 = vector.shape_cast %65 : vector<1x288x128xbf16> to vector<288x128xbf16>
    %c0_58 = arith.constant 0 : index
    %c0_59 = arith.constant 0 : index
    %c0_60 = arith.constant 0 : index
    %67 = vector.load %arg2[%c0_58, %c0_59, %c0_60] : memref<9x128x128xbf16, #tpu.memory_space<vmem>>, vector<1x128x128xbf16>
    %68 = vector.shape_cast %67 : vector<1x128x128xbf16> to vector<128x128xbf16>
    %cst_61 = arith.constant dense<0.000000e+00> : vector<288x128xf32>
    %69 = tpu.matmul %66, %68, %cst_61 {dimension_numbers = #tpu.dot_dimension_numbers<[1], [0], [0], [1], [0, 0, 1, 1], [], []>} : vector<288x128xbf16>, vector<128x128xbf16>, vector<288x128xf32> -> vector<288x128xf32>
    %c1_62 = arith.constant 1 : index
    %c1_63 = arith.constant 1 : index
    %c0_64 = arith.constant 0 : index
    %70 = vector.load %arg1[%c1_62, %c1_63, %c0_64] : memref<4x326x128xbf16, #tpu.memory_space<vmem>>, vector<1x288x128xbf16>
    %71 = vector.shape_cast %70 : vector<1x288x128xbf16> to vector<288x128xbf16>
    %c1_65 = arith.constant 1 : index
    %c0_66 = arith.constant 0 : index
    %c0_67 = arith.constant 0 : index
    %72 = vector.load %arg2[%c1_65, %c0_66, %c0_67] : memref<9x128x128xbf16, #tpu.memory_space<vmem>>, vector<1x128x128xbf16>
    %73 = vector.shape_cast %72 : vector<1x128x128xbf16> to vector<128x128xbf16>
    %cst_68 = arith.constant dense<0.000000e+00> : vector<288x128xf32>
    %74 = tpu.matmul %71, %73, %cst_68 {dimension_numbers = #tpu.dot_dimension_numbers<[1], [0], [0], [1], [0, 0, 1, 1], [], []>} : vector<288x128xbf16>, vector<128x128xbf16>, vector<288x128xf32> -> vector<288x128xf32>
    %75 = arith.addf %69, %74 : vector<288x128xf32>
    %c1_69 = arith.constant 1 : index
    %c2_70 = arith.constant 2 : index
    %c0_71 = arith.constant 0 : index
    %76 = vector.load %arg1[%c1_69, %c2_70, %c0_71] : memref<4x326x128xbf16, #tpu.memory_space<vmem>>, vector<1x288x128xbf16>
    %77 = vector.shape_cast %76 : vector<1x288x128xbf16> to vector<288x128xbf16>
    %c2_72 = arith.constant 2 : index
    %c0_73 = arith.constant 0 : index
    %c0_74 = arith.constant 0 : index
    %78 = vector.load %arg2[%c2_72, %c0_73, %c0_74] : memref<9x128x128xbf16, #tpu.memory_space<vmem>>, vector<1x128x128xbf16>
    %79 = vector.shape_cast %78 : vector<1x128x128xbf16> to vector<128x128xbf16>
    %cst_75 = arith.constant dense<0.000000e+00> : vector<288x128xf32>
    %80 = tpu.matmul %77, %79, %cst_75 {dimension_numbers = #tpu.dot_dimension_numbers<[1], [0], [0], [1], [0, 0, 1, 1], [], []>} : vector<288x128xbf16>, vector<128x128xbf16>, vector<288x128xf32> -> vector<288x128xf32>
    %81 = arith.addf %75, %80 : vector<288x128xf32>
    %c1_76 = arith.constant 1 : index
    %c18_77 = arith.constant 18 : index
    %c0_78 = arith.constant 0 : index
    %82 = vector.load %arg1[%c1_76, %c18_77, %c0_78] : memref<4x326x128xbf16, #tpu.memory_space<vmem>>, vector<1x288x128xbf16>
    %83 = vector.shape_cast %82 : vector<1x288x128xbf16> to vector<288x128xbf16>
    %c3_79 = arith.constant 3 : index
    %c0_80 = arith.constant 0 : index
    %c0_81 = arith.constant 0 : index
    %84 = vector.load %arg2[%c3_79, %c0_80, %c0_81] : memref<9x128x128xbf16, #tpu.memory_space<vmem>>, vector<1x128x128xbf16>
    %85 = vector.shape_cast %84 : vector<1x128x128xbf16> to vector<128x128xbf16>
    %cst_82 = arith.constant dense<0.000000e+00> : vector<288x128xf32>
    %86 = tpu.matmul %83, %85, %cst_82 {dimension_numbers = #tpu.dot_dimension_numbers<[1], [0], [0], [1], [0, 0, 1, 1], [], []>} : vector<288x128xbf16>, vector<128x128xbf16>, vector<288x128xf32> -> vector<288x128xf32>
    %87 = arith.addf %81, %86 : vector<288x128xf32>
    %c1_83 = arith.constant 1 : index
    %c19_84 = arith.constant 19 : index
    %c0_85 = arith.constant 0 : index
    %88 = vector.load %arg1[%c1_83, %c19_84, %c0_85] : memref<4x326x128xbf16, #tpu.memory_space<vmem>>, vector<1x288x128xbf16>
    %89 = vector.shape_cast %88 : vector<1x288x128xbf16> to vector<288x128xbf16>
    %c4_86 = arith.constant 4 : index
    %c0_87 = arith.constant 0 : index
    %c0_88 = arith.constant 0 : index
    %90 = vector.load %arg2[%c4_86, %c0_87, %c0_88] : memref<9x128x128xbf16, #tpu.memory_space<vmem>>, vector<1x128x128xbf16>
    %91 = vector.shape_cast %90 : vector<1x128x128xbf16> to vector<128x128xbf16>
    %cst_89 = arith.constant dense<0.000000e+00> : vector<288x128xf32>
    %92 = tpu.matmul %89, %91, %cst_89 {dimension_numbers = #tpu.dot_dimension_numbers<[1], [0], [0], [1], [0, 0, 1, 1], [], []>} : vector<288x128xbf16>, vector<128x128xbf16>, vector<288x128xf32> -> vector<288x128xf32>
    %93 = arith.addf %87, %92 : vector<288x128xf32>
    %c1_90 = arith.constant 1 : index
    %c20_91 = arith.constant 20 : index
    %c0_92 = arith.constant 0 : index
    %94 = vector.load %arg1[%c1_90, %c20_91, %c0_92] : memref<4x326x128xbf16, #tpu.memory_space<vmem>>, vector<1x288x128xbf16>
    %95 = vector.shape_cast %94 : vector<1x288x128xbf16> to vector<288x128xbf16>
    %c5_93 = arith.constant 5 : index
    %c0_94 = arith.constant 0 : index
    %c0_95 = arith.constant 0 : index
    %96 = vector.load %arg2[%c5_93, %c0_94, %c0_95] : memref<9x128x128xbf16, #tpu.memory_space<vmem>>, vector<1x128x128xbf16>
    %97 = vector.shape_cast %96 : vector<1x128x128xbf16> to vector<128x128xbf16>
    %cst_96 = arith.constant dense<0.000000e+00> : vector<288x128xf32>
    %98 = tpu.matmul %95, %97, %cst_96 {dimension_numbers = #tpu.dot_dimension_numbers<[1], [0], [0], [1], [0, 0, 1, 1], [], []>} : vector<288x128xbf16>, vector<128x128xbf16>, vector<288x128xf32> -> vector<288x128xf32>
    %99 = arith.addf %93, %98 : vector<288x128xf32>
    %c1_97 = arith.constant 1 : index
    %c36_98 = arith.constant 36 : index
    %c0_99 = arith.constant 0 : index
    %100 = vector.load %arg1[%c1_97, %c36_98, %c0_99] : memref<4x326x128xbf16, #tpu.memory_space<vmem>>, vector<1x288x128xbf16>
    %101 = vector.shape_cast %100 : vector<1x288x128xbf16> to vector<288x128xbf16>
    %c6_100 = arith.constant 6 : index
    %c0_101 = arith.constant 0 : index
    %c0_102 = arith.constant 0 : index
    %102 = vector.load %arg2[%c6_100, %c0_101, %c0_102] : memref<9x128x128xbf16, #tpu.memory_space<vmem>>, vector<1x128x128xbf16>
    %103 = vector.shape_cast %102 : vector<1x128x128xbf16> to vector<128x128xbf16>
    %cst_103 = arith.constant dense<0.000000e+00> : vector<288x128xf32>
    %104 = tpu.matmul %101, %103, %cst_103 {dimension_numbers = #tpu.dot_dimension_numbers<[1], [0], [0], [1], [0, 0, 1, 1], [], []>} : vector<288x128xbf16>, vector<128x128xbf16>, vector<288x128xf32> -> vector<288x128xf32>
    %105 = arith.addf %99, %104 : vector<288x128xf32>
    %c1_104 = arith.constant 1 : index
    %c37_105 = arith.constant 37 : index
    %c0_106 = arith.constant 0 : index
    %106 = vector.load %arg1[%c1_104, %c37_105, %c0_106] : memref<4x326x128xbf16, #tpu.memory_space<vmem>>, vector<1x288x128xbf16>
    %107 = vector.shape_cast %106 : vector<1x288x128xbf16> to vector<288x128xbf16>
    %c7_107 = arith.constant 7 : index
    %c0_108 = arith.constant 0 : index
    %c0_109 = arith.constant 0 : index
    %108 = vector.load %arg2[%c7_107, %c0_108, %c0_109] : memref<9x128x128xbf16, #tpu.memory_space<vmem>>, vector<1x128x128xbf16>
    %109 = vector.shape_cast %108 : vector<1x128x128xbf16> to vector<128x128xbf16>
    %cst_110 = arith.constant dense<0.000000e+00> : vector<288x128xf32>
    %110 = tpu.matmul %107, %109, %cst_110 {dimension_numbers = #tpu.dot_dimension_numbers<[1], [0], [0], [1], [0, 0, 1, 1], [], []>} : vector<288x128xbf16>, vector<128x128xbf16>, vector<288x128xf32> -> vector<288x128xf32>
    %111 = arith.addf %105, %110 : vector<288x128xf32>
    %c1_111 = arith.constant 1 : index
    %c38_112 = arith.constant 38 : index
    %c0_113 = arith.constant 0 : index
    %112 = vector.load %arg1[%c1_111, %c38_112, %c0_113] : memref<4x326x128xbf16, #tpu.memory_space<vmem>>, vector<1x288x128xbf16>
    %113 = vector.shape_cast %112 : vector<1x288x128xbf16> to vector<288x128xbf16>
    %c8_114 = arith.constant 8 : index
    %c0_115 = arith.constant 0 : index
    %c0_116 = arith.constant 0 : index
    %114 = vector.load %arg2[%c8_114, %c0_115, %c0_116] : memref<9x128x128xbf16, #tpu.memory_space<vmem>>, vector<1x128x128xbf16>
    %115 = vector.shape_cast %114 : vector<1x128x128xbf16> to vector<128x128xbf16>
    %cst_117 = arith.constant dense<0.000000e+00> : vector<288x128xf32>
    %116 = tpu.matmul %113, %115, %cst_117 {dimension_numbers = #tpu.dot_dimension_numbers<[1], [0], [0], [1], [0, 0, 1, 1], [], []>} : vector<288x128xbf16>, vector<128x128xbf16>, vector<288x128xf32> -> vector<288x128xf32>
    %117 = arith.addf %111, %116 : vector<288x128xf32>
    %c0_118 = arith.constant 0 : index
    %c0_119 = arith.constant 0 : index
    %118 = vector.load %arg3[%c0_118, %c0_119] : memref<1x128xf32, #tpu.memory_space<vmem>>, vector<1x128xf32>
    %119 = vector.broadcast %118 : vector<1x128xf32> to vector<288x128xf32>
    %120 = arith.mulf %117, %119 : vector<288x128xf32>
    %c0_120 = arith.constant 0 : index
    %c0_121 = arith.constant 0 : index
    %121 = vector.load %arg4[%c0_120, %c0_121] : memref<1x128xf32, #tpu.memory_space<vmem>>, vector<1x128xf32>
    %122 = vector.broadcast %121 : vector<1x128xf32> to vector<288x128xf32>
    %123 = arith.addf %120, %122 : vector<288x128xf32>
    %cst_122 = arith.constant 0.000000e+00 : f32
    %124 = vector.broadcast %cst_122 : f32 to vector<288x128xf32>
    %125 = arith.maximumf %123, %124 : vector<288x128xf32>
    %126 = arith.truncf %125 : vector<288x128xf32> to vector<288x128xbf16>
    %c1_123 = arith.constant 1 : index
    %c0_124 = arith.constant 0 : index
    %c0_125 = arith.constant 0 : index
    %127 = vector.load %arg5[%c1_123, %c0_124, %c0_125] : memref<4x288x128xbf16, #tpu.memory_space<vmem>>, vector<1x288x128xbf16>
    %128 = vector.shape_cast %127 : vector<1x288x128xbf16> to vector<288x128xbf16>
    %129 = vector.shape_cast %126 : vector<288x128xbf16> to vector<1x288x128xbf16>
    tpu.vector_store %arg5[%c1_123, %c0_124, %c0_125], %129 {strides = array<i32>} : memref<4x288x128xbf16, #tpu.memory_space<vmem>>, vector<1x288x128xbf16>,
    %c2_126 = arith.constant 2 : index
    %c0_127 = arith.constant 0 : index
    %c0_128 = arith.constant 0 : index
    %130 = vector.load %arg1[%c2_126, %c0_127, %c0_128] : memref<4x326x128xbf16, #tpu.memory_space<vmem>>, vector<1x288x128xbf16>
    %131 = vector.shape_cast %130 : vector<1x288x128xbf16> to vector<288x128xbf16>
    %c0_129 = arith.constant 0 : index
    %c0_130 = arith.constant 0 : index
    %c0_131 = arith.constant 0 : index
    %132 = vector.load %arg2[%c0_129, %c0_130, %c0_131] : memref<9x128x128xbf16, #tpu.memory_space<vmem>>, vector<1x128x128xbf16>
    %133 = vector.shape_cast %132 : vector<1x128x128xbf16> to vector<128x128xbf16>
    %cst_132 = arith.constant dense<0.000000e+00> : vector<288x128xf32>
    %134 = tpu.matmul %131, %133, %cst_132 {dimension_numbers = #tpu.dot_dimension_numbers<[1], [0], [0], [1], [0, 0, 1, 1], [], []>} : vector<288x128xbf16>, vector<128x128xbf16>, vector<288x128xf32> -> vector<288x128xf32>
    %c2_133 = arith.constant 2 : index
    %c1_134 = arith.constant 1 : index
    %c0_135 = arith.constant 0 : index
    %135 = vector.load %arg1[%c2_133, %c1_134, %c0_135] : memref<4x326x128xbf16, #tpu.memory_space<vmem>>, vector<1x288x128xbf16>
    %136 = vector.shape_cast %135 : vector<1x288x128xbf16> to vector<288x128xbf16>
    %c1_136 = arith.constant 1 : index
    %c0_137 = arith.constant 0 : index
    %c0_138 = arith.constant 0 : index
    %137 = vector.load %arg2[%c1_136, %c0_137, %c0_138] : memref<9x128x128xbf16, #tpu.memory_space<vmem>>, vector<1x128x128xbf16>
    %138 = vector.shape_cast %137 : vector<1x128x128xbf16> to vector<128x128xbf16>
    %cst_139 = arith.constant dense<0.000000e+00> : vector<288x128xf32>
    %139 = tpu.matmul %136, %138, %cst_139 {dimension_numbers = #tpu.dot_dimension_numbers<[1], [0], [0], [1], [0, 0, 1, 1], [], []>} : vector<288x128xbf16>, vector<128x128xbf16>, vector<288x128xf32> -> vector<288x128xf32>
    %140 = arith.addf %134, %139 : vector<288x128xf32>
    %c2_140 = arith.constant 2 : index
    %c2_141 = arith.constant 2 : index
    %c0_142 = arith.constant 0 : index
    %141 = vector.load %arg1[%c2_140, %c2_141, %c0_142] : memref<4x326x128xbf16, #tpu.memory_space<vmem>>, vector<1x288x128xbf16>
    %142 = vector.shape_cast %141 : vector<1x288x128xbf16> to vector<288x128xbf16>
    %c2_143 = arith.constant 2 : index
    %c0_144 = arith.constant 0 : index
    %c0_145 = arith.constant 0 : index
    %143 = vector.load %arg2[%c2_143, %c0_144, %c0_145] : memref<9x128x128xbf16, #tpu.memory_space<vmem>>, vector<1x128x128xbf16>
    %144 = vector.shape_cast %143 : vector<1x128x128xbf16> to vector<128x128xbf16>
    %cst_146 = arith.constant dense<0.000000e+00> : vector<288x128xf32>
    %145 = tpu.matmul %142, %144, %cst_146 {dimension_numbers = #tpu.dot_dimension_numbers<[1], [0], [0], [1], [0, 0, 1, 1], [], []>} : vector<288x128xbf16>, vector<128x128xbf16>, vector<288x128xf32> -> vector<288x128xf32>
    %146 = arith.addf %140, %145 : vector<288x128xf32>
    %c2_147 = arith.constant 2 : index
    %c18_148 = arith.constant 18 : index
    %c0_149 = arith.constant 0 : index
    %147 = vector.load %arg1[%c2_147, %c18_148, %c0_149] : memref<4x326x128xbf16, #tpu.memory_space<vmem>>, vector<1x288x128xbf16>
    %148 = vector.shape_cast %147 : vector<1x288x128xbf16> to vector<288x128xbf16>
    %c3_150 = arith.constant 3 : index
    %c0_151 = arith.constant 0 : index
    %c0_152 = arith.constant 0 : index
    %149 = vector.load %arg2[%c3_150, %c0_151, %c0_152] : memref<9x128x128xbf16, #tpu.memory_space<vmem>>, vector<1x128x128xbf16>
    %150 = vector.shape_cast %149 : vector<1x128x128xbf16> to vector<128x128xbf16>
    %cst_153 = arith.constant dense<0.000000e+00> : vector<288x128xf32>
    %151 = tpu.matmul %148, %150, %cst_153 {dimension_numbers = #tpu.dot_dimension_numbers<[1], [0], [0], [1], [0, 0, 1, 1], [], []>} : vector<288x128xbf16>, vector<128x128xbf16>, vector<288x128xf32> -> vector<288x128xf32>
    %152 = arith.addf %146, %151 : vector<288x128xf32>
    %c2_154 = arith.constant 2 : index
    %c19_155 = arith.constant 19 : index
    %c0_156 = arith.constant 0 : index
    %153 = vector.load %arg1[%c2_154, %c19_155, %c0_156] : memref<4x326x128xbf16, #tpu.memory_space<vmem>>, vector<1x288x128xbf16>
    %154 = vector.shape_cast %153 : vector<1x288x128xbf16> to vector<288x128xbf16>
    %c4_157 = arith.constant 4 : index
    %c0_158 = arith.constant 0 : index
    %c0_159 = arith.constant 0 : index
    %155 = vector.load %arg2[%c4_157, %c0_158, %c0_159] : memref<9x128x128xbf16, #tpu.memory_space<vmem>>, vector<1x128x128xbf16>
    %156 = vector.shape_cast %155 : vector<1x128x128xbf16> to vector<128x128xbf16>
    %cst_160 = arith.constant dense<0.000000e+00> : vector<288x128xf32>
    %157 = tpu.matmul %154, %156, %cst_160 {dimension_numbers = #tpu.dot_dimension_numbers<[1], [0], [0], [1], [0, 0, 1, 1], [], []>} : vector<288x128xbf16>, vector<128x128xbf16>, vector<288x128xf32> -> vector<288x128xf32>
    %158 = arith.addf %152, %157 : vector<288x128xf32>
    %c2_161 = arith.constant 2 : index
    %c20_162 = arith.constant 20 : index
    %c0_163 = arith.constant 0 : index
    %159 = vector.load %arg1[%c2_161, %c20_162, %c0_163] : memref<4x326x128xbf16, #tpu.memory_space<vmem>>, vector<1x288x128xbf16>
    %160 = vector.shape_cast %159 : vector<1x288x128xbf16> to vector<288x128xbf16>
    %c5_164 = arith.constant 5 : index
    %c0_165 = arith.constant 0 : index
    %c0_166 = arith.constant 0 : index
    %161 = vector.load %arg2[%c5_164, %c0_165, %c0_166] : memref<9x128x128xbf16, #tpu.memory_space<vmem>>, vector<1x128x128xbf16>
    %162 = vector.shape_cast %161 : vector<1x128x128xbf16> to vector<128x128xbf16>
    %cst_167 = arith.constant dense<0.000000e+00> : vector<288x128xf32>
    %163 = tpu.matmul %160, %162, %cst_167 {dimension_numbers = #tpu.dot_dimension_numbers<[1], [0], [0], [1], [0, 0, 1, 1], [], []>} : vector<288x128xbf16>, vector<128x128xbf16>, vector<288x128xf32> -> vector<288x128xf32>
    %164 = arith.addf %158, %163 : vector<288x128xf32>
    %c2_168 = arith.constant 2 : index
    %c36_169 = arith.constant 36 : index
    %c0_170 = arith.constant 0 : index
    %165 = vector.load %arg1[%c2_168, %c36_169, %c0_170] : memref<4x326x128xbf16, #tpu.memory_space<vmem>>, vector<1x288x128xbf16>
    %166 = vector.shape_cast %165 : vector<1x288x128xbf16> to vector<288x128xbf16>
    %c6_171 = arith.constant 6 : index
    %c0_172 = arith.constant 0 : index
    %c0_173 = arith.constant 0 : index
    %167 = vector.load %arg2[%c6_171, %c0_172, %c0_173] : memref<9x128x128xbf16, #tpu.memory_space<vmem>>, vector<1x128x128xbf16>
    %168 = vector.shape_cast %167 : vector<1x128x128xbf16> to vector<128x128xbf16>
    %cst_174 = arith.constant dense<0.000000e+00> : vector<288x128xf32>
    %169 = tpu.matmul %166, %168, %cst_174 {dimension_numbers = #tpu.dot_dimension_numbers<[1], [0], [0], [1], [0, 0, 1, 1], [], []>} : vector<288x128xbf16>, vector<128x128xbf16>, vector<288x128xf32> -> vector<288x128xf32>
    %170 = arith.addf %164, %169 : vector<288x128xf32>
    %c2_175 = arith.constant 2 : index
    %c37_176 = arith.constant 37 : index
    %c0_177 = arith.constant 0 : index
    %171 = vector.load %arg1[%c2_175, %c37_176, %c0_177] : memref<4x326x128xbf16, #tpu.memory_space<vmem>>, vector<1x288x128xbf16>
    %172 = vector.shape_cast %171 : vector<1x288x128xbf16> to vector<288x128xbf16>
    %c7_178 = arith.constant 7 : index
    %c0_179 = arith.constant 0 : index
    %c0_180 = arith.constant 0 : index
    %173 = vector.load %arg2[%c7_178, %c0_179, %c0_180] : memref<9x128x128xbf16, #tpu.memory_space<vmem>>, vector<1x128x128xbf16>
    %174 = vector.shape_cast %173 : vector<1x128x128xbf16> to vector<128x128xbf16>
    %cst_181 = arith.constant dense<0.000000e+00> : vector<288x128xf32>
    %175 = tpu.matmul %172, %174, %cst_181 {dimension_numbers = #tpu.dot_dimension_numbers<[1], [0], [0], [1], [0, 0, 1, 1], [], []>} : vector<288x128xbf16>, vector<128x128xbf16>, vector<288x128xf32> -> vector<288x128xf32>
    %176 = arith.addf %170, %175 : vector<288x128xf32>
    %c2_182 = arith.constant 2 : index
    %c38_183 = arith.constant 38 : index
    %c0_184 = arith.constant 0 : index
    %177 = vector.load %arg1[%c2_182, %c38_183, %c0_184] : memref<4x326x128xbf16, #tpu.memory_space<vmem>>, vector<1x288x128xbf16>
    %178 = vector.shape_cast %177 : vector<1x288x128xbf16> to vector<288x128xbf16>
    %c8_185 = arith.constant 8 : index
    %c0_186 = arith.constant 0 : index
    %c0_187 = arith.constant 0 : index
    %179 = vector.load %arg2[%c8_185, %c0_186, %c0_187] : memref<9x128x128xbf16, #tpu.memory_space<vmem>>, vector<1x128x128xbf16>
    %180 = vector.shape_cast %179 : vector<1x128x128xbf16> to vector<128x128xbf16>
    %cst_188 = arith.constant dense<0.000000e+00> : vector<288x128xf32>
    %181 = tpu.matmul %178, %180, %cst_188 {dimension_numbers = #tpu.dot_dimension_numbers<[1], [0], [0], [1], [0, 0, 1, 1], [], []>} : vector<288x128xbf16>, vector<128x128xbf16>, vector<288x128xf32> -> vector<288x128xf32>
    %182 = arith.addf %176, %181 : vector<288x128xf32>
    %c0_189 = arith.constant 0 : index
    %c0_190 = arith.constant 0 : index
    %183 = vector.load %arg3[%c0_189, %c0_190] : memref<1x128xf32, #tpu.memory_space<vmem>>, vector<1x128xf32>
    %184 = vector.broadcast %183 : vector<1x128xf32> to vector<288x128xf32>
    %185 = arith.mulf %182, %184 : vector<288x128xf32>
    %c0_191 = arith.constant 0 : index
    %c0_192 = arith.constant 0 : index
    %186 = vector.load %arg4[%c0_191, %c0_192] : memref<1x128xf32, #tpu.memory_space<vmem>>, vector<1x128xf32>
    %187 = vector.broadcast %186 : vector<1x128xf32> to vector<288x128xf32>
    %188 = arith.addf %185, %187 : vector<288x128xf32>
    %cst_193 = arith.constant 0.000000e+00 : f32
    %189 = vector.broadcast %cst_193 : f32 to vector<288x128xf32>
    %190 = arith.maximumf %188, %189 : vector<288x128xf32>
    %191 = arith.truncf %190 : vector<288x128xf32> to vector<288x128xbf16>
    %c2_194 = arith.constant 2 : index
    %c0_195 = arith.constant 0 : index
    %c0_196 = arith.constant 0 : index
    %192 = vector.load %arg5[%c2_194, %c0_195, %c0_196] : memref<4x288x128xbf16, #tpu.memory_space<vmem>>, vector<1x288x128xbf16>
    %193 = vector.shape_cast %192 : vector<1x288x128xbf16> to vector<288x128xbf16>
    %194 = vector.shape_cast %191 : vector<288x128xbf16> to vector<1x288x128xbf16>
    tpu.vector_store %arg5[%c2_194, %c0_195, %c0_196], %194 {strides = array<i32>} : memref<4x288x128xbf16, #tpu.memory_space<vmem>>, vector<1x288x128xbf16>,
    %c3_197 = arith.constant 3 : index
    %c0_198 = arith.constant 0 : index
    %c0_199 = arith.constant 0 : index
    %195 = vector.load %arg1[%c3_197, %c0_198, %c0_199] : memref<4x326x128xbf16, #tpu.memory_space<vmem>>, vector<1x288x128xbf16>
    %196 = vector.shape_cast %195 : vector<1x288x128xbf16> to vector<288x128xbf16>
    %c0_200 = arith.constant 0 : index
    %c0_201 = arith.constant 0 : index
    %c0_202 = arith.constant 0 : index
    %197 = vector.load %arg2[%c0_200, %c0_201, %c0_202] : memref<9x128x128xbf16, #tpu.memory_space<vmem>>, vector<1x128x128xbf16>
    %198 = vector.shape_cast %197 : vector<1x128x128xbf16> to vector<128x128xbf16>
    %cst_203 = arith.constant dense<0.000000e+00> : vector<288x128xf32>
    %199 = tpu.matmul %196, %198, %cst_203 {dimension_numbers = #tpu.dot_dimension_numbers<[1], [0], [0], [1], [0, 0, 1, 1], [], []>} : vector<288x128xbf16>, vector<128x128xbf16>, vector<288x128xf32> -> vector<288x128xf32>
    %c3_204 = arith.constant 3 : index
    %c1_205 = arith.constant 1 : index
    %c0_206 = arith.constant 0 : index
    %200 = vector.load %arg1[%c3_204, %c1_205, %c0_206] : memref<4x326x128xbf16, #tpu.memory_space<vmem>>, vector<1x288x128xbf16>
    %201 = vector.shape_cast %200 : vector<1x288x128xbf16> to vector<288x128xbf16>
    %c1_207 = arith.constant 1 : index
    %c0_208 = arith.constant 0 : index
    %c0_209 = arith.constant 0 : index
    %202 = vector.load %arg2[%c1_207, %c0_208, %c0_209] : memref<9x128x128xbf16, #tpu.memory_space<vmem>>, vector<1x128x128xbf16>
    %203 = vector.shape_cast %202 : vector<1x128x128xbf16> to vector<128x128xbf16>
    %cst_210 = arith.constant dense<0.000000e+00> : vector<288x128xf32>
    %204 = tpu.matmul %201, %203, %cst_210 {dimension_numbers = #tpu.dot_dimension_numbers<[1], [0], [0], [1], [0, 0, 1, 1], [], []>} : vector<288x128xbf16>, vector<128x128xbf16>, vector<288x128xf32> -> vector<288x128xf32>
    %205 = arith.addf %199, %204 : vector<288x128xf32>
    %c3_211 = arith.constant 3 : index
    %c2_212 = arith.constant 2 : index
    %c0_213 = arith.constant 0 : index
    %206 = vector.load %arg1[%c3_211, %c2_212, %c0_213] : memref<4x326x128xbf16, #tpu.memory_space<vmem>>, vector<1x288x128xbf16>
    %207 = vector.shape_cast %206 : vector<1x288x128xbf16> to vector<288x128xbf16>
    %c2_214 = arith.constant 2 : index
    %c0_215 = arith.constant 0 : index
    %c0_216 = arith.constant 0 : index
    %208 = vector.load %arg2[%c2_214, %c0_215, %c0_216] : memref<9x128x128xbf16, #tpu.memory_space<vmem>>, vector<1x128x128xbf16>
    %209 = vector.shape_cast %208 : vector<1x128x128xbf16> to vector<128x128xbf16>
    %cst_217 = arith.constant dense<0.000000e+00> : vector<288x128xf32>
    %210 = tpu.matmul %207, %209, %cst_217 {dimension_numbers = #tpu.dot_dimension_numbers<[1], [0], [0], [1], [0, 0, 1, 1], [], []>} : vector<288x128xbf16>, vector<128x128xbf16>, vector<288x128xf32> -> vector<288x128xf32>
    %211 = arith.addf %205, %210 : vector<288x128xf32>
    %c3_218 = arith.constant 3 : index
    %c18_219 = arith.constant 18 : index
    %c0_220 = arith.constant 0 : index
    %212 = vector.load %arg1[%c3_218, %c18_219, %c0_220] : memref<4x326x128xbf16, #tpu.memory_space<vmem>>, vector<1x288x128xbf16>
    %213 = vector.shape_cast %212 : vector<1x288x128xbf16> to vector<288x128xbf16>
    %c3_221 = arith.constant 3 : index
    %c0_222 = arith.constant 0 : index
    %c0_223 = arith.constant 0 : index
    %214 = vector.load %arg2[%c3_221, %c0_222, %c0_223] : memref<9x128x128xbf16, #tpu.memory_space<vmem>>, vector<1x128x128xbf16>
    %215 = vector.shape_cast %214 : vector<1x128x128xbf16> to vector<128x128xbf16>
    %cst_224 = arith.constant dense<0.000000e+00> : vector<288x128xf32>
    %216 = tpu.matmul %213, %215, %cst_224 {dimension_numbers = #tpu.dot_dimension_numbers<[1], [0], [0], [1], [0, 0, 1, 1], [], []>} : vector<288x128xbf16>, vector<128x128xbf16>, vector<288x128xf32> -> vector<288x128xf32>
    %217 = arith.addf %211, %216 : vector<288x128xf32>
    %c3_225 = arith.constant 3 : index
    %c19_226 = arith.constant 19 : index
    %c0_227 = arith.constant 0 : index
    %218 = vector.load %arg1[%c3_225, %c19_226, %c0_227] : memref<4x326x128xbf16, #tpu.memory_space<vmem>>, vector<1x288x128xbf16>
    %219 = vector.shape_cast %218 : vector<1x288x128xbf16> to vector<288x128xbf16>
    %c4_228 = arith.constant 4 : index
    %c0_229 = arith.constant 0 : index
    %c0_230 = arith.constant 0 : index
    %220 = vector.load %arg2[%c4_228, %c0_229, %c0_230] : memref<9x128x128xbf16, #tpu.memory_space<vmem>>, vector<1x128x128xbf16>
    %221 = vector.shape_cast %220 : vector<1x128x128xbf16> to vector<128x128xbf16>
    %cst_231 = arith.constant dense<0.000000e+00> : vector<288x128xf32>
    %222 = tpu.matmul %219, %221, %cst_231 {dimension_numbers = #tpu.dot_dimension_numbers<[1], [0], [0], [1], [0, 0, 1, 1], [], []>} : vector<288x128xbf16>, vector<128x128xbf16>, vector<288x128xf32> -> vector<288x128xf32>
    %223 = arith.addf %217, %222 : vector<288x128xf32>
    %c3_232 = arith.constant 3 : index
    %c20_233 = arith.constant 20 : index
    %c0_234 = arith.constant 0 : index
    %224 = vector.load %arg1[%c3_232, %c20_233, %c0_234] : memref<4x326x128xbf16, #tpu.memory_space<vmem>>, vector<1x288x128xbf16>
    %225 = vector.shape_cast %224 : vector<1x288x128xbf16> to vector<288x128xbf16>
    %c5_235 = arith.constant 5 : index
    %c0_236 = arith.constant 0 : index
    %c0_237 = arith.constant 0 : index
    %226 = vector.load %arg2[%c5_235, %c0_236, %c0_237] : memref<9x128x128xbf16, #tpu.memory_space<vmem>>, vector<1x128x128xbf16>
    %227 = vector.shape_cast %226 : vector<1x128x128xbf16> to vector<128x128xbf16>
    %cst_238 = arith.constant dense<0.000000e+00> : vector<288x128xf32>
    %228 = tpu.matmul %225, %227, %cst_238 {dimension_numbers = #tpu.dot_dimension_numbers<[1], [0], [0], [1], [0, 0, 1, 1], [], []>} : vector<288x128xbf16>, vector<128x128xbf16>, vector<288x128xf32> -> vector<288x128xf32>
    %229 = arith.addf %223, %228 : vector<288x128xf32>
    %c3_239 = arith.constant 3 : index
    %c36_240 = arith.constant 36 : index
    %c0_241 = arith.constant 0 : index
    %230 = vector.load %arg1[%c3_239, %c36_240, %c0_241] : memref<4x326x128xbf16, #tpu.memory_space<vmem>>, vector<1x288x128xbf16>
    %231 = vector.shape_cast %230 : vector<1x288x128xbf16> to vector<288x128xbf16>
    %c6_242 = arith.constant 6 : index
    %c0_243 = arith.constant 0 : index
    %c0_244 = arith.constant 0 : index
    %232 = vector.load %arg2[%c6_242, %c0_243, %c0_244] : memref<9x128x128xbf16, #tpu.memory_space<vmem>>, vector<1x128x128xbf16>
    %233 = vector.shape_cast %232 : vector<1x128x128xbf16> to vector<128x128xbf16>
    %cst_245 = arith.constant dense<0.000000e+00> : vector<288x128xf32>
    %234 = tpu.matmul %231, %233, %cst_245 {dimension_numbers = #tpu.dot_dimension_numbers<[1], [0], [0], [1], [0, 0, 1, 1], [], []>} : vector<288x128xbf16>, vector<128x128xbf16>, vector<288x128xf32> -> vector<288x128xf32>
    %235 = arith.addf %229, %234 : vector<288x128xf32>
    %c3_246 = arith.constant 3 : index
    %c37_247 = arith.constant 37 : index
    %c0_248 = arith.constant 0 : index
    %236 = vector.load %arg1[%c3_246, %c37_247, %c0_248] : memref<4x326x128xbf16, #tpu.memory_space<vmem>>, vector<1x288x128xbf16>
    %237 = vector.shape_cast %236 : vector<1x288x128xbf16> to vector<288x128xbf16>
    %c7_249 = arith.constant 7 : index
    %c0_250 = arith.constant 0 : index
    %c0_251 = arith.constant 0 : index
    %238 = vector.load %arg2[%c7_249, %c0_250, %c0_251] : memref<9x128x128xbf16, #tpu.memory_space<vmem>>, vector<1x128x128xbf16>
    %239 = vector.shape_cast %238 : vector<1x128x128xbf16> to vector<128x128xbf16>
    %cst_252 = arith.constant dense<0.000000e+00> : vector<288x128xf32>
    %240 = tpu.matmul %237, %239, %cst_252 {dimension_numbers = #tpu.dot_dimension_numbers<[1], [0], [0], [1], [0, 0, 1, 1], [], []>} : vector<288x128xbf16>, vector<128x128xbf16>, vector<288x128xf32> -> vector<288x128xf32>
    %241 = arith.addf %235, %240 : vector<288x128xf32>
    %c3_253 = arith.constant 3 : index
    %c38_254 = arith.constant 38 : index
    %c0_255 = arith.constant 0 : index
    %242 = vector.load %arg1[%c3_253, %c38_254, %c0_255] : memref<4x326x128xbf16, #tpu.memory_space<vmem>>, vector<1x288x128xbf16>
    %243 = vector.shape_cast %242 : vector<1x288x128xbf16> to vector<288x128xbf16>
    %c8_256 = arith.constant 8 : index
    %c0_257 = arith.constant 0 : index
    %c0_258 = arith.constant 0 : index
    %244 = vector.load %arg2[%c8_256, %c0_257, %c0_258] : memref<9x128x128xbf16, #tpu.memory_space<vmem>>, vector<1x128x128xbf16>
    %245 = vector.shape_cast %244 : vector<1x128x128xbf16> to vector<128x128xbf16>
    %cst_259 = arith.constant dense<0.000000e+00> : vector<288x128xf32>
    %246 = tpu.matmul %243, %245, %cst_259 {dimension_numbers = #tpu.dot_dimension_numbers<[1], [0], [0], [1], [0, 0, 1, 1], [], []>} : vector<288x128xbf16>, vector<128x128xbf16>, vector<288x128xf32> -> vector<288x128xf32>
    %247 = arith.addf %241, %246 : vector<288x128xf32>
    %c0_260 = arith.constant 0 : index
    %c0_261 = arith.constant 0 : index
    %248 = vector.load %arg3[%c0_260, %c0_261] : memref<1x128xf32, #tpu.memory_space<vmem>>, vector<1x128xf32>
    %249 = vector.broadcast %248 : vector<1x128xf32> to vector<288x128xf32>
    %250 = arith.mulf %247, %249 : vector<288x128xf32>
    %c0_262 = arith.constant 0 : index
    %c0_263 = arith.constant 0 : index
    %251 = vector.load %arg4[%c0_262, %c0_263] : memref<1x128xf32, #tpu.memory_space<vmem>>, vector<1x128xf32>
    %252 = vector.broadcast %251 : vector<1x128xf32> to vector<288x128xf32>
    %253 = arith.addf %250, %252 : vector<288x128xf32>
    %cst_264 = arith.constant 0.000000e+00 : f32
    %254 = vector.broadcast %cst_264 : f32 to vector<288x128xf32>
    %255 = arith.maximumf %253, %254 : vector<288x128xf32>
    %256 = arith.truncf %255 : vector<288x128xf32> to vector<288x128xbf16>
    %c3_265 = arith.constant 3 : index
    %c0_266 = arith.constant 0 : index
    %c0_267 = arith.constant 0 : index
    %257 = vector.load %arg5[%c3_265, %c0_266, %c0_267] : memref<4x288x128xbf16, #tpu.memory_space<vmem>>, vector<1x288x128xbf16>
    %258 = vector.shape_cast %257 : vector<1x288x128xbf16> to vector<288x128xbf16>
    %259 = vector.shape_cast %256 : vector<288x128xbf16> to vector<1x288x128xbf16>
    tpu.vector_store %arg5[%c3_265, %c0_266, %c0_267], %259 {strides = array<i32>} : memref<4x288x128xbf16, #tpu.memory_space<vmem>>, vector<1x288x128xbf16>,
    return
  }
  func.func @transform_0(%arg0: i32) -> (i32, i32, i32) {
    %c0_i32 = arith.constant 0 : i32
    %c0_i32_0 = arith.constant 0 : i32
    %c0_i32_1 = arith.constant 0 : i32
    return %arg0, %c0_i32, %c0_i32_0 : i32, i32, i32
  }
  func.func @transform_1(%arg0: i32) -> (i32, i32, i32) {
    %c0_i32 = arith.constant 0 : i32
    %c0_i32_0 = arith.constant 0 : i32
    %c0_i32_1 = arith.constant 0 : i32
    %c0_i32_2 = arith.constant 0 : i32
    return %c0_i32, %c0_i32_0, %c0_i32_1 : i32, i32, i32
  }
  func.func @transform_2(%arg0: i32) -> (i32, i32) {
    %c0_i32 = arith.constant 0 : i32
    %c0_i32_0 = arith.constant 0 : i32
    %c0_i32_1 = arith.constant 0 : i32
    return %c0_i32, %c0_i32_0 : i32, i32
  }
  func.func @transform_3(%arg0: i32) -> (i32, i32) {
    %c0_i32 = arith.constant 0 : i32
    %c0_i32_0 = arith.constant 0 : i32
    %c0_i32_1 = arith.constant 0 : i32
    return %c0_i32, %c0_i32_0 : i32, i32
  }
  func.func @transform_4(%arg0: i32) -> (i32, i32, i32) {
    %c0_i32 = arith.constant 0 : i32
    %c0_i32_0 = arith.constant 0 : i32
    %c0_i32_1 = arith.constant 0 : i32
    return %arg0, %c0_i32, %c0_i32_0 : i32, i32, i32
  }
}

module attributes {stable_mosaic.version = 11 : i64} {
  func.func @kernel(%arg0: i32, %arg1: i32, %arg2: memref<1x256x128xbf16, #tpu.memory_space<vmem>>, %arg3: memref<1x256x128xbf16, #tpu.memory_space<vmem>>, %arg4: memref<1x256x128xbf16, #tpu.memory_space<vmem>>, %arg5: memref<3x128x128xbf16, #tpu.memory_space<vmem>>, %arg6: memref<1x128xf32, #tpu.memory_space<vmem>>, %arg7: memref<1x128xf32, #tpu.memory_space<vmem>>, %arg8: memref<1x256x128xbf16, #tpu.memory_space<vmem>>) attributes {dimension_semantics = [#tpu.dimension_semantics<parallel>, #tpu.dimension_semantics<parallel>], iteration_bounds = array<i64: 2, 8>, scalar_prefetch = 0 : i64, scratch_operands = 0 : i64, tpu.core_type = #tpu.core_type<tc>, window_params = [{transform_indices = @transform_0, window_bounds = array<i64: 1, 256, 128>}, {transform_indices = @transform_1, window_bounds = array<i64: 1, 256, 128>}, {transform_indices = @transform_2, window_bounds = array<i64: 1, 256, 128>}, {pipeline_mode = #tpu.pipeline_mode<synchronous>, transform_indices = @transform_3, window_bounds = array<i64: 3, 128, 128>}, {pipeline_mode = #tpu.pipeline_mode<synchronous>, transform_indices = @transform_4, window_bounds = array<i64: 1, 128>}, {pipeline_mode = #tpu.pipeline_mode<synchronous>, transform_indices = @transform_5, window_bounds = array<i64: 1, 128>}, {transform_indices = @transform_6, window_bounds = array<i64: 1, 256, 128>}]} {
    %c0 = arith.constant 0 : index
    %c0_0 = arith.constant 0 : index
    %c0_1 = arith.constant 0 : index
    %0 = vector.load %arg2[%c0, %c0_0, %c0_1] : memref<1x256x128xbf16, #tpu.memory_space<vmem>>, vector<1x256x128xbf16>
    %1 = vector.shape_cast %0 : vector<1x256x128xbf16> to vector<256x128xbf16>
    %c0_2 = arith.constant 0 : index
    %c0_3 = arith.constant 0 : index
    %c0_4 = arith.constant 0 : index
    %2 = vector.load %arg5[%c0_2, %c0_3, %c0_4] : memref<3x128x128xbf16, #tpu.memory_space<vmem>>, vector<1x128x128xbf16>
    %3 = vector.shape_cast %2 : vector<1x128x128xbf16> to vector<128x128xbf16>
    %cst = arith.constant dense<0.000000e+00> : vector<256x128xf32>
    %4 = tpu.matmul %1, %3, %cst {dimension_numbers = #tpu.dot_dimension_numbers<[1], [0], [0], [1], [0, 0, 1, 1], [], []>} : vector<256x128xbf16>, vector<128x128xbf16>, vector<256x128xf32> -> vector<256x128xf32>
    %c0_5 = arith.constant 0 : index
    %c0_6 = arith.constant 0 : index
    %c0_7 = arith.constant 0 : index
    %5 = vector.load %arg3[%c0_5, %c0_6, %c0_7] : memref<1x256x128xbf16, #tpu.memory_space<vmem>>, vector<1x256x128xbf16>
    %6 = vector.shape_cast %5 : vector<1x256x128xbf16> to vector<256x128xbf16>
    %c1 = arith.constant 1 : index
    %c0_8 = arith.constant 0 : index
    %c0_9 = arith.constant 0 : index
    %7 = vector.load %arg5[%c1, %c0_8, %c0_9] : memref<3x128x128xbf16, #tpu.memory_space<vmem>>, vector<1x128x128xbf16>
    %8 = vector.shape_cast %7 : vector<1x128x128xbf16> to vector<128x128xbf16>
    %cst_10 = arith.constant dense<0.000000e+00> : vector<256x128xf32>
    %9 = tpu.matmul %6, %8, %cst_10 {dimension_numbers = #tpu.dot_dimension_numbers<[1], [0], [0], [1], [0, 0, 1, 1], [], []>} : vector<256x128xbf16>, vector<128x128xbf16>, vector<256x128xf32> -> vector<256x128xf32>
    %10 = arith.addf %4, %9 : vector<256x128xf32>
    %c0_11 = arith.constant 0 : index
    %c0_12 = arith.constant 0 : index
    %c0_13 = arith.constant 0 : index
    %11 = vector.load %arg4[%c0_11, %c0_12, %c0_13] : memref<1x256x128xbf16, #tpu.memory_space<vmem>>, vector<1x256x128xbf16>
    %12 = vector.shape_cast %11 : vector<1x256x128xbf16> to vector<256x128xbf16>
    %c2 = arith.constant 2 : index
    %c0_14 = arith.constant 0 : index
    %c0_15 = arith.constant 0 : index
    %13 = vector.load %arg5[%c2, %c0_14, %c0_15] : memref<3x128x128xbf16, #tpu.memory_space<vmem>>, vector<1x128x128xbf16>
    %14 = vector.shape_cast %13 : vector<1x128x128xbf16> to vector<128x128xbf16>
    %cst_16 = arith.constant dense<0.000000e+00> : vector<256x128xf32>
    %15 = tpu.matmul %12, %14, %cst_16 {dimension_numbers = #tpu.dot_dimension_numbers<[1], [0], [0], [1], [0, 0, 1, 1], [], []>} : vector<256x128xbf16>, vector<128x128xbf16>, vector<256x128xf32> -> vector<256x128xf32>
    %16 = arith.addf %10, %15 : vector<256x128xf32>
    %c0_17 = arith.constant 0 : index
    %c0_18 = arith.constant 0 : index
    %17 = vector.load %arg6[%c0_17, %c0_18] : memref<1x128xf32, #tpu.memory_space<vmem>>, vector<1x128xf32>
    %18 = vector.broadcast %17 : vector<1x128xf32> to vector<256x128xf32>
    %19 = arith.mulf %16, %18 : vector<256x128xf32>
    %c0_19 = arith.constant 0 : index
    %c0_20 = arith.constant 0 : index
    %20 = vector.load %arg7[%c0_19, %c0_20] : memref<1x128xf32, #tpu.memory_space<vmem>>, vector<1x128xf32>
    %21 = vector.broadcast %20 : vector<1x128xf32> to vector<256x128xf32>
    %22 = arith.addf %19, %21 : vector<256x128xf32>
    %cst_21 = arith.constant 0.000000e+00 : f32
    %23 = vector.broadcast %cst_21 : f32 to vector<256x128xf32>
    %24 = arith.maximumf %22, %23 : vector<256x128xf32>
    %25 = arith.truncf %24 : vector<256x128xf32> to vector<256x128xbf16>
    %c0_22 = arith.constant 0 : index
    %c0_23 = arith.constant 0 : index
    %c0_24 = arith.constant 0 : index
    %26 = vector.load %arg8[%c0_22, %c0_23, %c0_24] : memref<1x256x128xbf16, #tpu.memory_space<vmem>>, vector<1x256x128xbf16>
    %27 = vector.shape_cast %26 : vector<1x256x128xbf16> to vector<256x128xbf16>
    %28 = vector.shape_cast %25 : vector<256x128xbf16> to vector<1x256x128xbf16>
    tpu.vector_store %arg8[%c0_22, %c0_23, %c0_24], %28 {strides = array<i32>} : memref<1x256x128xbf16, #tpu.memory_space<vmem>>, vector<1x256x128xbf16>,
    return
  }
  func.func @transform_0(%arg0: i32, %arg1: i32) -> (i32, i32, i32) {
    %c10_i32 = arith.constant 10 : i32
    %0 = arith.muli %arg0, %c10_i32 : i32
    %1 = arith.addi %0, %arg1 : i32
    %c0_i32 = arith.constant 0 : i32
    %2 = arith.addi %1, %c0_i32 : i32
    %c0_i32_0 = arith.constant 0 : i32
    %c0_i32_1 = arith.constant 0 : i32
    %c0_i32_2 = arith.constant 0 : i32
    return %2, %c0_i32_0, %c0_i32_1 : i32, i32, i32
  }
  func.func @transform_1(%arg0: i32, %arg1: i32) -> (i32, i32, i32) {
    %c10_i32 = arith.constant 10 : i32
    %0 = arith.muli %arg0, %c10_i32 : i32
    %1 = arith.addi %0, %arg1 : i32
    %c1_i32 = arith.constant 1 : i32
    %2 = arith.addi %1, %c1_i32 : i32
    %c0_i32 = arith.constant 0 : i32
    %c0_i32_0 = arith.constant 0 : i32
    %c0_i32_1 = arith.constant 0 : i32
    return %2, %c0_i32, %c0_i32_0 : i32, i32, i32
  }
  func.func @transform_2(%arg0: i32, %arg1: i32) -> (i32, i32, i32) {
    %c10_i32 = arith.constant 10 : i32
    %0 = arith.muli %arg0, %c10_i32 : i32
    %1 = arith.addi %0, %arg1 : i32
    %c2_i32 = arith.constant 2 : i32
    %2 = arith.addi %1, %c2_i32 : i32
    %c0_i32 = arith.constant 0 : i32
    %c0_i32_0 = arith.constant 0 : i32
    %c0_i32_1 = arith.constant 0 : i32
    return %2, %c0_i32, %c0_i32_0 : i32, i32, i32
  }
  func.func @transform_3(%arg0: i32, %arg1: i32) -> (i32, i32, i32) {
    %c0_i32 = arith.constant 0 : i32
    %c0_i32_0 = arith.constant 0 : i32
    %c0_i32_1 = arith.constant 0 : i32
    %c0_i32_2 = arith.constant 0 : i32
    return %c0_i32, %c0_i32_0, %c0_i32_1 : i32, i32, i32
  }
  func.func @transform_4(%arg0: i32, %arg1: i32) -> (i32, i32) {
    %c0_i32 = arith.constant 0 : i32
    %c0_i32_0 = arith.constant 0 : i32
    %c0_i32_1 = arith.constant 0 : i32
    return %c0_i32, %c0_i32_0 : i32, i32
  }
  func.func @transform_5(%arg0: i32, %arg1: i32) -> (i32, i32) {
    %c0_i32 = arith.constant 0 : i32
    %c0_i32_0 = arith.constant 0 : i32
    %c0_i32_1 = arith.constant 0 : i32
    return %c0_i32, %c0_i32_0 : i32, i32
  }
  func.func @transform_6(%arg0: i32, %arg1: i32) -> (i32, i32, i32) {
    %c8_i32 = arith.constant 8 : i32
    %0 = arith.muli %arg0, %c8_i32 : i32
    %1 = arith.addi %0, %arg1 : i32
    %c0_i32 = arith.constant 0 : i32
    %c0_i32_0 = arith.constant 0 : i32
    %c0_i32_1 = arith.constant 0 : i32
    return %1, %c0_i32, %c0_i32_0 : i32, i32, i32
  }
}

module attributes {stable_mosaic.version = 11 : i64} {
  func.func @kernel(%arg0: i32, %arg1: i32, %arg2: memref<1x256x128xbf16, #tpu.memory_space<vmem>>, %arg3: memref<1x256x128xbf16, #tpu.memory_space<vmem>>, %arg4: memref<1x256x128xbf16, #tpu.memory_space<vmem>>, %arg5: memref<3x128x128xbf16, #tpu.memory_space<vmem>>, %arg6: memref<1x128xf32, #tpu.memory_space<vmem>>, %arg7: memref<1x128xf32, #tpu.memory_space<vmem>>, %arg8: memref<1x256x128xbf16, #tpu.memory_space<vmem>>, %arg9: memref<1x256x128xf32, #tpu.memory_space<vmem>>) attributes {dimension_semantics = [#tpu.dimension_semantics<parallel>, #tpu.dimension_semantics<parallel>], iteration_bounds = array<i64: 2, 8>, scalar_prefetch = 0 : i64, scratch_operands = 0 : i64, tpu.core_type = #tpu.core_type<tc>, window_params = [{transform_indices = @transform_0, window_bounds = array<i64: 1, 256, 128>}, {transform_indices = @transform_1, window_bounds = array<i64: 1, 256, 128>}, {transform_indices = @transform_2, window_bounds = array<i64: 1, 256, 128>}, {pipeline_mode = #tpu.pipeline_mode<synchronous>, transform_indices = @transform_3, window_bounds = array<i64: 3, 128, 128>}, {pipeline_mode = #tpu.pipeline_mode<synchronous>, transform_indices = @transform_4, window_bounds = array<i64: 1, 128>}, {pipeline_mode = #tpu.pipeline_mode<synchronous>, transform_indices = @transform_5, window_bounds = array<i64: 1, 128>}, {transform_indices = @transform_6, window_bounds = array<i64: 1, 256, 128>}, {transform_indices = @transform_7, window_bounds = array<i64: 1, 256, 128>}]} {
    %c0 = arith.constant 0 : index
    %c0_0 = arith.constant 0 : index
    %c0_1 = arith.constant 0 : index
    %0 = vector.load %arg2[%c0, %c0_0, %c0_1] : memref<1x256x128xbf16, #tpu.memory_space<vmem>>, vector<1x256x128xbf16>
    %1 = vector.shape_cast %0 : vector<1x256x128xbf16> to vector<256x128xbf16>
    %c0_2 = arith.constant 0 : index
    %c0_3 = arith.constant 0 : index
    %c0_4 = arith.constant 0 : index
    %2 = vector.load %arg5[%c0_2, %c0_3, %c0_4] : memref<3x128x128xbf16, #tpu.memory_space<vmem>>, vector<1x128x128xbf16>
    %3 = vector.shape_cast %2 : vector<1x128x128xbf16> to vector<128x128xbf16>
    %cst = arith.constant dense<0.000000e+00> : vector<256x128xf32>
    %4 = tpu.matmul %1, %3, %cst {dimension_numbers = #tpu.dot_dimension_numbers<[1], [0], [0], [1], [0, 0, 1, 1], [], []>} : vector<256x128xbf16>, vector<128x128xbf16>, vector<256x128xf32> -> vector<256x128xf32>
    %c0_5 = arith.constant 0 : index
    %c0_6 = arith.constant 0 : index
    %c0_7 = arith.constant 0 : index
    %5 = vector.load %arg3[%c0_5, %c0_6, %c0_7] : memref<1x256x128xbf16, #tpu.memory_space<vmem>>, vector<1x256x128xbf16>
    %6 = vector.shape_cast %5 : vector<1x256x128xbf16> to vector<256x128xbf16>
    %c1 = arith.constant 1 : index
    %c0_8 = arith.constant 0 : index
    %c0_9 = arith.constant 0 : index
    %7 = vector.load %arg5[%c1, %c0_8, %c0_9] : memref<3x128x128xbf16, #tpu.memory_space<vmem>>, vector<1x128x128xbf16>
    %8 = vector.shape_cast %7 : vector<1x128x128xbf16> to vector<128x128xbf16>
    %cst_10 = arith.constant dense<0.000000e+00> : vector<256x128xf32>
    %9 = tpu.matmul %6, %8, %cst_10 {dimension_numbers = #tpu.dot_dimension_numbers<[1], [0], [0], [1], [0, 0, 1, 1], [], []>} : vector<256x128xbf16>, vector<128x128xbf16>, vector<256x128xf32> -> vector<256x128xf32>
    %10 = arith.addf %4, %9 : vector<256x128xf32>
    %c0_11 = arith.constant 0 : index
    %c0_12 = arith.constant 0 : index
    %c0_13 = arith.constant 0 : index
    %11 = vector.load %arg4[%c0_11, %c0_12, %c0_13] : memref<1x256x128xbf16, #tpu.memory_space<vmem>>, vector<1x256x128xbf16>
    %12 = vector.shape_cast %11 : vector<1x256x128xbf16> to vector<256x128xbf16>
    %c2 = arith.constant 2 : index
    %c0_14 = arith.constant 0 : index
    %c0_15 = arith.constant 0 : index
    %13 = vector.load %arg5[%c2, %c0_14, %c0_15] : memref<3x128x128xbf16, #tpu.memory_space<vmem>>, vector<1x128x128xbf16>
    %14 = vector.shape_cast %13 : vector<1x128x128xbf16> to vector<128x128xbf16>
    %cst_16 = arith.constant dense<0.000000e+00> : vector<256x128xf32>
    %15 = tpu.matmul %12, %14, %cst_16 {dimension_numbers = #tpu.dot_dimension_numbers<[1], [0], [0], [1], [0, 0, 1, 1], [], []>} : vector<256x128xbf16>, vector<128x128xbf16>, vector<256x128xf32> -> vector<256x128xf32>
    %16 = arith.addf %10, %15 : vector<256x128xf32>
    %c0_17 = arith.constant 0 : index
    %c0_18 = arith.constant 0 : index
    %17 = vector.load %arg6[%c0_17, %c0_18] : memref<1x128xf32, #tpu.memory_space<vmem>>, vector<1x128xf32>
    %18 = vector.broadcast %17 : vector<1x128xf32> to vector<256x128xf32>
    %19 = arith.mulf %16, %18 : vector<256x128xf32>
    %c0_19 = arith.constant 0 : index
    %c0_20 = arith.constant 0 : index
    %20 = vector.load %arg7[%c0_19, %c0_20] : memref<1x128xf32, #tpu.memory_space<vmem>>, vector<1x128xf32>
    %21 = vector.broadcast %20 : vector<1x128xf32> to vector<256x128xf32>
    %22 = arith.addf %19, %21 : vector<256x128xf32>
    %c0_21 = arith.constant 0 : index
    %c0_22 = arith.constant 0 : index
    %c0_23 = arith.constant 0 : index
    %23 = vector.load %arg8[%c0_21, %c0_22, %c0_23] : memref<1x256x128xbf16, #tpu.memory_space<vmem>>, vector<1x256x128xbf16>
    %24 = vector.shape_cast %23 : vector<1x256x128xbf16> to vector<256x128xbf16>
    %25 = arith.extf %24 : vector<256x128xbf16> to vector<256x128xf32>
    %26 = arith.addf %22, %25 : vector<256x128xf32>
    %cst_24 = arith.constant 0.000000e+00 : f32
    %27 = vector.broadcast %cst_24 : f32 to vector<256x128xf32>
    %28 = arith.maximumf %26, %27 : vector<256x128xf32>
    %c0_25 = arith.constant 0 : index
    %c0_26 = arith.constant 0 : index
    %c0_27 = arith.constant 0 : index
    %29 = vector.load %arg9[%c0_25, %c0_26, %c0_27] : memref<1x256x128xf32, #tpu.memory_space<vmem>>, vector<1x256x128xf32>
    %30 = vector.shape_cast %29 : vector<1x256x128xf32> to vector<256x128xf32>
    %31 = vector.shape_cast %28 : vector<256x128xf32> to vector<1x256x128xf32>
    tpu.vector_store %arg9[%c0_25, %c0_26, %c0_27], %31 {strides = array<i32>} : memref<1x256x128xf32, #tpu.memory_space<vmem>>, vector<1x256x128xf32>,
    return
  }
  func.func @transform_0(%arg0: i32, %arg1: i32) -> (i32, i32, i32) {
    %c10_i32 = arith.constant 10 : i32
    %0 = arith.muli %arg0, %c10_i32 : i32
    %1 = arith.addi %0, %arg1 : i32
    %c0_i32 = arith.constant 0 : i32
    %2 = arith.addi %1, %c0_i32 : i32
    %c0_i32_0 = arith.constant 0 : i32
    %c0_i32_1 = arith.constant 0 : i32
    %c0_i32_2 = arith.constant 0 : i32
    return %2, %c0_i32_0, %c0_i32_1 : i32, i32, i32
  }
  func.func @transform_1(%arg0: i32, %arg1: i32) -> (i32, i32, i32) {
    %c10_i32 = arith.constant 10 : i32
    %0 = arith.muli %arg0, %c10_i32 : i32
    %1 = arith.addi %0, %arg1 : i32
    %c1_i32 = arith.constant 1 : i32
    %2 = arith.addi %1, %c1_i32 : i32
    %c0_i32 = arith.constant 0 : i32
    %c0_i32_0 = arith.constant 0 : i32
    %c0_i32_1 = arith.constant 0 : i32
    return %2, %c0_i32, %c0_i32_0 : i32, i32, i32
  }
  func.func @transform_2(%arg0: i32, %arg1: i32) -> (i32, i32, i32) {
    %c10_i32 = arith.constant 10 : i32
    %0 = arith.muli %arg0, %c10_i32 : i32
    %1 = arith.addi %0, %arg1 : i32
    %c2_i32 = arith.constant 2 : i32
    %2 = arith.addi %1, %c2_i32 : i32
    %c0_i32 = arith.constant 0 : i32
    %c0_i32_0 = arith.constant 0 : i32
    %c0_i32_1 = arith.constant 0 : i32
    return %2, %c0_i32, %c0_i32_0 : i32, i32, i32
  }
  func.func @transform_3(%arg0: i32, %arg1: i32) -> (i32, i32, i32) {
    %c0_i32 = arith.constant 0 : i32
    %c0_i32_0 = arith.constant 0 : i32
    %c0_i32_1 = arith.constant 0 : i32
    %c0_i32_2 = arith.constant 0 : i32
    return %c0_i32, %c0_i32_0, %c0_i32_1 : i32, i32, i32
  }
  func.func @transform_4(%arg0: i32, %arg1: i32) -> (i32, i32) {
    %c0_i32 = arith.constant 0 : i32
    %c0_i32_0 = arith.constant 0 : i32
    %c0_i32_1 = arith.constant 0 : i32
    return %c0_i32, %c0_i32_0 : i32, i32
  }
  func.func @transform_5(%arg0: i32, %arg1: i32) -> (i32, i32) {
    %c0_i32 = arith.constant 0 : i32
    %c0_i32_0 = arith.constant 0 : i32
    %c0_i32_1 = arith.constant 0 : i32
    return %c0_i32, %c0_i32_0 : i32, i32
  }
  func.func @transform_6(%arg0: i32, %arg1: i32) -> (i32, i32, i32) {
    %c8_i32 = arith.constant 8 : i32
    %0 = arith.muli %arg0, %c8_i32 : i32
    %1 = arith.addi %0, %arg1 : i32
    %c0_i32 = arith.constant 0 : i32
    %c0_i32_0 = arith.constant 0 : i32
    %c0_i32_1 = arith.constant 0 : i32
    return %1, %c0_i32, %c0_i32_0 : i32, i32, i32
  }
  func.func @transform_7(%arg0: i32, %arg1: i32) -> (i32, i32, i32) {
    %c8_i32 = arith.constant 8 : i32
    %0 = arith.muli %arg0, %c8_i32 : i32
    %1 = arith.addi %0, %arg1 : i32
    %c0_i32 = arith.constant 0 : i32
    %c0_i32_0 = arith.constant 0 : i32
    %c0_i32_1 = arith.constant 0 : i32
    return %1, %c0_i32, %c0_i32_0 : i32, i32, i32
  }
}

</mosaic_0001>

<bundles_post_ra>
// kernel: spatio_temporal_res_block.5
= control target key start
LH: loop header
LB: loop body
LE: loop exit
PB: predicated region body
PF: predicated region fallthrough
CT: control target
= control target key end

     0   :  { %s2601_s21 = smov 0   ;;  %s2603_s22 = smov 0   ;;  %s2956_s0 = inlined_call_operand.vmem [shape: bf16[20,256,128], index: 0, kind: input, shape index: {}, may-alias: {0,1,2}]   ;;  %s2957_s1 = inlined_call_operand.vmem [shape: bf16[20,256,128], index: 1, kind: input, shape index: {}, may-alias: {0,1,2}]   ;;  %s2958_s2 = inlined_call_operand.vmem [shape: bf16[20,256,128], index: 2, kind: input, shape index: {}, may-alias: {0,1,2}]   ;;  %s2959_s3 = inlined_call_operand.vmem [shape: bf16[3,128,128], index: 3, kind: input, shape index: {}]   ;;  %s2960_s4 = inlined_call_operand.vmem [shape: f32[1,128], index: 4, kind: input, shape index: {}]   ;;  %s2961_s5 = inlined_call_operand.vmem [shape: f32[1,128], index: 5, kind: input, shape index: {}]   ;;  %s2962_s6 = inlined_call_operand.vmem [shape: bf16[16,256,128], index: 6, kind: output, shape index: {}]  }
   0x1   :  { %s2605_s23 = smov 0   ;;  %s2607_s24 = smov 0  }
   0x2   :  { %s2609_s25 = smov 0  }
   0x3 LB: > { %s25_s26 = sadd.s32 1, %s2556_s23  ;;  %s28_s27 = sadd.s32 1, %s2560_s24  ;;  %s2564_s25 = sphi %s2609_s25, %s16_s25   ;;  %s2560_s24 = sphi %s2607_s24, %s2966_s24   ;;  %s2556_s23 = sphi %s2605_s23, %s2965_s23   ;;  %s2552_s22 = sphi %s2603_s22, %s2964_s22   ;;  %s2548_s21 = sphi %s2601_s21, %s2963_s21  }
   0x4   : > { %p26_p0 = scmp.ge.s32.totalorder %s25_s26, 8  ;;  %p1837_p1 = scmp.ge.s32.totalorder %s2564_s25, 1 }
   0x5   : > { %p280_p2 = scmp.lt.s32.totalorder %s2564_s25, 17 }
   0x6   : > { %s2968_s26 = smov (%p26_p0, %s25_s26), 0  ;;  %s2970_s27 = smov (!%p26_p0, %s28_s27), %s2560_s24 }
   0x7   : > { %p281_p3 = pnand %p1837_p1, %p280_p2  ;;  %p30_p4 = scmp.ge.s32.totalorder %s2970_s27, 2 }
   0x8   : > { %v2454_v0 = vld [vmem:[%s2959_s3 + $0x40] sm:$0xff] (!%p281_p3)   ;;  %s330_s30 = smul.u32 (!%p281_p3), 10, %s2552_s22  ;;  %v2456_v2 = vld [vmem:[%s2959_s3 + $0x48] sm:$0xff] (!%p281_p3)   ;;  %v2458_v4 = vld [vmem:[%s2959_s3 + $0x50] sm:$0xff] (!%p281_p3)  }
   0x9   : > { %s2972_s27 = smov (%p30_p4, %s2970_s27), 0  ;;  %284 = sbr.rel (%p281_p3) target bundleno = 357 (0x165), region = 44 }
   0xa   : > { %v2642_v1 = vld [vmem:[%s2959_s3] sm:$0xff] (!%p281_p3)   ;;  %2190 = vmatprep.subr.bf16.mxu1 (!%p281_p3), %v2454_v0  ;;  %s2648_s11 = sadd.s32 (!%p281_p3), %s2548_s21, %s330_s30  ;;  %v2654_v3 = vld [vmem:[%s2959_s3 + $0x8] sm:$0xff] (!%p281_p3)   ;;  %v2665_v5 = vld [vmem:[%s2959_s3 + $0x10] sm:$0xff] (!%p281_p3)  }
   0xb   : > { %2238 = vmatprep.subr.bf16.mxu0 (!%p281_p3), %v2642_v1  ;;  %2191 = vmatpush3.bf16.msra.mxu1 (!%p281_p3), %v2454_v0  ;;  %s341_s14 = sadd.s32 (!%p281_p3), 1, %s2648_s11  ;;  %p332_p6 = scmp.lt.s32.totalorder (!%p281_p3), %s2648_s11, 19  ;;  %v2460_v6 = vld [vmem:[%s2959_s3 + $0x58] sm:$0xff] (!%p281_p3)   ;;  %v2462_v8 = vld [vmem:[%s2959_s3 + $0x60] sm:$0xff] (!%p281_p3)   ;;  %v2464_v10 = vld [vmem:[%s2959_s3 + $0x68] sm:$0xff] (!%p281_p3)  }
   0xc   : > { %2239 = vmatpush3.bf16.msra.mxu0 (!%p281_p3), %v2642_v1  ;;  %2192 = vmatprep.subr.bf16.mxu1 (!%p281_p3), %v2456_v2  ;;  %p342_p5 = scmp.lt.s32.totalorder (!%p281_p3), %s341_s14, 19  ;;  %v2677_v7 = vld [vmem:[%s2959_s3 + $0x18] sm:$0xff] (!%p281_p3)   ;;  %v2687_v9 = vld [vmem:[%s2959_s3 + $0x20] sm:$0xff] (!%p281_p3)   ;;  %v2705_v11 = vld [vmem:[%s2959_s3 + $0x28] sm:$0xff] (!%p281_p3)   ;;  %s352_s17 = sadd.s32 (!%p281_p3), 2, %s2648_s11 }
   0xd   : > { %2240 = vmatprep.subr.bf16.mxu0 (!%p281_p3), %v2654_v3  ;;  %v2466_v14 = vld [vmem:[%s2959_s3 + $0x70] sm:$0xff] (!%p281_p3)   ;;  %v2468_v16 = vld [vmem:[%s2959_s3 + $0x78] sm:$0xff] (!%p281_p3)   ;;  %v2474_v19 = vld [vmem:[%s2959_s3 + $0x80] sm:$0xff] (!%p281_p3)   ;;  %p353_p7 = scmp.lt.s32.totalorder (!%p281_p3), %s352_s17, 19 }
   0xe   : > { %v2719_v15 = vld [vmem:[%s2959_s3 + $0x30] sm:$0xff] (!%p281_p3)   ;;  %v2729_v17 = vld [vmem:[%s2959_s3 + $0x38] sm:$0xff] (!%p281_p3)   ;;  %v2475_v21 = vld [vmem:[%s2959_s3 + $0x88] sm:$0xff] (!%p281_p3)  }
   0xf   : > { %2193 = vmatpush3.bf16.msra.mxu1 (!%p281_p3), %v2456_v2  ;;  %v2480_v25 = vld [vmem:[%s2959_s3 + $0x90] sm:$0xff] (!%p281_p3)   ;;  %v2481_v29 = vld [vmem:[%s2959_s3 + $0x98] sm:$0xff] (!%p281_p3)   ;;  %v2486_v31 = vld [vmem:[%s2959_s3 + $0xa0] sm:$0xff] (!%p281_p3)  }
  0x10   : > { %s2974_s14 = smov (!%p342_p5, %s341_s14), 19  ;;  %2241 = vmatpush3.bf16.msra.mxu0 %v2654_v3  ;;  %2194 = vmatprep.subr.bf16.mxu1 %v2458_v4  ;;  %s2976_s17 = smov (!%p353_p7, %s352_s17), 19  ;;  %v2487_v35 = vld [vmem:[%s2959_s3 + $0xa8] sm:$0xff]   ;;  %v2492_v37 = vld [vmem:[%s2959_s3 + $0xb0] sm:$0xff]   ;;  %v2493_v41 = vld [vmem:[%s2959_s3 + $0xb8] sm:$0xff]  }
  0x11   : > { %s333_s19 = scalar_select %p332_p6, %s2648_s11, 19  ;;  %2242 = vmatprep.subr.bf16.mxu0 %v2665_v5 }
  0x12   : > { %s1988_s7 = sshll.u32 %s2974_s14, 7 }
  0x13   : > { %2195 = vmatpush3.bf16.msra.mxu1 %v2458_v4  ;;  %s1987_s8 = sshll.u32 %s333_s19, 7  ;;  %s2692_s14 = scalar_lea.vmem %s2957_s1, %s1988_s7 }
  0x14   : > { %2243 = vmatpush3.bf16.msra.mxu0 %v2665_v5  ;;  %2196 = vmatprep.subr.bf16.mxu1 %v2460_v6  ;;  %s2700_s28 = scalar_lea.vmem %s2956_s0, %s1987_s8  ;;  %v2470_v12 = vld [vmem:[%s2692_s14] sm:$0xff]   ;;  %v2472_v18 = vld [vmem:[%s2692_s14 + $0x8] sm:$0xff]   ;;  %v2476_v22 = vld [vmem:[%s2692_s14 + $0x10] sm:$0xff]   ;;  %s1989_s7 = sshll.u32 %s2976_s17, 7 }
  0x15   : > { %2244 = vmatprep.subr.bf16.mxu0 %v2677_v7  ;;  %v2471_v13 = vld [vmem:[%s2700_s28] sm:$0xff]   ;;  %2206 = vmatprep.mubr.bf16.mxu1 %v2470_v12  ;;  %v2473_v20 = vld [vmem:[%s2700_s28 + $0x8] sm:$0xff]   ;;  %v2477_v23 = vld [vmem:[%s2700_s28 + $0x10] sm:$0xff]   ;;  %s2760_s10 = scalar_lea.vmem %s2958_s2, %s1989_s7 }
  0x16   : > { %2254 = vmatprep.mubr.bf16.mxu0 %v2471_v13  ;;  %v2478_v24 = vld [vmem:[%s2692_s14 + $0x18] sm:$0xff]   ;;  %v2482_v27 = vld [vmem:[%s2692_s14 + $0x20] sm:$0xff]   ;;  %v2484_v30 = vld [vmem:[%s2692_s14 + $0x28] sm:$0xff]  }
  0x17   : > { %2197 = vmatpush3.bf16.msra.mxu1 %v2460_v6  ;;  %v2479_v26 = vld [vmem:[%s2700_s28 + $0x18] sm:$0xff]   ;;  %v2483_v28 = vld [vmem:[%s2700_s28 + $0x20] sm:$0xff]   ;;  %v2485_v32 = vld [vmem:[%s2700_s28 + $0x28] sm:$0xff]  }
  0x18   : > { %2245 = vmatpush3.bf16.msra.mxu0 %v2677_v7  ;;  %2198 = vmatprep.subr.bf16.mxu1 %v2462_v8  ;;  %v2488_v33 = vld [vmem:[%s2692_s14 + $0x30] sm:$0xff]   ;;  %v2490_v36 = vld [vmem:[%s2692_s14 + $0x38] sm:$0xff]   ;;  %v2494_v39 = vld [vmem:[%s2692_s14 + $0x40] sm:$0xff]  }
  0x19   : > { %2246 = vmatprep.subr.bf16.mxu0 %v2687_v9  ;;  %v2489_v34 = vld [vmem:[%s2700_s28 + $0x30] sm:$0xff]   ;;  %v2491_v38 = vld [vmem:[%s2700_s28 + $0x38] sm:$0xff]   ;;  %v2495_v40 = vld [vmem:[%s2760_s10] sm:$0xff]  }
  0x1a   : > { %v2496_v42 = vld [vmem:[%s2692_s14 + $0x48] sm:$0xff]   ;;  %v2498_v44 = vld [vmem:[%s2692_s14 + $0x50] sm:$0xff]   ;;  %v2500_v46 = vld [vmem:[%s2692_s14 + $0x58] sm:$0xff]  }
  0x1b   : > { %2199 = vmatpush3.bf16.msra.mxu1 %v2462_v8  ;;  %v2497_v43 = vld [vmem:[%s2760_s10 + $0x8] sm:$0xff]   ;;  %v2499_v45 = vld [vmem:[%s2760_s10 + $0x10] sm:$0xff]   ;;  %v2501_v47 = vld [vmem:[%s2760_s10 + $0x18] sm:$0xff]  }
  0x1c   : > { %2247 = vmatpush3.bf16.msra.mxu0 %v2687_v9  ;;  %2200 = vmatprep.subr.bf16.mxu1 %v2464_v10  ;;  %v2502_v48 = vld [vmem:[%s2692_s14 + $0x60] sm:$0xff]   ;;  %v2504_v50 = vld [vmem:[%s2692_s14 + $0x68] sm:$0xff]   ;;  %v2506_v52 = vld [vmem:[%s2692_s14 + $0x70] sm:$0xff]  }
  0x1d   : > { %2248 = vmatprep.subr.bf16.mxu0 %v2705_v11  ;;  %v2503_v49 = vld [vmem:[%s2760_s10 + $0x20] sm:$0xff]   ;;  %v2505_v51 = vld [vmem:[%s2760_s10 + $0x28] sm:$0xff]   ;;  %v2507_v53 = vld [vmem:[%s2760_s10 + $0x30] sm:$0xff]  }
  0x1e   : > { %v2508_v54 = vld [vmem:[%s2692_s14 + $0x78] sm:$0xff]   ;;  %v2510_v56 = vld [vmem:[%s2700_s28 + $0x40] sm:$0xff]   ;;  %v2512_v58 = vld [vmem:[%s2700_s28 + $0x48] sm:$0xff]   ;;  %s1844_s14 = sshll.u32 %s2552_s22, 3 }
  0x1f   : > { %2201 = vmatpush3.bf16.msra.mxu1 %v2464_v10  ;;  %v2509_v55 = vld [vmem:[%s2760_s10 + $0x38] sm:$0xff]   ;;  %v2511_v57 = vld [vmem:[%s2760_s10 + $0x40] sm:$0xff]   ;;  %v2513_v59 = vld [vmem:[%s2760_s10 + $0x48] sm:$0xff]  }
  0x20   : > { %2249 = vmatpush3.bf16.msra.mxu0 %v2705_v11  ;;  %2202 = vmatprep.subr.bf16.mxu1 %v2466_v14  ;;  %v2514_v60 = vld [vmem:[%s2700_s28 + $0x50] sm:$0xff]   ;;  %v2516_v62 = vld [vmem:[%s2700_s28 + $0x58] sm:$0xff]   ;;  %v2518_v0 = vld [vmem:[%s2700_s28 + $0x60] sm:$0xff]  }
  0x21   : > { %2250 = vmatprep.subr.bf16.mxu0 %v2719_v15  ;;  %v2515_v61 = vld [vmem:[%s2760_s10 + $0x50] sm:$0xff]   ;;  %v2517_v63 = vld [vmem:[%s2760_s10 + $0x58] sm:$0xff]   ;;  %v2520_v2 = vld [vmem:[%s2700_s28 + $0x68] sm:$0xff]  }
  0x22   : > { %v2522_v4 = vld [vmem:[%s2700_s28 + $0x70] sm:$0xff]   ;;  %v2524_v6 = vld [vmem:[%s2700_s28 + $0x78] sm:$0xff]   ;;  %s362_s28 = sadd.s32 %s2548_s21, %s1844_s14 }
  0x23   : > { %2203 = vmatpush3.bf16.msra.mxu1 %v2466_v14  ;;  %p363_p8 = scmp.lt.s32.totalorder %s362_s28, 15 }
  0x24   : > { %2251 = vmatpush3.bf16.msra.mxu0 %v2719_v15  ;;  %2204 = vmatprep.subr.bf16.mxu1 %v2468_v16 }
  0x25   : > { %2252 = vmatprep.subr.bf16.mxu0 %v2729_v17  ;;  %s2978_s28 = smov (!%p363_p8, %s362_s28), 15 }
  0x26   : > { %s1990_s21 = sshll.u32 %s2978_s28, 7 }
  0x27   : > { %2205 = vmatpush3.bf16.msra.mxu1 %v2468_v16  ;;  %s2861_s12 = scalar_lea.vmem %s2962_s6, %s1990_s21 }
  0x28   : > { %2253 = vmatpush3.bf16.msra.mxu0 %v2729_v17  ;;  %2334 = vmatprep.subr.bf16.mxu1 %v2642_v1 }
  0x29   : > { %2286 = vmatprep.subr.bf16.mxu0 %v2474_v19 }
  0x2a   : > { %2207 = vmatmul.mubr.bf16.vlgmr.msra.gmra.mrb[0].mxu1 %v2472_v18 }
  0x2b   : > { %2255 = vmatmul.mubr.bf16.vlgmr.msra.gmra.mrb[0].mxu0 %v2473_v20  ;;  %2342 = vmatpush3.bf16.msra.mxu1 %v2642_v1  ;;  %v2519_v1 = vld [vmem:[%s2760_s10 + $0x60] sm:$0xff]  }
  0x2c   : > { %2287 = vmatpush3.bf16.msra.mxu0 %v2474_v19  ;;  %2210 = vmatprep.mubr.bf16.mxu1 %v2476_v22 }
  0x2d   : > { %2288 = vmatprep.subr.bf16.mxu0 %v2475_v21  ;;  %2258 = vmatprep.mubr.bf16.mxu0 %v2477_v23 }
  0x2e   : > { %2335 = vmatprep.subr.bf16.mxu1 %v2654_v3 }
  0x2f   : > { %2343 = vmatpush3.bf16.msra.mxu1 %v2654_v3  ;;  %v2521_v3 = vld [vmem:[%s2760_s10 + $0x68] sm:$0xff]  }
  0x30   : > { %2289 = vmatpush3.bf16.msra.mxu0 %v2475_v21  ;;  %2336 = vmatprep.subr.bf16.mxu1 %v2665_v5 }
  0x31   : > { %2290 = vmatprep.subr.bf16.mxu0 %v2480_v25 }
  0x32   : > { %2211 = vmatmul.mubr.bf16.gmra.mrb[4].mxu1 %v2478_v24 }
  0x33   : > { %2259 = vmatmul.mubr.bf16.gmra.mrb[4].mxu0 %v2479_v26  ;;  %2214 = vmatprep.mubr.bf16.mxu1 %v2482_v27 }
  0x34   : > { %2291 = vmatpush3.bf16.msra.mxu0 %v2480_v25  ;;  %2262 = vmatprep.mubr.bf16.mxu0 %v2483_v28  ;;  %v2843_v25 = vld [vmem:[%s2960_s4] ss:$0 sm:$0xff] }
  0x35   : > { %2292 = vmatprep.subr.bf16.mxu0 %v2481_v29  ;;  %2344 = vmatpush3.bf16.msra.mxu1 %v2665_v5  ;;  %v2523_v5 = vld [vmem:[%s2760_s10 + $0x70] sm:$0xff]   ;;  %v2848_v28 = vld [vmem:[%s2961_s5] ss:$0 sm:$0xff] }
  0x36   : > { %2337 = vmatprep.subr.bf16.mxu1 %v2677_v7 }
  0x38   : > { %2293 = vmatpush3.bf16.msra.mxu0 %v2481_v29 }
  0x39   : > { %2294 = vmatprep.subr.bf16.mxu0 %v2486_v31  ;;  %2345 = vmatpush3.bf16.msra.mxu1 %v2677_v7  ;;  %v2525_v7 = vld [vmem:[%s2760_s10 + $0x78] sm:$0xff]  }
  0x3a   : > { %2215 = vmatmul.mubr.bf16.gmra.mrb[8].mxu1 %v2484_v30  ;;  %2338 = vmatprep.subr.bf16.mxu1 %v2687_v9 }
  0x3b   : > { %2263 = vmatmul.mubr.bf16.gmra.mrb[8].mxu0 %v2485_v32  ;;  %2218 = vmatprep.mubr.bf16.mxu1 %v2488_v33 }
  0x3c   : > { %2295 = vmatpush3.bf16.msra.mxu0 %v2486_v31  ;;  %2266 = vmatprep.mubr.bf16.mxu0 %v2489_v34 }
  0x3d   : > { %2296 = vmatprep.subr.bf16.mxu0 %v2487_v35  ;;  %2346 = vmatpush3.bf16.msra.mxu1 %v2687_v9 }
  0x3e   : > { %2339 = vmatprep.subr.bf16.mxu1 %v2705_v11 }
  0x40   : > { %2297 = vmatpush3.bf16.msra.mxu0 %v2487_v35 }
  0x41   : > { %2298 = vmatprep.subr.bf16.mxu0 %v2492_v37  ;;  %2347 = vmatpush3.bf16.msra.mxu1 %v2705_v11 }
  0x42   : > { %2219 = vmatmul.mubr.bf16.gmra.mrb[12].mxu1 %v2490_v36  ;;  %2340 = vmatprep.subr.bf16.mxu1 %v2719_v15 }
  0x43   : > { %2267 = vmatmul.mubr.bf16.gmra.mrb[12].mxu0 %v2491_v38  ;;  %2222 = vmatprep.mubr.bf16.mxu1 %v2494_v39 }
  0x44   : > { %2299 = vmatpush3.bf16.msra.mxu0 %v2492_v37  ;;  %2302 = vmatprep.mubr.bf16.mxu0 %v2495_v40 }
  0x45   : > { %2300 = vmatprep.subr.bf16.mxu0 %v2493_v41  ;;  %2348 = vmatpush3.bf16.msra.mxu1 %v2719_v15 }
  0x46   : > { %2341 = vmatprep.subr.bf16.mxu1 %v2729_v17 }
  0x48   : > { %2301 = vmatpush3.bf16.msra.mxu0 %v2493_v41 }
  0x49   : > { %2349 = vmatpush3.bf16.msra.mxu1 %v2729_v17 }
  0x4a   : > { %2223 = vmatmul.mubr.bf16.gmra.mrb[16].mxu1 %v2496_v42 }
  0x4b   : > { %2303 = vmatmul.mubr.bf16.vlgmr.msra.gmra.mrb[0].mxu0 %v2497_v43  ;;  %2226 = vmatprep.mubr.bf16.mxu1 %v2498_v44 }
  0x4c   : > { %2306 = vmatprep.mubr.bf16.mxu0 %v2499_v45 }
  0x52   : > { %2227 = vmatmul.mubr.bf16.gmra.mrb[20].mxu1 %v2500_v46 }
  0x53   : > { %2307 = vmatmul.mubr.bf16.gmra.mrb[4].mxu0 %v2501_v47  ;;  %2230 = vmatprep.mubr.bf16.mxu1 %v2502_v48 }
  0x54   : > { %2310 = vmatprep.mubr.bf16.mxu0 %v2503_v49 }
  0x5a   : > { %2231 = vmatmul.mubr.bf16.gmra.mrb[24].mxu1 %v2504_v50 }
  0x5b   : > { %2311 = vmatmul.mubr.bf16.gmra.mrb[8].mxu0 %v2505_v51  ;;  %2234 = vmatprep.mubr.bf16.mxu1 %v2506_v52 }
  0x5c   : > { %2314 = vmatprep.mubr.bf16.mxu0 %v2507_v53 }
  0x62   : > { %2235 = vmatmul.mubr.bf16.gmra.mrb[28].mxu1 %v2508_v54 }
  0x63   : > { %2315 = vmatmul.mubr.bf16.gmra.mrb[12].mxu0 %v2509_v55  ;;  %2270 = vmatprep.mubr.bf16.mxu1 %v2510_v56 }
  0x64   : > { %2318 = vmatprep.mubr.bf16.mxu0 %v2511_v57 }
  0x6a   : > { %2271 = vmatmul.mubr.bf16.vlgmr.msra.gmra.mrb[16].mxu1 %v2512_v58 }
  0x6b   : > { %2319 = vmatmul.mubr.bf16.gmra.mrb[16].mxu0 %v2513_v59  ;;  %2274 = vmatprep.mubr.bf16.mxu1 %v2514_v60 }
  0x6c   : > { %2322 = vmatprep.mubr.bf16.mxu0 %v2515_v61 }
  0x72   : > { %2275 = vmatmul.mubr.bf16.gmra.mrb[20].mxu1 %v2516_v62 }
  0x73   : > { %2323 = vmatmul.mubr.bf16.gmra.mrb[20].mxu0 %v2517_v63  ;;  %2278 = vmatprep.mubr.bf16.mxu1 %v2518_v0 }
  0x74   : > { %2326 = vmatprep.mubr.bf16.mxu0 %v2519_v1 }
  0x7a   : > { %2279 = vmatmul.mubr.bf16.gmra.mrb[24].mxu1 %v2520_v2 }
  0x7b   : > { %2327 = vmatmul.mubr.bf16.gmra.mrb[24].mxu0 %v2521_v3  ;;  %2282 = vmatprep.mubr.bf16.mxu1 %v2522_v4 }
  0x7c   : > { %2330 = vmatprep.mubr.bf16.mxu0 %v2523_v5 }
  0x82   : > { %2283 = vmatmul.mubr.bf16.gmra.mrb[28].mxu1 %v2524_v6 }
  0x83   : > { %2331 = vmatmul.mubr.bf16.gmra.mrb[28].mxu0 %v2525_v7 }
  0xfd   : > { %v2208_v8 = vpop.f32.mrb[0].mxu1 }
  0xfe   : > { %v646_v9 = vpop.f32.mrb[1].mxu1 }
  0xff   : > { %v2209_v10 = vpop.f32.mrb[2].mxu1 }
 0x100   : > { %v649_v11 = vpop.f32.mrb[3].mxu1 }
 0x105   : > { %v2212_v12 = vpop.f32.mrb[4].mxu1 }
 0x106   : > { %v662_v13 = vpop.f32.mrb[5].mxu1 }
 0x107   : > { %v2213_v14 = vpop.f32.mrb[6].mxu1 }
 0x108   : > { %v665_v15 = vpop.f32.mrb[7].mxu1 }
 0x10d   : > { %v2216_v16 = vpop.f32.mrb[8].mxu1 }
 0x10e   : > { %v678_v17 = vpop.f32.mrb[9].mxu1 }
 0x10f   : > { %v2826_v18 = vpop.f32.mrb[10].mxu1 }
 0x110   : > { %v2828_v19 = vpop.f32.mrb[11].mxu1 }
 0x115   : > { %v2830_v20 = vpop.f32.mrb[12].mxu1 }
 0x116   : > { %v2832_v21 = vpop.f32.mrb[13].mxu1 }
 0x117   : > { %v2834_v22 = vpop.f32.mrb[14].mxu1 }
 0x118   : > { %v2837_v23 = vpop.f32.mrb[15].mxu1 }
 0x11e   : > { %v2304_v24 = vpop.f32.mrb[0].mxu0 }
 0x11f   : > { %v2350_v26 = vadd.f32 %v2304_v24, %v2208_v8  ;;  %v1305_v27 = vpop.f32.mrb[1].mxu0 }
 0x120   : > { %v2351_v29 = vadd.f32 %v1305_v27, %v646_v9  ;;  %v2305_v30 = vpop.f32.mrb[2].mxu0 }
 0x121   : > { %v1473_v31 = vmul.f32 %v2350_v26, %v2843_v25  ;;  %v2352_v32 = vadd.f32 %v2305_v30, %v2209_v10  ;;  %v1308_v33 = vpop.f32.mrb[3].mxu0 }
 0x122   : > { %v1471_v34 = vmul.f32 %v2351_v29, %v2843_v25  ;;  %v2353_v35 = vadd.f32 %v1308_v33, %v649_v11 }
 0x123   : > { %v1512_v36 = vadd.f32 %v2848_v28, %v1473_v31  ;;  %v1474_v37 = vmul.f32 %v2352_v32, %v2843_v25 }
 0x124   : > { %v1510_v38 = vadd.f32 %v2848_v28, %v1471_v34  ;;  %v1472_v39 = vmul.f32 %v2353_v35, %v2843_v25 }
 0x125   : > { %v1513_v40 = vadd.f32 %v2848_v28, %v1474_v37  ;;  %v1544_v43 = vmax.f32 %v1512_v36, 0.0 }
 0x126   : > { %v1511_v41 = vadd.f32 %v2848_v28, %v1472_v39  ;;  %v2308_v42 = vpop.f32.mrb[4].mxu0  ;;  %v1542_v47 = vmax.f32 %v1510_v38, 0.0 }
 0x127   : > { %v1545_v44 = vmax.f32 %v1513_v40, 0.0  ;;  %v2354_v45 = vadd.f32 %v2308_v42, %v2212_v12  ;;  %v1321_v46 = vpop.f32.mrb[5].mxu0 }
 0x128   : > { %v1543_v48 = vmax.f32 %v1511_v41, 0.0  ;;  %v2355_v49 = vadd.f32 %v1321_v46, %v662_v13  ;;  %v2309_v50 = vpop.f32.mrb[6].mxu0 }
 0x129   : > { %v2031_v51 = vpack.c.bf16 %v1545_v44, %v1544_v43  ;;  %v1477_v52 = vmul.f32 %v2354_v45, %v2843_v25  ;;  %v2356_v53 = vadd.f32 %v2309_v50, %v2213_v14  ;;  %v1324_v54 = vpop.f32.mrb[7].mxu0 }
 0x12a   : > { %v2026_v55 = vpack.c.bf16 %v1543_v48, %v1542_v47  ;;  %v1475_v56 = vmul.f32 %v2355_v49, %v2843_v25  ;;  %v2357_v57 = vadd.f32 %v1324_v54, %v665_v15 }
 0x12b   : > { %2103 = vst [vmem:[%s2861_s12 + $0x8] sm:$0xff] %v2031_v51   ;;  %v1516_v58 = vadd.f32 %v2848_v28, %v1477_v52  ;;  %v1478_v59 = vmul.f32 %v2356_v53, %v2843_v25 }
 0x12c   : > { %2027 = vst [vmem:[%s2861_s12] sm:$0xff] %v2026_v55   ;;  %v1514_v60 = vadd.f32 %v2848_v28, %v1475_v56  ;;  %v1476_v61 = vmul.f32 %v2357_v57, %v2843_v25 }
 0x12d   : > { %v1517_v62 = vadd.f32 %v2848_v28, %v1478_v59  ;;  %v1548_v1 = vmax.f32 %v1516_v58, 0.0 }
 0x12e   : > { %v1515_v63 = vadd.f32 %v2848_v28, %v1476_v61  ;;  %v2312_v0 = vpop.f32.mrb[8].mxu0  ;;  %v1546_v5 = vmax.f32 %v1514_v60, 0.0 }
 0x12f   : > { %v1549_v2 = vmax.f32 %v1517_v62, 0.0  ;;  %v2358_v3 = vadd.f32 %v2312_v0, %v2216_v16  ;;  %v1337_v4 = vpop.f32.mrb[9].mxu0 }
 0x130   : > { %v1547_v6 = vmax.f32 %v1515_v63, 0.0  ;;  %v2359_v7 = vadd.f32 %v1337_v4, %v678_v17  ;;  %v2313_v8 = vpop.f32.mrb[10].mxu0 }
 0x131   : > { %v2041_v9 = vpack.c.bf16 %v1549_v2, %v1548_v1  ;;  %v1481_v10 = vmul.f32 %v2358_v3, %v2843_v25  ;;  %v2360_v11 = vadd.f32 %v2313_v8, %v2826_v18  ;;  %v1340_v12 = vpop.f32.mrb[11].mxu0 }
 0x132   : > { %v2036_v13 = vpack.c.bf16 %v1547_v6, %v1546_v5  ;;  %v1479_v14 = vmul.f32 %v2359_v7, %v2843_v25  ;;  %v2361_v15 = vadd.f32 %v1340_v12, %v2828_v19 }
 0x133   : > { %2105 = vst [vmem:[%s2861_s12 + $0x18] sm:$0xff] %v2041_v9   ;;  %v1520_v16 = vadd.f32 %v2848_v28, %v1481_v10  ;;  %v1482_v24 = vmul.f32 %v2360_v11, %v2843_v25 }
 0x134   : > { %2104 = vst [vmem:[%s2861_s12 + $0x10] sm:$0xff] %v2036_v13   ;;  %v1518_v17 = vadd.f32 %v2848_v28, %v1479_v14  ;;  %v1480_v26 = vmul.f32 %v2361_v15, %v2843_v25 }
 0x135   : > { %v1521_v27 = vadd.f32 %v2848_v28, %v1482_v24  ;;  %v1552_v30 = vmax.f32 %v1520_v16, 0.0 }
 0x136   : > { %v1519_v18 = vadd.f32 %v2848_v28, %v1480_v26  ;;  %v2316_v29 = vpop.f32.mrb[12].mxu0  ;;  %v1550_v33 = vmax.f32 %v1518_v17, 0.0 }
 0x137   : > { %v1553_v31 = vmax.f32 %v1521_v27, 0.0  ;;  %v2362_v19 = vadd.f32 %v2316_v29, %v2830_v20  ;;  %v1353_v32 = vpop.f32.mrb[13].mxu0 }
 0x138   : > { %v1551_v34 = vmax.f32 %v1519_v18, 0.0  ;;  %v2363_v35 = vadd.f32 %v1353_v32, %v2832_v21  ;;  %v2317_v36 = vpop.f32.mrb[14].mxu0 }
 0x139   : > { %v2051_v37 = vpack.c.bf16 %v1553_v31, %v1552_v30  ;;  %v1485_v38 = vmul.f32 %v2362_v19, %v2843_v25  ;;  %v2364_v39 = vadd.f32 %v2317_v36, %v2834_v22  ;;  %v1356_v40 = vpop.f32.mrb[15].mxu0 }
 0x13a   : > { %v2046_v41 = vpack.c.bf16 %v1551_v34, %v1550_v33  ;;  %v1483_v42 = vmul.f32 %v2363_v35, %v2843_v25  ;;  %v2365_v43 = vadd.f32 %v1356_v40, %v2837_v23 }
 0x13b   : > { %2107 = vst [vmem:[%s2861_s12 + $0x28] sm:$0xff] %v2051_v37   ;;  %v1524_v20 = vadd.f32 %v2848_v28, %v1485_v38  ;;  %v1486_v44 = vmul.f32 %v2364_v39, %v2843_v25 }
 0x13c   : > { %2106 = vst [vmem:[%s2861_s12 + $0x20] sm:$0xff] %v2046_v41   ;;  %v1522_v21 = vadd.f32 %v2848_v28, %v1483_v42  ;;  %v1484_v45 = vmul.f32 %v2365_v43, %v2843_v25 }
 0x13d   : > { %v1525_v46 = vadd.f32 %v2848_v28, %v1486_v44  ;;  %v2272_v47 = vpop.f32.mrb[16].mxu1  ;;  %v1556_v50 = vmax.f32 %v1524_v20, 0.0 }
 0x13e   : > { %v1523_v22 = vadd.f32 %v2848_v28, %v1484_v45  ;;  %v2320_v48 = vpop.f32.mrb[16].mxu0  ;;  %v1015_v49 = vpop.f32.mrb[17].mxu1  ;;  %v1554_v54 = vmax.f32 %v1522_v21, 0.0 }
 0x13f   : > { %v1557_v51 = vmax.f32 %v1525_v46, 0.0  ;;  %v2366_v23 = vadd.f32 %v2320_v48, %v2272_v47  ;;  %v1369_v52 = vpop.f32.mrb[17].mxu0  ;;  %v2273_v53 = vpop.f32.mrb[18].mxu1 }
 0x140   : > { %v1555_v55 = vmax.f32 %v1523_v22, 0.0  ;;  %v2367_v56 = vadd.f32 %v1369_v52, %v1015_v49  ;;  %v2321_v57 = vpop.f32.mrb[18].mxu0  ;;  %v1018_v58 = vpop.f32.mrb[19].mxu1 }
 0x141   : > { %v2061_v59 = vpack.c.bf16 %v1557_v51, %v1556_v50  ;;  %v1489_v60 = vmul.f32 %v2366_v23, %v2843_v25  ;;  %v2368_v61 = vadd.f32 %v2321_v57, %v2273_v53  ;;  %v1372_v62 = vpop.f32.mrb[19].mxu0 }
 0x142   : > { %v2056_v63 = vpack.c.bf16 %v1555_v55, %v1554_v54  ;;  %v1487_v0 = vmul.f32 %v2367_v56, %v2843_v25  ;;  %v2369_v1 = vadd.f32 %v1372_v62, %v1018_v58 }
 0x143   : > { %2109 = vst [vmem:[%s2861_s12 + $0x38] sm:$0xff] %v2061_v59   ;;  %v1528_v2 = vadd.f32 %v2848_v28, %v1489_v60  ;;  %v1490_v3 = vmul.f32 %v2368_v61, %v2843_v25 }
 0x144   : > { %2108 = vst [vmem:[%s2861_s12 + $0x30] sm:$0xff] %v2056_v63   ;;  %v1526_v4 = vadd.f32 %v2848_v28, %v1487_v0  ;;  %v1488_v5 = vmul.f32 %v2369_v1, %v2843_v25 }
 0x145   : > { %v1529_v6 = vadd.f32 %v2848_v28, %v1490_v3  ;;  %v2276_v7 = vpop.f32.mrb[20].mxu1  ;;  %v1560_v11 = vmax.f32 %v1528_v2, 0.0 }
 0x146   : > { %v1527_v8 = vadd.f32 %v2848_v28, %v1488_v5  ;;  %v2324_v9 = vpop.f32.mrb[20].mxu0  ;;  %v1031_v10 = vpop.f32.mrb[21].mxu1  ;;  %v1558_v16 = vmax.f32 %v1526_v4, 0.0 }
 0x147   : > { %v1561_v12 = vmax.f32 %v1529_v6, 0.0  ;;  %v2370_v13 = vadd.f32 %v2324_v9, %v2276_v7  ;;  %v1385_v14 = vpop.f32.mrb[21].mxu0  ;;  %v2277_v15 = vpop.f32.mrb[22].mxu1 }
 0x148   : > { %v1559_v24 = vmax.f32 %v1527_v8, 0.0  ;;  %v2371_v17 = vadd.f32 %v1385_v14, %v1031_v10  ;;  %v2325_v26 = vpop.f32.mrb[22].mxu0  ;;  %v1034_v27 = vpop.f32.mrb[23].mxu1 }
 0x149   : > { %v2071_v18 = vpack.c.bf16 %v1561_v12, %v1560_v11  ;;  %v1493_v29 = vmul.f32 %v2370_v13, %v2843_v25  ;;  %v2372_v30 = vadd.f32 %v2325_v26, %v2277_v15  ;;  %v1388_v31 = vpop.f32.mrb[23].mxu0 }
 0x14a   : > { %v2066_v19 = vpack.c.bf16 %v1559_v24, %v1558_v16  ;;  %v1491_v32 = vmul.f32 %v2371_v17, %v2843_v25  ;;  %v2373_v33 = vadd.f32 %v1388_v31, %v1034_v27 }
 0x14b   : > { %2111 = vst [vmem:[%s2861_s12 + $0x48] sm:$0xff] %v2071_v18   ;;  %v1532_v34 = vadd.f32 %v2848_v28, %v1493_v29  ;;  %v1494_v35 = vmul.f32 %v2372_v30, %v2843_v25 }
 0x14c   : > { %2110 = vst [vmem:[%s2861_s12 + $0x40] sm:$0xff] %v2066_v19   ;;  %v1530_v36 = vadd.f32 %v2848_v28, %v1491_v32  ;;  %v1492_v37 = vmul.f32 %v2373_v33, %v2843_v25 }
 0x14d   : > { %v1533_v38 = vadd.f32 %v2848_v28, %v1494_v35  ;;  %v2280_v39 = vpop.f32.mrb[24].mxu1  ;;  %v1564_v43 = vmax.f32 %v1532_v34, 0.0 }
 0x14e   : > { %v1531_v40 = vadd.f32 %v2848_v28, %v1492_v37  ;;  %v2328_v41 = vpop.f32.mrb[24].mxu0  ;;  %v1047_v42 = vpop.f32.mrb[25].mxu1  ;;  %v1562_v46 = vmax.f32 %v1530_v36, 0.0 }
 0x14f   : > { %v1565_v20 = vmax.f32 %v1533_v38, 0.0  ;;  %v2374_v44 = vadd.f32 %v2328_v41, %v2280_v39  ;;  %v1401_v21 = vpop.f32.mrb[25].mxu0  ;;  %v2281_v45 = vpop.f32.mrb[26].mxu1 }
 0x150   : > { %v1563_v47 = vmax.f32 %v1531_v40, 0.0  ;;  %v2375_v22 = vadd.f32 %v1401_v21, %v1047_v42  ;;  %v2329_v48 = vpop.f32.mrb[26].mxu0  ;;  %v1050_v49 = vpop.f32.mrb[27].mxu1 }
 0x151   : > { %v2081_v50 = vpack.c.bf16 %v1565_v20, %v1564_v43  ;;  %v1497_v51 = vmul.f32 %v2374_v44, %v2843_v25  ;;  %v2376_v23 = vadd.f32 %v2329_v48, %v2281_v45  ;;  %v1404_v52 = vpop.f32.mrb[27].mxu0 }
 0x152   : > { %v2076_v53 = vpack.c.bf16 %v1563_v47, %v1562_v46  ;;  %v1495_v54 = vmul.f32 %v2375_v22, %v2843_v25  ;;  %v2377_v55 = vadd.f32 %v1404_v52, %v1050_v49 }
 0x153   : > { %2113 = vst [vmem:[%s2861_s12 + $0x58] sm:$0xff] %v2081_v50   ;;  %v1536_v56 = vadd.f32 %v2848_v28, %v1497_v51  ;;  %v1498_v57 = vmul.f32 %v2376_v23, %v2843_v25 }
 0x154   : > { %2112 = vst [vmem:[%s2861_s12 + $0x50] sm:$0xff] %v2076_v53   ;;  %v1534_v58 = vadd.f32 %v2848_v28, %v1495_v54  ;;  %v1496_v59 = vmul.f32 %v2377_v55, %v2843_v25 }
 0x155   : > { %v1537_v60 = vadd.f32 %v2848_v28, %v1498_v57  ;;  %v2284_v61 = vpop.f32.mrb[28].mxu1  ;;  %v1568_v1 = vmax.f32 %v1536_v56, 0.0 }
 0x156   : > { %v1535_v62 = vadd.f32 %v2848_v28, %v1496_v59  ;;  %v2332_v63 = vpop.f32.mrb[28].mxu0  ;;  %v1063_v0 = vpop.f32.mrb[29].mxu1  ;;  %v1566_v6 = vmax.f32 %v1534_v58, 0.0 }
 0x157   : > { %v1569_v2 = vmax.f32 %v1537_v60, 0.0  ;;  %v2378_v3 = vadd.f32 %v2332_v63, %v2284_v61  ;;  %v1417_v4 = vpop.f32.mrb[29].mxu0  ;;  %v2285_v5 = vpop.f32.mrb[30].mxu1 }
 0x158   : > { %v1567_v7 = vmax.f32 %v1535_v62, 0.0  ;;  %v2379_v8 = vadd.f32 %v1417_v4, %v1063_v0  ;;  %v2333_v9 = vpop.f32.mrb[30].mxu0  ;;  %v1066_v10 = vpop.f32.mrb[31].mxu1 }
 0x159   : > { %v2091_v11 = vpack.c.bf16 %v1569_v2, %v1568_v1  ;;  %v1501_v12 = vmul.f32 %v2378_v3, %v2843_v25  ;;  %v2380_v13 = vadd.f32 %v2333_v9, %v2285_v5  ;;  %v1420_v14 = vpop.f32.mrb[31].mxu0 }
 0x15a   : > { %v2086_v15 = vpack.c.bf16 %v1567_v7, %v1566_v6  ;;  %v1499_v16 = vmul.f32 %v2379_v8, %v2843_v25  ;;  %v2381_v24 = vadd.f32 %v1420_v14, %v1066_v10 }
 0x15b   : > { %2115 = vst [vmem:[%s2861_s12 + $0x68] sm:$0xff] %v2091_v11   ;;  %v1540_v17 = vadd.f32 %v2848_v28, %v1501_v12  ;;  %v1502_v26 = vmul.f32 %v2380_v13, %v2843_v25 }
 0x15c   : > { %2114 = vst [vmem:[%s2861_s12 + $0x60] sm:$0xff] %v2086_v15   ;;  %v1538_v27 = vadd.f32 %v2848_v28, %v1499_v16  ;;  %v1500_v18 = vmul.f32 %v2381_v24, %v2843_v25 }
 0x15d   : > { %v1541_v29 = vadd.f32 %v2848_v28, %v1502_v26  ;;  %v1572_v31 = vmax.f32 %v1540_v17, 0.0 }
 0x15e   : > { %v1539_v30 = vadd.f32 %v2848_v28, %v1500_v18  ;;  %v1570_v32 = vmax.f32 %v1538_v27, 0.0 }
 0x15f   : > { %v1573_v19 = vmax.f32 %v1541_v29, 0.0 }
 0x160   : > { %v1571_v33 = vmax.f32 %v1539_v30, 0.0 }
 0x161   : > { %v2101_v34 = vpack.c.bf16 %v1573_v19, %v1572_v31 }
 0x162   : > { %v2096_v35 = vpack.c.bf16 %v1571_v33, %v1570_v32 }
 0x163   : > { %2117 = vst [vmem:[%s2861_s12 + $0x78] sm:$0xff] %v2101_v34  }
 0x164   : > { %2116 = vst [vmem:[%s2861_s12 + $0x70] sm:$0xff] %v2096_v35  }
 0x165 PF: > { %s16_s25 = sadd.s32 1, %s2564_s25   ;;  %s2963_s21 = smov %s2556_s23 }
 0x166   : > { %p13_p9 = scmp.ge.s32.totalorder %s16_s25, 18   ;;  %s2964_s22 = smov %s2560_s24 }
 0x167   : > { %s2965_s23 = smov %s2968_s26  ;;  %s2966_s24 = smov %s2972_s27 }
 0x168   :  { %15 = sbr.rel (!%p13_p9) target bundleno = 3 (0x3), region = 82 }

// kernel: spatio_temporal_res_block.4
= control target key start
LH: loop header
LB: loop body
LE: loop exit
PB: predicated region body
PF: predicated region fallthrough
CT: control target
= control target key end

     0   :  { %s23064_s15 = smov 0   ;;  %s27157_s0 = inlined_call_operand.vmem [shape: bf16[16,326,128], index: 0, kind: input, shape index: {}]   ;;  %s27158_s1 = inlined_call_operand.vmem [shape: bf16[9,128,128], index: 1, kind: input, shape index: {}]   ;;  %s27159_s2 = inlined_call_operand.vmem [shape: f32[1,128], index: 2, kind: input, shape index: {}]   ;;  %s27160_s3 = inlined_call_operand.vmem [shape: f32[1,128], index: 3, kind: input, shape index: {}]   ;;  %s27161_s4 = inlined_call_operand.vmem [shape: bf16[16,288,128], index: 4, kind: output, shape index: {}]  }
   0x1 LB: > { %s16157_s16 = sadd.s32 4294967295, %s23037_s15   ;;  %p16161_p0 = scmp.ge.s32.totalorder %s23037_s15, 1  ;;  %s23037_s15 = sphi %s23064_s15, %s14_s15  }
   0x2   : > { %p164_p1 = scmp.lt.s32.totalorder %s23037_s15, 5 }
   0x4   : > { %p165_p2 = pnand %p16161_p0, %p164_p1 }
   0x6   : > { %168 = sbr.rel (%p165_p2) target bundleno = 1561 (0x619), region = 36 }
   0xd   : > { %v22369_v0 = vld [vmem:[%s27158_s1 + $0x40] sm:$0xff]   ;;  %s16162_s19 = sshll.u32 %s16157_s16, 2  ;;  %v22371_v2 = vld [vmem:[%s27158_s1 + $0x48] sm:$0xff]   ;;  %v22373_v4 = vld [vmem:[%s27158_s1 + $0x50] sm:$0xff]   ;;  %vm370_vm0 = vsmask.f32 7424 }
   0xe   : > { %v22370_v1 = vld [vmem:[%s27158_s1 + $0x40] sm:$0xff]   ;;  %p193_p3 = scmp.lt.s32.totalorder %s16162_s19, 15  ;;  %19335 = vmatprep.subr.bf16.mxu0 %v22369_v0  ;;  %v22372_v3 = vld [vmem:[%s27158_s1 + $0x48] sm:$0xff]   ;;  %v22374_v5 = vld [vmem:[%s27158_s1 + $0x50] sm:$0xff]   ;;  %vm1026_vm1 = vcmask 1046528   ;;  %vm2298_vm3 = vcmask 1045504  }
   0xf   : > { %19803 = vmatprep.subr.bf16.mxu1 %v22370_v1  ;;  %19336 = vmatpush3.bf16.msra.mxu0 %v22369_v0  ;;  %v22375_v6 = vld [vmem:[%s27158_s1 + $0x58] sm:$0xff]   ;;  %v22377_v8 = vld [vmem:[%s27158_s1 + $0x60] sm:$0xff]   ;;  %v22379_v10 = vld [vmem:[%s27158_s1 + $0x68] sm:$0xff]   ;;  %vm1827_vm2 = vsmask.f32 6400  ;;  %vm3570_vm5 = vcmask 1044480  }
  0x10   : > { %19804 = vmatpush3.bf16.msra.mxu1 %v22370_v1  ;;  %19337 = vmatprep.subr.bf16.mxu0 %v22371_v2  ;;  %s27215_s19 = smov (!%p193_p3, %s16162_s19), 15  ;;  %v22376_v7 = vld [vmem:[%s27158_s1 + $0x58] sm:$0xff]   ;;  %v22378_v9 = vld [vmem:[%s27158_s1 + $0x60] sm:$0xff]   ;;  %v22380_v11 = vld [vmem:[%s27158_s1 + $0x68] sm:$0xff]   ;;  %vm3099_vm4 = vsmask.f32 5376 }
  0x11   : > { %19805 = vmatprep.subr.bf16.mxu1 %v22372_v3  ;;  %s22359_s8 = smul.u32 164, %s27215_s19  ;;  %v22381_v17 = vld [vmem:[%s27158_s1 + $0x70] sm:$0xff]   ;;  %v22383_v31 = vld [vmem:[%s27158_s1 + $0x78] sm:$0xff]   ;;  %v22390_v45 = vld [vmem:[%s27158_s1] sm:$0xff]  }
  0x12   : > { %v22382_v25 = vld [vmem:[%s27158_s1 + $0x70] sm:$0xff]   ;;  %v22384_v35 = vld [vmem:[%s27158_s1 + $0x78] sm:$0xff]   ;;  %v22392_v50 = vld [vmem:[%s27158_s1] sm:$0xff]   ;;  %s22360_s22 = smul.u32 144, %s27215_s19 }
  0x13   : > { %19338 = vmatpush3.bf16.msra.mxu0 %v22371_v2  ;;  %s23108_s16 = scalar_lea.vmem %s27157_s0, %s22359_s8 }
  0x14   : > { %19806 = vmatpush3.bf16.msra.mxu1 %v22372_v3  ;;  %19339 = vmatprep.subr.bf16.mxu0 %v22373_v4  ;;  %v207_v12 = vld [vmem:[%s23108_s16] sm:$0xf]  ;;  %v208_v13 = vld [vmem:[%s23108_s16 + $0x4] sm:$0xf]  ;;  %v23121_v15 = vld [vmem:[%s23108_s16 + $0x8] sm:$0xff]   ;;  %s25629_s28 = scalar_lea.vmem %s27161_s4, %s22360_s22 }
  0x15   : > { %19807 = vmatprep.subr.bf16.mxu1 %v22374_v5  ;;  %v23118_v14 = vcombine.low %v207_v12, %v208_v13  ;;  %v23124_v16 = vld [vmem:[%s23108_s16 + $0xac] sm:$0xff]   ;;  %v16466_v18 = vld [vmem:[%s23108_s16 + $0xa4] sm:$0xf]  ;;  %v16467_v19 = vld [vmem:[%s23108_s16 + $0xa8] sm:$0xf]  ;;  %v379_v22 = vshll.u32 %v23121_v15, 16 }
  0x16   : > { %v23134_v23 = vcombine.low %v16466_v18, %v16467_v19  ;;  %v23137_v24 = vld [vmem:[%s23108_s16 + $0x10] sm:$0xff]   ;;  %v4360_v26 = vshll.u32 %v23124_v16, 16  ;;  %v383_v32 = vshrl.u32 %v23121_v15, 16  ;;  %v4364_v39 = vshrl.u32 %v23124_v16, 16  ;;  %v23164_v47 = vld [vmem:[%s23108_s16 + $0x18] sm:$0xff]   ;;  %v23176_v55 = vld [vmem:[%s23108_s16 + $0x20] sm:$0xff]  }
  0x17   : > { %19340 = vmatpush3.bf16.msra.mxu0 %v22373_v4  ;;  %v372_v20 = vshrl.u32 %v23118_v14, 16  ;;  %v374_v21 = vshll.u32 %v23118_v14, 16  ;;  %v381_v28 = vrot.slane %v379_v22, 1  ;;  %v387_v33 = vshll.u32 %v23137_v24, 16  ;;  %v23151_v34 = vld [vmem:[%s23108_s16 + $0xb4] sm:$0xff]   ;;  %v23171_v51 = vld [vmem:[%s23108_s16 + $0xbc] sm:$0xff]  }
  0x18   : > { %19808 = vmatpush3.bf16.msra.mxu1 %v22374_v5  ;;  %19341 = vmatprep.subr.bf16.mxu0 %v22375_v6  ;;  %v4353_v29 = vshrl.u32 %v23134_v23, 16  ;;  %v4355_v30 = vshll.u32 %v23134_v23, 16  ;;  %v4362_v38 = vrot.slane %v4360_v26, 1  ;;  %v4368_v40 = vshll.u32 %v23151_v34, 16  ;;  %v23179_v56 = vld [vmem:[%s23108_s16 + $0xc4] sm:$0xff]   ;;  %v23206_v19 = vld [vmem:[%s23108_s16 + $0x30] sm:$0xff]  }
  0x19   : > { %19809 = vmatprep.subr.bf16.mxu1 %v22376_v7  ;;  %v376_v27 = vrot.slane %v374_v21, 1  ;;  %v389_v43 = vrot.slane %v387_v33, 1  ;;  %v391_v44 = vshrl.u32 %v23137_v24, 16  ;;  %v385_v49 = vor.u32 %v383_v32, %v381_v28  ;;  %v22397_v3 = vld [vmem:[%s27158_s1 + $0x8] sm:$0xff]   ;;  %v22404_v32 = vld [vmem:[%s27158_s1 + $0x10] sm:$0xff]  }
  0x1a   : > { %v4357_v37 = vrot.slane %v4355_v30, 1  ;;  %v4370_v46 = vrot.slane %v4368_v40, 1  ;;  %v4372_v52 = vshrl.u32 %v23151_v34, 16  ;;  %v4366_v53 = vor.u32 %v4364_v39, %v4362_v38  ;;  %v22403_v30 = vld [vmem:[%s27158_s1 + $0x10] sm:$0xff]   ;;  %v23226_v39 = vld [vmem:[%s23108_s16 + $0x38] sm:$0xff]  }
  0x1b   : > { %19342 = vmatpush3.bf16.msra.mxu0 %v22375_v6  ;;  %v377_v36 = vor.u32 %v376_v27, %v372_v20  ;;  %v395_v54 = vshll.u32 %v23164_v47, 16  ;;  %v393_v57 = vor.u32 %v391_v44, %v389_v43  ;;  %v4376_v59 = vshll.u32 %v23171_v51, 16  ;;  %v22398_v6 = vld [vmem:[%s27158_s1 + $0x8] sm:$0xff]   ;;  %v23209_v20 = vld [vmem:[%s23108_s16 + $0xd4] sm:$0xff]  }
  0x1c   : > { %19810 = vmatpush3.bf16.msra.mxu1 %v22376_v7  ;;  %19343 = vmatprep.subr.bf16.mxu0 %v22377_v8  ;;  %v4358_v42 = vor.u32 %v4357_v37, %v4353_v29  ;;  %v4374_v58 = vor.u32 %v4372_v52, %v4370_v46  ;;  %v399_v60 = vshrl.u32 %v23164_v47, 16  ;;  %v403_v62 = vshll.u32 %v23176_v55, 16  ;;  %v23240_v52 = vld [vmem:[%s23108_s16 + $0xe4] sm:$0xff]  }
  0x1d   : > { %19811 = vmatprep.subr.bf16.mxu1 %v22378_v9  ;;  %v382_v41 = vsel %vm370_vm0, %v377_v36, %v381_v28  ;;  %v397_v61 = vrot.slane %v395_v54, 1  ;;  %v4380_v63 = vshrl.u32 %v23171_v51, 16  ;;  %v4384_v0 = vshll.u32 %v23179_v56, 16 }
  0x1e   : > { %19351 = vmatprep.mubr.bf16.mxu0 %v382_v41  ;;  %v4363_v48 = vsel %vm370_vm0, %v4358_v42, %v4362_v38  ;;  %v390_v1 = vsel %vm370_vm0, %v385_v49, %v389_v43  ;;  %v4378_v2 = vrot.slane %v4376_v59, 1  ;;  %v4371_v4 = vsel %vm370_vm0, %v4366_v53, %v4370_v46  ;;  %v23231_v42 = vld [vmem:[%s23108_s16 + $0xdc] sm:$0xff]  }
  0x1f   : > { %19344 = vmatpush3.bf16.msra.mxu0 %v22377_v8  ;;  %19819 = vmatprep.mubr.bf16.mxu1 %v4363_v48  ;;  %v405_v5 = vrot.slane %v403_v62, 1  ;;  %v398_v7 = vsel %vm370_vm0, %v393_v57, %v397_v61  ;;  %v23196_v8 = vld [vmem:[%s23108_s16 + $0x28] sm:$0xff]   ;;  %v4388_v12 = vshrl.u32 %v23179_v56, 16  ;;  %v401_v13 = vor.u32 %v399_v60, %v397_v61  ;;  %v23236_v48 = vld [vmem:[%s23108_s16 + $0x40] sm:$0xff]   ;;  %v22409_v59 = vld [vmem:[%s27158_s1 + $0x18] sm:$0xff]  }
  0x20   : > { %19812 = vmatpush3.bf16.msra.mxu1 %v22378_v9  ;;  %19345 = vmatprep.subr.bf16.mxu0 %v22379_v10  ;;  %v407_v9 = vshrl.u32 %v23176_v55, 16  ;;  %v411_v18 = vshll.u32 %v23196_v8, 16  ;;  %v4382_v21 = vor.u32 %v4380_v63, %v4378_v2  ;;  %v419_v28 = vshll.u32 %v23206_v19, 16  ;;  %v22410_v62 = vld [vmem:[%s27158_s1 + $0x18] sm:$0xff]  }
  0x21   : > { %19813 = vmatprep.subr.bf16.mxu1 %v22380_v11  ;;  %v4400_v29 = vshll.u32 %v23209_v20, 16  ;;  %v406_v33 = vsel %vm370_vm0, %v401_v13, %v405_v5  ;;  %v423_v40 = vshrl.u32 %v23206_v19, 16  ;;  %v4404_v43 = vshrl.u32 %v23209_v20, 16 }
  0x22   : > { %v409_v22 = vor.u32 %v407_v9, %v405_v5  ;;  %v413_v26 = vrot.slane %v411_v18, 1  ;;  %v421_v44 = vrot.slane %v419_v28, 1  ;;  %v427_v46 = vshll.u32 %v23226_v39, 16  ;;  %v23267_v18 = vld [vmem:[%s23108_s16 + $0x50] sm:$0xff]   ;;  %v22415_v28 = vld [vmem:[%s27158_s1 + $0x20] sm:$0xff]  }
  0x23   : > { %19346 = vmatpush3.bf16.msra.mxu0 %v22379_v10  ;;  %v4379_v10 = vsel %vm370_vm0, %v4374_v58, %v4378_v2  ;;  %v435_v58 = vshll.u32 %v23236_v48, 16  ;;  %v431_v63 = vshrl.u32 %v23226_v39, 16  ;;  %v4416_v2 = vshll.u32 %v23240_v52, 16 }
  0x24   : > { %19814 = vmatpush3.bf16.msra.mxu1 %v22380_v11  ;;  %19347 = vmatprep.subr.bf16.mxu0 %v22381_v17  ;;  %v23201_v11 = vld [vmem:[%s23108_s16 + $0xcc] sm:$0xff]   ;;  %v414_v38 = vsel %vm370_vm0, %v409_v22, %v413_v26  ;;  %v425_v54 = vor.u32 %v423_v40, %v421_v44  ;;  %v429_v57 = vrot.slane %v427_v46, 1  ;;  %v4420_v13 = vshrl.u32 %v23240_v52, 16 }
  0x25   : > { %19815 = vmatprep.subr.bf16.mxu1 %v22382_v25  ;;  %v4396_v36 = vshrl.u32 %v23201_v11, 16 }
  0x26   : > { %v430_v5 = vsel %vm370_vm0, %v425_v54, %v429_v57  ;;  %v23297_v54 = vld [vmem:[%s23108_s16 + $0x60] sm:$0xff]  }
  0x27   : > { %19348 = vmatpush3.bf16.msra.mxu0 %v22381_v17  ;;  %v4386_v17 = vrot.slane %v4384_v0, 1  ;;  %v4412_v0 = vshrl.u32 %v23231_v42, 16 }
  0x28   : > { %19816 = vmatpush3.bf16.msra.mxu1 %v22382_v25  ;;  %19349 = vmatprep.subr.bf16.mxu0 %v22383_v31  ;;  %v4392_v25 = vshll.u32 %v23201_v11, 16 }
  0x29   : > { %19817 = vmatprep.subr.bf16.mxu1 %v22384_v35  ;;  %v4390_v27 = vor.u32 %v4388_v12, %v4386_v17  ;;  %v4387_v37 = vsel %vm370_vm0, %v4382_v21, %v4386_v17  ;;  %v433_v21 = vor.u32 %v431_v63, %v429_v57 }
  0x2b   : > { %19350 = vmatpush3.bf16.msra.mxu0 %v22383_v31  ;;  %v4394_v31 = vrot.slane %v4392_v25, 1  ;;  %v4418_v25 = vrot.slane %v4416_v2, 1 }
  0x2c   : > { %19818 = vmatpush3.bf16.msra.mxu1 %v22384_v35  ;;  %19387 = vmatprep.subr.bf16.mxu0 %v22390_v45  ;;  %v415_v35 = vshrl.u32 %v23196_v8, 16 }
  0x2d   : > { %19855 = vmatprep.subr.bf16.mxu1 %v22392_v50  ;;  %v4395_v41 = vsel %vm370_vm0, %v4390_v27, %v4394_v31  ;;  %v4398_v53 = vor.u32 %v4396_v36, %v4394_v31  ;;  %v23271_v27 = vld [vmem:[%s23108_s16 + $0xf4] sm:$0xff]   ;;  %v22416_v31 = vld [vmem:[%s27158_s1 + $0x20] sm:$0xff]   ;;  %v451_v36 = vshll.u32 %v23267_v18, 16 }
  0x2e   : > { %19352 = vmatmul.mubr.bf16.vlgmr.msra.gmra.mrb[0].mxu0 %v390_v1  ;;  %v417_v49 = vor.u32 %v415_v35, %v413_v26 }
  0x2f   : > { %19820 = vmatmul.mubr.bf16.vlgmr.msra.gmra.mrb[0].mxu1 %v4371_v4  ;;  %19388 = vmatpush3.bf16.msra.mxu0 %v22390_v45  ;;  %v4402_v45 = vrot.slane %v4400_v29, 1  ;;  %v453_v57 = vrot.slane %v451_v36, 1 }
  0x30   : > { %19856 = vmatpush3.bf16.msra.mxu1 %v22392_v50  ;;  %19355 = vmatprep.mubr.bf16.mxu0 %v398_v7  ;;  %v4408_v50 = vshll.u32 %v23231_v42, 16  ;;  %v422_v1 = vsel %vm370_vm0, %v417_v49, %v421_v44  ;;  %v23260_v7 = vld [vmem:[%s23108_s16 + $0xec] sm:$0xff]   ;;  %v4436_v49 = vshrl.u32 %v23271_v27, 16 }
  0x31   : > { %19823 = vmatprep.mubr.bf16.mxu1 %v4379_v10  ;;  %19389 = vmatprep.subr.bf16.mxu0 %v22397_v3  ;;  %v4406_v60 = vor.u32 %v4404_v43, %v4402_v45  ;;  %v4403_v4 = vsel %vm370_vm0, %v4398_v53, %v4402_v45  ;;  %v437_v10 = vrot.slane %v435_v58, 1  ;;  %v4424_v17 = vshll.u32 %v23260_v7, 16  ;;  %v23288_v43 = vld [vmem:[%s23108_s16 + $0xfc] sm:$0xff]   ;;  %v23300_v58 = vld [vmem:[%s23108_s16 + $0x104] sm:$0xff]  }
  0x32   : > { %19857 = vmatprep.subr.bf16.mxu1 %v22398_v6  ;;  %v4410_v61 = vrot.slane %v4408_v50, 1  ;;  %v4428_v35 = vshrl.u32 %v23260_v7, 16  ;;  %v455_v45 = vshrl.u32 %v23267_v18, 16  ;;  %v4440_v53 = vshll.u32 %v23288_v43, 16 }
  0x33   : > { %19390 = vmatpush3.bf16.msra.mxu0 %v22397_v3  ;;  %v23254_v3 = vld [vmem:[%s23108_s16 + $0x48] sm:$0xff]  }
  0x34   : > { %19858 = vmatpush3.bf16.msra.mxu1 %v22398_v6  ;;  %19391 = vmatprep.subr.bf16.mxu0 %v22403_v30  ;;  %v439_v6 = vshrl.u32 %v23236_v48, 16  ;;  %v4411_v9 = vsel %vm370_vm0, %v4406_v60, %v4410_v61  ;;  %v443_v12 = vshll.u32 %v23254_v3, 16  ;;  %v4414_v22 = vor.u32 %v4412_v0, %v4410_v61 }
  0x35   : > { %19859 = vmatprep.subr.bf16.mxu1 %v22404_v32  ;;  %v447_v26 = vshrl.u32 %v23254_v3, 16  ;;  %v457_v0 = vor.u32 %v455_v45, %v453_v57 }
  0x36   : > { %19356 = vmatmul.mubr.bf16.gmra.mrb[4].mxu0 %v406_v33  ;;  %v441_v29 = vor.u32 %v439_v6, %v437_v10  ;;  %v4426_v33 = vrot.slane %v4424_v17, 1  ;;  %v4419_v40 = vsel %vm370_vm0, %v4414_v22, %v4418_v25  ;;  %v467_v6 = vshll.u32 %v23297_v54, 16 }
  0x37   : > { %19824 = vmatmul.mubr.bf16.gmra.mrb[4].mxu1 %v4387_v37  ;;  %19359 = vmatprep.mubr.bf16.mxu0 %v414_v38  ;;  %v23282_v37 = vld [vmem:[%s23108_s16 + $0x58] sm:$0xff]   ;;  %v438_v38 = vsel %vm370_vm0, %v433_v21, %v437_v10  ;;  %v4448_v17 = vshll.u32 %v23300_v58, 16 }
  0x38   : > { %19827 = vmatprep.mubr.bf16.mxu1 %v4395_v41  ;;  %19392 = vmatpush3.bf16.msra.mxu0 %v22403_v30  ;;  %v445_v30 = vrot.slane %v443_v12, 1  ;;  %v4432_v41 = vshll.u32 %v23271_v27, 16  ;;  %v459_v46 = vshll.u32 %v23282_v37, 16  ;;  %v4430_v63 = vor.u32 %v4428_v35, %v4426_v33  ;;  %v22428_v35 = vld [vmem:[%s27158_s1 + $0x30] sm:$0xff]  }
  0x39   : > { %19860 = vmatpush3.bf16.msra.mxu1 %v22404_v32  ;;  %19393 = vmatprep.subr.bf16.mxu0 %v22409_v59  ;;  %v4422_v32 = vor.u32 %v4420_v13, %v4418_v25  ;;  %v463_v12 = vshrl.u32 %v23282_v37, 16  ;;  %v4444_v13 = vshrl.u32 %v23288_v43, 16  ;;  %v471_v25 = vshrl.u32 %v23297_v54, 16 }
  0x3a   : > { %19861 = vmatprep.subr.bf16.mxu1 %v22410_v62  ;;  %v446_v44 = vsel %vm370_vm0, %v441_v29, %v445_v30  ;;  %v449_v60 = vor.u32 %v447_v26, %v445_v30  ;;  %v4434_v61 = vrot.slane %v4432_v41, 1  ;;  %v4452_v29 = vshrl.u32 %v23300_v58, 16  ;;  %v23336_v41 = vld [vmem:[%s23108_s16 + $0x114] sm:$0xff]  }
  0x3b   : > { %v4427_v50 = vsel %vm370_vm0, %v4422_v32, %v4426_v33  ;;  %v22427_v32 = vld [vmem:[%s27158_s1 + $0x30] sm:$0xff]   ;;  %v469_v33 = vrot.slane %v467_v6, 1 }
  0x3c   : > { %19394 = vmatpush3.bf16.msra.mxu0 %v22409_v59  ;;  %v22421_v59 = vld [vmem:[%s27158_s1 + $0x28] sm:$0xff]   ;;  %v4438_v2 = vor.u32 %v4436_v49, %v4434_v61  ;;  %v454_v10 = vsel %vm370_vm0, %v449_v60, %v453_v57  ;;  %v4435_v21 = vsel %vm370_vm0, %v4430_v63, %v4434_v61  ;;  %v4464_v63 = vshll.u32 %v23336_v41, 16 }
  0x3d   : > { %19862 = vmatpush3.bf16.msra.mxu1 %v22410_v62  ;;  %19395 = vmatprep.subr.bf16.mxu0 %v22415_v28  ;;  %v22422_v62 = vld [vmem:[%s27158_s1 + $0x28] sm:$0xff]  }
  0x3e   : > { %19360 = vmatmul.mubr.bf16.gmra.mrb[8].mxu0 %v422_v1  ;;  %19863 = vmatprep.subr.bf16.mxu1 %v22416_v31  ;;  %v461_v1 = vrot.slane %v459_v46, 1  ;;  %v23339_v46 = vld [vmem:[%s23108_s16 + $0x78] sm:$0xff]  }
  0x3f   : > { %19828 = vmatmul.mubr.bf16.gmra.mrb[8].mxu1 %v4403_v4  ;;  %19363 = vmatprep.mubr.bf16.mxu0 %v430_v5  ;;  %v4442_v4 = vrot.slane %v4440_v53, 1  ;;  %v23309_v5 = vld [vmem:[%s23108_s16 + $0x68] sm:$0xff]   ;;  %v23342_v53 = vld [vmem:[%s23108_s16 + $0x11c] sm:$0xff]  }
  0x40   : > { %19831 = vmatprep.mubr.bf16.mxu1 %v4411_v9  ;;  %19396 = vmatpush3.bf16.msra.mxu0 %v22415_v28  ;;  %v23313_v9 = vld [vmem:[%s23108_s16 + $0x10c] sm:$0xff]   ;;  %v462_v22 = vsel %vm370_vm0, %v457_v0, %v461_v1  ;;  %v475_v26 = vshll.u32 %v23309_v5, 16  ;;  %v465_v36 = vor.u32 %v463_v12, %v461_v1  ;;  %v479_v57 = vshrl.u32 %v23309_v5, 16  ;;  %v23357_v12 = vld [vmem:[%s23108_s16 + $0x80] sm:$0xff]  }
  0x41   : > { %19864 = vmatpush3.bf16.msra.mxu1 %v22416_v31  ;;  %19397 = vmatprep.subr.bf16.mxu0 %v22421_v59  ;;  %v4443_v28 = vsel %vm370_vm0, %v4438_v2, %v4442_v4  ;;  %v4456_v30 = vshll.u32 %v23313_v9, 16  ;;  %v23327_v31 = vld [vmem:[%s23108_s16 + $0x70] sm:$0xff]   ;;  %v491_v2 = vshll.u32 %v23339_v46, 16 }
  0x42   : > { %19865 = vmatprep.subr.bf16.mxu1 %v22422_v62  ;;  %v477_v45 = vrot.slane %v475_v26, 1  ;;  %v470_v60 = vsel %vm370_vm0, %v465_v36, %v469_v33  ;;  %v487_v1 = vshrl.u32 %v23327_v31, 16  ;;  %v23366_v26 = vld [vmem:[%s23108_s16 + $0x88] sm:$0xff]  }
  0x43   : > { %v23372_v36 = vld [vmem:[%s23108_s16 + $0x12c] sm:$0xff]  }
  0x44   : > { %19398 = vmatpush3.bf16.msra.mxu0 %v22421_v59  ;;  %v483_v59 = vshll.u32 %v23327_v31, 16 }
  0x45   : > { %19866 = vmatpush3.bf16.msra.mxu1 %v22422_v62  ;;  %19399 = vmatprep.subr.bf16.mxu0 %v22427_v32  ;;  %v4460_v62 = vshrl.u32 %v23313_v9, 16 }
  0x46   : > { %19364 = vmatmul.mubr.bf16.gmra.mrb[12].mxu0 %v438_v38  ;;  %v4446_v38 = vor.u32 %v4444_v13, %v4442_v4  ;;  %19867 = vmatprep.subr.bf16.mxu1 %v22428_v35  ;;  %v4468_v4 = vshrl.u32 %v23336_v41, 16  ;;  %v485_v13 = vrot.slane %v483_v59, 1 }
  0x47   : > { %19832 = vmatmul.mubr.bf16.gmra.mrb[12].mxu1 %v4419_v40  ;;  %19367 = vmatprep.mubr.bf16.mxu0 %v446_v44  ;;  %v4450_v40 = vrot.slane %v4448_v17, 1  ;;  %v473_v44 = vor.u32 %v471_v25, %v469_v33  ;;  %v23360_v17 = vld [vmem:[%s23108_s16 + $0x124] sm:$0xff]   ;;  %v4466_v25 = vrot.slane %v4464_v63, 1 }
  0x48   : > { %19835 = vmatprep.mubr.bf16.mxu1 %v4427_v50  ;;  %v4458_v50 = vrot.slane %v4456_v30, 1  ;;  %19400 = vmatpush3.bf16.msra.mxu0 %v22427_v32  ;;  %27167 = vst [vmem:[#allocation2_spill] sm:$0xff] %v23360_v17  ;;  %v493_v30 = vrot.slane %v491_v2, 1  ;;  %v22436_v32 = vld [vmem:[%s27158_s1 + $0x38] sm:$0xff]  }
  0x49   : > { %v4454_v49 = vor.u32 %v4452_v29, %v4450_v40  ;;  %19868 = vmatpush3.bf16.msra.mxu1 %v22428_v35  ;;  %v4451_v61 = vsel %vm370_vm0, %v4446_v38, %v4450_v40  ;;  %v478_v0 = vsel %vm370_vm0, %v473_v44, %v477_v45  ;;  %v489_v29 = vor.u32 %v487_v1, %v485_v13  ;;  %v22439_v38 = vld [vmem:[%s27158_s1 + $0x80] sm:$0xff]   ;;  %v22437_v2 = vld [vmem:[%s23108_s16 + $0x90] ss:$0 sps:$4 sm:$0x11]  }
  0x4a   : > { %v4470_v33 = vor.u32 %v4468_v4, %v4466_v25  ;;  %v495_v40 = vshrl.u32 %v23339_v46, 16  ;;  %v499_v44 = vshll.u32 %v23357_v12, 16  ;;  %19869 = vmatprep.subr.bf16.mxu1 %v22436_v32  ;;  %v4488_v1 = vshll.u32 %v23372_v36, 16 }
  0x4b   : > { %v4459_v6 = vsel %vm370_vm0, %v4454_v49, %v4458_v50 }
  0x4c   : > { %v501_v4 = vrot.slane %v499_v44, 1 }
  0x4d   : > { %19870 = vmatpush3.bf16.msra.mxu1 %v22436_v32 }
  0x4e   : > { %19368 = vmatmul.mubr.bf16.gmra.mrb[16].mxu0 %v454_v10  ;;  %v4472_v10 = vshll.u32 %v23342_v53, 16 }
  0x4f   : > { %19836 = vmatmul.mubr.bf16.gmra.mrb[16].mxu1 %v4435_v21  ;;  %19371 = vmatprep.mubr.bf16.mxu0 %v462_v22  ;;  %v22434_v21 = vld [vmem:[%s27158_s1 + $0x38] sm:$0xff]   ;;  %v481_v22 = vor.u32 %v479_v57, %v477_v45  ;;  %v4476_v45 = vshrl.u32 %v23342_v53, 16  ;;  %v503_v57 = vshrl.u32 %v23357_v12, 16 }
  0x50   : > { %19839 = vmatprep.mubr.bf16.mxu1 %v4443_v28  ;;  %v4462_v28 = vor.u32 %v4460_v62, %v4458_v50  ;;  %19401 = vmatprep.subr.bf16.mxu0 %v22434_v21  ;;  %v4474_v35 = vrot.slane %v4472_v10, 1  ;;  %v4480_v50 = vshll.u32 %v23360_v17, 16  ;;  %v22440_v62 = vld [vmem:[%s27158_s1 + $0x80] sm:$0xff]   ;;  %v497_v10 = vor.u32 %v495_v40, %v493_v30 }
  0x51   : > { %19402 = vmatpush3.bf16.msra.mxu0 %v22434_v21  ;;  %v486_v49 = vsel %vm370_vm0, %v481_v22, %v485_v13  ;;  %19907 = vmatprep.subr.bf16.mxu1 %v22440_v62  ;;  %v505_v22 = vor.u32 %v503_v57, %v501_v4 }
  0x52   : > { %19439 = vmatprep.subr.bf16.mxu0 %v22439_v38  ;;  %v4467_v59 = vsel %vm370_vm0, %v4462_v28, %v4466_v25  ;;  %v4475_v63 = vsel %vm370_vm0, %v4470_v33, %v4474_v35  ;;  %v4482_v13 = vrot.slane %v4480_v50, 1  ;;  %v4478_v21 = vor.u32 %v4476_v45, %v4474_v35 }
  0x53   : > { %v502_v32 = vsel %vm370_vm0, %v497_v10, %v501_v4  ;;  %v511_v33 = vshrl.u32 %v23366_v26, 16  ;;  %v22460_v4 = vld [vmem:[%s27158_s1 + $0xc8] sm:$0xff]  }
  0x56   : > { %19372 = vmatmul.mubr.bf16.gmra.mrb[20].mxu0 %v470_v60  ;;  %v494_v60 = vsel %vm370_vm0, %v489_v29, %v493_v30  ;;  %v4490_v29 = vrot.slane %v4488_v1, 1 }
  0x57   : > { %19840 = vmatmul.mubr.bf16.gmra.mrb[20].mxu1 %v4451_v61  ;;  %19375 = vmatprep.mubr.bf16.mxu0 %v478_v0  ;;  %v507_v61 = vshll.u32 %v23366_v26, 16  ;;  %v4484_v0 = vshrl.u32 %v23360_v17, 16  ;;  %v515_v17 = vshll.u32 %v22437_v2, 16 }
  0x58   : > { %19843 = vmatprep.mubr.bf16.mxu1 %v4459_v6  ;;  %v22438_v6 = vld [vmem:[%s23108_s16 + $0x134] ss:$0 sps:$4 sm:$0x11]  }
  0x59   : > { %v509_v25 = vrot.slane %v507_v61, 1  ;;  %v4486_v28 = vor.u32 %v4484_v0, %v4482_v13  ;;  %v517_v40 = vrot.slane %v515_v17, 1  ;;  %v22442_v17 = vld [vmem:[%s27158_s1 + $0x88] sm:$0xff]   ;;  %v22912_v0 = vld [vmem:[%s23108_s16 + $0xbc] sm:$0xff]  }
  0x5a   : > { %v5011_v1 = vrot.slane %v22912_v0, 1  ;;  %v23575_v0 = vld [vmem:[%s27158_s1 + $0x100] sm:$0xff]  }
  0x5b   : > { %v510_v44 = vsel %vm370_vm0, %v505_v22, %v509_v25  ;;  %v4491_v30 = vsel %vm370_vm0, %v4486_v28, %v4490_v29  ;;  %v513_v35 = vor.u32 %v511_v33, %v509_v25  ;;  %v22914_v22 = vld [vmem:[%s23108_s16 + $0xc4] sm:$0xff]   ;;  %v22916_v33 = vld [vmem:[%s23108_s16 + $0xcc] sm:$0xff]  }
  0x5c   : > { %v5013_v25 = vrot.slane %v22914_v22, 1  ;;  %v22915_v28 = vld [vmem:[%s23108_s16 + $0x28] sm:$0xff]  }
  0x5d   : > { %v518_v57 = vsel %vm370_vm0, %v513_v35, %v517_v40  ;;  %v22464_v40 = vld [vmem:[%s27158_s1 + $0xd8] sm:$0xff]   ;;  %v22931_v22 = vld [vmem:[%s23108_s16 + $0x68] sm:$0xff]  }
  0x5e   : > { %19376 = vmatmul.mubr.bf16.gmra.mrb[24].mxu0 %v486_v49  ;;  %v4483_v49 = vsel %vm370_vm0, %v4478_v21, %v4482_v13  ;;  %v22913_v13 = vld [vmem:[%s23108_s16 + $0x20] sm:$0xff]  }
  0x5f   : > { %19844 = vmatmul.mubr.bf16.gmra.mrb[24].mxu1 %v4467_v59  ;;  %19379 = vmatprep.mubr.bf16.mxu0 %v494_v60  ;;  %v4492_v59 = vshrl.u32 %v23372_v36, 16  ;;  %v4496_v60 = vshll.u32 %v22438_v6, 16  ;;  %v1034_v21 = vrot.slane %v22913_v13, 1  ;;  %v22930_v13 = vld [vmem:[%s23108_s16 + $0x104] sm:$0xff]  }
  0x60   : > { %19847 = vmatprep.mubr.bf16.mxu1 %v4475_v63  ;;  %v22441_v63 = vld [vmem:[%s27158_s1 + $0x88] sm:$0xff]  }
  0x61   : > { %v4494_v45 = vor.u32 %v4492_v59, %v4490_v29  ;;  %v4498_v50 = vrot.slane %v4496_v60, 1  ;;  %v1036_v29 = vrot.slane %v22915_v28, 1  ;;  %v22463_v60 = vld [vmem:[%s27158_s1 + $0xd8] sm:$0xff]   ;;  %v22932_v28 = vld [vmem:[%s23108_s16 + $0x10c] sm:$0xff]  }
  0x63   : > { %v4499_v61 = vsel %vm370_vm0, %v4494_v45, %v4498_v50  ;;  %v1037_v35 = vsel %vm1026_vm1, %v1034_v21, %v1036_v29  ;;  %v22917_v50 = vld [vmem:[%s23108_s16 + $0x30] sm:$0xff]  }
  0x66   : > { %19380 = vmatmul.mubr.bf16.gmra.mrb[28].mxu0 %v502_v32  ;;  %v22461_v32 = vld [vmem:[%s27158_s1 + $0xd0] sm:$0xff]  }
  0x67   : > { %19848 = vmatmul.mubr.bf16.gmra.mrb[28].mxu1 %v4483_v49  ;;  %19383 = vmatprep.mubr.bf16.mxu0 %v510_v44  ;;  %v5015_v49 = vrot.slane %v22916_v33, 1  ;;  %v22462_v44 = vld [vmem:[%s27158_s1 + $0xd0] sm:$0xff]  }
  0x68   : > { %19851 = vmatprep.mubr.bf16.mxu1 %v4491_v30  ;;  %v5014_v30 = vsel %vm1026_vm1, %v5011_v1, %v5013_v25 }
  0x69   : > { %v5016_v45 = vsel %vm1026_vm1, %v5013_v25, %v5015_v49  ;;  %v1052_v25 = vrot.slane %v22931_v22, 1 }
  0x6e   : > { %19384 = vmatmul.mubr.bf16.gmra.mrb[32].mxu0 %v518_v57  ;;  %v1038_v57 = vrot.slane %v22917_v50, 1  ;;  %v22936_v50 = vld [vmem:[%s23108_s16 + $0x11c] sm:$0xff]  }
  0x6f   : > { %19852 = vmatmul.mubr.bf16.gmra.mrb[32].mxu1 %v4499_v61  ;;  %19403 = vmatprep.mubr.bf16.mxu0 %v23118_v14  ;;  %v22443_v14 = vld [vmem:[%s27158_s1 + $0x90] sm:$0xff]  }
  0x70   : > { %19871 = vmatprep.mubr.bf16.mxu1 %v23134_v23  ;;  %v22446_v23 = vld [vmem:[%s27158_s1 + $0x98] sm:$0xff]  }
  0x71   : > { %v22918_v61 = vld [vmem:[%s23108_s16 + $0xd4] sm:$0xff]  }
  0x76   : > { %19404 = vmatmul.mubr.bf16.vlgmr.msra.gmra.mrb[0].mxu0 %v23121_v15  ;;  %v22444_v15 = vld [vmem:[%s27158_s1 + $0x90] sm:$0xff]  }
  0x77   : > { %19872 = vmatmul.mubr.bf16.vlgmr.msra.gmra.mrb[0].mxu1 %v23124_v16  ;;  %19440 = vmatpush3.bf16.msra.mxu0 %v22439_v38  ;;  %v22445_v16 = vld [vmem:[%s27158_s1 + $0x98] sm:$0xff]  }
  0x78   : > { %19908 = vmatpush3.bf16.msra.mxu1 %v22440_v62  ;;  %19407 = vmatprep.mubr.bf16.mxu0 %v23137_v24  ;;  %v22447_v24 = vld [vmem:[%s27158_s1 + $0xa0] sm:$0xff]   ;;  %v22911_v38 = vld [vmem:[%s23108_s16 + $0x18] sm:$0xff]  }
  0x79   : > { %19875 = vmatprep.mubr.bf16.mxu1 %v23151_v34  ;;  %19441 = vmatprep.subr.bf16.mxu0 %v22441_v63  ;;  %v22448_v34 = vld [vmem:[%s27158_s1 + $0xa0] sm:$0xff]   ;;  %v1032_v62 = vrot.slane %v22911_v38, 1 }
  0x7a   : > { %19909 = vmatprep.subr.bf16.mxu1 %v22442_v17  ;;  %v22928_v38 = vld [vmem:[%s23108_s16 + $0xfc] sm:$0xff]  }
  0x7b   : > { %19442 = vmatpush3.bf16.msra.mxu0 %v22441_v63  ;;  %v1035_v59 = vsel %vm1026_vm1, %v1032_v62, %v1034_v21  ;;  %v5017_v63 = vrot.slane %v22918_v61, 1  ;;  %v5029_v21 = vrot.slane %v22930_v13, 1  ;;  %v23663_v13 = vld [vmem:[%s23108_s16 + $0xdc] sm:$0xff]  }
  0x7c   : > { %19910 = vmatpush3.bf16.msra.mxu1 %v22442_v17  ;;  %19443 = vmatprep.subr.bf16.mxu0 %v22443_v14  ;;  %v22919_v17 = vld [vmem:[%s23108_s16 + $0x38] sm:$0xff]  }
  0x7d   : > { %19911 = vmatprep.subr.bf16.mxu1 %v22444_v15 }
  0x7e   : > { %19408 = vmatmul.mubr.bf16.gmra.mrb[4].mxu0 %v23164_v47  ;;  %v22449_v47 = vld [vmem:[%s27158_s1 + $0xa8] sm:$0xff]  }
  0x7f   : > { %19876 = vmatmul.mubr.bf16.gmra.mrb[4].mxu1 %v23171_v51  ;;  %19411 = vmatprep.mubr.bf16.mxu0 %v23176_v55  ;;  %v22450_v51 = vld [vmem:[%s27158_s1 + $0xa8] sm:$0xff]   ;;  %v22451_v55 = vld [vmem:[%s27158_s1 + $0xb0] sm:$0xff]  }
  0x80   : > { %19879 = vmatprep.mubr.bf16.mxu1 %v23179_v56  ;;  %19444 = vmatpush3.bf16.msra.mxu0 %v22443_v14  ;;  %v22452_v56 = vld [vmem:[%s27158_s1 + $0xb0] sm:$0xff]   ;;  %v1040_v14 = vrot.slane %v22919_v17, 1 }
  0x81   : > { %19912 = vmatpush3.bf16.msra.mxu1 %v22444_v15  ;;  %19445 = vmatprep.subr.bf16.mxu0 %v22445_v16  ;;  %v22920_v15 = vld [vmem:[%s23108_s16 + $0xdc] sm:$0xff]  }
  0x82   : > { %19913 = vmatprep.subr.bf16.mxu1 %v22446_v23 }
  0x84   : > { %19446 = vmatpush3.bf16.msra.mxu0 %v22445_v16  ;;  %v5019_v16 = vrot.slane %v22920_v15, 1  ;;  %v22937_v15 = vld [vmem:[%s23108_s16 + $0x80] sm:$0xff]  }
  0x85   : > { %19914 = vmatpush3.bf16.msra.mxu1 %v22446_v23  ;;  %19447 = vmatprep.subr.bf16.mxu0 %v22447_v24  ;;  %v22465_v23 = vld [vmem:[%s27158_s1 + $0xe0] sm:$0xff]  }
  0x86   : > { %19412 = vmatmul.mubr.bf16.gmra.mrb[8].mxu0 %v23196_v8  ;;  %19915 = vmatprep.subr.bf16.mxu1 %v22448_v34  ;;  %v22453_v8 = vld [vmem:[%s27158_s1 + $0xb8] sm:$0xff]  }
  0x87   : > { %19880 = vmatmul.mubr.bf16.gmra.mrb[8].mxu1 %v23201_v11  ;;  %19415 = vmatprep.mubr.bf16.mxu0 %v23206_v19  ;;  %v22454_v11 = vld [vmem:[%s27158_s1 + $0xb8] sm:$0xff]   ;;  %v22457_v19 = vld [vmem:[%s27158_s1 + $0xc0] sm:$0xff]  }
  0x88   : > { %19883 = vmatprep.mubr.bf16.mxu1 %v23209_v20  ;;  %19448 = vmatpush3.bf16.msra.mxu0 %v22447_v24  ;;  %v22458_v20 = vld [vmem:[%s27158_s1 + $0xc0] sm:$0xff]  }
  0x89   : > { %19916 = vmatpush3.bf16.msra.mxu1 %v22448_v34  ;;  %19449 = vmatprep.subr.bf16.mxu0 %v22449_v47  ;;  %v22466_v24 = vld [vmem:[%s27158_s1 + $0xe0] sm:$0xff]   ;;  %v1039_v34 = vsel %vm1026_vm1, %v1036_v29, %v1038_v57  ;;  %v5031_v29 = vrot.slane %v22932_v28, 1 }
  0x8a   : > { %19917 = vmatprep.subr.bf16.mxu1 %v22450_v51  ;;  %v23671_v28 = vld [vmem:[%s23108_s16 + $0xe4] sm:$0xff]  }
  0x8c   : > { %19450 = vmatpush3.bf16.msra.mxu0 %v22449_v47  ;;  %v5018_v47 = vsel %vm1026_vm1, %v5015_v49, %v5017_v63 }
  0x8d   : > { %19918 = vmatpush3.bf16.msra.mxu1 %v22450_v51  ;;  %19451 = vmatprep.subr.bf16.mxu0 %v22451_v55  ;;  %v1041_v51 = vsel %vm1026_vm1, %v1038_v57, %v1040_v14  ;;  %v5035_v57 = vrot.slane %v22936_v50, 1 }
  0x8e   : > { %19416 = vmatmul.mubr.bf16.gmra.mrb[12].mxu0 %v23226_v39  ;;  %19919 = vmatprep.subr.bf16.mxu1 %v22452_v56  ;;  %v1005_v39 = vld [vmem:[%s23108_s16] sm:$0xe] }
  0x8f   : > { %19884 = vmatmul.mubr.bf16.gmra.mrb[12].mxu1 %v23231_v42  ;;  %19419 = vmatprep.mubr.bf16.mxu0 %v23236_v48  ;;  %v16554_v42 = vld [vmem:[%s23108_s16 + $0xa4] sm:$0xe] }
  0x90   : > { %19887 = vmatprep.mubr.bf16.mxu1 %v23240_v52  ;;  %19452 = vmatpush3.bf16.msra.mxu0 %v22451_v55  ;;  %v22905_v48 = vld [vmem:[%s23108_s16 + $0x4] sm:$0xf]  ;;  %v5020_v55 = vsel %vm1026_vm1, %v5017_v63, %v5019_v16 }
  0x91   : > { %19920 = vmatpush3.bf16.msra.mxu1 %v22452_v56  ;;  %19453 = vmatprep.subr.bf16.mxu0 %v22453_v8  ;;  %v16233_v52 = vcombine.low %v1005_v39, %v22905_v48  ;;  %v22467_v56 = vld [vmem:[%s27158_s1 + $0xe8] sm:$0xff]  }
  0x92   : > { %19921 = vmatprep.subr.bf16.mxu1 %v22454_v11 }
  0x94   : > { %19454 = vmatpush3.bf16.msra.mxu0 %v22453_v8  ;;  %v22468_v8 = vld [vmem:[%s27158_s1 + $0xe8] sm:$0xff]  }
  0x95   : > { %19922 = vmatpush3.bf16.msra.mxu1 %v22454_v11  ;;  %19491 = vmatprep.subr.bf16.mxu0 %v22457_v19  ;;  %v22921_v11 = vld [vmem:[%s23108_s16 + $0x40] sm:$0xff]  }
  0x96   : > { %19420 = vmatmul.mubr.bf16.gmra.mrb[16].mxu0 %v23254_v3  ;;  %19959 = vmatprep.subr.bf16.mxu1 %v22458_v20  ;;  %v22906_v3 = vld [vmem:[%s23108_s16 + $0xa8] sm:$0xf] }
  0x97   : > { %19888 = vmatmul.mubr.bf16.gmra.mrb[16].mxu1 %v23260_v7  ;;  %19423 = vmatprep.mubr.bf16.mxu0 %v23267_v18  ;;  %v16571_v7 = vcombine.low %v16554_v42, %v22906_v3  ;;  %v27168_v18 = vld [vmem:[#allocation2_spill] sm:$0xff]  ;;  %v22923_v42 = vld [vmem:[%s23108_s16 + $0x48] sm:$0xff]  }
  0x98   : > { %19891 = vmatprep.mubr.bf16.mxu1 %v23271_v27  ;;  %v1027_v27 = vrot.slane %v16233_v52, 1  ;;  %v1044_v48 = vrot.slane %v22923_v42, 1  ;;  %v22924_v52 = vld [vmem:[%s23108_s16 + $0xec] sm:$0xff]   ;;  %v23619_v42 = vld [vmem:[%s23108_s16 + $0x18] sm:$0xff]  }
  0x99   : > { %v5023_v3 = vrot.slane %v22924_v52, 1 }
  0x9e   : > { %19424 = vmatmul.mubr.bf16.gmra.mrb[20].mxu0 %v23282_v37  ;;  %v22907_v37 = vld [vmem:[%s23108_s16 + $0x8] sm:$0xff]  }
  0x9f   : > { %19892 = vmatmul.mubr.bf16.gmra.mrb[20].mxu1 %v23288_v43  ;;  %19427 = vmatprep.mubr.bf16.mxu0 %v23297_v54  ;;  %v1028_v43 = vrot.slane %v22907_v37, 1  ;;  %v5006_v54 = vrot.slane %v16571_v7, 1  ;;  %v22469_v7 = vld [vmem:[%s27158_s1 + $0xf0] sm:$0xff]   ;;  %v22471_v37 = vld [vmem:[%s27158_s1 + $0xf8] sm:$0xff]  }
  0xa0   : > { %19895 = vmatprep.mubr.bf16.mxu1 %v23300_v58  ;;  %v22908_v58 = vld [vmem:[%s23108_s16 + $0xac] sm:$0xff]  }
  0xa6   : > { %19428 = vmatmul.mubr.bf16.gmra.mrb[24].mxu0 %v23309_v5  ;;  %v5007_v5 = vrot.slane %v22908_v58, 1 }
  0xa7   : > { %19896 = vmatmul.mubr.bf16.gmra.mrb[24].mxu1 %v23313_v9  ;;  %19431 = vmatprep.mubr.bf16.mxu0 %v23327_v31  ;;  %v1029_v9 = vsel %vm1026_vm1, %v1027_v27, %v1028_v43 }
  0xa8   : > { %19899 = vmatprep.mubr.bf16.mxu1 %v23336_v41  ;;  %v5008_v31 = vsel %vm1026_vm1, %v5006_v54, %v5007_v5  ;;  %v22909_v41 = vld [vmem:[%s23108_s16 + $0x10] sm:$0xff]  }
  0xae   : > { %19432 = vmatmul.mubr.bf16.gmra.mrb[28].mxu0 %v23339_v46  ;;  %v1030_v46 = vrot.slane %v22909_v41, 1  ;;  %v22926_v41 = vld [vmem:[%s23108_s16 + $0xf4] sm:$0xff]  }
  0xaf   : > { %19900 = vmatmul.mubr.bf16.gmra.mrb[28].mxu1 %v23342_v53  ;;  %19435 = vmatprep.mubr.bf16.mxu0 %v23357_v12  ;;  %v22910_v53 = vld [vmem:[%s23108_s16 + $0xb4] sm:$0xff]  }
  0xb0   : > { %19903 = vmatprep.mubr.bf16.mxu1 %v27168_v18  ;;  %v5009_v12 = vrot.slane %v22910_v53, 1  ;;  %v1031_v2 = vsel %vm1026_vm1, %v1028_v43, %v1030_v46  ;;  %v1033_v6 = vsel %vm1026_vm1, %v1030_v46, %v1032_v62  ;;  %v22470_v18 = vld [vmem:[%s27158_s1 + $0xf0] sm:$0xff]   ;;  %v5025_v46 = vrot.slane %v22926_v41, 1  ;;  %v22927_v53 = vld [vmem:[%s23108_s16 + $0x58] sm:$0xff]  }
  0xb1   : > { %v5027_v62 = vrot.slane %v22928_v38, 1 }
  0xb2   : > { %v5012_v10 = vsel %vm1026_vm1, %v5009_v12, %v5011_v1  ;;  %v23580_v1 = vld [vmem:[%s27158_s1 + $0x100] sm:$0xff]  }
  0xb3   : > { %v5030_v33 = vsel %vm1026_vm1, %v5027_v62, %v5029_v21 }
  0xb6   : > { %19436 = vmatmul.mubr.bf16.gmra.mrb[32].mxu0 %v23366_v26  ;;  %v22459_v26 = vld [vmem:[%s27158_s1 + $0xc8] sm:$0xff]  }
  0xb7   : > { %19904 = vmatmul.mubr.bf16.gmra.mrb[32].mxu1 %v23372_v36  ;;  %19455 = vmatprep.mubr.bf16.mxu0 %v1029_v9  ;;  %v5010_v36 = vsel %vm1026_vm1, %v5007_v5, %v5009_v12  ;;  %v22472_v5 = vld [vmem:[%s27158_s1 + $0xf8] sm:$0xff]   ;;  %v22925_v9 = vld [vmem:[%s23108_s16 + $0x50] sm:$0xff]   ;;  %v1048_v12 = vrot.slane %v22927_v53, 1 }
  0xb8   : > { %19923 = vmatprep.mubr.bf16.mxu1 %v5008_v31  ;;  %v1046_v31 = vrot.slane %v22925_v9, 1 }
  0xbe   : > { %19456 = vmatmul.mubr.bf16.vlgmr.msra.gmra.mrb[0].mxu0 %v1031_v2  ;;  %v1047_v2 = vsel %vm1026_vm1, %v1044_v48, %v1046_v31 }
  0xbf   : > { %19924 = vmatmul.mubr.bf16.vlgmr.msra.gmra.mrb[0].mxu1 %v5010_v36  ;;  %19492 = vmatpush3.bf16.msra.mxu0 %v22457_v19  ;;  %v1042_v19 = vrot.slane %v22921_v11, 1  ;;  %v1049_v36 = vsel %vm1026_vm1, %v1046_v31, %v1048_v12  ;;  %v23611_v11 = vld [vmem:[%s23108_s16 + $0x10] sm:$0xff]  }
  0xc0   : > { %19960 = vmatpush3.bf16.msra.mxu1 %v22458_v20  ;;  %19459 = vmatprep.mubr.bf16.mxu0 %v1033_v6  ;;  %v22922_v20 = vld [vmem:[%s23108_s16 + $0xe4] sm:$0xff]   ;;  %v22942_v31 = vld [vmem:[%s23108_s16 + $0x134] ss:$0 sps:$4 sm:$0x11]   ;;  %v1491_v53 = vrot.slane %v23611_v11, 1 }
  0xc1   : > { %19927 = vmatprep.mubr.bf16.mxu1 %v5012_v10  ;;  %19493 = vmatprep.subr.bf16.mxu0 %v22459_v26  ;;  %v5021_v39 = vrot.slane %v22922_v20, 1  ;;  %v1043_v27 = vsel %vm1026_vm1, %v1040_v14, %v1042_v19  ;;  %v1045_v54 = vsel %vm1026_vm1, %v1042_v19, %v1044_v48  ;;  %v22929_v6 = vld [vmem:[%s23108_s16 + $0x60] sm:$0xff]   ;;  %v16580_v19 = vld [vmem:[%s23108_s16 + $0xac] sm:$0xe]  ;;  %v16581_v20 = vld [vmem:[%s23108_s16 + $0xb0] sm:$0xf] }
  0xc2   : > { %19961 = vmatprep.subr.bf16.mxu1 %v22460_v4  ;;  %v1050_v10 = vrot.slane %v22929_v6, 1  ;;  %v5041_v41 = vrot.slane %v22942_v31, 1  ;;  %v23657_v6 = vld [vmem:[%s23108_s16 + $0xd4] sm:$0xff]  }
  0xc3   : > { %19494 = vmatpush3.bf16.msra.mxu0 %v22459_v26  ;;  %v5022_v43 = vsel %vm1026_vm1, %v5019_v16, %v5021_v39  ;;  %v5024_v58 = vsel %vm1026_vm1, %v5021_v39, %v5023_v3  ;;  %v5026_v26 = vsel %vm1026_vm1, %v5023_v3, %v5025_v46  ;;  %v1058_v16 = vrot.slane %v22937_v15, 1  ;;  %v23616_v39 = vld [vmem:[%s23108_s16 + $0xb4] sm:$0xff]   ;;  %v23625_v3 = vld [vmem:[%s23108_s16 + $0xbc] sm:$0xff]  }
  0xc4   : > { %19962 = vmatpush3.bf16.msra.mxu1 %v22460_v4  ;;  %19495 = vmatprep.subr.bf16.mxu0 %v22461_v32  ;;  %v5028_v4 = vsel %vm1026_vm1, %v5025_v46, %v5027_v62  ;;  %v1053_v49 = vsel %vm1026_vm1, %v1050_v10, %v1052_v25  ;;  %v5469_v62 = vrot.slane %v23616_v39, 1  ;;  %v5477_v50 = vrot.slane %v23657_v6, 1 }
  0xc5   : > { %19963 = vmatprep.subr.bf16.mxu1 %v22462_v44  ;;  %v5481_v15 = vrot.slane %v23671_v28, 1 }
  0xc6   : > { %19460 = vmatmul.mubr.bf16.gmra.mrb[4].mxu0 %v1035_v59  ;;  %v22933_v59 = vld [vmem:[%s23108_s16 + $0x70] sm:$0xff]  }
  0xc7   : > { %19928 = vmatmul.mubr.bf16.gmra.mrb[4].mxu1 %v5014_v30  ;;  %19463 = vmatprep.mubr.bf16.mxu0 %v1037_v35  ;;  %v22934_v30 = vld [vmem:[%s23108_s16 + $0x114] sm:$0xff]  }
  0xc8   : > { %19931 = vmatprep.mubr.bf16.mxu1 %v5016_v45  ;;  %19496 = vmatpush3.bf16.msra.mxu0 %v22461_v32  ;;  %v1051_v32 = vsel %vm1026_vm1, %v1048_v12, %v1050_v10  ;;  %v5033_v35 = vrot.slane %v22934_v30, 1  ;;  %v23646_v12 = vld [vmem:[%s23108_s16 + $0xcc] sm:$0xff]   ;;  %v23660_v10 = vld [vmem:[%s23108_s16 + $0x38] sm:$0xff]  }
  0xc9   : > { %19964 = vmatpush3.bf16.msra.mxu1 %v22462_v44  ;;  %19497 = vmatprep.subr.bf16.mxu0 %v22463_v60  ;;  %v5032_v44 = vsel %vm1026_vm1, %v5029_v21, %v5031_v29  ;;  %v23666_v21 = vld [vmem:[%s23108_s16 + $0x40] sm:$0xff]   ;;  %v23687_v30 = vld [vmem:[%s23108_s16 + $0xf4] sm:$0xff]  }
  0xca   : > { %19965 = vmatprep.subr.bf16.mxu1 %v22464_v40  ;;  %v5034_v63 = vsel %vm1026_vm1, %v5031_v29, %v5033_v35  ;;  %v5036_v14 = vsel %vm1026_vm1, %v5033_v35, %v5035_v57  ;;  %v23674_v29 = vld [vmem:[%s23108_s16 + $0x48] sm:$0xff]  }
  0xcc   : > { %19498 = vmatpush3.bf16.msra.mxu0 %v22463_v60  ;;  %v1054_v60 = vrot.slane %v22933_v59, 1 }
  0xcd   : > { %19966 = vmatpush3.bf16.msra.mxu1 %v22464_v40  ;;  %19499 = vmatprep.subr.bf16.mxu0 %v22465_v23  ;;  %v22935_v40 = vld [vmem:[%s23108_s16 + $0x78] sm:$0xff]  }
  0xce   : > { %19464 = vmatmul.mubr.bf16.gmra.mrb[8].mxu0 %v1039_v34  ;;  %19967 = vmatprep.subr.bf16.mxu1 %v22466_v24  ;;  %v1056_v45 = vrot.slane %v22935_v40, 1  ;;  %v1055_v61 = vsel %vm1026_vm1, %v1052_v25, %v1054_v60  ;;  %v22939_v34 = vld [vmem:[%s23108_s16 + $0x88] sm:$0xff]  }
  0xcf   : > { %19932 = vmatmul.mubr.bf16.gmra.mrb[8].mxu1 %v5018_v47  ;;  %19467 = vmatprep.mubr.bf16.mxu0 %v1041_v51  ;;  %v1060_v47 = vrot.slane %v22939_v34, 1  ;;  %v22940_v51 = vld [vmem:[%s23108_s16 + $0x12c] sm:$0xff]  }
  0xd0   : > { %19935 = vmatprep.mubr.bf16.mxu1 %v5020_v55  ;;  %19500 = vmatpush3.bf16.msra.mxu0 %v22465_v23  ;;  %v1057_v17 = vsel %vm1026_vm1, %v1054_v60, %v1056_v45  ;;  %v22938_v23 = vld [vmem:[%s23108_s16 + $0x124] sm:$0xff]   ;;  %v5039_v55 = vrot.slane %v22940_v51, 1  ;;  %v1059_v48 = vsel %vm1026_vm1, %v1056_v45, %v1058_v16  ;;  %v23692_v45 = vld [vmem:[%s23108_s16 + $0x58] sm:$0xff]   ;;  %v23715_v51 = vld [vmem:[%s23108_s16 + $0x10c] sm:$0xff]  }
  0xd1   : > { %19968 = vmatpush3.bf16.msra.mxu1 %v22466_v24  ;;  %19501 = vmatprep.subr.bf16.mxu0 %v22467_v56  ;;  %v5037_v24 = vrot.slane %v22938_v23, 1  ;;  %v23707_v23 = vld [vmem:[%s23108_s16 + $0x104] sm:$0xff]  }
  0xd2   : > { %19969 = vmatprep.subr.bf16.mxu1 %v22468_v8  ;;  %v5042_v59 = vsel %vm1026_vm1, %v5039_v55, %v5041_v41  ;;  %v22486_v41 = vld [vmem:[%s27158_s1 + $0x108] sm:$0xff]  }
  0xd4   : > { %19502 = vmatpush3.bf16.msra.mxu0 %v22467_v56  ;;  %v1343_v56 = vld [vmem:[%s23108_s16 + $0x8] sm:$0xe] }
  0xd5   : > { %19970 = vmatpush3.bf16.msra.mxu1 %v22468_v8  ;;  %19503 = vmatprep.subr.bf16.mxu0 %v22469_v7  ;;  %v1344_v8 = vld [vmem:[%s23108_s16 + $0xc] sm:$0xf] }
  0xd6   : > { %19468 = vmatmul.mubr.bf16.gmra.mrb[12].mxu0 %v1043_v27  ;;  %19971 = vmatprep.subr.bf16.mxu1 %v22470_v18  ;;  %v23622_v52 = vcombine.low %v1343_v56, %v1344_v8  ;;  %v1061_v27 = vsel %vm1026_vm1, %v1058_v16, %v1060_v47  ;;  %v1505_v16 = vrot.slane %v23674_v29, 1  ;;  %v1837_v56 = vshrl.u32 %v23611_v11, 16 }
  0xd7   : > { %19936 = vmatmul.mubr.bf16.gmra.mrb[12].mxu1 %v5022_v43  ;;  %19471 = vmatprep.mubr.bf16.mxu0 %v1045_v54  ;;  %v23635_v43 = vld [vmem:[%s23108_s16 + $0xc4] sm:$0xff]   ;;  %v5040_v54 = vsel %vm1026_vm1, %v5037_v24, %v5039_v55  ;;  %v23718_v55 = vld [vmem:[%s23108_s16 + $0x70] sm:$0xff]   ;;  %v1840_v8 = vshll.u32 %v23611_v11, 16  ;;  %v5816_v11 = vshll.u32 %v23616_v39, 16 }
  0xd8   : > { %19939 = vmatprep.mubr.bf16.mxu1 %v5024_v58  ;;  %19504 = vmatpush3.bf16.msra.mxu0 %v22469_v7  ;;  %v23628_v7 = vld [vmem:[%s23108_s16 + $0x20] sm:$0xff]   ;;  %v23639_v58 = vld [vmem:[%s23108_s16 + $0x28] sm:$0xff]   ;;  %v1490_v46 = vrot.slane %v23622_v52, 1  ;;  %v5473_v22 = vrot.slane %v23635_v43, 1 }
  0xd9   : > { %19972 = vmatpush3.bf16.msra.mxu1 %v22470_v18  ;;  %19505 = vmatprep.subr.bf16.mxu0 %v22471_v37  ;;  %v5038_v18 = vsel %vm1026_vm1, %v5035_v57, %v5037_v24  ;;  %v1497_v25 = vrot.slane %v23639_v58, 1  ;;  %v1501_v57 = vrot.slane %v23660_v10, 1  ;;  %v23710_v24 = vld [vmem:[%s23108_s16 + $0x68] sm:$0xff]  }
  0xda   : > { %19973 = vmatprep.subr.bf16.mxu1 %v22472_v5  ;;  %v1492_v60 = vsel %vm1026_vm1, %v1490_v46, %v1491_v53 }
  0xdc   : > { %19506 = vmatpush3.bf16.msra.mxu0 %v22471_v37  ;;  %v23632_v37 = vcombine.low %v16580_v19, %v16581_v20  ;;  %v23723_v19 = vld [vmem:[%s23108_s16 + $0x114] sm:$0xff]  }
  0xdd   : > { %19974 = vmatpush3.bf16.msra.mxu1 %v22472_v5  ;;  %19543 = vmatprep.subr.bf16.mxu0 %v23575_v0  ;;  %v22941_v5 = vld [vmem:[%s23108_s16 + $0x90] ss:$0 sps:$4 sm:$0x11]   ;;  %v23726_v20 = vld [vmem:[%s23108_s16 + $0x78] sm:$0xff]  }
  0xde   : > { %19472 = vmatmul.mubr.bf16.gmra.mrb[16].mxu0 %v1047_v2  ;;  %20011 = vmatprep.subr.bf16.mxu1 %v23580_v1  ;;  %v1062_v9 = vrot.slane %v22941_v5, 1  ;;  %v5468_v38 = vrot.slane %v23632_v37, 1  ;;  %v1493_v2 = vrot.slane %v23619_v42, 1  ;;  %v23763_v5 = vld [vmem:[%s23108_s16 + $0x90] sm:$0xff]  }
  0xdf   : > { %19940 = vmatmul.mubr.bf16.gmra.mrb[16].mxu1 %v5026_v26  ;;  %19475 = vmatprep.mubr.bf16.mxu0 %v1049_v36  ;;  %v23652_v26 = vld [vmem:[%s23108_s16 + $0x30] sm:$0xff]   ;;  %v5471_v36 = vrot.slane %v23625_v3, 1 }
  0xe0   : > { %19943 = vmatprep.mubr.bf16.mxu1 %v5028_v4  ;;  %v1495_v4 = vrot.slane %v23628_v7, 1  ;;  %v5470_v35 = vsel %vm1026_vm1, %v5468_v38, %v5469_v62  ;;  %v1499_v40 = vrot.slane %v23652_v26, 1  ;;  %v23751_v38 = vld [vmem:[%s23108_s16 + $0x88] sm:$0xff]  }
  0xe1   : > { %v5472_v31 = vsel %vm1026_vm1, %v5469_v62, %v5471_v36  ;;  %v1829_v62 = vshrl.u32 %v23622_v52, 16 }
  0xe2   : > { %v1496_v46 = vsel %vm1026_vm1, %v1493_v2, %v1495_v4 }
  0xe6   : > { %19476 = vmatmul.mubr.bf16.gmra.mrb[20].mxu0 %v1051_v32  ;;  %v1063_v32 = vsel %vm1026_vm1, %v1060_v47, %v1062_v9  ;;  %v23740_v9 = vld [vmem:[%s23108_s16 + $0x124] sm:$0xff]  }
  0xe7   : > { %19944 = vmatmul.mubr.bf16.gmra.mrb[20].mxu1 %v5030_v33  ;;  %19479 = vmatprep.mubr.bf16.mxu0 %v1053_v49  ;;  %v5475_v33 = vrot.slane %v23646_v12, 1  ;;  %v23679_v49 = vld [vmem:[%s23108_s16 + $0xec] sm:$0xff]  }
  0xe8   : > { %19947 = vmatprep.mubr.bf16.mxu1 %v5032_v44  ;;  %v23682_v44 = vld [vmem:[%s23108_s16 + $0x50] sm:$0xff]   ;;  %v5483_v34 = vrot.slane %v23679_v49, 1 }
  0xe9   : > { %v1507_v47 = vrot.slane %v23682_v44, 1 }
  0xee   : > { %19480 = vmatmul.mubr.bf16.gmra.mrb[24].mxu0 %v1055_v61  ;;  %v5479_v61 = vrot.slane %v23663_v13, 1 }
  0xef   : > { %19948 = vmatmul.mubr.bf16.gmra.mrb[24].mxu1 %v5034_v63  ;;  %19483 = vmatprep.mubr.bf16.mxu0 %v1057_v17  ;;  %v1503_v63 = vrot.slane %v23666_v21, 1  ;;  %v23699_v17 = vld [vmem:[%s23108_s16 + $0xfc] sm:$0xff]  }
  0xf0   : > { %19951 = vmatprep.mubr.bf16.mxu1 %v5036_v14  ;;  %v23702_v14 = vld [vmem:[%s23108_s16 + $0x60] sm:$0xff]  }
  0xf6   : > { %19484 = vmatmul.mubr.bf16.gmra.mrb[28].mxu0 %v1059_v48  ;;  %v23729_v48 = vld [vmem:[%s23108_s16 + $0x11c] sm:$0xff]  }
  0xf7   : > { %19952 = vmatmul.mubr.bf16.gmra.mrb[28].mxu1 %v5038_v18  ;;  %19487 = vmatprep.mubr.bf16.mxu0 %v1061_v27  ;;  %v23732_v18 = vld [vmem:[%s23108_s16 + $0x80] sm:$0xff]   ;;  %v1494_v27 = vsel %vm1026_vm1, %v1491_v53, %v1493_v2  ;;  %v23766_v2 = vld [vmem:[%s23108_s16 + $0x134] sm:$0xff]  }
  0xf8   : > { %19955 = vmatprep.mubr.bf16.mxu1 %v5040_v54  ;;  %v22485_v54 = vld [vmem:[%s27158_s1 + $0x108] sm:$0xff]   ;;  %v23771_v53 = vld [vmem:[%s23108_s16 + $0x98] ss:$0 sps:$4 sm:$0x11]  }
  0xfe   : > { %19488 = vmatmul.mubr.bf16.gmra.mrb[32].mxu0 %v1063_v32  ;;  %v5474_v32 = vsel %vm1026_vm1, %v5471_v36, %v5473_v22  ;;  %v22491_v36 = vld [vmem:[%s27158_s1 + $0x110] sm:$0xff]  }
  0xff   : > { %19956 = vmatmul.mubr.bf16.gmra.mrb[32].mxu1 %v5042_v59  ;;  %19507 = vmatprep.mubr.bf16.mxu0 %v1492_v60  ;;  %v22492_v60 = vld [vmem:[%s27158_s1 + $0x110] sm:$0xff]   ;;  %v5476_v59 = vsel %vm1026_vm1, %v5473_v22, %v5475_v33  ;;  %v1873_v22 = vshrl.u32 %v23652_v26, 16 }
 0x100   : > { %19975 = vmatprep.mubr.bf16.mxu1 %v5470_v35  ;;  %v23760_v35 = vld [vmem:[%s23108_s16 + $0x12c] sm:$0xff]  }
 0x106   : > { %19508 = vmatmul.mubr.bf16.vlgmr.msra.gmra.mrb[0].mxu0 %v1494_v27  ;;  %v5478_v27 = vsel %vm1026_vm1, %v5475_v33, %v5477_v50  ;;  %v5808_v33 = vshll.u32 %v23632_v37, 16 }
 0x107   : > { %19976 = vmatmul.mubr.bf16.vlgmr.msra.gmra.mrb[0].mxu1 %v5472_v31  ;;  %19544 = vmatpush3.bf16.msra.mxu0 %v23575_v0  ;;  %v1517_v31 = vrot.slane %v23726_v20, 1  ;;  %v5805_v0 = vshrl.u32 %v23632_v37, 16  ;;  %v1502_v37 = vsel %vm1026_vm1, %v1499_v40, %v1501_v57 }
 0x108   : > { %20012 = vmatpush3.bf16.msra.mxu1 %v23580_v1  ;;  %19511 = vmatprep.mubr.bf16.mxu0 %v1496_v46  ;;  %v23786_v46 = vld [vmem:[%s23108_s16 + $0x13c] ss:$0 sps:$4 sm:$0x11]  }
 0x109   : > { %19979 = vmatprep.mubr.bf16.mxu1 %v5474_v32  ;;  %19545 = vmatprep.subr.bf16.mxu0 %v22485_v54  ;;  %v1498_v32 = vsel %vm1026_vm1, %v1495_v4, %v1497_v25  ;;  %v22497_v1 = vld [vmem:[%s27158_s1 + $0x118] sm:$0xff]   ;;  %v1500_v4 = vsel %vm1026_vm1, %v1497_v25, %v1499_v40  ;;  %v22503_v25 = vld [vmem:[%s27158_s1 + $0x120] sm:$0xff]   ;;  %v22510_v40 = vld [vmem:[%s27158_s1 + $0x128] sm:$0xff]  }
 0x10a   : > { %20013 = vmatprep.subr.bf16.mxu1 %v22486_v41 }
 0x10b   : > { %19546 = vmatpush3.bf16.msra.mxu0 %v22485_v54  ;;  %v22498_v54 = vld [vmem:[%s27158_s1 + $0x118] sm:$0xff]  }
 0x10c   : > { %20014 = vmatpush3.bf16.msra.mxu1 %v22486_v41  ;;  %19547 = vmatprep.subr.bf16.mxu0 %v22491_v36  ;;  %v1832_v41 = vshll.u32 %v23622_v52, 16  ;;  %v22504_v52 = vld [vmem:[%s27158_s1 + $0x120] sm:$0xff]  }
 0x10d   : > { %20015 = vmatprep.subr.bf16.mxu1 %v22492_v60 }
 0x10e   : > { %19512 = vmatmul.mubr.bf16.gmra.mrb[4].mxu0 %v1498_v32  ;;  %v5813_v32 = vshrl.u32 %v23616_v39, 16  ;;  %v1504_v39 = vsel %vm1026_vm1, %v1501_v57, %v1503_v63  ;;  %v23868_v57 = vrot.slane %v5805_v0, 1  ;;  %v1846_v0 = vshrl.u32 %v23619_v42, 16 }
 0x10f   : > { %19980 = vmatmul.mubr.bf16.gmra.mrb[4].mxu1 %v5476_v59  ;;  %19515 = vmatprep.mubr.bf16.mxu0 %v1500_v4  ;;  %v23832_v59 = vrot.slane %v1829_v62, 1  ;;  %v23835_v4 = vrot.slane %v1832_v41, 2  ;;  %v22509_v62 = vld [vmem:[%s27158_s1 + $0x128] sm:$0xff]   ;;  %v23877_v41 = vrot.slane %v5816_v11, 2 }
 0x110   : > { %19983 = vmatprep.mubr.bf16.mxu1 %v5478_v27  ;;  %19548 = vmatpush3.bf16.msra.mxu0 %v22491_v36  ;;  %v23859_v27 = vrot.slane %v1837_v56, 1  ;;  %v23861_v36 = vrot.slane %v1840_v8, 2  ;;  %v22515_v56 = vld [vmem:[%s27158_s1 + $0x130] sm:$0xff]   ;;  %v23875_v8 = vrot.slane %v5813_v32, 1  ;;  %v22522_v32 = vld [vmem:[%s27158_s1 + $0x138] sm:$0xff]  }
 0x111   : > { %20016 = vmatpush3.bf16.msra.mxu1 %v22492_v60  ;;  %19549 = vmatprep.subr.bf16.mxu0 %v22497_v1  ;;  %v5480_v60 = vsel %vm1026_vm1, %v5477_v50, %v5479_v61  ;;  %v5482_v50 = vsel %vm1026_vm1, %v5479_v61, %v5481_v15  ;;  %v22516_v61 = vld [vmem:[%s27158_s1 + $0x130] sm:$0xff]  }
 0x112   : > { %20017 = vmatprep.subr.bf16.mxu1 %v22498_v54 }
 0x114   : > { %19550 = vmatpush3.bf16.msra.mxu0 %v22497_v1  ;;  %v23870_v1 = vrot.slane %v5808_v33, 2  ;;  %v5822_v33 = vshrl.u32 %v23625_v3, 16 }
 0x115   : > { %20018 = vmatpush3.bf16.msra.mxu1 %v22498_v54  ;;  %19551 = vmatprep.subr.bf16.mxu0 %v22503_v25  ;;  %v1849_v54 = vshll.u32 %v23619_v42, 16  ;;  %v5484_v42 = vsel %vm1026_vm1, %v5481_v15, %v5483_v34 }
 0x116   : > { %19516 = vmatmul.mubr.bf16.gmra.mrb[8].mxu0 %v1502_v37  ;;  %20019 = vmatprep.subr.bf16.mxu1 %v22504_v52  ;;  %v5825_v37 = vshll.u32 %v23625_v3, 16  ;;  %v1508_v3 = vsel %vm1026_vm1, %v1505_v16, %v1507_v47 }
 0x117   : > { %19984 = vmatmul.mubr.bf16.gmra.mrb[8].mxu1 %v5480_v60  ;;  %19519 = vmatprep.mubr.bf16.mxu0 %v1504_v39  ;;  %v23909_v11 = vrot.slane %v1849_v54, 2  ;;  %v27169_v60 = vrot.slane %v23687_v30, 1  ;;  %v5834_v54 = vshll.u32 %v23635_v43, 16 }
 0x118   : > { %19987 = vmatprep.mubr.bf16.mxu1 %v5482_v50  ;;  %19552 = vmatpush3.bf16.msra.mxu0 %v22503_v25  ;;  %v1506_v25 = vsel %vm1026_vm1, %v1503_v63, %v1505_v16  ;;  %v22524_v63 = vld [vmem:[%s27158_s1 + $0x138] sm:$0xff]   ;;  %v23919_v16 = vld [vmem:[%s27158_s1 + $0x140] sm:$0xff]   ;;  %v23923_v39 = vrot.slane %v5825_v37, 2  ;;  %v1855_v50 = vshrl.u32 %v23628_v7, 16 }
 0x119   : > { %20020 = vmatpush3.bf16.msra.mxu1 %v22504_v52  ;;  %19553 = vmatprep.subr.bf16.mxu0 %v22509_v62  ;;  %v23907_v52 = vrot.slane %v1846_v0, 1  ;;  %v5486_v15 = vsel %vm1026_vm1, %v5483_v34, %v27169_v60  ;;  %v1858_v0 = vshll.u32 %v23628_v7, 16  ;;  %v23930_v34 = vld [vmem:[%s27158_s1 + $0x140] sm:$0xff]   ;;  %v27172_v37 = vmov %v27169_v60 }
 0x11a   : > { %20021 = vmatprep.subr.bf16.mxu1 %v22510_v40  ;;  %v1864_v60 = vshrl.u32 %v23639_v58, 16 }
 0x11c   : > { %19554 = vmatpush3.bf16.msra.mxu0 %v22509_v62  ;;  %v23921_v62 = vrot.slane %v5822_v33, 1  ;;  %v27170_v33 = vrot.slane %v23692_v45, 1 }
 0x11d   : > { %20022 = vmatpush3.bf16.msra.mxu1 %v22510_v40  ;;  %19555 = vmatprep.subr.bf16.mxu0 %v22515_v56  ;;  %v5831_v40 = vshrl.u32 %v23635_v43, 16 }
 0x11e   : > { %19520 = vmatmul.mubr.bf16.gmra.mrb[12].mxu0 %v1506_v25  ;;  %20023 = vmatprep.subr.bf16.mxu1 %v22516_v61  ;;  %v1510_v7 = vsel %vm1026_vm1, %v1507_v47, %v27170_v33 }
 0x11f   : > { %19988 = vmatmul.mubr.bf16.gmra.mrb[12].mxu1 %v5484_v42  ;;  %19523 = vmatprep.mubr.bf16.mxu0 %v1508_v3  ;;  %v27173_v42 = vrot.slane %v23702_v14, 1  ;;  %v27174_v3 = vmov %v27170_v33 }
 0x120   : > { %19991 = vmatprep.mubr.bf16.mxu1 %v5486_v15  ;;  %19556 = vmatpush3.bf16.msra.mxu0 %v22515_v56  ;;  %v27171_v56 = vrot.slane %v23699_v17, 1  ;;  %v27175_v15 = vrot.slane %v23707_v23, 1 }
 0x121   : > { %20024 = vmatpush3.bf16.msra.mxu1 %v22516_v61  ;;  %19557 = vmatprep.subr.bf16.mxu0 %v22522_v32  ;;  %v1512_v43 = vsel %vm1026_vm1, %v27174_v3, %v27173_v42  ;;  %v23949_v61 = vrot.slane %v1855_v50, 1  ;;  %v23963_v50 = vrot.slane %v5834_v54, 2  ;;  %v5840_v42 = vshrl.u32 %v23646_v12, 16 }
 0x122   : > { %20025 = vmatprep.subr.bf16.mxu1 %v22524_v63  ;;  %v5488_v25 = vsel %vm1026_vm1, %v27172_v37, %v27171_v56  ;;  %v27176_v47 = vmov %v27171_v56  ;;  %v23959_v56 = vrot.slane %v1858_v0, 2  ;;  %v1867_v37 = vshll.u32 %v23639_v58, 16 }
 0x123   : > { %v5490_v33 = vsel %vm1026_vm1, %v27176_v47, %v27175_v15  ;;  %v27177_v3 = vrot.slane %v23710_v24, 1  ;;  %v27179_v0 = vrot.slane %v23715_v51, 1  ;;  %v23983_v47 = vrot.slane %v1864_v60, 1 }
 0x124   : > { %19558 = vmatpush3.bf16.msra.mxu0 %v22522_v32  ;;  %v23961_v32 = vrot.slane %v5831_v40, 1  ;;  %v27180_v40 = vmov %v27175_v15  ;;  %v1876_v60 = vshll.u32 %v23652_v26, 16 }
 0x125   : > { %20026 = vmatpush3.bf16.msra.mxu1 %v22524_v63  ;;  %19595 = vmatprep.subr.bf16.mxu0 %v23919_v16  ;;  %v5843_v63 = vshll.u32 %v23646_v12, 16  ;;  %v5492_v54 = vsel %vm1026_vm1, %v27180_v40, %v27179_v0  ;;  %v27182_v58 = vmov %v27177_v3  ;;  %v23985_v12 = vrot.slane %v1867_v37, 2 }
 0x126   : > { %19524 = vmatmul.mubr.bf16.gmra.mrb[16].mxu0 %v1510_v7  ;;  %20063 = vmatprep.subr.bf16.mxu1 %v23930_v34  ;;  %v27178_v7 = vrot.slane %v23702_v14, 1  ;;  %v5849_v37 = vshrl.u32 %v23657_v6, 16 }
 0x127   : > { %19992 = vmatmul.mubr.bf16.gmra.mrb[16].mxu1 %v5488_v25  ;;  %19527 = vmatprep.mubr.bf16.mxu0 %v1512_v43  ;;  %v27181_v43 = vrot.slane %v23718_v55, 1  ;;  %v23994_v40 = vrot.slane %v5843_v63, 2 }
 0x128   : > { %19995 = vmatprep.mubr.bf16.mxu1 %v5490_v33  ;;  %v1514_v25 = vsel %vm1026_vm1, %v27178_v7, %v27177_v3  ;;  %v27183_v33 = vrot.slane %v23723_v19, 1  ;;  %v27184_v3 = vmov %v27179_v0  ;;  %v23992_v0 = vrot.slane %v5840_v42, 1 }
 0x129   : > { %v1516_v15 = vsel %vm1026_vm1, %v27182_v58, %v27181_v43  ;;  %v5852_v43 = vshll.u32 %v23657_v6, 16  ;;  %v27185_v58 = vrot.slane %v23718_v55, 1  ;;  %v27186_v42 = vrot.slane %v23729_v48, 1 }
 0x12a   : > { %v5494_v7 = vsel %vm1026_vm1, %v27184_v3, %v27183_v33  ;;  %v27187_v63 = vmov %v27183_v33  ;;  %v1882_v6 = vshrl.u32 %v23660_v10, 16  ;;  %v1885_v33 = vshll.u32 %v23660_v10, 16 }
 0x12b   : > { %v27189_v55 = vrot.slane %v23740_v9, 1  ;;  %v27190_v3 = vmov %v27186_v42  ;;  %v24022_v19 = vrot.slane %v1873_v22, 1  ;;  %v24026_v20 = vrot.slane %v5849_v37, 1 }
 0x12c   : > { %v5861_v10 = vshll.u32 %v23663_v13, 16  ;;  %v27191_v48 = vrot.slane %v23751_v38, 1  ;;  %v27193_v22 = vrot.slane %v23760_v35, 1  ;;  %v1891_v38 = vshrl.u32 %v23666_v21, 16 }
 0x12d   : > { %v1843_v35 = vor.u32 %v23861_v36, %v23859_v27  ;;  %v1900_v36 = vshrl.u32 %v23674_v29, 16 }
 0x12e   : > { %19528 = vmatmul.mubr.bf16.gmra.mrb[20].mxu0 %v1514_v25  ;;  %v1518_v25 = vsel %vm1026_vm1, %v27185_v58, %v1517_v31  ;;  %v24024_v58 = vrot.slane %v1876_v60, 2  ;;  %v27194_v60 = vmov %v27189_v55 }
 0x12f   : > { %19996 = vmatmul.mubr.bf16.gmra.mrb[20].mxu1 %v5492_v54  ;;  %19531 = vmatprep.mubr.bf16.mxu0 %v1516_v15  ;;  %v5496_v54 = vsel %vm1026_vm1, %v27187_v63, %v27186_v42  ;;  %v27188_v15 = vrot.slane %v23732_v18, 1  ;;  %v24029_v42 = vrot.slane %v5852_v43, 2  ;;  %v5500_v37 = vsel %vm1026_vm1, %v27194_v60, %v27193_v22 }
 0x130   : > { %19999 = vmatprep.mubr.bf16.mxu1 %v5494_v7  ;;  %v5498_v7 = vsel %vm1026_vm1, %v27190_v3, %v27189_v55  ;;  %v27196_v43 = vmov %v27191_v48  ;;  %v27197_v18 = vrot.slane %v23766_v2, 1  ;;  %v27198_v55 = vmov %v27193_v22 }
 0x131   : > { %v1520_v26 = vsel %vm1026_vm1, %v1517_v31, %v27188_v15  ;;  %v5858_v31 = vshrl.u32 %v23663_v13, 16  ;;  %v24047_v13 = vrot.slane %v1882_v6, 1  ;;  %v1894_v6 = vshll.u32 %v23666_v21, 16 }
 0x132   : > { %v5502_v3 = vsel %vm1026_vm1, %v27198_v55, %v27197_v18  ;;  %v5876_v2 = vshrl.u32 %v23679_v49, 16  ;;  %v5879_v55 = vshll.u32 %v23679_v49, 16  ;;  %v5855_v49 = vor.u32 %v24029_v42, %v24026_v20 }
 0x133   : > { %v24056_v9 = vrot.slane %v5858_v31, 1  ;;  %v5811_v31 = vor.u32 %v23870_v1, %v23868_v57  ;;  %v1903_v57 = vshll.u32 %v23674_v29, 16  ;;  %v24093_v29 = vrot.slane %v1900_v36, 1 }
 0x134   : > { %v5906_v36 = vshll.u32 %v23707_v23, 16 }
 0x136   : > { %19532 = vmatmul.mubr.bf16.gmra.mrb[24].mxu0 %v1518_v25  ;;  %v27192_v25 = vmov %v27188_v15 }
 0x137   : > { %20000 = vmatmul.mubr.bf16.gmra.mrb[24].mxu1 %v5496_v54  ;;  %19535 = vmatprep.mubr.bf16.mxu0 %v1520_v26  ;;  %v1522_v63 = vsel %vm1026_vm1, %v27192_v25, %v27191_v48  ;;  %v27195_v54 = vrot.slane %v23763_v5, 1  ;;  %v24049_v26 = vrot.slane %v1885_v33, 2  ;;  %v1835_v33 = vor.u32 %v23835_v4, %v23832_v59 }
 0x138   : > { %20003 = vmatprep.mubr.bf16.mxu1 %v5498_v7  ;;  %v24058_v7 = vrot.slane %v5861_v10, 2  ;;  %v5867_v48 = vshrl.u32 %v23671_v28, 16  ;;  %v5870_v25 = vshll.u32 %v23671_v28, 16  ;;  %v5819_v10 = vor.u32 %v23877_v41, %v23875_v8 }
 0x139   : > { %v1524_v15 = vsel %vm1026_vm1, %v27196_v43, %v27195_v54  ;;  %v27200_v21 = vmov %v27195_v54  ;;  %v27201_v59 = vrot.slane %v23786_v46, 1  ;;  %v27202_v4 = vmov %v27197_v18  ;;  %v22529_v54 = vld [vmem:[%s27158_s1 + $0x148] sm:$0xff]   ;;  %v22532_v18 = vld [vmem:[%s27158_s1 + $0x150] sm:$0xff]  }
 0x13a   : > { %v1844_v28 = vsel %vm1827_vm2, %v1835_v33, %v1843_v35  ;;  %v5820_v1 = vsel %vm1827_vm2, %v5811_v31, %v5819_v10  ;;  %v1852_v5 = vor.u32 %v23909_v11, %v23907_v52  ;;  %v1896_v46 = vrot.slane %v1894_v6, 2 }
 0x13b   : > { %v5504_v27 = vsel %vm1026_vm1, %v27202_v4, %v27201_v59  ;;  %v24088_v8 = vrot.slane %v5867_v48, 1  ;;  %v5828_v41 = vor.u32 %v23923_v39, %v23921_v62  ;;  %v5872_v60 = vrot.slane %v5870_v25, 2  ;;  %v22530_v62 = vld [vmem:[%s27158_s1 + $0x148] sm:$0xff]  }
 0x13c   : > { %v5837_v52 = vor.u32 %v23963_v50, %v23961_v32  ;;  %v1853_v11 = vsel %vm1827_vm2, %v1843_v35, %v1852_v5  ;;  %v24107_v39 = vrot.slane %v1903_v57, 2  ;;  %v1870_v32 = vor.u32 %v23985_v12, %v23983_v47  ;;  %v22531_v50 = vld [vmem:[%s27158_s1 + $0x150] sm:$0xff]  }
 0x13d   : > { %v5829_v43 = vsel %vm1827_vm2, %v5819_v10, %v5828_v41  ;;  %v5885_v6 = vshrl.u32 %v23687_v30, 16  ;;  %v5846_v47 = vor.u32 %v23994_v40, %v23992_v0  ;;  %v5888_v12 = vshll.u32 %v23687_v30, 16  ;;  %v22534_v40 = vld [vmem:[%s27158_s1 + $0x158] sm:$0xff]  }
 0x13e   : > { %19536 = vmatmul.mubr.bf16.gmra.mrb[28].mxu0 %v1522_v63  ;;  %v27199_v63 = vrot.slane %v23771_v53, 1  ;;  %v1893_v53 = vrot.slane %v1891_v38, 1  ;;  %v1912_v38 = vshll.u32 %v23682_v44, 16  ;;  %v1918_v33 = vshrl.u32 %v23692_v45, 16 }
 0x13f   : > { %20004 = vmatmul.mubr.bf16.gmra.mrb[28].mxu1 %v5500_v37  ;;  %19539 = vmatprep.mubr.bf16.mxu0 %v1524_v15  ;;  %v1861_v37 = vor.u32 %v23959_v56, %v23949_v61  ;;  %v24109_v15 = vrot.slane %v5876_v2, 1  ;;  %v5838_v56 = vsel %vm1827_vm2, %v5828_v41, %v5837_v52  ;;  %v5847_v0 = vsel %vm1827_vm2, %v5837_v52, %v5846_v47  ;;  %v22538_v2 = vld [vmem:[%s27158_s1 + $0x168] sm:$0xff]  }
 0x140   : > { %20007 = vmatprep.mubr.bf16.mxu1 %v5502_v3  ;;  %v1526_v22 = vsel %vm1026_vm1, %v27200_v21, %v27199_v63  ;;  %v1909_v3 = vshrl.u32 %v23682_v44, 16  ;;  %v5856_v20 = vsel %vm1827_vm2, %v5846_v47, %v5855_v49  ;;  %v1888_v42 = vor.u32 %v24049_v26, %v24047_v13  ;;  %v22535_v13 = vld [vmem:[%s27158_s1 + $0x160] sm:$0xff]  }
 0x141   : > { %v1862_v61 = vsel %vm1827_vm2, %v1852_v5, %v1861_v37  ;;  %v1871_v44 = vsel %vm1827_vm2, %v1861_v37, %v1870_v32  ;;  %v5864_v35 = vor.u32 %v24058_v7, %v24056_v9  ;;  %v24151_v48 = vor.u32 %v1896_v46, %v1893_v53  ;;  %v22536_v7 = vld [vmem:[%s27158_s1 + $0x160] sm:$0xff]  }
 0x142   : > { %v5881_v25 = vrot.slane %v5879_v55, 2  ;;  %v1911_v31 = vrot.slane %v1909_v3, 1  ;;  %v1914_v10 = vrot.slane %v1912_v38, 2  ;;  %v5890_v63 = vrot.slane %v5888_v12, 2  ;;  %v24214_v3 = vld [vmem:[%s23108_s16 + $0x114] sm:$0xff]  }
 0x143   : > { %v24153_v21 = vrot.slane %v1918_v33, 1  ;;  %v5873_v26 = vor.u32 %v5872_v60, %v24088_v8  ;;  %v5897_v9 = vshll.u32 %v23699_v17, 16  ;;  %v1927_v4 = vshrl.u32 %v23702_v14, 16  ;;  %v22542_v33 = vld [vmem:[%s27158_s1 + $0x178] sm:$0xff]  }
 0x144   : > { %v1939_v5 = vshll.u32 %v23710_v24, 16  ;;  %v1898_v53 = vsel %vm1827_vm2, %v1888_v42, %v24151_v48  ;;  %v5912_v46 = vshrl.u32 %v23715_v51, 16  ;;  %v5882_v51 = vor.u32 %v5881_v25, %v24109_v15  ;;  %v24200_v15 = vld [vmem:[%s23108_s16 + $0x10c] sm:$0xff]  }
 0x145   : > { %v5899_v8 = vrot.slane %v5897_v9, 2  ;;  %v24188_v41 = vor.u32 %v1914_v10, %v1911_v31  ;;  %v1929_v60 = vrot.slane %v1927_v4, 1  ;;  %v5921_v38 = vshrl.u32 %v24214_v3, 16  ;;  %v24261_v4 = vld [vmem:[%s23108_s16 + $0x124] sm:$0xff]  }
 0x146   : > { %19540 = vmatmul.mubr.bf16.gmra.mrb[32].mxu0 %v1526_v22  ;;  %v5883_v47 = vsel %vm1827_vm2, %v5873_v26, %v5882_v51  ;;  %v5924_v12 = vshll.u32 %v24214_v3, 16 }
 0x147   : > { %20008 = vmatmul.mubr.bf16.gmra.mrb[32].mxu1 %v5504_v27  ;;  %19559 = vmatprep.mubr.bf16.mxu0 %v1844_v28  ;;  %v1930_v27 = vshll.u32 %v23702_v14, 16  ;;  %v5903_v28 = vshrl.u32 %v23707_v23, 16  ;;  %v22537_v14 = vld [vmem:[%s27158_s1 + $0x168] sm:$0xff]   ;;  %v5874_v23 = vsel %vm1827_vm2, %v5864_v35, %v5873_v26 }
 0x148   : > { %20027 = vmatprep.mubr.bf16.mxu1 %v5820_v1  ;;  %v1936_v1 = vshrl.u32 %v23710_v24, 16  ;;  %v1906_v24 = vor.u32 %v24107_v39, %v24093_v29  ;;  %v5908_v29 = vrot.slane %v5906_v36, 2  ;;  %v22539_v39 = vld [vmem:[%s27158_s1 + $0x170] sm:$0xff]   ;;  %v5926_v10 = vrot.slane %v5924_v12, 2 }
 0x149   : > { %v1932_v37 = vrot.slane %v1930_v27, 2  ;;  %v5905_v52 = vrot.slane %v5903_v28, 1  ;;  %v5939_v27 = vshrl.u32 %v24261_v4, 16  ;;  %v5942_v28 = vshll.u32 %v24261_v4, 16  ;;  %v24294_v12 = vld [vmem:[%s23108_s16 + $0x134] sm:$0xff]  }
 0x14a   : > { %v1907_v55 = vsel %vm1827_vm2, %v24151_v48, %v1906_v24  ;;  %v24237_v48 = vld [vmem:[%s23108_s16 + $0x11c] sm:$0xff]  }
 0x14b   : > { %v5930_v25 = vshrl.u32 %v24237_v48, 16  ;;  %v5909_v31 = vor.u32 %v5908_v29, %v5905_v52  ;;  %v5941_v52 = vrot.slane %v5939_v27, 1  ;;  %v5944_v29 = vrot.slane %v5942_v28, 2 }
 0x14e   : > { %19560 = vmatmul.mubr.bf16.vlgmr.msra.gmra.mrb[0].mxu0 %v1853_v11  ;;  %v24190_v11 = vrot.slane %v1936_v1, 1 }
 0x14f   : > { %20028 = vmatmul.mubr.bf16.vlgmr.msra.gmra.mrb[0].mxu1 %v5829_v43  ;;  %19596 = vmatpush3.bf16.msra.mxu0 %v23919_v16  ;;  %v1879_v16 = vor.u32 %v24024_v58, %v24022_v19  ;;  %v1921_v19 = vshll.u32 %v23692_v45, 16  ;;  %v5894_v58 = vshrl.u32 %v23699_v17, 16  ;;  %v5887_v45 = vrot.slane %v5885_v6, 1  ;;  %v22541_v6 = vld [vmem:[%s27158_s1 + $0x178] sm:$0xff]  }
 0x150   : > { %20064 = vmatpush3.bf16.msra.mxu1 %v23930_v34  ;;  %19563 = vmatprep.mubr.bf16.mxu0 %v1862_v61  ;;  %v22533_v34 = vld [vmem:[%s27158_s1 + $0x158] sm:$0xff]   ;;  %v5865_v17 = vsel %vm1827_vm2, %v5855_v49, %v5864_v35  ;;  %v5915_v61 = vshll.u32 %v24200_v15, 16  ;;  %v5923_v35 = vrot.slane %v5921_v38, 1 }
 0x151   : > { %20031 = vmatprep.mubr.bf16.mxu1 %v5838_v56  ;;  %19597 = vmatprep.subr.bf16.mxu0 %v22529_v54  ;;  %v1880_v30 = vsel %vm1827_vm2, %v1870_v32, %v1879_v16  ;;  %v24155_v22 = vrot.slane %v1921_v19, 2  ;;  %v24157_v59 = vrot.slane %v5894_v58, 1  ;;  %v1889_v57 = vsel %vm1827_vm2, %v1879_v16, %v1888_v42  ;;  %v24204_v56 = vld [vmem:[%s23108_s16 + $0x70] sm:$0xff]  }
 0x152   : > { %20065 = vmatprep.subr.bf16.mxu1 %v22530_v62  ;;  %v5891_v43 = vor.u32 %v5890_v63, %v5887_v45  ;;  %v1945_v32 = vshrl.u32 %v24204_v56, 16  ;;  %v1916_v16 = vsel %vm1827_vm2, %v1906_v24, %v24188_v41  ;;  %v24243_v45 = vld [vmem:[%s27158_s1 + $0x180] sm:$0xff]   ;;  %v5933_v63 = vshll.u32 %v24237_v48, 16 }
 0x153   : > { %19598 = vmatpush3.bf16.msra.mxu0 %v22529_v54  ;;  %v24192_v54 = vrot.slane %v1939_v5, 2 }
 0x154   : > { %20066 = vmatpush3.bf16.msra.mxu1 %v22530_v62  ;;  %19599 = vmatprep.subr.bf16.mxu0 %v22531_v50  ;;  %v24194_v62 = vrot.slane %v5912_v46, 1  ;;  %v5892_v49 = vsel %vm1827_vm2, %v5882_v51, %v5891_v43 }
 0x155   : > { %20067 = vmatprep.subr.bf16.mxu1 %v22532_v18 }
 0x156   : > { %19564 = vmatmul.mubr.bf16.gmra.mrb[4].mxu0 %v1871_v44  ;;  %v1924_v44 = vor.u32 %v24155_v22, %v24153_v21  ;;  %v24247_v21 = vld [vmem:[%s23108_s16 + $0x80] sm:$0xff]  }
 0x157   : > { %20032 = vmatmul.mubr.bf16.gmra.mrb[4].mxu1 %v5847_v0  ;;  %19567 = vmatprep.mubr.bf16.mxu0 %v1880_v30  ;;  %v1933_v0 = vor.u32 %v1932_v37, %v1929_v60  ;;  %v5917_v30 = vrot.slane %v5915_v61, 2  ;;  %v1963_v22 = vshrl.u32 %v24247_v21, 16 }
 0x158   : > { %20035 = vmatprep.mubr.bf16.mxu1 %v5856_v20  ;;  %19600 = vmatpush3.bf16.msra.mxu0 %v22531_v50  ;;  %v1948_v50 = vshll.u32 %v24204_v56, 16  ;;  %v1947_v20 = vrot.slane %v1945_v32, 1  ;;  %v1925_v26 = vsel %vm1827_vm2, %v24188_v41, %v1924_v44  ;;  %v24277_v41 = vld [vmem:[%s23108_s16 + $0x12c] sm:$0xff]  }
 0x159   : > { %20068 = vmatpush3.bf16.msra.mxu1 %v22532_v18  ;;  %19601 = vmatprep.subr.bf16.mxu0 %v22533_v34  ;;  %v22540_v18 = vld [vmem:[%s27158_s1 + $0x170] sm:$0xff]   ;;  %v5918_v1 = vor.u32 %v5917_v30, %v24194_v62  ;;  %v1965_v51 = vrot.slane %v1963_v22, 1  ;;  %v5948_v60 = vshrl.u32 %v24277_v41, 16 }
 0x15a   : > { %20069 = vmatprep.subr.bf16.mxu1 %v22534_v40  ;;  %v1950_v42 = vrot.slane %v1948_v50, 2  ;;  %v24290_v50 = vld [vmem:[%s23108_s16 + $0x98] ss:$0 sps:$4 sm:$0x33]  }
 0x15c   : > { %19602 = vmatpush3.bf16.msra.mxu0 %v22533_v34  ;;  %v5900_v34 = vor.u32 %v5899_v8, %v24157_v59  ;;  %v1966_v59 = vshll.u32 %v24247_v21, 16  ;;  %v1951_v46 = vor.u32 %v1950_v42, %v1947_v20  ;;  %v1993_v20 = vshll.u32 %v24290_v50, 16  ;;  %v24301_v42 = vld [vmem:[%s23108_s16 + $0x13c] ss:$0 sps:$4 sm:$0x33]  }
 0x15d   : > { %20070 = vmatpush3.bf16.msra.mxu1 %v22534_v40  ;;  %19603 = vmatprep.subr.bf16.mxu0 %v22535_v13  ;;  %v24232_v40 = vld [vmem:[%s23108_s16 + $0x78] sm:$0xff]   ;;  %v5969_v27 = vshll.u32 %v24301_v42, 16 }
 0x15e   : > { %19568 = vmatmul.mubr.bf16.gmra.mrb[8].mxu0 %v1889_v57  ;;  %20071 = vmatprep.subr.bf16.mxu1 %v22536_v7  ;;  %v1954_v19 = vshrl.u32 %v24232_v40, 16  ;;  %v1957_v58 = vshll.u32 %v24232_v40, 16  ;;  %v5901_v9 = vsel %vm1827_vm2, %v5891_v43, %v5900_v34  ;;  %v5910_v36 = vsel %vm1827_vm2, %v5900_v34, %v5909_v31 }
 0x15f   : > { %20036 = vmatmul.mubr.bf16.gmra.mrb[8].mxu1 %v5865_v17  ;;  %19571 = vmatprep.mubr.bf16.mxu0 %v1898_v53  ;;  %v1942_v57 = vor.u32 %v24192_v54, %v24190_v11  ;;  %v5932_v53 = vrot.slane %v5930_v25, 1  ;;  %v1968_v37 = vrot.slane %v1966_v59, 2  ;;  %v5951_v11 = vshll.u32 %v24277_v41, 16 }
 0x160   : > { %20039 = vmatprep.mubr.bf16.mxu1 %v5874_v23  ;;  %19604 = vmatpush3.bf16.msra.mxu0 %v22535_v13  ;;  %v24254_v13 = vld [vmem:[%s27158_s1 + $0x180] sm:$0xff]   ;;  %v1956_v5 = vrot.slane %v1954_v19, 1  ;;  %v1959_v17 = vrot.slane %v1957_v58, 2  ;;  %v24272_v23 = vld [vmem:[%s23108_s16 + $0x88] sm:$0xff]   ;;  %v5919_v43 = vsel %vm1827_vm2, %v5909_v31, %v5918_v1  ;;  %v5950_v34 = vrot.slane %v5948_v60, 1 }
 0x161   : > { %20072 = vmatpush3.bf16.msra.mxu1 %v22536_v7  ;;  %19605 = vmatprep.subr.bf16.mxu0 %v22537_v14  ;;  %v1934_v7 = vsel %vm1827_vm2, %v1924_v44, %v1933_v0  ;;  %v1972_v24 = vshrl.u32 %v24272_v23, 16  ;;  %v1975_v8 = vshll.u32 %v24272_v23, 16  ;;  %v1943_v54 = vsel %vm1827_vm2, %v1933_v0, %v1942_v57  ;;  %v22955_v60 = vld [vmem:[%s23108_s16 + $0xb0] sm:$0xf] }
 0x162   : > { %20073 = vmatprep.subr.bf16.mxu1 %v22538_v2  ;;  %v1952_v62 = vsel %vm1827_vm2, %v1942_v57, %v1951_v46  ;;  %v5945_v44 = vor.u32 %v5944_v29, %v5941_v52  ;;  %v5953_v0 = vrot.slane %v5951_v11, 2  ;;  %v1990_v58 = vshrl.u32 %v24290_v50, 16 }
 0x164   : > { %19606 = vmatpush3.bf16.msra.mxu0 %v22537_v14  ;;  %v5935_v14 = vrot.slane %v5933_v63, 2  ;;  %v1992_v57 = vrot.slane %v1990_v58, 1  ;;  %v22549_v58 = vld [vmem:[%s27158_s1 + $0x188] sm:$0xff]  }
 0x165   : > { %20074 = vmatpush3.bf16.msra.mxu1 %v22538_v2  ;;  %19607 = vmatprep.subr.bf16.mxu0 %v22539_v39  ;;  %v5927_v2 = vor.u32 %v5926_v10, %v5923_v35 }
 0x166   : > { %19572 = vmatmul.mubr.bf16.gmra.mrb[12].mxu0 %v1907_v55  ;;  %20075 = vmatprep.subr.bf16.mxu1 %v22540_v18  ;;  %v1960_v55 = vor.u32 %v1959_v17, %v1956_v5  ;;  %v5936_v38 = vor.u32 %v5935_v14, %v5932_v53  ;;  %v16686_v5 = vld [vmem:[%s23108_s16 + $0xac] sm:$0xc] }
 0x167   : > { %20040 = vmatmul.mubr.bf16.gmra.mrb[12].mxu1 %v5883_v47  ;;  %19575 = vmatprep.mubr.bf16.mxu0 %v1916_v16  ;;  %v1969_v47 = vor.u32 %v1968_v37, %v1965_v51  ;;  %v1977_v16 = vrot.slane %v1975_v8, 2  ;;  %v22954_v8 = vld [vmem:[%s23108_s16 + $0xc] sm:$0xf]  ;;  %v16703_v37 = vcombine.low %v16686_v5, %v22955_v60  ;;  %v22554_v5 = vld [vmem:[%s27158_s1 + $0x198] sm:$0xff]  }
 0x168   : > { %20043 = vmatprep.mubr.bf16.mxu1 %v5892_v49  ;;  %19608 = vmatpush3.bf16.msra.mxu0 %v22539_v39  ;;  %v24285_v39 = vld [vmem:[%s23108_s16 + $0x90] sm:$0xff]   ;;  %v5960_v49 = vshll.u32 %v24294_v12, 16  ;;  %v1961_v35 = vsel %vm1827_vm2, %v1951_v46, %v1960_v55  ;;  %v5937_v25 = vsel %vm1827_vm2, %v5927_v2, %v5936_v38  ;;  %v5946_v22 = vsel %vm1827_vm2, %v5936_v38, %v5945_v44 }
 0x169   : > { %20076 = vmatpush3.bf16.msra.mxu1 %v22540_v18  ;;  %19609 = vmatprep.subr.bf16.mxu0 %v22541_v6  ;;  %v1981_v61 = vshrl.u32 %v24285_v39, 16  ;;  %v1984_v32 = vshll.u32 %v24285_v39, 16  ;;  %v5928_v18 = vsel %vm1827_vm2, %v5918_v1, %v5927_v2  ;;  %v1970_v31 = vsel %vm1827_vm2, %v1960_v55, %v1969_v47 }
 0x16a   : > { %20077 = vmatprep.subr.bf16.mxu1 %v22542_v33  ;;  %v5962_v63 = vrot.slane %v5960_v49, 2  ;;  %v1995_v1 = vrot.slane %v1993_v20, 2 }
 0x16b   : > { %v1983_v30 = vrot.slane %v1981_v61, 1  ;;  %v1986_v19 = vrot.slane %v1984_v32, 2  ;;  %v22957_v61 = vld [vmem:[%s23108_s16 + $0xb4] sm:$0xff]  }
 0x16c   : > { %19610 = vmatpush3.bf16.msra.mxu0 %v22541_v6  ;;  %v1974_v6 = vrot.slane %v1972_v24, 1  ;;  %v5971_v24 = vrot.slane %v5969_v27, 2  ;;  %v1996_v52 = vor.u32 %v1995_v1, %v1992_v57  ;;  %v6274_v32 = vrot.slane %v22957_v61, 2  ;;  %v22965_v27 = vld [vmem:[%s23108_s16 + $0xd4] sm:$0xff]   ;;  %v22558_v61 = vld [vmem:[%s27158_s1 + $0x1a8] sm:$0xff]  }
 0x16d   : > { %20078 = vmatpush3.bf16.msra.mxu1 %v22542_v33  ;;  %19647 = vmatprep.subr.bf16.mxu0 %v24243_v45  ;;  %v5957_v33 = vshrl.u32 %v24294_v12, 16 }
 0x16e   : > { %19576 = vmatmul.mubr.bf16.gmra.mrb[16].mxu0 %v1925_v26  ;;  %20115 = vmatprep.subr.bf16.mxu1 %v24254_v13  ;;  %v1978_v59 = vor.u32 %v1977_v16, %v1974_v6  ;;  %v5954_v26 = vor.u32 %v5953_v0, %v5950_v34  ;;  %v22961_v0 = vld [vmem:[%s23108_s16 + $0xc4] sm:$0xff]  }
 0x16f   : > { %20044 = vmatmul.mubr.bf16.gmra.mrb[16].mxu1 %v5901_v9  ;;  %19579 = vmatprep.mubr.bf16.mxu0 %v1934_v7  ;;  %v5959_v10 = vrot.slane %v5957_v33, 1  ;;  %v1987_v9 = vor.u32 %v1986_v19, %v1983_v30  ;;  %v5966_v7 = vshrl.u32 %v24301_v42, 16  ;;  %v22959_v33 = vld [vmem:[%s23108_s16 + $0xbc] sm:$0xff]   ;;  %v6278_v30 = vrot.slane %v22961_v0, 2 }
 0x170   : > { %20047 = vmatprep.mubr.bf16.mxu1 %v5910_v36  ;;  %v2277_v36 = vld [vmem:[%s23108_s16 + $0x8] sm:$0xc]  ;;  %v1979_v17 = vsel %vm1827_vm2, %v1969_v47, %v1978_v59  ;;  %v5955_v53 = vsel %vm1827_vm2, %v5945_v44, %v5954_v26  ;;  %v22958_v47 = vld [vmem:[%s23108_s16 + $0x18] sm:$0xff]   ;;  %v6276_v49 = vrot.slane %v22959_v33, 2  ;;  %v22960_v44 = vld [vmem:[%s23108_s16 + $0x20] sm:$0xff]  }
 0x171   : > { %v5963_v28 = vor.u32 %v5962_v63, %v5959_v10  ;;  %v1988_v46 = vsel %vm1827_vm2, %v1978_v59, %v1987_v9  ;;  %v5968_v14 = vrot.slane %v5966_v7, 1  ;;  %v16326_v2 = vcombine.low %v2277_v36, %v22954_v8  ;;  %v22962_v10 = vld [vmem:[%s23108_s16 + $0x28] sm:$0xff]   ;;  %v22551_v7 = vld [vmem:[%s27158_s1 + $0x190] sm:$0xff]   ;;  %v22553_v36 = vld [vmem:[%s27158_s1 + $0x198] sm:$0xff]  }
 0x172   : > { %v2302_v16 = vrot.slane %v22958_v47, 2  ;;  %v2304_v34 = vrot.slane %v22960_v44, 2  ;;  %v6277_v20 = vsel %vm2298_vm3, %v6274_v32, %v6276_v49  ;;  %v2306_v63 = vrot.slane %v22962_v10, 2  ;;  %v22968_v8 = vld [vmem:[%s23108_s16 + $0x40] sm:$0xff]   ;;  %v22560_v44 = vld [vmem:[%s27158_s1 + $0x1b0] sm:$0xff]   ;;  %v22561_v0 = vld [vmem:[%s27158_s1 + $0x1b8] sm:$0xff]  }
 0x173   : > { %v5964_v51 = vsel %vm1827_vm2, %v5954_v26, %v5963_v28  ;;  %v5972_v29 = vor.u32 %v5971_v24, %v5968_v14  ;;  %v2299_v11 = vrot.slane %v16326_v2, 2  ;;  %v22964_v26 = vld [vmem:[%s23108_s16 + $0x30] sm:$0xff]   ;;  %v22967_v14 = vld [vmem:[%s23108_s16 + $0xdc] sm:$0xff]   ;;  %v2312_v2 = vrot.slane %v22968_v8, 2 }
 0x174   : > { %v6284_v24 = vrot.slane %v22967_v14, 2  ;;  %v2326_v8 = vrot.slane %v24232_v40, 2 }
 0x175   : > { %v5973_v55 = vsel %vm1827_vm2, %v5963_v28, %v5972_v29  ;;  %v6282_v28 = vrot.slane %v22965_v27, 2 }
 0x176   : > { %19580 = vmatmul.mubr.bf16.gmra.mrb[20].mxu0 %v1943_v54  ;;  %v22956_v54 = vld [vmem:[%s23108_s16 + $0x10] sm:$0xff]  }
 0x177   : > { %20048 = vmatmul.mubr.bf16.gmra.mrb[20].mxu1 %v5919_v43  ;;  %19583 = vmatprep.mubr.bf16.mxu0 %v1952_v62  ;;  %v2300_v43 = vrot.slane %v22956_v54, 2  ;;  %v6273_v62 = vrot.slane %v16703_v37, 2  ;;  %v22555_v37 = vld [vmem:[%s27158_s1 + $0x1a0] sm:$0xff]  }
 0x178   : > { %20051 = vmatprep.mubr.bf16.mxu1 %v5928_v18  ;;  %v1997_v18 = vsel %vm1827_vm2, %v1987_v9, %v1996_v52  ;;  %v2308_v9 = vrot.slane %v22964_v26, 2  ;;  %v22556_v52 = vld [vmem:[%s27158_s1 + $0x1a0] sm:$0xff]  }
 0x179   : > { %v2301_v38 = vsel %vm2298_vm3, %v2299_v11, %v2300_v43  ;;  %v6275_v6 = vsel %vm2298_vm3, %v6273_v62, %v6274_v32  ;;  %v2303_v19 = vsel %vm2298_vm3, %v2300_v43, %v2302_v16  ;;  %v6285_v11 = vsel %vm2298_vm3, %v6282_v28, %v6284_v24  ;;  %v22557_v62 = vld [vmem:[%s27158_s1 + $0x1a8] sm:$0xff]  }
 0x17a   : > { %v2309_v1 = vsel %vm2298_vm3, %v2306_v63, %v2308_v9  ;;  %v22970_v32 = vld [vmem:[%s23108_s16 + $0x48] sm:$0xff]  }
 0x17e   : > { %19584 = vmatmul.mubr.bf16.gmra.mrb[24].mxu0 %v1961_v35  ;;  %v22550_v35 = vld [vmem:[%s27158_s1 + $0x188] sm:$0xff]  }
 0x17f   : > { %20052 = vmatmul.mubr.bf16.gmra.mrb[24].mxu1 %v5937_v25  ;;  %19587 = vmatprep.mubr.bf16.mxu0 %v1970_v31  ;;  %v2305_v25 = vsel %vm2298_vm3, %v2302_v16, %v2304_v34  ;;  %v6279_v31 = vsel %vm2298_vm3, %v6276_v49, %v6278_v30  ;;  %v22973_v16 = vld [vmem:[%s23108_s16 + $0xf4] sm:$0xff]  }
 0x180   : > { %20055 = vmatprep.mubr.bf16.mxu1 %v5946_v22  ;;  %v22963_v22 = vld [vmem:[%s23108_s16 + $0xcc] sm:$0xff]   ;;  %v6290_v33 = vrot.slane %v22973_v16, 2 }
 0x181   : > { %v6280_v59 = vrot.slane %v22963_v22, 2  ;;  %v22559_v49 = vld [vmem:[%s27158_s1 + $0x1b0] sm:$0xff]  }
 0x183   : > { %v6281_v57 = vsel %vm2298_vm3, %v6278_v30, %v6280_v59 }
 0x186   : > { %19588 = vmatmul.mubr.bf16.gmra.mrb[28].mxu0 %v1979_v17  ;;  %v6283_v17 = vsel %vm2298_vm3, %v6280_v59, %v6282_v28  ;;  %v22977_v59 = vld [vmem:[%s23108_s16 + $0x104] sm:$0xff]  }
 0x187   : > { %20056 = vmatmul.mubr.bf16.gmra.mrb[28].mxu1 %v5955_v53  ;;  %19591 = vmatprep.mubr.bf16.mxu0 %v1988_v46  ;;  %v22966_v53 = vld [vmem:[%s23108_s16 + $0x38] sm:$0xff]   ;;  %v6294_v26 = vrot.slane %v22977_v59, 2  ;;  %v24499_v59 = vld [vmem:[%s23108_s16 + $0xe4] sm:$0xff]  }
 0x188   : > { %20059 = vmatprep.mubr.bf16.mxu1 %v5964_v51  ;;  %v2310_v46 = vrot.slane %v22966_v53, 2  ;;  %v22969_v51 = vld [vmem:[%s23108_s16 + $0xe4] sm:$0xff]  }
 0x189   : > { %v6286_v60 = vrot.slane %v22969_v51, 2 }
 0x18a   : > { %v2311_v29 = vsel %vm2298_vm3, %v2308_v9, %v2310_v46  ;;  %v2313_v54 = vsel %vm2298_vm3, %v2310_v46, %v2312_v2  ;;  %v24406_v9 = vld [vmem:[%s27158_s1 + $0x1c0] sm:$0xff]  }
 0x18b   : > { %v6287_v43 = vsel %vm2298_vm3, %v6284_v24, %v6286_v60 }
 0x18e   : > { %19592 = vmatmul.mubr.bf16.gmra.mrb[32].mxu0 %v1997_v18  ;;  %v2314_v18 = vrot.slane %v22970_v32, 2 }
 0x18f   : > { %20060 = vmatmul.mubr.bf16.gmra.mrb[32].mxu1 %v5973_v55  ;;  %19611 = vmatprep.mubr.bf16.mxu0 %v2301_v38  ;;  %v22971_v55 = vld [vmem:[%s23108_s16 + $0xec] sm:$0xff]  }
 0x190   : > { %20079 = vmatprep.mubr.bf16.mxu1 %v6275_v6  ;;  %v6288_v38 = vrot.slane %v22971_v55, 2  ;;  %v22972_v6 = vld [vmem:[%s23108_s16 + $0x50] sm:$0xff]   ;;  %v6308_v55 = vrot.slane %v24301_v42, 2 }
 0x191   : > { %v2316_v47 = vrot.slane %v22972_v6, 2 }
 0x192   : > { %v6289_v30 = vsel %vm2298_vm3, %v6286_v60, %v6288_v38 }
 0x196   : > { %19612 = vmatmul.mubr.bf16.vlgmr.msra.gmra.mrb[0].mxu0 %v2303_v19  ;;  %v2317_v19 = vsel %vm2298_vm3, %v2314_v18, %v2316_v47 }
 0x197   : > { %20080 = vmatmul.mubr.bf16.vlgmr.msra.gmra.mrb[0].mxu1 %v6277_v20  ;;  %19648 = vmatpush3.bf16.msra.mxu0 %v24243_v45  ;;  %v22552_v45 = vld [vmem:[%s27158_s1 + $0x190] sm:$0xff]   ;;  %v22562_v20 = vld [vmem:[%s27158_s1 + $0x1b8] sm:$0xff]  }
 0x198   : > { %20116 = vmatpush3.bf16.msra.mxu1 %v24254_v13  ;;  %19615 = vmatprep.mubr.bf16.mxu0 %v2305_v25  ;;  %v2307_v13 = vsel %vm2298_vm3, %v2304_v34, %v2306_v63  ;;  %v2315_v34 = vsel %vm2298_vm3, %v2312_v2, %v2314_v18  ;;  %v22976_v63 = vld [vmem:[%s23108_s16 + $0x60] sm:$0xff]   ;;  %v2334_v18 = vrot.slane %v24290_v50, 2 }
 0x199   : > { %20083 = vmatprep.mubr.bf16.mxu1 %v6279_v31  ;;  %19649 = vmatprep.subr.bf16.mxu0 %v22549_v58  ;;  %v22975_v31 = vld [vmem:[%s23108_s16 + $0xfc] sm:$0xff]   ;;  %v2320_v22 = vrot.slane %v22976_v63, 2 }
 0x19a   : > { %20117 = vmatprep.subr.bf16.mxu1 %v22550_v35  ;;  %v6292_v10 = vrot.slane %v22975_v31, 2  ;;  %v24489_v31 = vld [vmem:[%s23108_s16 + $0x38] sm:$0xff]  }
 0x19b   : > { %19650 = vmatpush3.bf16.msra.mxu0 %v22549_v58  ;;  %v6291_v58 = vsel %vm2298_vm3, %v6288_v38, %v6290_v33 }
 0x19c   : > { %20118 = vmatpush3.bf16.msra.mxu1 %v22550_v35  ;;  %19651 = vmatprep.subr.bf16.mxu0 %v22551_v7  ;;  %v22974_v35 = vld [vmem:[%s23108_s16 + $0x58] sm:$0xff]   ;;  %v6293_v28 = vsel %vm2298_vm3, %v6290_v33, %v6292_v10  ;;  %v24464_v33 = vld [vmem:[%s23108_s16 + $0x20] sm:$0xff]  }
 0x19d   : > { %20119 = vmatprep.subr.bf16.mxu1 %v22552_v45  ;;  %v2318_v25 = vrot.slane %v22974_v35, 2 }
 0x19e   : > { %19616 = vmatmul.mubr.bf16.gmra.mrb[4].mxu0 %v2307_v13  ;;  %v6295_v13 = vsel %vm2298_vm3, %v6292_v10, %v6294_v26  ;;  %v24492_v10 = vld [vmem:[%s23108_s16 + $0xdc] sm:$0xff]  }
 0x19f   : > { %20084 = vmatmul.mubr.bf16.gmra.mrb[4].mxu1 %v6281_v57  ;;  %19619 = vmatprep.mubr.bf16.mxu0 %v2309_v1  ;;  %v2319_v27 = vsel %vm2298_vm3, %v2316_v47, %v2318_v25  ;;  %v6296_v1 = vrot.slane %v24200_v15, 2  ;;  %v6300_v15 = vrot.slane %v24237_v48, 2  ;;  %v2330_v48 = vrot.slane %v24272_v23, 2 }
 0x1a0   : > { %20087 = vmatprep.mubr.bf16.mxu1 %v6283_v17  ;;  %19652 = vmatpush3.bf16.msra.mxu0 %v22551_v7  ;;  %v24411_v7 = vld [vmem:[%s27158_s1 + $0x1c0] sm:$0xff]   ;;  %v6298_v17 = vrot.slane %v24214_v3, 2  ;;  %v6302_v3 = vrot.slane %v24261_v4, 2  ;;  %v2332_v4 = vrot.slane %v24285_v39, 2 }
 0x1a1   : > { %20120 = vmatpush3.bf16.msra.mxu1 %v22552_v45  ;;  %19653 = vmatprep.subr.bf16.mxu0 %v22553_v36  ;;  %v2321_v45 = vsel %vm2298_vm3, %v2318_v25, %v2320_v22  ;;  %v6297_v46 = vsel %vm2298_vm3, %v6294_v26, %v6296_v1  ;;  %v24486_v25 = vld [vmem:[%s23108_s16 + $0xd4] sm:$0xff]   ;;  %v24502_v26 = vld [vmem:[%s23108_s16 + $0x48] sm:$0xff]  }
 0x1a2   : > { %20121 = vmatprep.subr.bf16.mxu1 %v22554_v5  ;;  %v6299_v24 = vsel %vm2298_vm3, %v6296_v1, %v6298_v17  ;;  %v6301_v51 = vsel %vm2298_vm3, %v6298_v17, %v6300_v15  ;;  %v6303_v40 = vsel %vm2298_vm3, %v6300_v15, %v6302_v3  ;;  %v2333_v23 = vsel %vm2298_vm3, %v2330_v48, %v2332_v4  ;;  %v22576_v17 = vld [vmem:[%s27158_s1 + $0x1c8] sm:$0xff]   ;;  %v24532_v15 = vld [vmem:[%s23108_s16 + $0xfc] sm:$0xff]  }
 0x1a3   : > { %v2335_v50 = vsel %vm2298_vm3, %v2332_v4, %v2334_v18  ;;  %v22588_v18 = vld [vmem:[%s27158_s1 + $0x1d8] sm:$0xff]  }
 0x1a4   : > { %19654 = vmatpush3.bf16.msra.mxu0 %v22553_v36  ;;  %v22978_v36 = vld [vmem:[%s23108_s16 + $0x68] sm:$0xff]  }
 0x1a5   : > { %20122 = vmatpush3.bf16.msra.mxu1 %v22554_v5  ;;  %19655 = vmatprep.subr.bf16.mxu0 %v22555_v37  ;;  %v2322_v57 = vrot.slane %v22978_v36, 2  ;;  %v2324_v5 = vrot.slane %v24204_v56, 2  ;;  %v2328_v56 = vrot.slane %v24247_v21, 2  ;;  %v6304_v21 = vrot.slane %v24277_v41, 2 }
 0x1a6   : > { %19620 = vmatmul.mubr.bf16.gmra.mrb[8].mxu0 %v2311_v29  ;;  %20123 = vmatprep.subr.bf16.mxu1 %v22556_v52  ;;  %v2616_v29 = vld [vmem:[%s23108_s16 + $0x14] sm:$0xf] }
 0x1a7   : > { %20088 = vmatmul.mubr.bf16.gmra.mrb[8].mxu1 %v6285_v11  ;;  %19623 = vmatprep.mubr.bf16.mxu0 %v2313_v54  ;;  %v2323_v53 = vsel %vm2298_vm3, %v2320_v22, %v2322_v57  ;;  %v2325_v14 = vsel %vm2298_vm3, %v2322_v57, %v2324_v5  ;;  %v2327_v2 = vsel %vm2298_vm3, %v2324_v5, %v2326_v8  ;;  %v16712_v11 = vld [vmem:[%s23108_s16 + $0xb4] sm:$0xc]  ;;  %v16713_v54 = vld [vmem:[%s23108_s16 + $0xb8] sm:$0xf]  ;;  %v24496_v22 = vld [vmem:[%s23108_s16 + $0x40] sm:$0xff]  }
 0x1a8   : > { %20091 = vmatprep.mubr.bf16.mxu1 %v6287_v43  ;;  %19656 = vmatpush3.bf16.msra.mxu0 %v22555_v37  ;;  %v2329_v60 = vsel %vm2298_vm3, %v2326_v8, %v2328_v56  ;;  %v6306_v37 = vrot.slane %v24294_v12, 2  ;;  %v2331_v43 = vsel %vm2298_vm3, %v2328_v56, %v2330_v48  ;;  %v24452_v39 = vcombine.low %v16712_v11, %v16713_v54  ;;  %v24455_v12 = vld [vmem:[%s23108_s16 + $0xbc] sm:$0xff]   ;;  %v24514_v57 = vld [vmem:[%s23108_s16 + $0x50] sm:$0xff]   ;;  %v24550_v48 = vld [vmem:[%s23108_s16 + $0x104] sm:$0xff]  }
 0x1a9   : > { %20124 = vmatpush3.bf16.msra.mxu1 %v22556_v52  ;;  %19657 = vmatprep.subr.bf16.mxu0 %v22557_v62  ;;  %v2615_v52 = vld [vmem:[%s23108_s16 + $0x10] sm:$0xc]  ;;  %v6736_v16 = vrot.slane %v24455_v12, 2  ;;  %v6744_v8 = vrot.slane %v24492_v10, 2  ;;  %v2773_v56 = vrot.slane %v24496_v22, 2  ;;  %v22587_v54 = vld [vmem:[%s27158_s1 + $0x1d8] sm:$0xff]  }
 0x1aa   : > { %20125 = vmatprep.subr.bf16.mxu1 %v22558_v61  ;;  %v24449_v32 = vcombine.low %v2615_v52, %v2616_v29  ;;  %v6307_v41 = vsel %vm2298_vm3, %v6304_v21, %v6306_v37  ;;  %v6735_v47 = vrot.slane %v24452_v39, 2  ;;  %v6309_v42 = vsel %vm2298_vm3, %v6306_v37, %v6308_v55  ;;  %v24558_v52 = vld [vmem:[%s23108_s16 + $0x10c] sm:$0xff]  }
 0x1ab   : > { %v24561_v29 = vld [vmem:[%s23108_s16 + $0x70] sm:$0xff]  }
 0x1ac   : > { %19658 = vmatpush3.bf16.msra.mxu0 %v22557_v62  ;;  %v24445_v62 = vld [vmem:[%s23108_s16 + $0x18] sm:$0xff]   ;;  %v2762_v38 = vrot.slane %v24449_v32, 2 }
 0x1ad   : > { %20126 = vmatpush3.bf16.msra.mxu1 %v22558_v61  ;;  %19659 = vmatprep.subr.bf16.mxu0 %v22559_v49  ;;  %v6305_v61 = vsel %vm2298_vm3, %v6302_v3, %v6304_v21  ;;  %v2763_v6 = vrot.slane %v24445_v62, 2  ;;  %v6746_v3 = vrot.slane %v24499_v59, 2  ;;  %v24553_v21 = vld [vmem:[%s23108_s16 + $0x68] sm:$0xff]  }
 0x1ae   : > { %19624 = vmatmul.mubr.bf16.gmra.mrb[12].mxu0 %v2315_v34  ;;  %20127 = vmatprep.subr.bf16.mxu1 %v22560_v44 }
 0x1af   : > { %20092 = vmatmul.mubr.bf16.gmra.mrb[12].mxu1 %v6289_v30  ;;  %19627 = vmatprep.mubr.bf16.mxu0 %v2317_v19  ;;  %v2764_v34 = vsel %vm2298_vm3, %v2762_v38, %v2763_v6  ;;  %v24477_v30 = vld [vmem:[%s23108_s16 + $0xcc] sm:$0xff]   ;;  %v2765_v19 = vrot.slane %v24464_v33, 2 }
 0x1b0   : > { %20095 = vmatprep.mubr.bf16.mxu1 %v6291_v58  ;;  %19660 = vmatpush3.bf16.msra.mxu0 %v22559_v49  ;;  %v24467_v49 = vld [vmem:[%s23108_s16 + $0xc4] sm:$0xff]   ;;  %v6740_v63 = vrot.slane %v24477_v30, 2 }
 0x1b1   : > { %20128 = vmatpush3.bf16.msra.mxu1 %v22560_v44  ;;  %19661 = vmatprep.subr.bf16.mxu0 %v22561_v0  ;;  %v24471_v44 = vld [vmem:[%s23108_s16 + $0x28] sm:$0xff]   ;;  %v6738_v58 = vrot.slane %v24467_v49, 2 }
 0x1b2   : > { %20129 = vmatprep.subr.bf16.mxu1 %v22562_v20  ;;  %v2767_v35 = vrot.slane %v24471_v44, 2 }
 0x1b3   : > { %v6741_v1 = vsel %vm2298_vm3, %v6738_v58, %v6740_v63 }
 0x1b4   : > { %19662 = vmatpush3.bf16.msra.mxu0 %v22561_v0  ;;  %v6737_v0 = vsel %vm2298_vm3, %v6735_v47, %v6736_v16  ;;  %v2768_v36 = vsel %vm2298_vm3, %v2765_v19, %v2767_v35  ;;  %v6754_v47 = vrot.slane %v24550_v48, 2 }
 0x1b5   : > { %20130 = vmatpush3.bf16.msra.mxu1 %v22562_v20  ;;  %19699 = vmatprep.subr.bf16.mxu0 %v24406_v9  ;;  %v24482_v20 = vld [vmem:[%s23108_s16 + $0x30] sm:$0xff]  }
 0x1b6   : > { %19628 = vmatmul.mubr.bf16.gmra.mrb[16].mxu0 %v2319_v27  ;;  %20167 = vmatprep.subr.bf16.mxu1 %v24411_v7  ;;  %v2766_v27 = vsel %vm2298_vm3, %v2763_v6, %v2765_v19  ;;  %v2769_v5 = vrot.slane %v24482_v20, 2  ;;  %v24579_v6 = vld [vmem:[%s23108_s16 + $0x78] sm:$0xff]  }
 0x1b7   : > { %20096 = vmatmul.mubr.bf16.gmra.mrb[16].mxu1 %v6293_v28  ;;  %19631 = vmatprep.mubr.bf16.mxu0 %v2321_v45  ;;  %v22575_v28 = vld [vmem:[%s27158_s1 + $0x1c8] sm:$0xff]  }
 0x1b8   : > { %20099 = vmatprep.mubr.bf16.mxu1 %v6295_v13  ;;  %v24509_v45 = vld [vmem:[%s23108_s16 + $0xec] sm:$0xff]   ;;  %v6739_v13 = vsel %vm2298_vm3, %v6736_v16, %v6738_v58  ;;  %v2770_v11 = vsel %vm2298_vm3, %v2767_v35, %v2769_v5  ;;  %v22593_v16 = vld [vmem:[%s27158_s1 + $0x1e0] sm:$0xff]  }
 0x1b9   : > { %v24593_v58 = vld [vmem:[%s23108_s16 + $0x11c] sm:$0xff]  }
 0x1ba   : > { %v24596_v35 = vld [vmem:[%s23108_s16 + $0x80] sm:$0xff]  }
 0x1be   : > { %19632 = vmatmul.mubr.bf16.gmra.mrb[20].mxu0 %v2323_v53  ;;  %v24522_v53 = vld [vmem:[%s23108_s16 + $0xf4] sm:$0xff]  }
 0x1bf   : > { %20100 = vmatmul.mubr.bf16.gmra.mrb[20].mxu1 %v6297_v46  ;;  %19635 = vmatprep.mubr.bf16.mxu0 %v2325_v14  ;;  %v24525_v46 = vld [vmem:[%s23108_s16 + $0x58] sm:$0xff]   ;;  %v6742_v14 = vrot.slane %v24486_v25, 2  ;;  %v6750_v4 = vrot.slane %v24522_v53, 2 }
 0x1c0   : > { %20103 = vmatprep.mubr.bf16.mxu1 %v6299_v24  ;;  %v2771_v24 = vrot.slane %v24489_v31, 2  ;;  %v2779_v37 = vrot.slane %v24525_v46, 2 }
 0x1c1   : > { %v6745_v55 = vsel %vm2298_vm3, %v6742_v14, %v6744_v8 }
 0x1c6   : > { %19636 = vmatmul.mubr.bf16.gmra.mrb[24].mxu0 %v2327_v2  ;;  %v22582_v2 = vld [vmem:[%s27158_s1 + $0x1d0] sm:$0xff]  }
 0x1c7   : > { %20104 = vmatmul.mubr.bf16.gmra.mrb[24].mxu1 %v6301_v51  ;;  %19639 = vmatprep.mubr.bf16.mxu0 %v2329_v60  ;;  %v2775_v51 = vrot.slane %v24502_v26, 2  ;;  %v24545_v60 = vld [vmem:[%s23108_s16 + $0x60] sm:$0xff]  }
 0x1c8   : > { %20107 = vmatprep.mubr.bf16.mxu1 %v6303_v40  ;;  %v2777_v40 = vrot.slane %v24514_v57, 2  ;;  %v2781_v38 = vrot.slane %v24545_v60, 2 }
 0x1ce   : > { %19640 = vmatmul.mubr.bf16.gmra.mrb[28].mxu0 %v2331_v43  ;;  %v6752_v43 = vrot.slane %v24532_v15, 2 }
 0x1cf   : > { %20108 = vmatmul.mubr.bf16.gmra.mrb[28].mxu1 %v6305_v61  ;;  %19643 = vmatprep.mubr.bf16.mxu0 %v2333_v23  ;;  %v24569_v61 = vld [vmem:[%s23108_s16 + $0x114] sm:$0xff]   ;;  %v6743_v23 = vsel %vm2298_vm3, %v6740_v63, %v6742_v14  ;;  %v24599_v63 = vld [vmem:[%s23108_s16 + $0x124] sm:$0xff]   ;;  %v2776_v14 = vsel %vm2298_vm3, %v2773_v56, %v2775_v51 }
 0x1d0   : > { %20111 = vmatprep.mubr.bf16.mxu1 %v6307_v41  ;;  %v2772_v41 = vsel %vm2298_vm3, %v2769_v5, %v2771_v24  ;;  %v6758_v19 = vrot.slane %v24569_v61, 2  ;;  %v24613_v5 = vld [vmem:[%s23108_s16 + $0x90] sm:$0xff]  }
 0x1d6   : > { %19644 = vmatmul.mubr.bf16.gmra.mrb[32].mxu0 %v2335_v50  ;;  %v2783_v50 = vrot.slane %v24553_v21, 2 }
 0x1d7   : > { %20112 = vmatmul.mubr.bf16.gmra.mrb[32].mxu1 %v6309_v42  ;;  %19663 = vmatprep.mubr.bf16.mxu0 %v2764_v34  ;;  %v6756_v42 = vrot.slane %v24558_v52, 2  ;;  %v2785_v34 = vrot.slane %v24561_v29, 2 }
 0x1d8   : > { %20131 = vmatprep.mubr.bf16.mxu1 %v6737_v0  ;;  %v22594_v0 = vld [vmem:[%s27158_s1 + $0x1e0] sm:$0xff]  }
 0x1de   : > { %19664 = vmatmul.mubr.bf16.vlgmr.msra.gmra.mrb[0].mxu0 %v2766_v27  ;;  %v24602_v27 = vld [vmem:[%s23108_s16 + $0x88] sm:$0xff]  }
 0x1df   : > { %20132 = vmatmul.mubr.bf16.vlgmr.msra.gmra.mrb[0].mxu1 %v6739_v13  ;;  %19700 = vmatpush3.bf16.msra.mxu0 %v24406_v9  ;;  %v22581_v9 = vld [vmem:[%s27158_s1 + $0x1d0] sm:$0xff]  }
 0x1e0   : > { %20168 = vmatpush3.bf16.msra.mxu1 %v24411_v7  ;;  %19667 = vmatprep.mubr.bf16.mxu0 %v2768_v36  ;;  %v6748_v7 = vrot.slane %v24509_v45, 2  ;;  %v24606_v13 = vld [vmem:[%s23108_s16 + $0x12c] sm:$0xff]   ;;  %v2774_v36 = vsel %vm2298_vm3, %v2771_v24, %v2773_v56  ;;  %v24624_v24 = vld [vmem:[%s23108_s16 + $0x134] sm:$0xff]   ;;  %v6762_v56 = vrot.slane %v24599_v63, 2 }
 0x1e1   : > { %20135 = vmatprep.mubr.bf16.mxu1 %v6741_v1  ;;  %19701 = vmatprep.subr.bf16.mxu0 %v22575_v28  ;;  %v22599_v1 = vld [vmem:[%s27158_s1 + $0x1e8] sm:$0xff]  }
 0x1e2   : > { %20169 = vmatprep.subr.bf16.mxu1 %v22576_v17 }
 0x1e3   : > { %19702 = vmatpush3.bf16.msra.mxu0 %v22575_v28  ;;  %v2787_v28 = vrot.slane %v24579_v6, 2 }
 0x1e4   : > { %20170 = vmatpush3.bf16.msra.mxu1 %v22576_v17  ;;  %19703 = vmatprep.subr.bf16.mxu0 %v22581_v9  ;;  %v6747_v17 = vsel %vm2298_vm3, %v6744_v8, %v6746_v3  ;;  %v2789_v8 = vrot.slane %v24596_v35, 2 }
 0x1e5   : > { %20171 = vmatprep.subr.bf16.mxu1 %v22582_v2 }
 0x1e6   : > { %19668 = vmatmul.mubr.bf16.gmra.mrb[4].mxu0 %v2770_v11  ;;  %v6749_v11 = vsel %vm2298_vm3, %v6746_v3, %v6748_v7  ;;  %v22606_v3 = vld [vmem:[%s27158_s1 + $0x1f0] sm:$0xff]  }
 0x1e7   : > { %20136 = vmatmul.mubr.bf16.gmra.mrb[4].mxu1 %v6743_v23  ;;  %19671 = vmatprep.mubr.bf16.mxu0 %v2772_v41  ;;  %v2791_v23 = vrot.slane %v24602_v27, 2  ;;  %v6764_v41 = vrot.slane %v24606_v13, 2 }
 0x1e8   : > { %20139 = vmatprep.mubr.bf16.mxu1 %v6745_v55  ;;  %19704 = vmatpush3.bf16.msra.mxu0 %v22581_v9  ;;  %v22600_v9 = vld [vmem:[%s27158_s1 + $0x1e8] sm:$0xff]   ;;  %v6753_v55 = vsel %vm2298_vm3, %v6750_v4, %v6752_v43 }
 0x1e9   : > { %20172 = vmatpush3.bf16.msra.mxu1 %v22582_v2  ;;  %19705 = vmatprep.subr.bf16.mxu0 %v22587_v54  ;;  %v6760_v2 = vrot.slane %v24593_v58, 2 }
 0x1ea   : > { %20173 = vmatprep.subr.bf16.mxu1 %v22588_v18 }
 0x1ec   : > { %19706 = vmatpush3.bf16.msra.mxu0 %v22587_v54  ;;  %v22605_v54 = vld [vmem:[%s27158_s1 + $0x1f0] sm:$0xff]  }
 0x1ed   : > { %20174 = vmatpush3.bf16.msra.mxu1 %v22588_v18  ;;  %19707 = vmatprep.subr.bf16.mxu0 %v22593_v16  ;;  %v24640_v18 = vld [vmem:[%s23108_s16 + $0x98] sm:$0xff]  }
 0x1ee   : > { %19672 = vmatmul.mubr.bf16.gmra.mrb[8].mxu0 %v2774_v36  ;;  %20175 = vmatprep.subr.bf16.mxu1 %v22594_v0 }
 0x1ef   : > { %20140 = vmatmul.mubr.bf16.gmra.mrb[8].mxu1 %v6747_v17  ;;  %19675 = vmatprep.mubr.bf16.mxu0 %v2776_v14  ;;  %v24645_v17 = vld [vmem:[%s23108_s16 + $0x13c] sm:$0xff]   ;;  %v6751_v14 = vsel %vm2298_vm3, %v6748_v7, %v6750_v4 }
 0x1f0   : > { %20143 = vmatprep.mubr.bf16.mxu1 %v6749_v11  ;;  %19708 = vmatpush3.bf16.msra.mxu0 %v22593_v16  ;;  %v2778_v16 = vsel %vm2298_vm3, %v2775_v51, %v2777_v40  ;;  %v2780_v11 = vsel %vm2298_vm3, %v2777_v40, %v2779_v37  ;;  %v22614_v51 = vld [vmem:[%s27158_s1 + $0x1f8] sm:$0xff]   ;;  %v24675_v7 = vld [vmem:[%s23108_s16 + $0xa0] ss:$0 sps:$4 sm:$0x33]   ;;  %v6768_v36 = vrot.slane %v24645_v17, 2 }
 0x1f1   : > { %20176 = vmatpush3.bf16.msra.mxu1 %v22594_v0  ;;  %19709 = vmatprep.subr.bf16.mxu0 %v22599_v1  ;;  %v22612_v0 = vld [vmem:[%s27158_s1 + $0x1f8] sm:$0xff]   ;;  %v24678_v40 = vld [vmem:[%s23108_s16 + $0x144] ss:$0 sps:$4 sm:$0x33]  }
 0x1f2   : > { %20177 = vmatprep.subr.bf16.mxu1 %v22600_v9  ;;  %v24689_v4 = vld [vmem:[%s27158_s1 + $0x200] sm:$0xff]  }
 0x1f4   : > { %19710 = vmatpush3.bf16.msra.mxu0 %v22599_v1  ;;  %v24683_v1 = vld [vmem:[%s27158_s1 + $0x200] sm:$0xff]  }
 0x1f5   : > { %20178 = vmatpush3.bf16.msra.mxu1 %v22600_v9  ;;  %19711 = vmatprep.subr.bf16.mxu0 %v22605_v54  ;;  %v2782_v9 = vsel %vm2298_vm3, %v2779_v37, %v2781_v38  ;;  %v6757_v37 = vsel %vm2298_vm3, %v6754_v47, %v6756_v42 }
 0x1f6   : > { %19676 = vmatmul.mubr.bf16.gmra.mrb[12].mxu0 %v2778_v16  ;;  %20179 = vmatprep.subr.bf16.mxu1 %v22606_v3 }
 0x1f7   : > { %20144 = vmatmul.mubr.bf16.gmra.mrb[12].mxu1 %v6751_v14  ;;  %19679 = vmatprep.mubr.bf16.mxu0 %v2780_v11  ;;  %v3112_v14 = vshll.u32 %v24445_v62, 16  ;;  %v7072_v11 = vshrl.u32 %v24452_v39, 16 }
 0x1f8   : > { %20147 = vmatprep.mubr.bf16.mxu1 %v6753_v55  ;;  %19712 = vmatpush3.bf16.msra.mxu0 %v22605_v54  ;;  %v6755_v54 = vsel %vm2298_vm3, %v6752_v43, %v6754_v47  ;;  %v2797_v55 = vrot.slane %v24675_v7, 2  ;;  %v3101_v43 = vshrl.u32 %v24449_v32, 16  ;;  %v7075_v47 = vshll.u32 %v24452_v39, 16 }
 0x1f9   : > { %20180 = vmatpush3.bf16.msra.mxu1 %v22606_v3  ;;  %19713 = vmatprep.subr.bf16.mxu0 %v22612_v0  ;;  %v2784_v3 = vsel %vm2298_vm3, %v2781_v38, %v2783_v50  ;;  %v3104_v38 = vshll.u32 %v24449_v32, 16  ;;  %v6759_v32 = vsel %vm2298_vm3, %v6756_v42, %v6758_v19  ;;  %v7080_v39 = vshrl.u32 %v24455_v12, 16 }
 0x1fa   : > { %20181 = vmatprep.subr.bf16.mxu1 %v22614_v51  ;;  %v7074_v16 = vrot.slane %v7072_v11, 2  ;;  %v7089_v11 = vshrl.u32 %v24467_v49, 16 }
 0x1fc   : > { %19714 = vmatpush3.bf16.msra.mxu0 %v22612_v0  ;;  %v3109_v0 = vshrl.u32 %v24445_v62, 16  ;;  %v2788_v62 = vsel %vm2298_vm3, %v2785_v34, %v2787_v28 }
 0x1fd   : > { %20182 = vmatpush3.bf16.msra.mxu1 %v22614_v51  ;;  %19751 = vmatprep.subr.bf16.mxu0 %v24683_v1  ;;  %v2786_v51 = vsel %vm2298_vm3, %v2783_v50, %v2785_v34  ;;  %v6761_v50 = vsel %vm2298_vm3, %v6758_v19, %v6760_v2  ;;  %v7077_v34 = vrot.slane %v7075_v47, 3  ;;  %v6763_v19 = vsel %vm2298_vm3, %v6760_v2, %v6762_v56 }
 0x1fe   : > { %19680 = vmatmul.mubr.bf16.gmra.mrb[16].mxu0 %v2782_v9  ;;  %20219 = vmatprep.subr.bf16.mxu1 %v24689_v4  ;;  %v3103_v9 = vrot.slane %v3101_v43, 2  ;;  %v3111_v42 = vrot.slane %v3109_v0, 2  ;;  %v2790_v43 = vsel %vm2298_vm3, %v2787_v28, %v2789_v8  ;;  %v3121_v0 = vshll.u32 %v24464_v33, 16 }
 0x1ff   : > { %20148 = vmatmul.mubr.bf16.gmra.mrb[16].mxu1 %v6755_v54  ;;  %19683 = vmatprep.mubr.bf16.mxu0 %v2784_v3  ;;  %v3106_v54 = vrot.slane %v3104_v38, 3  ;;  %v3114_v3 = vrot.slane %v3112_v14, 3  ;;  %v3118_v38 = vshrl.u32 %v24464_v33, 16  ;;  %v6765_v28 = vsel %vm2298_vm3, %v6762_v56, %v6764_v41 }
 0x200   : > { %20151 = vmatprep.mubr.bf16.mxu1 %v6757_v37  ;;  %v7083_v37 = vshll.u32 %v24455_v12, 16  ;;  %v2792_v12 = vsel %vm2298_vm3, %v2789_v8, %v2791_v23  ;;  %v7082_v2 = vrot.slane %v7080_v39, 2  ;;  %v7092_v47 = vshll.u32 %v24467_v49, 16 }
 0x201   : > { %v3120_v8 = vrot.slane %v3118_v38, 2  ;;  %v27203_v33 = vrot.slane %v24613_v5, 2  ;;  %v27204_v56 = vrot.slane %v24624_v24, 2  ;;  %v27205_v39 = vrot.slane %v24640_v18, 2 }
 0x202   : > { %v7085_v14 = vrot.slane %v7083_v37, 3  ;;  %v7091_v37 = vrot.slane %v7089_v11, 2  ;;  %v7098_v38 = vshrl.u32 %v24477_v30, 16  ;;  %v3115_v11 = vor.u32 %v3114_v3, %v3111_v42 }
 0x203   : > { %v27206_v49 = vmov %v27203_v33  ;;  %v3139_v42 = vshll.u32 %v24482_v20, 16 }
 0x204   : > { %v7100_v3 = vrot.slane %v7098_v38, 2 }
 0x206   : > { %19684 = vmatmul.mubr.bf16.gmra.mrb[20].mxu0 %v2786_v51  ;;  %v3123_v51 = vrot.slane %v3121_v0, 3  ;;  %v7101_v0 = vshll.u32 %v24477_v30, 16 }
 0x207   : > { %20152 = vmatmul.mubr.bf16.gmra.mrb[20].mxu1 %v6759_v32  ;;  %19687 = vmatprep.mubr.bf16.mxu0 %v2788_v62  ;;  %v2794_v32 = vsel %vm2298_vm3, %v2791_v23, %v27203_v33  ;;  %v6767_v62 = vsel %vm2298_vm3, %v6764_v41, %v27204_v56  ;;  %v3130_v41 = vshll.u32 %v24471_v44, 16 }
 0x208   : > { %20155 = vmatprep.mubr.bf16.mxu1 %v6761_v50  ;;  %v2796_v50 = vsel %vm2298_vm3, %v27206_v49, %v27205_v39  ;;  %v7078_v39 = vor.u32 %v7077_v34, %v7074_v16  ;;  %v7086_v49 = vor.u32 %v7085_v14, %v7082_v2  ;;  %v7103_v7 = vrot.slane %v7101_v0, 3 }
 0x209   : > { %v3124_v34 = vor.u32 %v3123_v51, %v3120_v8  ;;  %v3148_v14 = vshll.u32 %v24489_v31, 16 }
 0x20a   : > { %v7087_v16 = vsel %vm3099_vm4, %v7078_v39, %v7086_v49  ;;  %v3154_v39 = vshrl.u32 %v24496_v22, 16 }
 0x20b   : > { %v3125_v8 = vsel %vm3099_vm4, %v3115_v11, %v3124_v34 }
 0x20e   : > { %19688 = vmatmul.mubr.bf16.gmra.mrb[24].mxu0 %v2790_v43  ;;  %v3127_v43 = vshrl.u32 %v24471_v44, 16  ;;  %v27209_v44 = vrot.slane %v24678_v40, 2  ;;  %v7110_v40 = vshll.u32 %v24486_v25, 16 }
 0x20f   : > { %20156 = vmatmul.mubr.bf16.gmra.mrb[24].mxu1 %v6763_v19  ;;  %19691 = vmatprep.mubr.bf16.mxu0 %v2792_v12  ;;  %v27207_v19 = vmov %v27204_v56  ;;  %v7094_v12 = vrot.slane %v7092_v47, 3  ;;  %v3136_v56 = vshrl.u32 %v24482_v20, 16  ;;  %v7116_v20 = vshrl.u32 %v24492_v10, 16 }
 0x210   : > { %20159 = vmatprep.mubr.bf16.mxu1 %v6765_v28  ;;  %v6769_v23 = vsel %vm2298_vm3, %v27207_v19, %v6768_v36  ;;  %v3107_v28 = vor.u32 %v3106_v54, %v3103_v9  ;;  %v3129_v33 = vrot.slane %v3127_v43, 2  ;;  %v6771_v30 = vsel %vm2298_vm3, %v6768_v36, %v27209_v44 }
 0x211   : > { %v3132_v54 = vrot.slane %v3130_v41, 3  ;;  %v7095_v2 = vor.u32 %v7094_v12, %v7091_v37  ;;  %v3145_v36 = vshrl.u32 %v24489_v31, 16  ;;  %v7104_v43 = vor.u32 %v7103_v7, %v7100_v3  ;;  %v22619_v31 = vld [vmem:[%s27158_s1 + $0x208] sm:$0xff]  }
 0x212   : > { %v3116_v9 = vsel %vm3099_vm4, %v3107_v28, %v3115_v11  ;;  %v3138_v19 = vrot.slane %v3136_v56, 2  ;;  %v7112_v41 = vrot.slane %v7110_v40, 3  ;;  %v3150_v37 = vrot.slane %v3148_v14, 3  ;;  %v22620_v11 = vld [vmem:[%s27158_s1 + $0x208] sm:$0xff]  }
 0x213   : > { %v3147_v38 = vrot.slane %v3145_v36, 2  ;;  %v7118_v0 = vrot.slane %v7116_v20, 2  ;;  %v7128_v44 = vshll.u32 %v24499_v59, 16  ;;  %v3156_v3 = vrot.slane %v3154_v39, 2 }
 0x214   : > { %v3172_v20 = vshrl.u32 %v24514_v57, 16 }
 0x216   : > { %19692 = vmatmul.mubr.bf16.gmra.mrb[28].mxu0 %v2794_v32  ;;  %v27208_v32 = vrot.slane %v24640_v18, 2 }
 0x217   : > { %20160 = vmatmul.mubr.bf16.gmra.mrb[28].mxu1 %v6767_v62  ;;  %19695 = vmatprep.mubr.bf16.mxu0 %v2796_v50  ;;  %v3133_v62 = vor.u32 %v3132_v54, %v3129_v33  ;;  %v7119_v50 = vshll.u32 %v24492_v10, 16  ;;  %v7105_v10 = vsel %vm3099_vm4, %v7095_v2, %v7104_v43 }
 0x218   : > { %20163 = vmatprep.mubr.bf16.mxu1 %v6769_v23  ;;  %v2798_v47 = vsel %vm2298_vm3, %v27208_v32, %v2797_v55  ;;  %v7107_v55 = vshrl.u32 %v24486_v25, 16  ;;  %v3141_v23 = vrot.slane %v3139_v42, 3  ;;  %v7096_v25 = vsel %vm3099_vm4, %v7086_v49, %v7095_v2 }
 0x219   : > { %v3134_v12 = vsel %vm3099_vm4, %v3124_v34, %v3133_v62  ;;  %v7121_v28 = vrot.slane %v7119_v50, 3  ;;  %v3157_v49 = vshll.u32 %v24496_v22, 16  ;;  %v7125_v32 = vshrl.u32 %v24499_v59, 16  ;;  %v22622_v22 = vld [vmem:[%s27158_s1 + $0x210] sm:$0xff]  }
 0x21a   : > { %v7109_v51 = vrot.slane %v7107_v55, 2  ;;  %v3142_v33 = vor.u32 %v3141_v23, %v3138_v19  ;;  %v7137_v42 = vshll.u32 %v24509_v45, 16  ;;  %v7130_v55 = vrot.slane %v7128_v44, 3 }
 0x21b   : > { %v7122_v54 = vor.u32 %v7121_v28, %v7118_v0  ;;  %v3159_v7 = vrot.slane %v3157_v49, 3  ;;  %v3175_v50 = vshll.u32 %v24514_v57, 16  ;;  %v7143_v23 = vshrl.u32 %v24522_v53, 16  ;;  %v22626_v28 = vld [vmem:[%s27158_s1 + $0x220] sm:$0xff]  }
 0x21c   : > { %v7113_v56 = vor.u32 %v7112_v41, %v7109_v51  ;;  %v3143_v59 = vsel %vm3099_vm4, %v3133_v62, %v3142_v33  ;;  %v7139_v14 = vrot.slane %v7137_v42, 3  ;;  %v22623_v62 = vld [vmem:[%s27158_s1 + $0x218] sm:$0xff]  }
 0x21d   : > { %v3160_v19 = vor.u32 %v3159_v7, %v3156_v3  ;;  %v3177_v0 = vrot.slane %v3175_v50, 3  ;;  %v3202_v3 = vshll.u32 %v24553_v21, 16 }
 0x21e   : > { %19696 = vmatmul.mubr.bf16.gmra.mrb[32].mxu0 %v2798_v47  ;;  %v3151_v47 = vor.u32 %v3150_v37, %v3147_v38  ;;  %v7123_v36 = vsel %vm3099_vm4, %v7113_v56, %v7122_v54  ;;  %v3184_v38 = vshll.u32 %v24525_v46, 16  ;;  %v7152_v37 = vshrl.u32 %v24532_v15, 16 }
 0x21f   : > { %20164 = vmatmul.mubr.bf16.gmra.mrb[32].mxu1 %v6771_v30  ;;  %19715 = vmatprep.mubr.bf16.mxu0 %v3116_v9  ;;  %v22621_v30 = vld [vmem:[%s27158_s1 + $0x210] sm:$0xff]   ;;  %v3163_v9 = vshrl.u32 %v24502_v26, 16 }
 0x220   : > { %20183 = vmatprep.mubr.bf16.mxu1 %v7087_v16  ;;  %v7114_v16 = vsel %vm3099_vm4, %v7104_v43, %v7113_v56  ;;  %v3152_v34 = vsel %vm3099_vm4, %v3142_v33, %v3151_v47  ;;  %v22624_v43 = vld [vmem:[%s27158_s1 + $0x218] sm:$0xff]   ;;  %v3186_v39 = vrot.slane %v3184_v38, 3  ;;  %v7182_v38 = vshll.u32 %v24569_v61, 16 }
 0x221   : > { %v3165_v40 = vrot.slane %v3163_v9, 2  ;;  %v22628_v9 = vld [vmem:[%s27158_s1 + $0x228] sm:$0xff]  }
 0x226   : > { %19716 = vmatmul.mubr.bf16.vlgmr.msra.gmra.mrb[0].mxu0 %v3125_v8  ;;  %v7146_v8 = vshll.u32 %v24522_v53, 16  ;;  %v3174_v53 = vrot.slane %v3172_v20, 2 }
 0x227   : > { %20184 = vmatmul.mubr.bf16.vlgmr.msra.gmra.mrb[0].mxu1 %v7096_v25  ;;  %19752 = vmatpush3.bf16.msra.mxu0 %v24683_v1  ;;  %v3166_v1 = vshll.u32 %v24502_v26, 16  ;;  %v7127_v26 = vrot.slane %v7125_v32, 2  ;;  %v3181_v25 = vshrl.u32 %v24525_v46, 16  ;;  %v3161_v46 = vsel %vm3099_vm4, %v3151_v47, %v3160_v19 }
 0x228   : > { %20220 = vmatpush3.bf16.msra.mxu1 %v24689_v4  ;;  %19719 = vmatprep.mubr.bf16.mxu0 %v3134_v12  ;;  %v7134_v4 = vshrl.u32 %v24509_v45, 16  ;;  %v7155_v12 = vshll.u32 %v24532_v15, 16  ;;  %v7148_v33 = vrot.slane %v7146_v8, 3  ;;  %v7154_v32 = vrot.slane %v7152_v37, 2 }
 0x229   : > { %20187 = vmatprep.mubr.bf16.mxu1 %v7105_v10  ;;  %19753 = vmatprep.subr.bf16.mxu0 %v22619_v31  ;;  %v3168_v2 = vrot.slane %v3166_v1, 3  ;;  %v7131_v51 = vor.u32 %v7130_v55, %v7127_v26  ;;  %v7145_v10 = vrot.slane %v7143_v23, 2  ;;  %v3183_v15 = vrot.slane %v3181_v25, 2 }
 0x22a   : > { %20221 = vmatprep.subr.bf16.mxu1 %v22620_v11  ;;  %v7136_v45 = vrot.slane %v7134_v4, 2  ;;  %v7157_v44 = vrot.slane %v7155_v12, 3  ;;  %v3178_v47 = vor.u32 %v3177_v0, %v3174_v53  ;;  %v7161_v4 = vshrl.u32 %v24550_v48, 16 }
 0x22b   : > { %19754 = vmatpush3.bf16.msra.mxu0 %v22619_v31  ;;  %v3169_v41 = vor.u32 %v3168_v2, %v3165_v40  ;;  %v22625_v31 = vld [vmem:[%s27158_s1 + $0x220] sm:$0xff]   ;;  %v7149_v1 = vor.u32 %v7148_v33, %v7145_v10  ;;  %v3187_v42 = vor.u32 %v3186_v39, %v3183_v15  ;;  %v7170_v26 = vshrl.u32 %v24558_v52, 16 }
 0x22c   : > { %20222 = vmatpush3.bf16.msra.mxu1 %v22620_v11  ;;  %19755 = vmatprep.subr.bf16.mxu0 %v22621_v30  ;;  %v7140_v57 = vor.u32 %v7139_v14, %v7136_v45  ;;  %v7132_v11 = vsel %vm3099_vm4, %v7122_v54, %v7131_v51  ;;  %v3190_v54 = vshrl.u32 %v24545_v60, 16  ;;  %v7158_v7 = vor.u32 %v7157_v44, %v7154_v32 }
 0x22d   : > { %20223 = vmatprep.subr.bf16.mxu1 %v22622_v22  ;;  %v3170_v56 = vsel %vm3099_vm4, %v3160_v19, %v3169_v41  ;;  %v3179_v55 = vsel %vm3099_vm4, %v3169_v41, %v3178_v47  ;;  %v3188_v45 = vsel %vm3099_vm4, %v3178_v47, %v3187_v42  ;;  %v7172_v50 = vrot.slane %v7170_v26, 2  ;;  %v22631_v19 = vld [vmem:[%s27158_s1 + $0x238] sm:$0xff]  }
 0x22e   : > { %19720 = vmatmul.mubr.bf16.gmra.mrb[4].mxu0 %v3143_v59  ;;  %v7141_v49 = vsel %vm3099_vm4, %v7131_v51, %v7140_v57  ;;  %v7164_v59 = vshll.u32 %v24550_v48, 16  ;;  %v22630_v48 = vld [vmem:[%s27158_s1 + $0x230] sm:$0xff]   ;;  %v3192_v40 = vrot.slane %v3190_v54, 2  ;;  %v7159_v20 = vsel %vm3099_vm4, %v7149_v1, %v7158_v7  ;;  %v22632_v51 = vld [vmem:[%s27158_s1 + $0x238] sm:$0xff]  }
 0x22f   : > { %20188 = vmatmul.mubr.bf16.gmra.mrb[4].mxu1 %v7114_v16  ;;  %19723 = vmatprep.mubr.bf16.mxu0 %v3152_v34  ;;  %v3199_v16 = vshrl.u32 %v24553_v21, 16  ;;  %v7173_v34 = vshll.u32 %v24558_v52, 16  ;;  %v7150_v21 = vsel %vm3099_vm4, %v7140_v57, %v7149_v1  ;;  %v3208_v23 = vshrl.u32 %v24561_v29, 16 }
 0x230   : > { %20191 = vmatprep.mubr.bf16.mxu1 %v7123_v36  ;;  %19756 = vmatpush3.bf16.msra.mxu0 %v22621_v30  ;;  %v22627_v30 = vld [vmem:[%s27158_s1 + $0x228] sm:$0xff]   ;;  %v7163_v36 = vrot.slane %v7161_v4, 2  ;;  %v7166_v52 = vrot.slane %v7164_v59, 3  ;;  %v3211_v8 = vshll.u32 %v24561_v29, 16  ;;  %v7179_v25 = vshrl.u32 %v24569_v61, 16 }
 0x231   : > { %20224 = vmatpush3.bf16.msra.mxu1 %v22622_v22  ;;  %19757 = vmatprep.subr.bf16.mxu0 %v22623_v62  ;;  %v3193_v22 = vshll.u32 %v24545_v60, 16  ;;  %v22629_v60 = vld [vmem:[%s27158_s1 + $0x230] sm:$0xff]   ;;  %v3201_v14 = vrot.slane %v3199_v16, 2  ;;  %v3217_v12 = vshrl.u32 %v24579_v6, 16  ;;  %v7188_v53 = vshrl.u32 %v24593_v58, 16 }
 0x232   : > { %20225 = vmatprep.subr.bf16.mxu1 %v22624_v43  ;;  %v7167_v57 = vor.u32 %v7166_v52, %v7163_v36  ;;  %v7191_v0 = vshll.u32 %v24593_v58, 16  ;;  %v3210_v61 = vrot.slane %v3208_v23, 2  ;;  %v7181_v33 = vrot.slane %v7179_v25, 2 }
 0x233   : > { %v3195_v2 = vrot.slane %v3193_v22, 3  ;;  %v3219_v15 = vrot.slane %v3217_v12, 2  ;;  %v7190_v32 = vrot.slane %v7188_v53, 2  ;;  %v3229_v1 = vshll.u32 %v24596_v35, 16 }
 0x234   : > { %19758 = vmatpush3.bf16.msra.mxu0 %v22623_v62  ;;  %v3204_v62 = vrot.slane %v3202_v3, 3  ;;  %v7168_v58 = vsel %vm3099_vm4, %v7158_v7, %v7167_v57  ;;  %v7193_v44 = vrot.slane %v7191_v0, 3  ;;  %v7197_v54 = vshrl.u32 %v24599_v63, 16 }
 0x235   : > { %20226 = vmatpush3.bf16.msra.mxu1 %v22624_v43  ;;  %19759 = vmatprep.subr.bf16.mxu0 %v22625_v31  ;;  %v7175_v43 = vrot.slane %v7173_v34, 3  ;;  %v3196_v41 = vor.u32 %v3195_v2, %v3192_v40  ;;  %v7200_v4 = vshll.u32 %v24599_v63, 16  ;;  %v3238_v59 = vshll.u32 %v24602_v27, 16 }
 0x236   : > { %19724 = vmatmul.mubr.bf16.gmra.mrb[8].mxu0 %v3161_v46  ;;  %20227 = vmatprep.subr.bf16.mxu1 %v22626_v28  ;;  %v3205_v37 = vor.u32 %v3204_v62, %v3201_v14  ;;  %v3213_v46 = vrot.slane %v3211_v8, 3  ;;  %v7194_v16 = vor.u32 %v7193_v44, %v7190_v32  ;;  %v7206_v3 = vshrl.u32 %v24606_v13, 16 }
 0x237   : > { %20192 = vmatmul.mubr.bf16.gmra.mrb[8].mxu1 %v7132_v11  ;;  %19727 = vmatprep.mubr.bf16.mxu0 %v3170_v56  ;;  %v7176_v29 = vor.u32 %v7175_v43, %v7172_v50  ;;  %v3197_v10 = vsel %vm3099_vm4, %v3187_v42, %v3196_v41  ;;  %v7184_v11 = vrot.slane %v7182_v38, 3  ;;  %v3235_v42 = vshrl.u32 %v24602_v27, 16 }
 0x238   : > { %20195 = vmatprep.mubr.bf16.mxu1 %v7141_v49  ;;  %19760 = vmatpush3.bf16.msra.mxu0 %v22625_v31  ;;  %v3220_v31 = vshll.u32 %v24579_v6, 16  ;;  %v24911_v6 = vld [vmem:[%s27158_s1 + $0x40] sm:$0xff]   ;;  %v3206_v56 = vsel %vm3099_vm4, %v3196_v41, %v3205_v37  ;;  %v7209_v7 = vshll.u32 %v24606_v13, 16  ;;  %v3240_v40 = vrot.slane %v3238_v59, 3  ;;  %v22980_v59 = vld [vmem:[%s23108_s16 + $0xb8] sm:$0xf] }
 0x239   : > { %20228 = vmatpush3.bf16.msra.mxu1 %v22626_v28  ;;  %19761 = vmatprep.subr.bf16.mxu0 %v22627_v30  ;;  %v24906_v28 = vld [vmem:[%s27158_s1 + $0x40] sm:$0xff]   ;;  %v7177_v49 = vsel %vm3099_vm4, %v7167_v57, %v7176_v29  ;;  %v7185_v47 = vor.u32 %v7184_v11, %v7181_v33  ;;  %v3237_v63 = vrot.slane %v3235_v42, 2  ;;  %v7208_v27 = vrot.slane %v7206_v3, 2 }
 0x23a   : > { %20229 = vmatprep.subr.bf16.mxu1 %v22628_v9  ;;  %v3222_v39 = vrot.slane %v3220_v31, 3  ;;  %v7211_v36 = vrot.slane %v7209_v7, 3  ;;  %v3247_v52 = vshll.u32 %v24613_v5, 16  ;;  %v7215_v14 = vshrl.u32 %v24624_v24, 16 }
 0x23b   : > { %v7186_v34 = vsel %vm3099_vm4, %v7176_v29, %v7185_v47  ;;  %v7195_v2 = vsel %vm3099_vm4, %v7185_v47, %v7194_v16  ;;  %v7218_v62 = vshll.u32 %v24624_v24, 16  ;;  %v3241_v50 = vor.u32 %v3240_v40, %v3237_v63  ;;  %v24941_v24 = vld [vmem:[%s23108_s16 + $0xa0] ss:$0 sps:$4 sm:$0x77]  }
 0x23c   : > { %19762 = vmatpush3.bf16.msra.mxu0 %v22627_v30  ;;  %v3214_v30 = vor.u32 %v3213_v46, %v3210_v61  ;;  %v3223_v22 = vor.u32 %v3222_v39, %v3219_v15  ;;  %v3253_v43 = vshrl.u32 %v24640_v18, 16  ;;  %v7212_v23 = vor.u32 %v7211_v36, %v7208_v27  ;;  %v3549_v39 = vld [vmem:[%s23108_s16 + $0x10] sm:$0x8]  ;;  %v22983_v27 = vld [vmem:[%s23108_s16 + $0x20] sm:$0xff]  }
 0x23d   : > { %20230 = vmatpush3.bf16.msra.mxu1 %v22628_v9  ;;  %19763 = vmatprep.subr.bf16.mxu0 %v22629_v60  ;;  %v3226_v9 = vshrl.u32 %v24596_v35, 16  ;;  %v7224_v8 = vshrl.u32 %v24645_v17, 16  ;;  %v3249_v25 = vrot.slane %v3247_v52, 3  ;;  %v7217_v38 = vrot.slane %v7215_v14, 2  ;;  %v22985_v52 = vld [vmem:[%s23108_s16 + $0x28] sm:$0xff]  }
 0x23e   : > { %19728 = vmatmul.mubr.bf16.gmra.mrb[12].mxu0 %v3179_v55  ;;  %20231 = vmatprep.subr.bf16.mxu1 %v22630_v48  ;;  %v3215_v26 = vsel %vm3099_vm4, %v3205_v37, %v3214_v30  ;;  %v7199_v55 = vrot.slane %v7197_v54, 2  ;;  %v7220_v57 = vrot.slane %v7218_v62, 3  ;;  %v3255_v31 = vrot.slane %v3253_v43, 2  ;;  %v22986_v62 = vld [vmem:[%s23108_s16 + $0xcc] sm:$0xff]  }
 0x23f   : > { %20196 = vmatmul.mubr.bf16.gmra.mrb[12].mxu1 %v7150_v21  ;;  %19731 = vmatprep.mubr.bf16.mxu0 %v3188_v45  ;;  %v3228_v35 = vrot.slane %v3226_v9, 2  ;;  %v7202_v21 = vrot.slane %v7200_v4, 3  ;;  %v3244_v45 = vshrl.u32 %v24613_v5, 16  ;;  %v3265_v33 = vshll.u32 %v24941_v24, 16 }
 0x240   : > { %20199 = vmatprep.mubr.bf16.mxu1 %v7159_v20  ;;  %19764 = vmatpush3.bf16.msra.mxu0 %v22629_v60  ;;  %v3231_v60 = vrot.slane %v3229_v1, 3  ;;  %v7221_v46 = vor.u32 %v7220_v57, %v7217_v38  ;;  %v3574_v36 = vrot.slane %v22983_v27, 3  ;;  %v3576_v14 = vrot.slane %v22985_v52, 3  ;;  %v22989_v57 = vld [vmem:[%s23108_s16 + $0x38] sm:$0xff]   ;;  %v22999_v27 = vld [vmem:[%s23108_s16 + $0x60] sm:$0xff]   ;;  %v23001_v52 = vld [vmem:[%s23108_s16 + $0x68] sm:$0xff]  }
 0x241   : > { %20232 = vmatpush3.bf16.msra.mxu1 %v22630_v48  ;;  %19765 = vmatprep.subr.bf16.mxu0 %v22631_v19  ;;  %v3224_v48 = vsel %vm3099_vm4, %v3214_v30, %v3223_v22  ;;  %v7203_v20 = vor.u32 %v7202_v21, %v7199_v55  ;;  %v3246_v41 = vrot.slane %v3244_v45, 2  ;;  %v3267_v47 = vrot.slane %v3265_v33, 3  ;;  %v22982_v55 = vld [vmem:[%s23108_s16 + $0xbc] sm:$0xff]   ;;  %v22984_v45 = vld [vmem:[%s23108_s16 + $0xc4] sm:$0xff]  }
 0x242   : > { %20233 = vmatprep.subr.bf16.mxu1 %v22632_v51  ;;  %v3232_v13 = vor.u32 %v3231_v60, %v3228_v35  ;;  %v7222_v44 = vsel %vm3099_vm4, %v7212_v23, %v7221_v46 }
 0x243   : > { %v7204_v37 = vsel %vm3099_vm4, %v7194_v16, %v7203_v20  ;;  %v7213_v53 = vsel %vm3099_vm4, %v7203_v20, %v7212_v23  ;;  %v3250_v61 = vor.u32 %v3249_v25, %v3246_v41  ;;  %v7545_v20 = vrot.slane %v22986_v62, 3  ;;  %v22639_v23 = vld [vmem:[%s27158_s1 + $0x48] sm:$0xff]   ;;  %v22987_v41 = vld [vmem:[%s23108_s16 + $0x30] sm:$0xff]  }
 0x244   : > { %19766 = vmatpush3.bf16.msra.mxu0 %v22631_v19  ;;  %v3256_v19 = vshll.u32 %v24640_v18, 16  ;;  %v3233_v5 = vsel %vm3099_vm4, %v3223_v22, %v3232_v13  ;;  %v3242_v12 = vsel %vm3099_vm4, %v3232_v13, %v3241_v50  ;;  %v24946_v18 = vld [vmem:[%s23108_s16 + $0x144] ss:$0 sps:$4 sm:$0x77]   ;;  %v22979_v22 = vld [vmem:[%s23108_s16 + $0x14] sm:$0xf] }
 0x245   : > { %20234 = vmatpush3.bf16.msra.mxu1 %v22632_v51  ;;  %20271 = vmatprep.subr.bf16.mxu0 %v24906_v28  ;;  %v7227_v51 = vshll.u32 %v24645_v17, 16  ;;  %v7226_v17 = vrot.slane %v7224_v8, 2  ;;  %v3251_v32 = vsel %vm3099_vm4, %v3241_v50, %v3250_v61  ;;  %v16419_v4 = vcombine.low %v3549_v39, %v22979_v22  ;;  %v22988_v25 = vld [vmem:[%s23108_s16 + $0xd4] sm:$0xff]   ;;  %v22994_v39 = vld [vmem:[%s23108_s16 + $0xec] sm:$0xff]  }
 0x246   : > { %19732 = vmatmul.mubr.bf16.gmra.mrb[16].mxu0 %v3197_v10  ;;  %20739 = vmatprep.subr.bf16.mxu1 %v24911_v6  ;;  %v3258_v29 = vrot.slane %v3256_v19, 3  ;;  %v3262_v10 = vshrl.u32 %v24941_v24, 16  ;;  %v7543_v13 = vrot.slane %v22984_v45, 3  ;;  %v3577_v19 = vsel %vm3570_vm5, %v3574_v36, %v3576_v14  ;;  %v22648_v22 = vld [vmem:[%s27158_s1 + $0x68] sm:$0xff]  }
 0x247   : > { %20200 = vmatmul.mubr.bf16.gmra.mrb[16].mxu1 %v7168_v58  ;;  %19735 = vmatprep.mubr.bf16.mxu0 %v3206_v56  ;;  %v7229_v0 = vrot.slane %v7227_v51, 3  ;;  %v7233_v58 = vshrl.u32 %v24946_v18, 16  ;;  %v7236_v56 = vshll.u32 %v24946_v18, 16  ;;  %v22640_v51 = vld [vmem:[%s27158_s1 + $0x48] sm:$0xff]   ;;  %v7547_v38 = vrot.slane %v22988_v25, 3  ;;  %v23004_v25 = vld [vmem:[%s23108_s16 + $0x114] sm:$0xff]  }
 0x248   : > { %20203 = vmatprep.mubr.bf16.mxu1 %v7177_v49  ;;  %v3259_v11 = vor.u32 %v3258_v29, %v3255_v31  ;;  %v16818_v49 = vld [vmem:[%s23108_s16 + $0xb4] sm:$0x8]  ;;  %v3264_v30 = vrot.slane %v3262_v10, 2  ;;  %v7546_v8 = vsel %vm3570_vm5, %v7543_v13, %v7545_v20  ;;  %v22990_v31 = vld [vmem:[%s23108_s16 + $0xdc] sm:$0xff]   ;;  %v23000_v45 = vld [vmem:[%s23108_s16 + $0x104] sm:$0xff]  }
 0x249   : > { %v7230_v15 = vor.u32 %v7229_v0, %v7226_v17  ;;  %v7235_v1 = vrot.slane %v7233_v58, 2  ;;  %v7238_v54 = vrot.slane %v7236_v56, 3  ;;  %v16835_v16 = vcombine.low %v16818_v49, %v22980_v59  ;;  %v22991_v10 = vld [vmem:[%s23108_s16 + $0x40] sm:$0xff]   ;;  %v22993_v56 = vld [vmem:[%s23108_s16 + $0x48] sm:$0xff]   ;;  %v22996_v59 = vld [vmem:[%s23108_s16 + $0xf4] sm:$0xff]  }
 0x24a   : > { %v3260_v9 = vsel %vm3099_vm4, %v3250_v61, %v3259_v11  ;;  %v3268_v3 = vor.u32 %v3267_v47, %v3264_v30  ;;  %v7549_v29 = vrot.slane %v22990_v31, 3  ;;  %v22643_v61 = vld [vmem:[%s27158_s1 + $0x58] sm:$0xff]   ;;  %v3582_v33 = vrot.slane %v22991_v10, 3  ;;  %v23002_v62 = vld [vmem:[%s23108_s16 + $0x10c] sm:$0xff]  }
 0x24b   : > { %v7231_v42 = vsel %vm3099_vm4, %v7221_v46, %v7230_v15  ;;  %v7239_v7 = vor.u32 %v7238_v54, %v7235_v1  ;;  %v7540_v60 = vrot.slane %v16835_v16, 3  ;;  %v22644_v46 = vld [vmem:[%s27158_s1 + $0x58] sm:$0xff]   ;;  %v7553_v49 = vrot.slane %v22994_v39, 3  ;;  %v22647_v54 = vld [vmem:[%s27158_s1 + $0x68] sm:$0xff]  }
 0x24c   : > { %v3269_v21 = vsel %vm3099_vm4, %v3259_v11, %v3268_v3  ;;  %v7550_v0 = vsel %vm3570_vm5, %v7547_v38, %v7549_v29  ;;  %v22992_v11 = vld [vmem:[%s23108_s16 + $0xe4] sm:$0xff]   ;;  %v7555_v16 = vrot.slane %v22996_v59, 3  ;;  %v22997_v3 = vld [vmem:[%s23108_s16 + $0x58] sm:$0xff]   ;;  %v17370_v39 = vld [vmem:[%s23108_s16 + $0x1ec] sm:$0xf] }
 0x24d   : > { %v7240_v63 = vsel %vm3099_vm4, %v7230_v15, %v7239_v7  ;;  %v7551_v58 = vrot.slane %v22992_v11, 3  ;;  %v3584_v15 = vrot.slane %v22993_v56, 3  ;;  %v3588_v7 = vrot.slane %v22997_v3, 3  ;;  %v23009_v10 = vld [vmem:[%s23108_s16 + $0x88] sm:$0xff]   ;;  %v23013_v59 = vld [vmem:[%s23108_s16 + $0x98] sm:$0xff]   ;;  %v25097_v3 = vld [vmem:[%s23108_s16 + $0x150] sm:$0xff]  }
 0x24e   : > { %19736 = vmatmul.mubr.bf16.gmra.mrb[20].mxu0 %v3215_v26  ;;  %v3571_v26 = vrot.slane %v16419_v4, 3  ;;  %v22995_v4 = vld [vmem:[%s23108_s16 + $0x50] sm:$0xff]   ;;  %v16918_v56 = vld [vmem:[%s23108_s16 + $0x148] sm:$0xf] }
 0x24f   : > { %20204 = vmatmul.mubr.bf16.gmra.mrb[20].mxu1 %v7186_v34  ;;  %19739 = vmatprep.mubr.bf16.mxu0 %v3224_v48  ;;  %v22981_v34 = vld [vmem:[%s23108_s16 + $0x18] sm:$0xff]   ;;  %v7541_v48 = vrot.slane %v22982_v55, 3  ;;  %v7552_v47 = vsel %vm3570_vm5, %v7549_v29, %v7551_v58  ;;  %v7554_v1 = vsel %vm3570_vm5, %v7551_v58, %v7553_v49  ;;  %v23010_v11 = vld [vmem:[%s23108_s16 + $0x12c] sm:$0xff]  }
 0x250   : > { %20207 = vmatprep.mubr.bf16.mxu1 %v7195_v2  ;;  %v3572_v35 = vrot.slane %v22981_v34, 3  ;;  %v7569_v58 = vrot.slane %v23010_v11, 3  ;;  %v25146_v11 = vld [vmem:[%s23108_s16 + $0x170] sm:$0xff]  }
 0x251   : > { %v7542_v2 = vsel %vm3570_vm5, %v7540_v60, %v7541_v48  ;;  %v7544_v43 = vsel %vm3570_vm5, %v7541_v48, %v7543_v13  ;;  %v22650_v60 = vld [vmem:[%s27158_s1 + $0x70] sm:$0xff]   ;;  %v7556_v48 = vsel %vm3570_vm5, %v7553_v49, %v7555_v16  ;;  %v7559_v13 = vrot.slane %v23000_v45, 3 }
 0x252   : > { %v3573_v40 = vsel %vm3570_vm5, %v3571_v26, %v3572_v35  ;;  %v3575_v50 = vsel %vm3570_vm5, %v3572_v35, %v3574_v36  ;;  %v22998_v26 = vld [vmem:[%s23108_s16 + $0xfc] sm:$0xff]   ;;  %v22649_v35 = vld [vmem:[%s27158_s1 + $0x70] sm:$0xff]   ;;  %v3590_v36 = vrot.slane %v22999_v27, 3 }
 0x253   : > { %v7557_v34 = vrot.slane %v22998_v26, 3  ;;  %v25081_v49 = vld [vmem:[%s23108_s16 + $0x1f0] sm:$0xf]  ;;  %v23014_v26 = vld [vmem:[%s23108_s16 + $0x13c] sm:$0xff]  }
 0x256   : > { %19740 = vmatmul.mubr.bf16.gmra.mrb[24].mxu0 %v3233_v5  ;;  %v3578_v5 = vrot.slane %v22987_v41, 3  ;;  %v23003_v41 = vld [vmem:[%s23108_s16 + $0x70] sm:$0xff]  }
 0x257   : > { %20208 = vmatmul.mubr.bf16.gmra.mrb[24].mxu1 %v7204_v37  ;;  %19743 = vmatprep.mubr.bf16.mxu0 %v3242_v12  ;;  %v3580_v37 = vrot.slane %v22989_v57, 3  ;;  %v22641_v12 = vld [vmem:[%s27158_s1 + $0x50] sm:$0xff]   ;;  %v23005_v57 = vld [vmem:[%s23108_s16 + $0x78] sm:$0xff]  }
 0x258   : > { %20211 = vmatprep.mubr.bf16.mxu1 %v7213_v53  ;;  %v7548_v53 = vsel %vm3570_vm5, %v7545_v20, %v7547_v38  ;;  %v7561_v20 = vrot.slane %v23002_v62, 3  ;;  %v7563_v38 = vrot.slane %v23004_v25, 3  ;;  %v7575_v62 = vrot.slane %v24946_v18, 3 }
 0x259   : > { %v3581_v17 = vsel %vm3570_vm5, %v3578_v5, %v3580_v37  ;;  %v3583_v30 = vsel %vm3570_vm5, %v3580_v37, %v3582_v33  ;;  %v3596_v37 = vrot.slane %v23005_v57, 3 }
 0x25e   : > { %19744 = vmatmul.mubr.bf16.gmra.mrb[28].mxu0 %v3251_v32  ;;  %v22645_v32 = vld [vmem:[%s27158_s1 + $0x60] sm:$0xff]  }
 0x25f   : > { %20212 = vmatmul.mubr.bf16.gmra.mrb[28].mxu1 %v7222_v44  ;;  %19747 = vmatprep.mubr.bf16.mxu0 %v3260_v9  ;;  %v22646_v44 = vld [vmem:[%s27158_s1 + $0x60] sm:$0xff]   ;;  %v3585_v9 = vsel %vm3570_vm5, %v3582_v33, %v3584_v15  ;;  %v3600_v33 = vrot.slane %v23009_v10, 3 }
 0x260   : > { %20215 = vmatprep.mubr.bf16.mxu1 %v7231_v42  ;;  %v3586_v42 = vrot.slane %v22995_v4, 3  ;;  %v23012_v4 = vld [vmem:[%s23108_s16 + $0x134] sm:$0xff]  }
 0x262   : > { %v3587_v55 = vsel %vm3570_vm5, %v3584_v15, %v3586_v42  ;;  %v25077_v15 = vld [vmem:[%s23108_s16 + $0x14c] sm:$0xf] }
 0x266   : > { %19748 = vmatmul.mubr.bf16.gmra.mrb[32].mxu0 %v3269_v21  ;;  %v3589_v21 = vsel %vm3570_vm5, %v3586_v42, %v3588_v7  ;;  %v7571_v42 = vrot.slane %v23012_v4, 3 }
 0x267   : > { %20216 = vmatmul.mubr.bf16.gmra.mrb[32].mxu1 %v7240_v63  ;;  %19767 = vmatprep.mubr.bf16.mxu0 %v3573_v40  ;;  %v7558_v63 = vsel %vm3570_vm5, %v7555_v16, %v7557_v34  ;;  %v22651_v40 = vld [vmem:[%s27158_s1 + $0x78] sm:$0xff]   ;;  %v3604_v16 = vrot.slane %v23013_v59, 3 }
 0x268   : > { %20235 = vmatprep.mubr.bf16.mxu1 %v7542_v2  ;;  %v22652_v2 = vld [vmem:[%s27158_s1 + $0x78] sm:$0xff]  }
 0x26e   : > { %19768 = vmatmul.mubr.bf16.vlgmr.msra.gmra.mrb[0].mxu0 %v3575_v50  ;;  %v25050_v50 = vld [vmem:[%s27158_s1] sm:$0xff]  }
 0x26f   : > { %20236 = vmatmul.mubr.bf16.vlgmr.msra.gmra.mrb[0].mxu1 %v7544_v43  ;;  %20272 = vmatpush3.bf16.msra.mxu0 %v24906_v28  ;;  %v22642_v28 = vld [vmem:[%s27158_s1 + $0x50] sm:$0xff]   ;;  %v25055_v43 = vld [vmem:[%s27158_s1] sm:$0xff]  }
 0x270   : > { %20740 = vmatpush3.bf16.msra.mxu1 %v24911_v6  ;;  %19771 = vmatprep.mubr.bf16.mxu0 %v3577_v19  ;;  %v3579_v6 = vsel %vm3570_vm5, %v3576_v14, %v3578_v5  ;;  %v3592_v14 = vrot.slane %v23001_v52, 3  ;;  %v3591_v19 = vsel %vm3570_vm5, %v3588_v7, %v3590_v36  ;;  %v3594_v5 = vrot.slane %v23003_v41, 3  ;;  %v25122_v41 = vld [vmem:[%s23108_s16 + $0x160] sm:$0xff]  }
 0x271   : > { %20239 = vmatprep.mubr.bf16.mxu1 %v7546_v8  ;;  %20273 = vmatprep.subr.bf16.mxu0 %v22639_v23  ;;  %v3606_v52 = vrot.slane %v24941_v24, 3  ;;  %v8334_v24 = vshrl.u32 %v25097_v3, 16 }
 0x272   : > { %20741 = vmatprep.subr.bf16.mxu1 %v22640_v51  ;;  %v3593_v8 = vsel %vm3570_vm5, %v3590_v36, %v3592_v14  ;;  %v3595_v29 = vsel %vm3570_vm5, %v3592_v14, %v3594_v5  ;;  %v25115_v14 = vld [vmem:[%s23108_s16 + $0x158] sm:$0xff]  }
 0x273   : > { %20274 = vmatpush3.bf16.msra.mxu0 %v22639_v23  ;;  %v7560_v23 = vsel %vm3570_vm5, %v7557_v34, %v7559_v13  ;;  %v7573_v34 = vrot.slane %v23014_v26, 3  ;;  %v3607_v25 = vsel %vm3570_vm5, %v3604_v16, %v3606_v52  ;;  %v22665_v26 = vld [vmem:[%s27158_s1 + $0x8] sm:$0xff]   ;;  %v22671_v52 = vld [vmem:[%s27158_s1 + $0x10] sm:$0xff]  }
 0x274   : > { %20742 = vmatpush3.bf16.msra.mxu1 %v22640_v51  ;;  %20275 = vmatprep.subr.bf16.mxu0 %v22641_v12  ;;  %v7562_v51 = vsel %vm3570_vm5, %v7559_v13, %v7561_v20 }
 0x275   : > { %20743 = vmatprep.subr.bf16.mxu1 %v22642_v28  ;;  %v7574_v27 = vsel %vm3570_vm5, %v7571_v42, %v7573_v34  ;;  %v7576_v18 = vsel %vm3570_vm5, %v7573_v34, %v7575_v62  ;;  %v25181_v62 = vld [vmem:[%s23108_s16 + $0x180] sm:$0xff]  }
 0x276   : > { %19772 = vmatmul.mubr.bf16.gmra.mrb[4].mxu0 %v3579_v6  ;;  %v3597_v6 = vsel %vm3570_vm5, %v3594_v5, %v3596_v37  ;;  %v25125_v5 = vld [vmem:[%s23108_s16 + $0x204] sm:$0xff]  }
 0x277   : > { %20240 = vmatmul.mubr.bf16.gmra.mrb[4].mxu1 %v7548_v53  ;;  %19775 = vmatprep.mubr.bf16.mxu0 %v3581_v17  ;;  %v23007_v17 = vld [vmem:[%s23108_s16 + $0x80] sm:$0xff]  }
 0x278   : > { %20243 = vmatprep.mubr.bf16.mxu1 %v7550_v0  ;;  %20276 = vmatpush3.bf16.msra.mxu0 %v22641_v12  ;;  %v23006_v12 = vld [vmem:[%s23108_s16 + $0x11c] sm:$0xff]   ;;  %v3598_v0 = vrot.slane %v23007_v17, 3  ;;  %v25140_v17 = vld [vmem:[%s23108_s16 + $0x168] sm:$0xff]  }
 0x279   : > { %20744 = vmatpush3.bf16.msra.mxu1 %v22642_v28  ;;  %20277 = vmatprep.subr.bf16.mxu0 %v22643_v61  ;;  %v7565_v31 = vrot.slane %v23006_v12, 3  ;;  %v7564_v28 = vsel %vm3570_vm5, %v7561_v20, %v7563_v38  ;;  %v8358_v59 = vshrl.u32 %v25140_v17, 16 }
 0x27a   : > { %20745 = vmatprep.subr.bf16.mxu1 %v22644_v46 }
 0x27b   : > { %v7566_v53 = vsel %vm3570_vm5, %v7563_v38, %v7565_v31  ;;  %v8338_v38 = vshll.u32 %v25115_v14, 16 }
 0x27c   : > { %20278 = vmatpush3.bf16.msra.mxu0 %v22643_v61  ;;  %v23008_v61 = vld [vmem:[%s23108_s16 + $0x124] sm:$0xff]  }
 0x27d   : > { %20746 = vmatpush3.bf16.msra.mxu1 %v22644_v46  ;;  %20279 = vmatprep.subr.bf16.mxu0 %v22645_v32  ;;  %v7567_v46 = vrot.slane %v23008_v61, 3  ;;  %v8340_v61 = vrot.slane %v8338_v38, 1 }
 0x27e   : > { %19776 = vmatmul.mubr.bf16.gmra.mrb[8].mxu0 %v3583_v30  ;;  %20747 = vmatprep.subr.bf16.mxu1 %v22646_v44  ;;  %v3601_v30 = vsel %vm3570_vm5, %v3598_v0, %v3600_v33 }
 0x27f   : > { %20244 = vmatmul.mubr.bf16.gmra.mrb[8].mxu1 %v7552_v47  ;;  %19779 = vmatprep.mubr.bf16.mxu0 %v3585_v9  ;;  %v25087_v47 = vcombine.low %v16918_v56, %v25077_v15  ;;  %v7570_v9 = vsel %vm3570_vm5, %v7567_v46, %v7569_v58 }
 0x280   : > { %20247 = vmatprep.mubr.bf16.mxu1 %v7554_v1  ;;  %20280 = vmatpush3.bf16.msra.mxu0 %v22645_v32  ;;  %v3599_v32 = vsel %vm3570_vm5, %v3596_v37, %v3598_v0  ;;  %v25091_v1 = vcombine.low %v17370_v39, %v25081_v49  ;;  %v25149_v39 = vld [vmem:[%s23108_s16 + $0x214] sm:$0xff]  }
 0x281   : > { %20748 = vmatpush3.bf16.msra.mxu1 %v22646_v44  ;;  %20281 = vmatprep.subr.bf16.mxu0 %v22647_v54  ;;  %v7568_v44 = vsel %vm3570_vm5, %v7565_v31, %v7567_v46  ;;  %v8325_v7 = vshll.u32 %v25087_v47, 16  ;;  %v25143_v46 = vld [vmem:[%s23108_s16 + $0x20c] sm:$0xff]  }
 0x282   : > { %20749 = vmatprep.subr.bf16.mxu1 %v22648_v22  ;;  %v12293_v36 = vshrl.u32 %v25091_v1, 16  ;;  %v12328_v34 = vshrl.u32 %v25143_v46, 16 }
 0x284   : > { %20282 = vmatpush3.bf16.msra.mxu0 %v22647_v54  ;;  %v23011_v54 = vld [vmem:[%s23108_s16 + $0x90] sm:$0xff]  }
 0x285   : > { %20750 = vmatpush3.bf16.msra.mxu1 %v22648_v22  ;;  %20283 = vmatprep.subr.bf16.mxu0 %v22649_v35  ;;  %v3602_v22 = vrot.slane %v23011_v54, 3  ;;  %v8350_v54 = vshrl.u32 %v25122_v41, 16 }
 0x286   : > { %19780 = vmatmul.mubr.bf16.gmra.mrb[12].mxu0 %v3587_v55  ;;  %20751 = vmatprep.subr.bf16.mxu1 %v22650_v60 }
 0x287   : > { %20248 = vmatmul.mubr.bf16.gmra.mrb[12].mxu1 %v7556_v48  ;;  %19783 = vmatprep.mubr.bf16.mxu0 %v3589_v21  ;;  %v3603_v55 = vsel %vm3570_vm5, %v3600_v33, %v3602_v22  ;;  %v7572_v48 = vsel %vm3570_vm5, %v7569_v58, %v7571_v42  ;;  %v3605_v21 = vsel %vm3570_vm5, %v3602_v22, %v3604_v16  ;;  %v12324_v22 = vshll.u32 %v25143_v46, 16 }
 0x288   : > { %20251 = vmatprep.mubr.bf16.mxu1 %v7558_v63  ;;  %20284 = vmatpush3.bf16.msra.mxu0 %v22649_v35  ;;  %v25102_v35 = vld [vmem:[%s23108_s16 + $0x1f4] sm:$0xff]   ;;  %v8323_v63 = vshrl.u32 %v25087_v47, 16  ;;  %v12320_v42 = vshrl.u32 %v25125_v5, 16  ;;  %v8362_v16 = vshll.u32 %v25146_v11, 16 }
 0x289   : > { %20752 = vmatpush3.bf16.msra.mxu1 %v22650_v60  ;;  %20285 = vmatprep.subr.bf16.mxu0 %v22651_v40  ;;  %v12295_v60 = vshll.u32 %v25091_v1, 16  ;;  %v12300_v13 = vshll.u32 %v25102_v35, 16  ;;  %v12304_v37 = vshrl.u32 %v25102_v35, 16 }
 0x28a   : > { %20753 = vmatprep.subr.bf16.mxu1 %v22652_v2 }
 0x28b   : > { %v12297_v45 = vrot.slane %v12295_v60, 1  ;;  %v12332_v60 = vshll.u32 %v25149_v39, 16 }
 0x28c   : > { %20286 = vmatpush3.bf16.msra.mxu0 %v22651_v40  ;;  %v8327_v40 = vrot.slane %v8325_v7, 1 }
 0x28d   : > { %20754 = vmatpush3.bf16.msra.mxu1 %v22652_v2  ;;  %20323 = vmatprep.subr.bf16.mxu0 %v25050_v50  ;;  %v8330_v2 = vshll.u32 %v25097_v3, 16 }
 0x28e   : > { %19784 = vmatmul.mubr.bf16.gmra.mrb[16].mxu0 %v3591_v19  ;;  %20791 = vmatprep.subr.bf16.mxu1 %v25055_v43  ;;  %v8328_v20 = vor.u32 %v8327_v40, %v8323_v63  ;;  %v25170_v63 = vld [vmem:[%s23108_s16 + $0x178] sm:$0xff]  }
 0x28f   : > { %20252 = vmatmul.mubr.bf16.gmra.mrb[16].mxu1 %v7560_v23  ;;  %19787 = vmatprep.mubr.bf16.mxu0 %v3593_v8  ;;  %v8332_v19 = vrot.slane %v8330_v2, 1  ;;  %v25119_v23 = vld [vmem:[%s23108_s16 + $0x1fc] sm:$0xff]   ;;  %v12298_v8 = vor.u32 %v12297_v45, %v12293_v36  ;;  %v12326_v2 = vrot.slane %v12324_v22, 1  ;;  %v25217_v22 = vld [vmem:[%s23108_s16 + $0x234] sm:$0xff]  }
 0x290   : > { %20255 = vmatprep.mubr.bf16.mxu1 %v7562_v51  ;;  %v12302_v51 = vrot.slane %v12300_v13, 1  ;;  %v12308_v12 = vshll.u32 %v25119_v23, 16  ;;  %v8364_v13 = vrot.slane %v8362_v16, 1 }
 0x291   : > { %v8333_v57 = vsel %vm370_vm0, %v8328_v20, %v8332_v19  ;;  %v8336_v0 = vor.u32 %v8334_v24, %v8332_v19  ;;  %v12334_v20 = vrot.slane %v12332_v60, 1  ;;  %v22672_v19 = vld [vmem:[%s27158_s1 + $0x10] sm:$0xff]   ;;  %v12336_v24 = vshrl.u32 %v25149_v39, 16 }
 0x292   : > { %v12303_v31 = vsel %vm370_vm0, %v12298_v8, %v12302_v51  ;;  %v12306_v10 = vor.u32 %v12304_v37, %v12302_v51  ;;  %v12310_v33 = vrot.slane %v12308_v12, 1  ;;  %v25187_v8 = vld [vmem:[%s23108_s16 + $0x224] sm:$0xff]   ;;  %v8374_v37 = vshrl.u32 %v25170_v63, 16 }
 0x293   : > { %v8378_v12 = vshll.u32 %v25181_v62, 16 }
 0x294   : > { %v12311_v4 = vsel %vm370_vm0, %v12306_v10, %v12310_v33 }
 0x296   : > { %19788 = vmatmul.mubr.bf16.gmra.mrb[20].mxu0 %v3595_v29  ;;  %v8342_v29 = vshrl.u32 %v25115_v14, 16 }
 0x297   : > { %20256 = vmatmul.mubr.bf16.gmra.mrb[20].mxu1 %v7564_v28  ;;  %19791 = vmatprep.mubr.bf16.mxu0 %v3597_v6  ;;  %v8346_v28 = vshll.u32 %v25122_v41, 16  ;;  %v12312_v6 = vshrl.u32 %v25119_v23, 16 }
 0x298   : > { %20259 = vmatprep.mubr.bf16.mxu1 %v7566_v53  ;;  %v12316_v53 = vshll.u32 %v25125_v5, 16  ;;  %v8344_v58 = vor.u32 %v8342_v29, %v8340_v61 }
 0x299   : > { %v8348_v56 = vrot.slane %v8346_v28, 1  ;;  %v12348_v28 = vshll.u32 %v25187_v8, 16 }
 0x29b   : > { %v8349_v7 = vsel %vm370_vm0, %v8344_v58, %v8348_v56  ;;  %v8352_v40 = vor.u32 %v8350_v54, %v8348_v56  ;;  %v25211_v56 = vld [vmem:[%s23108_s16 + $0x22c] sm:$0xff]   ;;  %v12350_v54 = vrot.slane %v12348_v28, 1 }
 0x29e   : > { %19792 = vmatmul.mubr.bf16.gmra.mrb[24].mxu0 %v3599_v32  ;;  %v12314_v32 = vor.u32 %v12312_v6, %v12310_v33  ;;  %v22677_v6 = vld [vmem:[%s27158_s1 + $0x18] sm:$0xff]   ;;  %v12338_v33 = vor.u32 %v12336_v24, %v12334_v20 }
 0x29f   : > { %20260 = vmatmul.mubr.bf16.gmra.mrb[24].mxu1 %v7568_v44  ;;  %19795 = vmatprep.mubr.bf16.mxu0 %v3601_v30  ;;  %v12318_v44 = vrot.slane %v12316_v53, 1  ;;  %v8354_v30 = vshll.u32 %v25140_v17, 16 }
 0x2a0   : > { %20263 = vmatprep.mubr.bf16.mxu1 %v7570_v9  ;;  %v8341_v9 = vsel %vm370_vm0, %v8336_v0, %v8340_v61  ;;  %v25205_v0 = vld [vmem:[%s23108_s16 + $0x188] sm:$0xff]   ;;  %v22678_v61 = vld [vmem:[%s27158_s1 + $0x18] sm:$0xff]  }
 0x2a1   : > { %v12322_v36 = vor.u32 %v12320_v42, %v12318_v44  ;;  %v8386_v42 = vshll.u32 %v25205_v0, 16 }
 0x2a6   : > { %19796 = vmatmul.mubr.bf16.gmra.mrb[28].mxu0 %v3603_v55  ;;  %v12319_v55 = vsel %vm370_vm0, %v12314_v32, %v12318_v44  ;;  %v8380_v44 = vrot.slane %v8378_v12, 1  ;;  %v22695_v12 = vld [vmem:[%s27158_s1 + $0x30] sm:$0xff]  }
 0x2a7   : > { %20264 = vmatmul.mubr.bf16.gmra.mrb[28].mxu1 %v7572_v48  ;;  %19799 = vmatprep.mubr.bf16.mxu0 %v3605_v21  ;;  %v8356_v48 = vrot.slane %v8354_v30, 1  ;;  %v22666_v21 = vld [vmem:[%s27158_s1 + $0x8] sm:$0xff]   ;;  %v25214_v30 = vld [vmem:[%s23108_s16 + $0x190] sm:$0xff]  }
 0x2a8   : > { %20267 = vmatprep.mubr.bf16.mxu1 %v7574_v27  ;;  %v25174_v27 = vld [vmem:[%s23108_s16 + $0x21c] sm:$0xff]  }
 0x2a9   : > { %v8360_v45 = vor.u32 %v8358_v59, %v8356_v48  ;;  %v8357_v51 = vsel %vm370_vm0, %v8352_v40, %v8356_v48  ;;  %v12340_v38 = vshll.u32 %v25174_v27, 16  ;;  %v12344_v29 = vshrl.u32 %v25174_v27, 16  ;;  %v22684_v59 = vld [vmem:[%s27158_s1 + $0x20] sm:$0xff]  }
 0x2aa   : > { %v8390_v48 = vshrl.u32 %v25205_v0, 16 }
 0x2ab   : > { %v12342_v58 = vrot.slane %v12340_v38, 1  ;;  %v25250_v38 = vld [vmem:[%s23108_s16 + $0x1a0] sm:$0xff]  }
 0x2ae   : > { %19800 = vmatmul.mubr.bf16.gmra.mrb[32].mxu0 %v3607_v25  ;;  %v8366_v25 = vshrl.u32 %v25146_v11, 16 }
 0x2af   : > { %20268 = vmatmul.mubr.bf16.gmra.mrb[32].mxu1 %v7576_v18  ;;  %20287 = vmatprep.mubr.bf16.mxu0 %v8333_v57  ;;  %v12327_v18 = vsel %vm370_vm0, %v12322_v36, %v12326_v2  ;;  %v8365_v57 = vsel %vm370_vm0, %v8360_v45, %v8364_v13  ;;  %v12364_v36 = vshll.u32 %v25217_v22, 16  ;;  %v22689_v45 = vld [vmem:[%s27158_s1 + $0x28] sm:$0xff]  }
 0x2b0   : > { %20755 = vmatprep.mubr.bf16.mxu1 %v12303_v31  ;;  %v8368_v10 = vor.u32 %v8366_v25, %v8364_v13  ;;  %v8388_v13 = vrot.slane %v8386_v42, 1 }
 0x2b2   : > { %v8392_v25 = vor.u32 %v8390_v48, %v8388_v13 }
 0x2b6   : > { %20288 = vmatmul.mubr.bf16.vlgmr.msra.gmra.mrb[36].mxu0 %v8341_v9  ;;  %v12346_v9 = vor.u32 %v12344_v29, %v12342_v58  ;;  %v22696_v29 = vld [vmem:[%s27158_s1 + $0x30] sm:$0xff]  }
 0x2b7   : > { %20756 = vmatmul.mubr.bf16.vlgmr.msra.gmra.mrb[36].mxu1 %v12311_v4  ;;  %20324 = vmatpush3.bf16.msra.mxu0 %v25050_v50  ;;  %v12330_v50 = vor.u32 %v12328_v34, %v12326_v2  ;;  %v22683_v4 = vld [vmem:[%s27158_s1 + $0x20] sm:$0xff]   ;;  %v12356_v34 = vshll.u32 %v25211_v56, 16  ;;  %v12360_v2 = vshrl.u32 %v25211_v56, 16 }
 0x2b8   : > { %20792 = vmatpush3.bf16.msra.mxu1 %v25055_v43  ;;  %20291 = vmatprep.mubr.bf16.mxu0 %v8349_v7  ;;  %v8370_v43 = vshll.u32 %v25170_v63, 16  ;;  %v12343_v7 = vsel %vm370_vm0, %v12338_v33, %v12342_v58  ;;  %v12351_v40 = vsel %vm370_vm0, %v12346_v9, %v12350_v54 }
 0x2b9   : > { %20759 = vmatprep.mubr.bf16.mxu1 %v12319_v55  ;;  %20325 = vmatprep.subr.bf16.mxu0 %v22665_v26  ;;  %v12335_v31 = vsel %vm370_vm0, %v12330_v50, %v12334_v20  ;;  %v12352_v55 = vshrl.u32 %v25187_v8, 16  ;;  %v22690_v50 = vld [vmem:[%s27158_s1 + $0x28] sm:$0xff]  }
 0x2ba   : > { %20793 = vmatprep.subr.bf16.mxu1 %v22666_v21  ;;  %v8372_v53 = vrot.slane %v8370_v43, 1  ;;  %v25247_v43 = vld [vmem:[%s23108_s16 + $0x23c] sm:$0xff]  }
 0x2bb   : > { %20326 = vmatpush3.bf16.msra.mxu0 %v22665_v26  ;;  %v8382_v26 = vshrl.u32 %v25181_v62, 16  ;;  %v12376_v9 = vshrl.u32 %v25247_v43, 16 }
 0x2bc   : > { %20794 = vmatpush3.bf16.msra.mxu1 %v22666_v21  ;;  %20327 = vmatprep.subr.bf16.mxu0 %v22671_v52  ;;  %v8376_v32 = vor.u32 %v8374_v37, %v8372_v53  ;;  %v8373_v16 = vsel %vm370_vm0, %v8368_v10, %v8372_v53  ;;  %v8394_v21 = vshll.u32 %v25214_v30, 16  ;;  %v25253_v37 = vld [vmem:[%s23108_s16 + $0x244] sm:$0xff]   ;;  %v12368_v53 = vshrl.u32 %v25217_v22, 16 }
 0x2bd   : > { %20795 = vmatprep.subr.bf16.mxu1 %v22672_v19  ;;  %v8384_v20 = vor.u32 %v8382_v26, %v8380_v44 }
 0x2be   : > { %20292 = vmatmul.mubr.bf16.gmra.mrb[40].mxu0 %v8357_v51  ;;  %v8381_v60 = vsel %vm370_vm0, %v8376_v32, %v8380_v44  ;;  %v12354_v51 = vor.u32 %v12352_v55, %v12350_v54  ;;  %v8396_v24 = vrot.slane %v8394_v21, 1  ;;  %v8410_v32 = vshll.u32 %v25250_v38, 16  ;;  %v25286_v21 = vld [vmem:[%s23108_s16 + $0x1b0] sm:$0xff]  }
 0x2bf   : > { %20760 = vmatmul.mubr.bf16.gmra.mrb[40].mxu1 %v12327_v18  ;;  %20295 = vmatprep.mubr.bf16.mxu0 %v8365_v57  ;;  %v12366_v57 = vrot.slane %v12364_v36, 1  ;;  %v8389_v28 = vsel %vm370_vm0, %v8384_v20, %v8388_v13  ;;  %v12380_v54 = vshll.u32 %v25253_v37, 16  ;;  %v25289_v36 = vld [vmem:[%s23108_s16 + $0x254] sm:$0xff]  }
 0x2c0   : > { %20763 = vmatprep.mubr.bf16.mxu1 %v12335_v31  ;;  %20328 = vmatpush3.bf16.msra.mxu0 %v22671_v52  ;;  %v25241_v52 = vld [vmem:[%s23108_s16 + $0x198] sm:$0xff]   ;;  %v8397_v33 = vsel %vm370_vm0, %v8392_v25, %v8396_v24  ;;  %v8412_v48 = vrot.slane %v8410_v32, 1 }
 0x2c1   : > { %20796 = vmatpush3.bf16.msra.mxu1 %v22672_v19  ;;  %20329 = vmatprep.subr.bf16.mxu0 %v22677_v6  ;;  %v12358_v19 = vrot.slane %v12356_v34, 1  ;;  %v8402_v31 = vshll.u32 %v25241_v52, 16  ;;  %v8406_v58 = vshrl.u32 %v25241_v52, 16  ;;  %v12370_v26 = vor.u32 %v12368_v53, %v12366_v57  ;;  %v25315_v53 = vld [vmem:[%s23108_s16 + $0x1b8] sm:$0xff]  }
 0x2c2   : > { %20797 = vmatprep.subr.bf16.mxu1 %v22678_v61 }
 0x2c3   : > { %v12362_v18 = vor.u32 %v12360_v2, %v12358_v19  ;;  %v12359_v10 = vsel %vm370_vm0, %v12354_v51, %v12358_v19  ;;  %v8404_v42 = vrot.slane %v8402_v31, 1  ;;  %v12382_v2 = vrot.slane %v12380_v54, 1 }
 0x2c4   : > { %20330 = vmatpush3.bf16.msra.mxu0 %v22677_v6  ;;  %v8398_v6 = vshrl.u32 %v25214_v30, 16  ;;  %v8414_v51 = vshrl.u32 %v25250_v38, 16 }
 0x2c5   : > { %20798 = vmatpush3.bf16.msra.mxu1 %v22678_v61  ;;  %20331 = vmatprep.subr.bf16.mxu0 %v22683_v4  ;;  %v12372_v61 = vshll.u32 %v25247_v43, 16  ;;  %v12367_v44 = vsel %vm370_vm0, %v12362_v18, %v12366_v57  ;;  %v8408_v55 = vor.u32 %v8406_v58, %v8404_v42  ;;  %v12384_v18 = vshrl.u32 %v25253_v37, 16 }
 0x2c6   : > { %20296 = vmatmul.mubr.bf16.gmra.mrb[44].mxu0 %v8373_v16  ;;  %20799 = vmatprep.subr.bf16.mxu1 %v22684_v59  ;;  %v22704_v16 = vld [vmem:[%s27158_s1 + $0x38] sm:$0xff]  }
 0x2c7   : > { %20764 = vmatmul.mubr.bf16.gmra.mrb[44].mxu1 %v12343_v7  ;;  %20299 = vmatprep.mubr.bf16.mxu0 %v8381_v60  ;;  %v8400_v7 = vor.u32 %v8398_v6, %v8396_v24  ;;  %v12374_v34 = vrot.slane %v12372_v61, 1  ;;  %v25283_v60 = vld [vmem:[%s23108_s16 + $0x24c] sm:$0xff]   ;;  %v8413_v24 = vsel %vm370_vm0, %v8408_v55, %v8412_v48  ;;  %v8416_v61 = vor.u32 %v8414_v51, %v8412_v48 }
 0x2c8   : > { %20767 = vmatprep.mubr.bf16.mxu1 %v12351_v40  ;;  %20332 = vmatpush3.bf16.msra.mxu0 %v22683_v4  ;;  %v22702_v4 = vld [vmem:[%s27158_s1 + $0x38] sm:$0xff]   ;;  %v12388_v25 = vshll.u32 %v25283_v60, 16  ;;  %v12386_v58 = vor.u32 %v12384_v18, %v12382_v2 }
 0x2c9   : > { %20800 = vmatpush3.bf16.msra.mxu1 %v22684_v59  ;;  %20333 = vmatprep.subr.bf16.mxu0 %v22689_v45  ;;  %v25277_v59 = vld [vmem:[%s23108_s16 + $0x1a8] sm:$0xff]   ;;  %v12378_v40 = vor.u32 %v12376_v9, %v12374_v34  ;;  %v8405_v20 = vsel %vm370_vm0, %v8400_v7, %v8404_v42  ;;  %v12375_v19 = vsel %vm370_vm0, %v12370_v26, %v12374_v34  ;;  %v25322_v9 = vld [vmem:[%s23108_s16 + $0x1c0] sm:$0xff]   ;;  %v8430_v26 = vshrl.u32 %v25286_v21, 16 }
 0x2ca   : > { %20801 = vmatprep.subr.bf16.mxu1 %v22690_v50  ;;  %v8418_v13 = vshll.u32 %v25277_v59, 16  ;;  %v8422_v57 = vshrl.u32 %v25277_v59, 16  ;;  %v25325_v42 = vld [vmem:[%s23108_s16 + $0x264] sm:$0xff]   ;;  %v12400_v34 = vshrl.u32 %v25289_v36, 16 }
 0x2cb   : > { %v12383_v31 = vsel %vm370_vm0, %v12378_v40, %v12382_v2  ;;  %v8438_v2 = vshrl.u32 %v25315_v53, 16  ;;  %v12412_v51 = vshll.u32 %v25325_v42, 16 }
 0x2cc   : > { %20334 = vmatpush3.bf16.msra.mxu0 %v22689_v45  ;;  %v25294_v45 = vld [vmem:[%s27158_s1 + $0x80] sm:$0xff]   ;;  %v8420_v6 = vrot.slane %v8418_v13, 1  ;;  %v8442_v13 = vshll.u32 %v25322_v9, 16 }
 0x2cd   : > { %20802 = vmatpush3.bf16.msra.mxu1 %v22690_v50  ;;  %20335 = vmatprep.subr.bf16.mxu0 %v22695_v12  ;;  %v25300_v50 = vld [vmem:[%s27158_s1 + $0x80] sm:$0xff]  }
 0x2ce   : > { %20300 = vmatmul.mubr.bf16.gmra.mrb[48].mxu0 %v8389_v28  ;;  %20803 = vmatprep.subr.bf16.mxu1 %v22696_v29  ;;  %v12396_v28 = vshll.u32 %v25289_v36, 16  ;;  %v8424_v32 = vor.u32 %v8422_v57, %v8420_v6  ;;  %v8421_v7 = vsel %vm370_vm0, %v8416_v61, %v8420_v6  ;;  %v25346_v6 = vld [vmem:[%s23108_s16 + $0x1d0] sm:$0xff]  }
 0x2cf   : > { %20768 = vmatmul.mubr.bf16.gmra.mrb[48].mxu1 %v12359_v10  ;;  %20303 = vmatprep.mubr.bf16.mxu0 %v8397_v33  ;;  %v12390_v10 = vrot.slane %v12388_v25, 1  ;;  %v25319_v33 = vld [vmem:[%s23108_s16 + $0x25c] sm:$0xff]  }
 0x2d0   : > { %20771 = vmatprep.mubr.bf16.mxu1 %v12367_v44  ;;  %20336 = vmatpush3.bf16.msra.mxu0 %v22695_v12  ;;  %v8426_v12 = vshll.u32 %v25286_v21, 16  ;;  %v12404_v55 = vshll.u32 %v25319_v33, 16 }
 0x2d1   : > { %20804 = vmatpush3.bf16.msra.mxu1 %v22696_v29  ;;  %20337 = vmatprep.subr.bf16.mxu0 %v22702_v4  ;;  %v12392_v29 = vshrl.u32 %v25283_v60, 16  ;;  %v12391_v48 = vsel %vm370_vm0, %v12386_v58, %v12390_v10  ;;  %v25349_v58 = vld [vmem:[%s23108_s16 + $0x274] sm:$0xff]  }
 0x2d2   : > { %20805 = vmatprep.subr.bf16.mxu1 %v22704_v16  ;;  %v8428_v44 = vrot.slane %v8426_v12, 1  ;;  %v12406_v12 = vrot.slane %v12404_v55, 1  ;;  %v8458_v55 = vshll.u32 %v25346_v6, 16 }
 0x2d3   : > { %v12394_v54 = vor.u32 %v12392_v29, %v12390_v10  ;;  %v12414_v10 = vrot.slane %v12412_v51, 1  ;;  %v25364_v51 = vld [vmem:[%s23108_s16 + $0x1d8] ss:$0 sps:$4 sm:$0x11]  }
 0x2d4   : > { %20338 = vmatpush3.bf16.msra.mxu0 %v22702_v4  ;;  %v12398_v4 = vrot.slane %v12396_v28, 1  ;;  %v8429_v40 = vsel %vm370_vm0, %v8424_v32, %v8428_v44  ;;  %v8432_v18 = vor.u32 %v8430_v26, %v8428_v44  ;;  %v8444_v28 = vrot.slane %v8442_v13, 1 }
 0x2d5   : > { %20806 = vmatpush3.bf16.msra.mxu1 %v22704_v16  ;;  %20375 = vmatprep.subr.bf16.mxu0 %v25294_v45  ;;  %v8434_v16 = vshll.u32 %v25315_v53, 16  ;;  %v8446_v44 = vshrl.u32 %v25322_v9, 16  ;;  %v12416_v26 = vshrl.u32 %v25325_v42, 16 }
 0x2d6   : > { %20304 = vmatmul.mubr.bf16.gmra.mrb[52].mxu0 %v8405_v20  ;;  %20843 = vmatprep.subr.bf16.mxu1 %v25300_v50  ;;  %v12399_v20 = vsel %vm370_vm0, %v12394_v54, %v12398_v4  ;;  %v12402_v57 = vor.u32 %v12400_v34, %v12398_v4 }
 0x2d7   : > { %20772 = vmatmul.mubr.bf16.gmra.mrb[52].mxu1 %v12375_v19  ;;  %20307 = vmatprep.mubr.bf16.mxu0 %v8413_v24  ;;  %v12408_v19 = vshrl.u32 %v25319_v33, 16  ;;  %v8436_v25 = vrot.slane %v8434_v16, 1  ;;  %v25340_v24 = vld [vmem:[%s23108_s16 + $0x1c8] sm:$0xff]  }
 0x2d8   : > { %20775 = vmatprep.mubr.bf16.mxu1 %v12383_v31  ;;  %27210 = vst [vmem:[#allocation2_spill] sm:$0xff] %v25340_v24  ;;  %v25343_v31 = vld [vmem:[%s23108_s16 + $0x26c] sm:$0xff]   ;;  %v8450_v32 = vshll.u32 %v25340_v24, 16  ;;  %v12407_v16 = vsel %vm370_vm0, %v12402_v57, %v12406_v12  ;;  %v8454_v34 = vshrl.u32 %v25340_v24, 16  ;;  %v8460_v57 = vrot.slane %v8458_v55, 1 }
 0x2d9   : > { %27211 = vst [vmem:[#allocation3_spill] sm:$0xff] %v25343_v31  ;;  %v8440_v29 = vor.u32 %v8438_v2, %v8436_v25  ;;  %v12410_v61 = vor.u32 %v12408_v19, %v12406_v12  ;;  %v8437_v54 = vsel %vm370_vm0, %v8432_v18, %v8436_v25  ;;  %v12420_v4 = vshll.u32 %v25343_v31, 16  ;;  %v25367_v12 = vld [vmem:[%s23108_s16 + $0x27c] ss:$0 sps:$4 sm:$0x11]  }
 0x2da   : > { %v12428_v2 = vshll.u32 %v25349_v58, 16  ;;  %v8452_v13 = vrot.slane %v8450_v32, 1  ;;  %v12418_v25 = vor.u32 %v12416_v26, %v12414_v10  ;;  %v8462_v24 = vshrl.u32 %v25346_v6, 16 }
 0x2db   : > { %v12422_v19 = vrot.slane %v12420_v4, 1  ;;  %v8466_v32 = vshll.u32 %v25364_v51, 16 }
 0x2dc   : > { %v8456_v18 = vor.u32 %v8454_v34, %v8452_v13  ;;  %v8464_v4 = vor.u32 %v8462_v24, %v8460_v57  ;;  %v22710_v24 = vld [vmem:[%s27158_s1 + $0x88] sm:$0xff]  }
 0x2de   : > { %20308 = vmatmul.mubr.bf16.gmra.mrb[56].mxu0 %v8421_v7  ;;  %v8445_v7 = vsel %vm370_vm0, %v8440_v29, %v8444_v28 }
 0x2df   : > { %20776 = vmatmul.mubr.bf16.gmra.mrb[56].mxu1 %v12391_v48  ;;  %20311 = vmatprep.mubr.bf16.mxu0 %v8429_v40  ;;  %v12415_v48 = vsel %vm370_vm0, %v12410_v61, %v12414_v10  ;;  %v12424_v40 = vshrl.u32 %v25343_v31, 16  ;;  %v12430_v61 = vrot.slane %v12428_v2, 1  ;;  %v12436_v10 = vshll.u32 %v25367_v12, 16  ;;  %v22716_v2 = vld [vmem:[%s27158_s1 + $0xa0] sm:$0xff]  }
 0x2e0   : > { %20779 = vmatprep.mubr.bf16.mxu1 %v12399_v20  ;;  %v8448_v20 = vor.u32 %v8446_v44, %v8444_v28  ;;  %v8461_v28 = vsel %vm370_vm0, %v8456_v18, %v8460_v57  ;;  %v22721_v18 = vld [vmem:[%s27158_s1 + $0xb8] sm:$0xff]  }
 0x2e1   : > { %v12426_v29 = vor.u32 %v12424_v40, %v12422_v19  ;;  %v12438_v34 = vrot.slane %v12436_v10, 1  ;;  %v22715_v40 = vld [vmem:[%s27158_s1 + $0xa0] sm:$0xff]   ;;  %v22722_v57 = vld [vmem:[%s27158_s1 + $0xb8] sm:$0xff]  }
 0x2e2   : > { %v8453_v31 = vsel %vm370_vm0, %v8448_v20, %v8452_v13  ;;  %v22717_v13 = vld [vmem:[%s27158_s1 + $0xa8] sm:$0xff]  }
 0x2e3   : > { %v12431_v44 = vsel %vm370_vm0, %v12426_v29, %v12430_v61  ;;  %v22718_v20 = vld [vmem:[%s27158_s1 + $0xa8] sm:$0xff]   ;;  %v25444_v29 = vld [vmem:[%s27158_s1 + $0xc0] sm:$0xff]  }
 0x2e6   : > { %20312 = vmatmul.mubr.bf16.gmra.mrb[60].mxu0 %v8437_v54  ;;  %v12423_v54 = vsel %vm370_vm0, %v12418_v25, %v12422_v19  ;;  %v22719_v19 = vld [vmem:[%s27158_s1 + $0xb0] sm:$0xff]  }
 0x2e7   : > { %20780 = vmatmul.mubr.bf16.gmra.mrb[60].mxu1 %v12407_v16  ;;  %20315 = vmatprep.mubr.bf16.mxu0 %v8445_v7  ;;  %v12432_v16 = vshrl.u32 %v25349_v58, 16  ;;  %v8468_v7 = vrot.slane %v8466_v32, 1  ;;  %v22720_v25 = vld [vmem:[%s27158_s1 + $0xb0] sm:$0xff]   ;;  %v17006_v32 = vld [vmem:[%s23108_s16 + $0x148] sm:$0xe] }
 0x2e8   : > { %20783 = vmatprep.mubr.bf16.mxu1 %v12415_v48 }
 0x2e9   : > { %v12434_v26 = vor.u32 %v12432_v16, %v12430_v61  ;;  %v8469_v55 = vsel %vm370_vm0, %v8464_v4, %v8468_v7  ;;  %v25449_v61 = vld [vmem:[%s27158_s1 + $0xc0] sm:$0xff]   ;;  %v12947_v7 = vrot.slane %v25102_v35, 1 }
 0x2eb   : > { %v12439_v48 = vsel %vm370_vm0, %v12434_v26, %v12438_v34  ;;  %v8979_v26 = vrot.slane %v25115_v14, 1  ;;  %v12949_v34 = vrot.slane %v25119_v23, 1 }
 0x2ee   : > { %20316 = vmatmul.mubr.bf16.gmra.mrb[64].mxu0 %v8453_v31  ;;  %v22709_v31 = vld [vmem:[%s27158_s1 + $0x88] sm:$0xff]  }
 0x2ef   : > { %20784 = vmatmul.mubr.bf16.gmra.mrb[64].mxu1 %v12423_v54  ;;  %20319 = vmatprep.mubr.bf16.mxu0 %v8461_v28  ;;  %v17458_v54 = vld [vmem:[%s23108_s16 + $0x1ec] sm:$0xe]  ;;  %v17023_v28 = vcombine.low %v17006_v32, %v25077_v15  ;;  %v8983_v15 = vrot.slane %v25140_v17, 1  ;;  %v12971_v32 = vrot.slane %v25289_v36, 1 }
 0x2f0   : > { %20787 = vmatprep.mubr.bf16.mxu1 %v12431_v44  ;;  %v17475_v16 = vcombine.low %v17458_v54, %v25081_v49  ;;  %v8977_v44 = vrot.slane %v25097_v3, 1  ;;  %v12953_v49 = vrot.slane %v25143_v46, 1 }
 0x2f1   : > { %v8976_v10 = vrot.slane %v17023_v28, 1  ;;  %v25559_v28 = vld [vmem:[%s27160_s3] ss:$0 sm:$0xff] }
 0x2f2   : > { %v12946_v4 = vrot.slane %v17475_v16, 1 }
 0x2f6   : > { %20320 = vmatmul.mubr.bf16.gmra.mrb[68].mxu0 %v8469_v55  ;;  %v8981_v55 = vrot.slane %v25122_v41, 1 }
 0x2f7   : > { %20788 = vmatmul.mubr.bf16.gmra.mrb[68].mxu1 %v12439_v48  ;;  %20339 = vmatprep.mubr.bf16.mxu0 %v25087_v47  ;;  %v22711_v47 = vld [vmem:[%s27158_s1 + $0x90] sm:$0xff]   ;;  %v12951_v48 = vrot.slane %v25125_v5, 1 }
 0x2f8   : > { %20807 = vmatprep.mubr.bf16.mxu1 %v25091_v1  ;;  %v22712_v1 = vld [vmem:[%s27158_s1 + $0x90] sm:$0xff]  }
 0x2fe   : > { %20340 = vmatmul.mubr.bf16.vlgmr.msra.gmra.mrb[36].mxu0 %v25097_v3  ;;  %v27212_v3 = vld [vmem:[#allocation2_spill] sm:$0xff] }
 0x2ff   : > { %20808 = vmatmul.mubr.bf16.vlgmr.msra.gmra.mrb[36].mxu1 %v25102_v35  ;;  %20376 = vmatpush3.bf16.msra.mxu0 %v25294_v45  ;;  %v22713_v45 = vld [vmem:[%s27158_s1 + $0x98] sm:$0xff]   ;;  %v8985_v35 = vrot.slane %v25146_v11, 1 }
 0x300   : > { %20844 = vmatpush3.bf16.msra.mxu1 %v25300_v50  ;;  %20343 = vmatprep.mubr.bf16.mxu0 %v25115_v14  ;;  %v22714_v50 = vld [vmem:[%s27158_s1 + $0x98] sm:$0xff]   ;;  %v8978_v14 = vsel %vm1026_vm1, %v8976_v10, %v8977_v44 }
 0x301   : > { %20811 = vmatprep.mubr.bf16.mxu1 %v25119_v23  ;;  %20377 = vmatprep.subr.bf16.mxu0 %v22709_v31  ;;  %v12948_v23 = vsel %vm1026_vm1, %v12946_v4, %v12947_v7 }
 0x302   : > { %20845 = vmatprep.subr.bf16.mxu1 %v22710_v24 }
 0x303   : > { %20378 = vmatpush3.bf16.msra.mxu0 %v22709_v31  ;;  %v27213_v31 = vld [vmem:[#allocation3_spill] sm:$0xff] }
 0x304   : > { %20846 = vmatpush3.bf16.msra.mxu1 %v22710_v24  ;;  %20379 = vmatprep.subr.bf16.mxu0 %v22711_v47  ;;  %v25495_v24 = vsel %vm1026_vm1, %v12949_v34, %v12951_v48 }
 0x305   : > { %20847 = vmatprep.subr.bf16.mxu1 %v22712_v1 }
 0x306   : > { %20344 = vmatmul.mubr.bf16.gmra.mrb[40].mxu0 %v25122_v41  ;;  %v12955_v41 = vrot.slane %v25149_v39, 1 }
 0x307   : > { %20812 = vmatmul.mubr.bf16.gmra.mrb[40].mxu1 %v25125_v5  ;;  %20347 = vmatprep.mubr.bf16.mxu0 %v25140_v17  ;;  %v25486_v5 = vsel %vm1026_vm1, %v8977_v44, %v8979_v26  ;;  %v25489_v17 = vsel %vm1026_vm1, %v12947_v7, %v12949_v34 }
 0x308   : > { %20815 = vmatprep.mubr.bf16.mxu1 %v25143_v46  ;;  %20380 = vmatpush3.bf16.msra.mxu0 %v22711_v47  ;;  %v25492_v46 = vsel %vm1026_vm1, %v8979_v26, %v8981_v55  ;;  %v25501_v47 = vsel %vm1026_vm1, %v12951_v48, %v12953_v49 }
 0x309   : > { %20848 = vmatpush3.bf16.msra.mxu1 %v22712_v1  ;;  %20381 = vmatprep.subr.bf16.mxu0 %v22713_v45  ;;  %v12957_v1 = vrot.slane %v25174_v27, 1 }
 0x30a   : > { %20849 = vmatprep.subr.bf16.mxu1 %v22714_v50 }
 0x30c   : > { %20382 = vmatpush3.bf16.msra.mxu0 %v22713_v45  ;;  %v25506_v45 = vsel %vm1026_vm1, %v8983_v15, %v8985_v35 }
 0x30d   : > { %20850 = vmatpush3.bf16.msra.mxu1 %v22714_v50  ;;  %20383 = vmatprep.subr.bf16.mxu0 %v22715_v40  ;;  %v8989_v50 = vrot.slane %v25181_v62, 1 }
 0x30e   : > { %20348 = vmatmul.mubr.bf16.gmra.mrb[44].mxu0 %v25146_v11  ;;  %20851 = vmatprep.subr.bf16.mxu1 %v22716_v2  ;;  %v25498_v11 = vsel %vm1026_vm1, %v8981_v55, %v8983_v15  ;;  %v9003_v55 = vrot.slane %v25315_v53, 1 }
 0x30f   : > { %20816 = vmatmul.mubr.bf16.gmra.mrb[44].mxu1 %v25149_v39  ;;  %20351 = vmatprep.mubr.bf16.mxu0 %v25170_v63  ;;  %v8987_v39 = vrot.slane %v25170_v63, 1  ;;  %v12963_v63 = vrot.slane %v25217_v22, 1 }
 0x310   : > { %20819 = vmatprep.mubr.bf16.mxu1 %v25174_v27  ;;  %20384 = vmatpush3.bf16.msra.mxu0 %v22715_v40  ;;  %v12959_v40 = vrot.slane %v25187_v8, 1  ;;  %v8995_v27 = vrot.slane %v25241_v52, 1 }
 0x311   : > { %20852 = vmatpush3.bf16.msra.mxu1 %v22716_v2  ;;  %20385 = vmatprep.subr.bf16.mxu0 %v22717_v13  ;;  %v8991_v2 = vrot.slane %v25205_v0, 1 }
 0x312   : > { %20853 = vmatprep.subr.bf16.mxu1 %v22718_v20 }
 0x314   : > { %20386 = vmatpush3.bf16.msra.mxu0 %v22717_v13  ;;  %v25512_v13 = vsel %vm1026_vm1, %v12953_v49, %v12955_v41 }
 0x315   : > { %20854 = vmatpush3.bf16.msra.mxu1 %v22718_v20  ;;  %20387 = vmatprep.subr.bf16.mxu0 %v22719_v19  ;;  %v12961_v20 = vrot.slane %v25211_v56, 1 }
 0x316   : > { %20352 = vmatmul.mubr.bf16.gmra.mrb[48].mxu0 %v25181_v62  ;;  %20855 = vmatprep.subr.bf16.mxu1 %v22720_v25  ;;  %v12967_v62 = vrot.slane %v25253_v37, 1 }
 0x317   : > { %20820 = vmatmul.mubr.bf16.gmra.mrb[48].mxu1 %v25187_v8  ;;  %20355 = vmatprep.mubr.bf16.mxu0 %v25205_v0  ;;  %v25523_v8 = vsel %vm1026_vm1, %v8985_v35, %v8987_v39  ;;  %v25526_v0 = vsel %vm1026_vm1, %v12955_v41, %v12957_v1 }
 0x318   : > { %20823 = vmatprep.mubr.bf16.mxu1 %v25211_v56  ;;  %20388 = vmatpush3.bf16.msra.mxu0 %v22719_v19  ;;  %v8993_v19 = vrot.slane %v25214_v30, 1  ;;  %v8999_v56 = vrot.slane %v25277_v59, 1 }
 0x319   : > { %20856 = vmatpush3.bf16.msra.mxu1 %v22720_v25  ;;  %20389 = vmatprep.subr.bf16.mxu0 %v22721_v18  ;;  %v12965_v25 = vrot.slane %v25247_v43, 1 }
 0x31a   : > { %20857 = vmatprep.subr.bf16.mxu1 %v22722_v57 }
 0x31b   : > { %v25565_v16 = vsel %vm1026_vm1, %v12963_v63, %v12965_v25  ;;  %v25571_v44 = vsel %vm1026_vm1, %v12965_v25, %v12967_v62 }
 0x31c   : > { %20390 = vmatpush3.bf16.msra.mxu0 %v22721_v18  ;;  %v8997_v18 = vrot.slane %v25250_v38, 1 }
 0x31d   : > { %20858 = vmatpush3.bf16.msra.mxu1 %v22722_v57  ;;  %20427 = vmatprep.subr.bf16.mxu0 %v25444_v29  ;;  %v25553_v57 = vsel %vm1026_vm1, %v12961_v20, %v12963_v63 }
 0x31e   : > { %20356 = vmatmul.mubr.bf16.gmra.mrb[52].mxu0 %v25214_v30  ;;  %20895 = vmatprep.subr.bf16.mxu1 %v25449_v61  ;;  %v12969_v30 = vrot.slane %v25283_v60, 1  ;;  %v25568_v10 = vsel %vm1026_vm1, %v8995_v27, %v8997_v18  ;;  %v25575_v26 = vsel %vm1026_vm1, %v8997_v18, %v8999_v56  ;;  %v22727_v18 = vld [vmem:[%s27158_s1 + $0xc8] sm:$0xff]  }
 0x31f   : > { %20824 = vmatmul.mubr.bf16.gmra.mrb[52].mxu1 %v25217_v22  ;;  %20359 = vmatprep.mubr.bf16.mxu0 %v25241_v52  ;;  %v25534_v22 = vld [vmem:[%s27159_s2] ss:$0 sm:$0xff]  ;;  %v25537_v52 = vsel %vm1026_vm1, %v8987_v39, %v8989_v50 }
 0x320   : > { %20827 = vmatprep.mubr.bf16.mxu1 %v25247_v43  ;;  %v25540_v43 = vsel %vm1026_vm1, %v12957_v1, %v12959_v40  ;;  %v25578_v34 = vsel %vm1026_vm1, %v12967_v62, %v12969_v30 }
 0x326   : > { %20360 = vmatmul.mubr.bf16.gmra.mrb[56].mxu0 %v25250_v38  ;;  %v25543_v38 = vsel %vm1026_vm1, %v8989_v50, %v8991_v2 }
 0x327   : > { %20828 = vmatmul.mubr.bf16.gmra.mrb[56].mxu1 %v25253_v37  ;;  %20363 = vmatprep.mubr.bf16.mxu0 %v25277_v59  ;;  %v9001_v37 = vrot.slane %v25286_v21, 1  ;;  %v25547_v59 = vsel %vm1026_vm1, %v12959_v40, %v12961_v20 }
 0x328   : > { %20831 = vmatprep.mubr.bf16.mxu1 %v25283_v60  ;;  %v25550_v60 = vsel %vm1026_vm1, %v8991_v2, %v8993_v19  ;;  %v25591_v2 = vsel %vm1026_vm1, %v12969_v30, %v12971_v32 }
 0x32e   : > { %20364 = vmatmul.mubr.bf16.gmra.mrb[60].mxu0 %v25286_v21  ;;  %v25562_v21 = vsel %vm1026_vm1, %v8993_v19, %v8995_v27 }
 0x32f   : > { %20832 = vmatmul.mubr.bf16.gmra.mrb[60].mxu1 %v25289_v36  ;;  %20367 = vmatprep.mubr.bf16.mxu0 %v25315_v53  ;;  %v22733_v53 = vld [vmem:[%s27158_s1 + $0xe0] sm:$0xff]  }
 0x330   : > { %20835 = vmatprep.mubr.bf16.mxu1 %v25319_v33 }
 0x336   : > { %20368 = vmatmul.mubr.bf16.gmra.mrb[64].mxu0 %v25322_v9 }
 0x337   : > { %20836 = vmatmul.mubr.bf16.gmra.mrb[64].mxu1 %v25325_v42  ;;  %20371 = vmatprep.mubr.bf16.mxu0 %v27212_v3 }
 0x338   : > { %20839 = vmatprep.mubr.bf16.mxu1 %v27213_v31 }
 0x33e   : > { %20372 = vmatmul.mubr.bf16.gmra.mrb[68].mxu0 %v25346_v6 }
 0x33f   : > { %20840 = vmatmul.mubr.bf16.gmra.mrb[68].mxu1 %v25349_v58  ;;  %20391 = vmatprep.mubr.bf16.mxu0 %v8978_v14  ;;  %v25584_v14 = vsel %vm1026_vm1, %v8999_v56, %v9001_v37 }
 0x340   : > { %20859 = vmatprep.mubr.bf16.mxu1 %v12948_v23  ;;  %v12973_v23 = vrot.slane %v25319_v33, 1 }
 0x341   : > { %v19769_v54 = vpop.f32.mrb[0].mxu0 }
 0x342   : > { %v3896_v36 = vmul.f32 %v19769_v54, %v25534_v22  ;;  %v20237_v4 = vpop.f32.mrb[0].mxu1  ;;  %v3708_v7 = vpop.f32.mrb[1].mxu0  ;;  %v22728_v54 = vld [vmem:[%s27158_s1 + $0xc8] sm:$0xff]  }
 0x343   : > { %v7865_v48 = vmul.f32 %v20237_v4, %v25534_v22  ;;  %v3894_v15 = vmul.f32 %v25534_v22, %v3708_v7  ;;  %v7677_v49 = vpop.f32.mrb[1].mxu1  ;;  %v19770_v35 = vpop.f32.mrb[2].mxu0 }
 0x344   : > { %v3939_v41 = vadd.f32 %v25559_v28, %v3896_v36  ;;  %v7863_v39 = vmul.f32 %v25534_v22, %v7677_v49  ;;  %v3897_v1 = vmul.f32 %v19770_v35, %v25534_v22  ;;  %v20238_v50 = vpop.f32.mrb[2].mxu1  ;;  %v3711_v40 = vpop.f32.mrb[3].mxu0  ;;  %v25611_v36 = vsel %vm1026_vm1, %v9001_v37, %v9003_v55 }
 0x345   : > { %v7908_v20 = vadd.f32 %v25559_v28, %v7865_v48  ;;  %v3937_v19 = vadd.f32 %v25559_v28, %v3894_v15  ;;  %v7866_v63 = vmul.f32 %v20238_v50, %v25534_v22  ;;  %v3895_v27 = vmul.f32 %v25534_v22, %v3711_v40  ;;  %v7680_v25 = vpop.f32.mrb[3].mxu1 }
 0x346   : > { %v7906_v62 = vadd.f32 %v25559_v28, %v7863_v39  ;;  %v3940_v56 = vadd.f32 %v25559_v28, %v3897_v1  ;;  %v7864_v30 = vmul.f32 %v25534_v22, %v7680_v25  ;;  %20392 = vmatmul.mubr.bf16.vlgmr.msra.gmra.mrb[36].mxu0 %v25486_v5  ;;  %v25620_v5 = vsel %vm1026_vm1, %v12971_v32, %v12973_v23 }
 0x347   : > { %v7909_v4 = vadd.f32 %v25559_v28, %v7866_v63  ;;  %v3938_v7 = vadd.f32 %v25559_v28, %v3895_v27  ;;  %20860 = vmatmul.mubr.bf16.vlgmr.msra.gmra.mrb[36].mxu1 %v25489_v17  ;;  %20428 = vmatpush3.bf16.msra.mxu0 %v25444_v29  ;;  %v3975_v48 = vmax.f32 %v3939_v41, 0.0  ;;  %v9005_v37 = vrot.slane %v25322_v9, 1 }
 0x348   : > { %v3976_v15 = vmax.f32 %v3940_v56, 0.0  ;;  %v7907_v49 = vadd.f32 %v25559_v28, %v7864_v30  ;;  %20896 = vmatpush3.bf16.msra.mxu1 %v25449_v61  ;;  %20395 = vmatprep.mubr.bf16.mxu0 %v25492_v46  ;;  %v7944_v35 = vmax.f32 %v7908_v20, 0.0  ;;  %v3973_v39 = vmax.f32 %v3937_v19, 0.0  ;;  %v22729_v61 = vld [vmem:[%s27158_s1 + $0xd0] sm:$0xff]  }
 0x349   : > { %v7945_v29 = vmax.f32 %v7909_v4, 0.0  ;;  %v3974_v17 = vmax.f32 %v3938_v7, 0.0  ;;  %v19773_v32 = vpop.f32.mrb[4].mxu0  ;;  %20863 = vmatprep.mubr.bf16.mxu1 %v25495_v24  ;;  %20429 = vmatprep.subr.bf16.mxu0 %v22727_v18  ;;  %v7942_v46 = vmax.f32 %v7906_v62, 0.0  ;;  %v22730_v19 = vld [vmem:[%s27158_s1 + $0xd0] sm:$0xff]  }
 0x34a   : > { %v17976_v41 = vpack.c.bf16 %v3976_v15, %v3975_v48  ;;  %v7943_v1 = vmax.f32 %v7907_v49, 0.0  ;;  %v3900_v50 = vmul.f32 %v19773_v32, %v25534_v22  ;;  %v20241_v40 = vpop.f32.mrb[4].mxu1  ;;  %v3724_v20 = vpop.f32.mrb[5].mxu0  ;;  %20897 = vmatprep.subr.bf16.mxu1 %v22728_v54  ;;  %v22731_v32 = vld [vmem:[%s27158_s1 + $0xd8] sm:$0xff]  }
 0x34b   : > { %v18066_v24 = vpack.c.bf16 %v7945_v29, %v7944_v35  ;;  %v17971_v63 = vpack.c.bf16 %v3974_v17, %v3973_v39  ;;  %v7869_v27 = vmul.f32 %v20241_v40, %v25534_v22  ;;  %v3898_v25 = vmul.f32 %v25534_v22, %v3724_v20  ;;  %v7693_v62 = vpop.f32.mrb[5].mxu1  ;;  %v19774_v56 = vpop.f32.mrb[6].mxu0  ;;  %20430 = vmatpush3.bf16.msra.mxu0 %v22727_v18 }
 0x34c   : > { %18328 = vst [vmem:[%s25629_s28 + $0x8] sm:$0xff] %v17976_v41   ;;  %v18061_v30 = vpack.c.bf16 %v7943_v1, %v7942_v46  ;;  %v3943_v4 = vadd.f32 %v25559_v28, %v3900_v50  ;;  %v7867_v7 = vmul.f32 %v25534_v22, %v7693_v62  ;;  %v3901_v48 = vmul.f32 %v19774_v56, %v25534_v22  ;;  %v20242_v15 = vpop.f32.mrb[6].mxu1  ;;  %v3727_v49 = vpop.f32.mrb[7].mxu0  ;;  %v22732_v1 = vld [vmem:[%s27158_s1 + $0xd8] sm:$0xff]  }
 0x34d   : > { %20898 = vmatpush3.bf16.msra.mxu1 %v22728_v54  ;;  %18346 = vst [vmem:[%s25629_s28 + $0x98] sm:$0xff] %v18066_v24   ;;  %17972 = vst [vmem:[%s25629_s28] sm:$0xff] %v17971_v63   ;;  %v7912_v35 = vadd.f32 %v25559_v28, %v7869_v27  ;;  %v3941_v39 = vadd.f32 %v25559_v28, %v3898_v25  ;;  %v7870_v18 = vmul.f32 %v20242_v15, %v25534_v22  ;;  %v7696_v17 = vpop.f32.mrb[7].mxu1 }
 0x34e   : > { %v3899_v29 = vmul.f32 %v25534_v22, %v3727_v49  ;;  %20431 = vmatprep.subr.bf16.mxu0 %v22729_v61  ;;  %18345 = vst [vmem:[%s25629_s28 + $0x90] sm:$0xff] %v18061_v30   ;;  %v7910_v46 = vadd.f32 %v25559_v28, %v7867_v7  ;;  %v3944_v54 = vadd.f32 %v25559_v28, %v3901_v48  ;;  %v12975_v20 = vrot.slane %v25325_v42, 1 }
 0x34f   : > { %v7868_v41 = vmul.f32 %v25534_v22, %v7696_v17  ;;  %20396 = vmatmul.mubr.bf16.gmra.mrb[40].mxu0 %v25498_v11  ;;  %20899 = vmatprep.subr.bf16.mxu1 %v22730_v19  ;;  %v7913_v50 = vadd.f32 %v25559_v28, %v7870_v18  ;;  %v9007_v24 = vrot.slane %v27212_v3, 1  ;;  %v3979_v63 = vmax.f32 %v3943_v4, 0.0 }
 0x350   : > { %v3942_v40 = vadd.f32 %v25559_v28, %v3899_v29  ;;  %20864 = vmatmul.mubr.bf16.gmra.mrb[40].mxu1 %v25501_v47  ;;  %20399 = vmatprep.mubr.bf16.mxu0 %v25506_v45  ;;  %v3980_v27 = vmax.f32 %v3944_v54, 0.0  ;;  %v25675_v25 = vsel %vm1026_vm1, %v9003_v55, %v9005_v37  ;;  %v7948_v47 = vmax.f32 %v7912_v35, 0.0 }
 0x351   : > { %v7911_v11 = vadd.f32 %v25559_v28, %v7868_v41  ;;  %20867 = vmatprep.mubr.bf16.mxu1 %v25512_v13  ;;  %20432 = vmatpush3.bf16.msra.mxu0 %v22729_v61  ;;  %v3977_v45 = vmax.f32 %v3941_v39, 0.0  ;;  %v7949_v62 = vmax.f32 %v7913_v50, 0.0  ;;  %v19777_v30 = vpop.f32.mrb[8].mxu0  ;;  %v7946_v4 = vmax.f32 %v7910_v46, 0.0 }
 0x352   : > { %v3978_v56 = vmax.f32 %v3942_v40, 0.0  ;;  %20900 = vmatpush3.bf16.msra.mxu1 %v22730_v19  ;;  %20433 = vmatprep.subr.bf16.mxu0 %v22731_v32  ;;  %v17986_v7 = vpack.c.bf16 %v3980_v27, %v3979_v63  ;;  %v3904_v13 = vmul.f32 %v19777_v30, %v25534_v22  ;;  %v20245_v61 = vpop.f32.mrb[8].mxu1  ;;  %v3740_v15 = vpop.f32.mrb[9].mxu0  ;;  %v22734_v40 = vld [vmem:[%s27158_s1 + $0xe0] sm:$0xff]   ;;  %v22735_v30 = vld [vmem:[%s27158_s1 + $0xe8] sm:$0xff]  }
 0x353   : > { %v7947_v48 = vmax.f32 %v7911_v11, 0.0  ;;  %20901 = vmatprep.subr.bf16.mxu1 %v22732_v1  ;;  %v18076_v55 = vpack.c.bf16 %v7949_v62, %v7948_v47  ;;  %v7873_v19 = vmul.f32 %v20245_v61, %v25534_v22  ;;  %v3902_v35 = vmul.f32 %v25534_v22, %v3740_v15  ;;  %v7709_v39 = vpop.f32.mrb[9].mxu1  ;;  %v19778_v18 = vpop.f32.mrb[10].mxu0 }
 0x354   : > { %v17981_v49 = vpack.c.bf16 %v3978_v56, %v3977_v45  ;;  %18330 = vst [vmem:[%s25629_s28 + $0x18] sm:$0xff] %v17986_v7   ;;  %v3947_v17 = vadd.f32 %v25559_v28, %v3904_v13  ;;  %v7871_v46 = vmul.f32 %v25534_v22, %v7709_v39  ;;  %v3905_v54 = vmul.f32 %v19778_v18, %v25534_v22  ;;  %v20246_v41 = vpop.f32.mrb[10].mxu1  ;;  %v3743_v50 = vpop.f32.mrb[11].mxu0 }
 0x355   : > { %v18071_v29 = vpack.c.bf16 %v7947_v48, %v7946_v4  ;;  %20434 = vmatpush3.bf16.msra.mxu0 %v22731_v32  ;;  %18348 = vst [vmem:[%s25629_s28 + $0xa8] sm:$0xff] %v18076_v55   ;;  %v7916_v63 = vadd.f32 %v25559_v28, %v7873_v19  ;;  %v3945_v27 = vadd.f32 %v25559_v28, %v3902_v35  ;;  %v7712_v45 = vpop.f32.mrb[11].mxu1  ;;  %v22736_v4 = vld [vmem:[%s27158_s1 + $0xe8] sm:$0xff]   ;;  %v12977_v48 = vrot.slane %v27213_v31, 1 }
 0x356   : > { %18329 = vst [vmem:[%s25629_s28 + $0x10] sm:$0xff] %v17981_v49   ;;  %v7874_v11 = vmul.f32 %v20246_v41, %v25534_v22  ;;  %v3903_v47 = vmul.f32 %v25534_v22, %v3743_v50  ;;  %20902 = vmatpush3.bf16.msra.mxu1 %v22732_v1  ;;  %v7914_v62 = vadd.f32 %v25559_v28, %v7871_v46  ;;  %v3983_v13 = vmax.f32 %v3947_v17, 0.0 }
 0x357   : > { %18347 = vst [vmem:[%s25629_s28 + $0xa0] sm:$0xff] %v18071_v29   ;;  %v3948_v32 = vadd.f32 %v25559_v28, %v3905_v54  ;;  %v7872_v56 = vmul.f32 %v25534_v22, %v7712_v45  ;;  %20400 = vmatmul.mubr.bf16.gmra.mrb[44].mxu0 %v25523_v8  ;;  %20435 = vmatprep.subr.bf16.mxu0 %v22733_v53  ;;  %v7952_v33 = vmax.f32 %v7916_v63, 0.0 }
 0x358   : > { %v7917_v1 = vadd.f32 %v25559_v28, %v7874_v11  ;;  %v3946_v7 = vadd.f32 %v25559_v28, %v3903_v47  ;;  %20868 = vmatmul.mubr.bf16.gmra.mrb[44].mxu1 %v25526_v0  ;;  %20403 = vmatprep.mubr.bf16.mxu0 %v25537_v52  ;;  %v25716_v8 = vsel %vm1026_vm1, %v12973_v23, %v12975_v20  ;;  %v3981_v52 = vmax.f32 %v3945_v27, 0.0  ;;  %v22737_v47 = vld [vmem:[%s27158_s1 + $0xf0] sm:$0xff]  }
 0x359   : > { %v3984_v61 = vmax.f32 %v3948_v32, 0.0  ;;  %v7915_v15 = vadd.f32 %v25559_v28, %v7872_v56  ;;  %20871 = vmatprep.mubr.bf16.mxu1 %v25540_v43  ;;  %20903 = vmatprep.subr.bf16.mxu1 %v22734_v40  ;;  %v25726_v0 = vsel %vm1026_vm1, %v9005_v37, %v9007_v24  ;;  %v19781_v49 = vpop.f32.mrb[12].mxu0  ;;  %v7950_v19 = vmax.f32 %v7914_v62, 0.0 }
 0x35a   : > { %v7953_v23 = vmax.f32 %v7917_v1, 0.0  ;;  %v3982_v55 = vmax.f32 %v3946_v7, 0.0  ;;  %20436 = vmatpush3.bf16.msra.mxu0 %v22733_v53  ;;  %20904 = vmatpush3.bf16.msra.mxu1 %v22734_v40  ;;  %v3908_v43 = vmul.f32 %v19781_v49, %v25534_v22  ;;  %v20249_v18 = vpop.f32.mrb[12].mxu1  ;;  %v3756_v29 = vpop.f32.mrb[13].mxu0  ;;  %v22738_v7 = vld [vmem:[%s27158_s1 + $0xf0] sm:$0xff]  }
 0x35b   : > { %v17996_v35 = vpack.c.bf16 %v3984_v61, %v3983_v13  ;;  %v7951_v39 = vmax.f32 %v7915_v15, 0.0  ;;  %20437 = vmatprep.subr.bf16.mxu0 %v22735_v30  ;;  %20905 = vmatprep.subr.bf16.mxu1 %v22736_v4  ;;  %v7877_v17 = vmul.f32 %v20249_v18, %v25534_v22  ;;  %v3906_v46 = vmul.f32 %v25534_v22, %v3756_v29  ;;  %v7725_v53 = vpop.f32.mrb[13].mxu1  ;;  %v19782_v54 = vpop.f32.mrb[14].mxu0 }
 0x35c   : > { %v18086_v9 = vpack.c.bf16 %v7953_v23, %v7952_v33  ;;  %v17991_v37 = vpack.c.bf16 %v3982_v55, %v3981_v52  ;;  %v3951_v50 = vadd.f32 %v25559_v28, %v3908_v43  ;;  %v7875_v40 = vmul.f32 %v25534_v22, %v7725_v53  ;;  %v20250_v27 = vpop.f32.mrb[14].mxu1  ;;  %v3759_v11 = vpop.f32.mrb[15].mxu0  ;;  %v22739_v33 = vld [vmem:[%s27158_s1 + $0xf8] sm:$0xff]  }
 0x35d   : > { %18332 = vst [vmem:[%s25629_s28 + $0x28] sm:$0xff] %v17996_v35   ;;  %v18081_v41 = vpack.c.bf16 %v7951_v39, %v7950_v19  ;;  %v3909_v63 = vmul.f32 %v19782_v54, %v25534_v22  ;;  %v7920_v45 = vadd.f32 %v25559_v28, %v7877_v17  ;;  %v3949_v62 = vadd.f32 %v25559_v28, %v3906_v46  ;;  %v7728_v1 = vpop.f32.mrb[15].mxu1 }
 0x35e   : > { %18350 = vst [vmem:[%s25629_s28 + $0xb8] sm:$0xff] %v18086_v9   ;;  %18331 = vst [vmem:[%s25629_s28 + $0x20] sm:$0xff] %v17991_v37   ;;  %v7878_v32 = vmul.f32 %v20250_v27, %v25534_v22  ;;  %v3907_v56 = vmul.f32 %v25534_v22, %v3759_v11  ;;  %20438 = vmatpush3.bf16.msra.mxu0 %v22735_v30  ;;  %v7918_v13 = vadd.f32 %v25559_v28, %v7875_v40 }
 0x35f   : > { %18349 = vst [vmem:[%s25629_s28 + $0xb0] sm:$0xff] %v18081_v41   ;;  %v3952_v61 = vadd.f32 %v25559_v28, %v3909_v63  ;;  %v7876_v15 = vmul.f32 %v25534_v22, %v7728_v1  ;;  %20404 = vmatmul.mubr.bf16.gmra.mrb[48].mxu0 %v25543_v38  ;;  %20906 = vmatpush3.bf16.msra.mxu1 %v22736_v4  ;;  %v9009_v38 = vrot.slane %v25346_v6, 1  ;;  %v22740_v4 = vld [vmem:[%s27158_s1 + $0xf8] sm:$0xff]   ;;  %v3987_v55 = vmax.f32 %v3951_v50, 0.0 }
 0x360   : > { %v7921_v30 = vadd.f32 %v25559_v28, %v7878_v32  ;;  %v3950_v52 = vadd.f32 %v25559_v28, %v3907_v56  ;;  %20872 = vmatmul.mubr.bf16.gmra.mrb[48].mxu1 %v25547_v59  ;;  %20407 = vmatprep.mubr.bf16.mxu0 %v25550_v60  ;;  %v25764_v23 = vsel %vm1026_vm1, %v12975_v20, %v12977_v48  ;;  %v12979_v59 = vrot.slane %v25349_v58, 1 }
 0x361   : > { %v3988_v49 = vmax.f32 %v3952_v61, 0.0  ;;  %v7919_v19 = vadd.f32 %v25559_v28, %v7876_v15  ;;  %20875 = vmatprep.mubr.bf16.mxu1 %v25553_v57  ;;  %20439 = vmatprep.subr.bf16.mxu0 %v22737_v47  ;;  %v7956_v60 = vmax.f32 %v7920_v45, 0.0  ;;  %v3985_v42 = vmax.f32 %v3949_v62, 0.0  ;;  %v19785_v39 = vpop.f32.mrb[16].mxu0  ;;  %v25783_v62 = vld [vmem:[%s27158_s1 + $0x100] sm:$0xff]  }
 0x362   : > { %v7957_v35 = vmax.f32 %v7921_v30, 0.0  ;;  %v3986_v20 = vmax.f32 %v3950_v52, 0.0  ;;  %20907 = vmatprep.subr.bf16.mxu1 %v22738_v7  ;;  %20440 = vmatpush3.bf16.msra.mxu0 %v22737_v47  ;;  %v7954_v43 = vmax.f32 %v7918_v13, 0.0  ;;  %v3912_v9 = vmul.f32 %v19785_v39, %v25534_v22  ;;  %v20253_v37 = vpop.f32.mrb[16].mxu1  ;;  %v3772_v17 = vpop.f32.mrb[17].mxu0  ;;  %v25794_v61 = vld [vmem:[%s27158_s1 + $0x100] sm:$0xff]  }
 0x363   : > { %v18006_v18 = vpack.c.bf16 %v3988_v49, %v3987_v55  ;;  %v7955_v29 = vmax.f32 %v7919_v19, 0.0  ;;  %20908 = vmatpush3.bf16.msra.mxu1 %v22738_v7  ;;  %20441 = vmatprep.subr.bf16.mxu0 %v22739_v33  ;;  %v7881_v53 = vmul.f32 %v20253_v37, %v25534_v22  ;;  %v3910_v54 = vmul.f32 %v25534_v22, %v3772_v17  ;;  %v7741_v41 = vpop.f32.mrb[17].mxu1  ;;  %v19786_v50 = vpop.f32.mrb[18].mxu0 }
 0x364   : > { %v18096_v57 = vpack.c.bf16 %v7957_v35, %v7956_v60  ;;  %v18001_v46 = vpack.c.bf16 %v3986_v20, %v3985_v42  ;;  %20909 = vmatprep.subr.bf16.mxu1 %v22740_v4  ;;  %v3955_v63 = vadd.f32 %v25559_v28, %v3912_v9  ;;  %v7879_v27 = vmul.f32 %v25534_v22, %v7741_v41  ;;  %v20254_v47 = vpop.f32.mrb[18].mxu1  ;;  %v3775_v45 = vpop.f32.mrb[19].mxu0 }
 0x365   : > { %18334 = vst [vmem:[%s25629_s28 + $0x38] sm:$0xff] %v18006_v18   ;;  %v18091_v40 = vpack.c.bf16 %v7955_v29, %v7954_v43  ;;  %v3913_v11 = vmul.f32 %v19786_v50, %v25534_v22  ;;  %v7924_v32 = vadd.f32 %v25559_v28, %v7881_v53  ;;  %v3953_v56 = vadd.f32 %v25559_v28, %v3910_v54  ;;  %v7744_v13 = vpop.f32.mrb[19].mxu1 }
 0x366   : > { %18352 = vst [vmem:[%s25629_s28 + $0xc8] sm:$0xff] %v18096_v57   ;;  %18333 = vst [vmem:[%s25629_s28 + $0x30] sm:$0xff] %v18001_v46   ;;  %v7882_v1 = vmul.f32 %v20254_v47, %v25534_v22  ;;  %v3911_v7 = vmul.f32 %v25534_v22, %v3775_v45  ;;  %20442 = vmatpush3.bf16.msra.mxu0 %v22739_v33  ;;  %v7922_v15 = vadd.f32 %v25559_v28, %v7879_v27 }
 0x367   : > { %18351 = vst [vmem:[%s25629_s28 + $0xc0] sm:$0xff] %v18091_v40   ;;  %v3956_v30 = vadd.f32 %v25559_v28, %v3913_v11  ;;  %v7880_v52 = vmul.f32 %v25534_v22, %v7744_v13  ;;  %20408 = vmatmul.mubr.bf16.gmra.mrb[52].mxu0 %v25562_v21  ;;  %20910 = vmatpush3.bf16.msra.mxu1 %v22740_v4  ;;  %v9011_v19 = vrot.slane %v25364_v51, 1  ;;  %v3991_v60 = vmax.f32 %v3955_v63, 0.0  ;;  %v17032_v40 = vld [vmem:[%s23108_s16 + $0x150] sm:$0xe] }
 0x368   : > { %v7925_v55 = vadd.f32 %v25559_v28, %v7882_v1  ;;  %v3954_v49 = vadd.f32 %v25559_v28, %v3911_v7  ;;  %20876 = vmatmul.mubr.bf16.gmra.mrb[52].mxu1 %v25565_v16  ;;  %20411 = vmatprep.mubr.bf16.mxu0 %v25568_v10  ;;  %v25810_v33 = vsel %vm1026_vm1, %v9007_v24, %v9009_v38  ;;  %v7960_v3 = vmax.f32 %v7924_v32, 0.0  ;;  %v17033_v63 = vld [vmem:[%s23108_s16 + $0x154] sm:$0xf]  ;;  %v17485_v1 = vld [vmem:[%s23108_s16 + $0x1f8] sm:$0xf] }
 0x369   : > { %v3992_v21 = vmax.f32 %v3956_v30, 0.0  ;;  %v7923_v4 = vadd.f32 %v25559_v28, %v7880_v52  ;;  %20879 = vmatprep.mubr.bf16.mxu1 %v25571_v44  ;;  %v25820_v16 = vsel %vm1026_vm1, %v12977_v48, %v12979_v59  ;;  %20479 = vmatprep.subr.bf16.mxu0 %v25783_v62  ;;  %v3989_v10 = vmax.f32 %v3953_v56, 0.0  ;;  %v19789_v42 = vpop.f32.mrb[20].mxu0  ;;  %v17484_v56 = vld [vmem:[%s23108_s16 + $0x1f4] sm:$0xe] }
 0x36a   : > { %v7961_v24 = vmax.f32 %v7925_v55, 0.0  ;;  %v3990_v51 = vmax.f32 %v3954_v49, 0.0  ;;  %20947 = vmatprep.subr.bf16.mxu1 %v25794_v61  ;;  %v7958_v35 = vmax.f32 %v7922_v15, 0.0  ;;  %v3916_v39 = vmul.f32 %v19789_v42, %v25534_v22  ;;  %v20257_v31 = vpop.f32.mrb[20].mxu1  ;;  %v3788_v48 = vpop.f32.mrb[21].mxu0 }
 0x36b   : > { %v18016_v20 = vpack.c.bf16 %v3992_v21, %v3991_v60  ;;  %v7959_v44 = vmax.f32 %v7923_v4, 0.0  ;;  %v7885_v29 = vmul.f32 %v20257_v31, %v25534_v22  ;;  %v3914_v9 = vmul.f32 %v25534_v22, %v3788_v48  ;;  %v7757_v37 = vpop.f32.mrb[21].mxu1  ;;  %v19790_v17 = vpop.f32.mrb[22].mxu0 }
 0x36c   : > { %v18106_v43 = vpack.c.bf16 %v7961_v24, %v7960_v3  ;;  %v18011_v18 = vpack.c.bf16 %v3990_v51, %v3989_v10  ;;  %v3959_v46 = vadd.f32 %v25559_v28, %v3916_v39  ;;  %v7883_v53 = vmul.f32 %v25534_v22, %v7757_v37  ;;  %v20258_v41 = vpop.f32.mrb[22].mxu1  ;;  %v3791_v50 = vpop.f32.mrb[23].mxu0 }
 0x36d   : > { %18336 = vst [vmem:[%s25629_s28 + $0x48] sm:$0xff] %v18016_v20   ;;  %v18101_v57 = vpack.c.bf16 %v7959_v44, %v7958_v35  ;;  %v3917_v54 = vmul.f32 %v19790_v17, %v25534_v22  ;;  %v7928_v27 = vadd.f32 %v25559_v28, %v7885_v29  ;;  %v3957_v11 = vadd.f32 %v25559_v28, %v3914_v9  ;;  %v7760_v32 = vpop.f32.mrb[23].mxu1  ;;  %v25869_v29 = vld [vmem:[%s23108_s16 + $0x1fc] sm:$0xff]  }
 0x36e   : > { %18354 = vst [vmem:[%s25629_s28 + $0xd8] sm:$0xff] %v18106_v43   ;;  %18335 = vst [vmem:[%s25629_s28 + $0x40] sm:$0xff] %v18011_v18   ;;  %v7886_v47 = vmul.f32 %v20258_v41, %v25534_v22  ;;  %v3915_v45 = vmul.f32 %v25534_v22, %v3791_v50  ;;  %v7926_v7 = vadd.f32 %v25559_v28, %v7883_v53  ;;  %v12981_v49 = vrot.slane %v25367_v12, 1  ;;  %v25866_v18 = vld [vmem:[%s23108_s16 + $0x158] sm:$0xff]  }
 0x36f   : > { %18353 = vst [vmem:[%s25629_s28 + $0xd0] sm:$0xff] %v18101_v57   ;;  %v3960_v13 = vadd.f32 %v25559_v28, %v3917_v54  ;;  %v7884_v15 = vmul.f32 %v25534_v22, %v7760_v32  ;;  %20412 = vmatmul.mubr.bf16.gmra.mrb[56].mxu0 %v25575_v26  ;;  %v25849_v30 = vsel %vm1026_vm1, %v9009_v38, %v9011_v19  ;;  %v3995_v21 = vmax.f32 %v3959_v46, 0.0 }
 0x370   : > { %v7929_v52 = vadd.f32 %v25559_v28, %v7886_v47  ;;  %v3958_v55 = vadd.f32 %v25559_v28, %v3915_v45  ;;  %20880 = vmatmul.mubr.bf16.gmra.mrb[56].mxu1 %v25578_v34  ;;  %20415 = vmatprep.mubr.bf16.mxu0 %v25584_v14  ;;  %v25856_v60 = vcombine.low %v17032_v40, %v17033_v63  ;;  %v7964_v38 = vmax.f32 %v7928_v27, 0.0 }
 0x371   : > { %v3996_v4 = vmax.f32 %v3960_v13, 0.0  ;;  %v7927_v26 = vadd.f32 %v25559_v28, %v7884_v15  ;;  %20883 = vmatprep.mubr.bf16.mxu1 %v25591_v2  ;;  %v25860_v6 = vcombine.low %v17484_v56, %v17485_v1  ;;  %v3993_v19 = vmax.f32 %v3957_v11, 0.0  ;;  %v19793_v14 = vpop.f32.mrb[24].mxu0 }
 0x372   : > { %v7965_v3 = vmax.f32 %v7929_v52, 0.0  ;;  %v3994_v34 = vmax.f32 %v3958_v55, 0.0  ;;  %v7962_v10 = vmax.f32 %v7926_v7, 0.0  ;;  %v3920_v42 = vmul.f32 %v19793_v14, %v25534_v22  ;;  %v20261_v35 = vpop.f32.mrb[24].mxu1  ;;  %v3804_v20 = vpop.f32.mrb[25].mxu0 }
 0x373   : > { %v18026_v24 = vpack.c.bf16 %v3996_v4, %v3995_v21  ;;  %v7963_v51 = vmax.f32 %v7927_v26, 0.0  ;;  %v7889_v39 = vmul.f32 %v20261_v35, %v25534_v22  ;;  %v3918_v31 = vmul.f32 %v25534_v22, %v3804_v20  ;;  %v7773_v48 = vpop.f32.mrb[25].mxu1  ;;  %v19794_v43 = vpop.f32.mrb[26].mxu0 }
 0x374   : > { %v18116_v44 = vpack.c.bf16 %v7965_v3, %v7964_v38  ;;  %v18021_v2 = vpack.c.bf16 %v3994_v34, %v3993_v19  ;;  %v3963_v37 = vadd.f32 %v25559_v28, %v3920_v42  ;;  %v7887_v17 = vmul.f32 %v25534_v22, %v7773_v48  ;;  %v20262_v46 = vpop.f32.mrb[26].mxu1  ;;  %v3807_v53 = vpop.f32.mrb[27].mxu0 }
 0x375   : > { %18338 = vst [vmem:[%s25629_s28 + $0x58] sm:$0xff] %v18026_v24   ;;  %v18111_v9 = vpack.c.bf16 %v7963_v51, %v7962_v10  ;;  %v3921_v57 = vmul.f32 %v19794_v43, %v25534_v22  ;;  %v7932_v54 = vadd.f32 %v25559_v28, %v7889_v39  ;;  %v3961_v41 = vadd.f32 %v25559_v28, %v3918_v31  ;;  %v7776_v63 = vpop.f32.mrb[27].mxu1 }
 0x376   : > { %18356 = vst [vmem:[%s25629_s28 + $0xe8] sm:$0xff] %v18116_v44   ;;  %18337 = vst [vmem:[%s25629_s28 + $0x50] sm:$0xff] %v18021_v2   ;;  %v7890_v50 = vmul.f32 %v20262_v46, %v25534_v22  ;;  %v3919_v40 = vmul.f32 %v25534_v22, %v3807_v53  ;;  %v7930_v27 = vadd.f32 %v25559_v28, %v7887_v17  ;;  %v9438_v45 = vrot.slane %v25856_v60, 1 }
 0x377   : > { %18355 = vst [vmem:[%s25629_s28 + $0xe0] sm:$0xff] %v18111_v9   ;;  %v3964_v11 = vadd.f32 %v25559_v28, %v3921_v57  ;;  %v7888_v47 = vmul.f32 %v25534_v22, %v7776_v63  ;;  %20416 = vmatmul.mubr.bf16.gmra.mrb[60].mxu0 %v25611_v36  ;;  %v9439_v1 = vrot.slane %v25866_v18, 1  ;;  %v13409_v7 = vrot.slane %v25869_v29, 1 }
 0x378   : > { %v7933_v32 = vadd.f32 %v25559_v28, %v7890_v50  ;;  %v3962_v56 = vadd.f32 %v25559_v28, %v3919_v40  ;;  %20884 = vmatmul.mubr.bf16.gmra.mrb[60].mxu1 %v25620_v5  ;;  %20419 = vmatprep.mubr.bf16.mxu0 %v25675_v25  ;;  %v3999_v13 = vmax.f32 %v3963_v37, 0.0  ;;  %v13408_v36 = vrot.slane %v25860_v6, 1 }
 0x379   : > { %v4000_v15 = vmax.f32 %v3964_v11, 0.0  ;;  %v7931_v52 = vadd.f32 %v25559_v28, %v7888_v47  ;;  %20887 = vmatprep.mubr.bf16.mxu1 %v25716_v8  ;;  %v7968_v55 = vmax.f32 %v7932_v54, 0.0  ;;  %v3997_v21 = vmax.f32 %v3961_v41, 0.0  ;;  %v19797_v5 = vpop.f32.mrb[28].mxu0 }
 0x37a   : > { %v7969_v4 = vmax.f32 %v7933_v32, 0.0  ;;  %v3998_v26 = vmax.f32 %v3962_v56, 0.0  ;;  %v7966_v38 = vmax.f32 %v7930_v27, 0.0  ;;  %v3924_v3 = vmul.f32 %v19797_v5, %v25534_v22  ;;  %v20265_v34 = vpop.f32.mrb[28].mxu1  ;;  %v3820_v14 = vpop.f32.mrb[29].mxu0  ;;  %v25938_v5 = vld [vmem:[%s23108_s16 + $0x204] sm:$0xff]  }
 0x37b   : > { %v18036_v25 = vpack.c.bf16 %v4000_v15, %v3999_v13  ;;  %v7967_v19 = vmax.f32 %v7931_v52, 0.0  ;;  %v7893_v8 = vmul.f32 %v20265_v34, %v25534_v22  ;;  %v3922_v51 = vmul.f32 %v25534_v22, %v3820_v14  ;;  %v7789_v42 = vpop.f32.mrb[29].mxu1  ;;  %v19798_v35 = vpop.f32.mrb[30].mxu0 }
 0x37c   : > { %v18126_v10 = vpack.c.bf16 %v7969_v4, %v7968_v55  ;;  %v18031_v24 = vpack.c.bf16 %v3998_v26, %v3997_v21  ;;  %v3967_v44 = vadd.f32 %v25559_v28, %v3924_v3  ;;  %v7891_v2 = vmul.f32 %v25534_v22, %v7789_v42  ;;  %v20266_v31 = vpop.f32.mrb[30].mxu1  ;;  %v3823_v48 = vpop.f32.mrb[31].mxu0  ;;  %v25935_v26 = vld [vmem:[%s23108_s16 + $0x160] sm:$0xff]  }
 0x37d   : > { %18340 = vst [vmem:[%s25629_s28 + $0x68] sm:$0xff] %v18036_v25   ;;  %v18121_v20 = vpack.c.bf16 %v7967_v19, %v7966_v38  ;;  %v3925_v39 = vmul.f32 %v19798_v35, %v25534_v22  ;;  %v7936_v43 = vadd.f32 %v25559_v28, %v7893_v8  ;;  %v3965_v9 = vadd.f32 %v25559_v28, %v3922_v51  ;;  %v7792_v57 = vpop.f32.mrb[31].mxu1 }
 0x37e   : > { %18358 = vst [vmem:[%s25629_s28 + $0xf8] sm:$0xff] %v18126_v10   ;;  %18339 = vst [vmem:[%s25629_s28 + $0x60] sm:$0xff] %v18031_v24   ;;  %v7894_v37 = vmul.f32 %v20266_v31, %v25534_v22  ;;  %v3923_v17 = vmul.f32 %v25534_v22, %v3823_v48  ;;  %v7934_v46 = vadd.f32 %v25559_v28, %v7891_v2  ;;  %v4003_v27 = vmax.f32 %v3967_v44, 0.0  ;;  %v25945_v10 = vld [vmem:[%s23108_s16 + $0x168] sm:$0xff]  }
 0x37f   : > { %18357 = vst [vmem:[%s25629_s28 + $0xf0] sm:$0xff] %v18121_v20   ;;  %v3968_v53 = vadd.f32 %v25559_v28, %v3925_v39  ;;  %v7892_v54 = vmul.f32 %v25534_v22, %v7792_v57  ;;  %20420 = vmatmul.mubr.bf16.gmra.mrb[64].mxu0 %v25726_v0  ;;  %v12982_v41 = vsel %vm1026_vm1, %v12979_v59, %v12981_v49  ;;  %v7972_v59 = vmax.f32 %v7936_v43, 0.0  ;;  %v25959_v39 = vld [vmem:[%s23108_s16 + $0x20c] sm:$0xff]  }
 0x380   : > { %v7937_v50 = vadd.f32 %v25559_v28, %v7894_v37  ;;  %v3966_v40 = vadd.f32 %v25559_v28, %v3923_v17  ;;  %20888 = vmatmul.mubr.bf16.gmra.mrb[64].mxu1 %v25764_v23  ;;  %20423 = vmatprep.mubr.bf16.mxu0 %v25810_v33  ;;  %v9440_v63 = vsel %vm1026_vm1, %v9438_v45, %v9439_v1  ;;  %v4001_v49 = vmax.f32 %v3965_v9, 0.0 }
 0x381   : > { %v4004_v0 = vmax.f32 %v3968_v53, 0.0  ;;  %v7935_v12 = vadd.f32 %v25559_v28, %v7892_v54  ;;  %20891 = vmatprep.mubr.bf16.mxu1 %v25820_v16  ;;  %v13410_v58 = vsel %vm1026_vm1, %v13408_v36, %v13409_v7  ;;  %v19801_v11 = vpop.f32.mrb[32].mxu0  ;;  %v7970_v47 = vmax.f32 %v7934_v46, 0.0 }
 0x382   : > { %v7973_v23 = vmax.f32 %v7937_v50, 0.0  ;;  %v4002_v33 = vmax.f32 %v3966_v40, 0.0  ;;  %v3928_v56 = vmul.f32 %v19801_v11, %v25534_v22  ;;  %v20269_v13 = vpop.f32.mrb[32].mxu1  ;;  %v3836_v15 = vpop.f32.mrb[33].mxu0  ;;  %v9441_v43 = vrot.slane %v25935_v26, 1  ;;  %v25991_v11 = vld [vmem:[%s23108_s16 + $0x21c] sm:$0xff]  }
 0x383   : > { %v18046_v45 = vpack.c.bf16 %v4004_v0, %v4003_v27  ;;  %v7971_v32 = vmax.f32 %v7935_v12, 0.0  ;;  %v7897_v36 = vmul.f32 %v20269_v13, %v25534_v22  ;;  %v3926_v55 = vmul.f32 %v25534_v22, %v3836_v15  ;;  %v7805_v21 = vpop.f32.mrb[33].mxu1  ;;  %v19802_v4 = vpop.f32.mrb[34].mxu0  ;;  %v25972_v12 = vld [vmem:[%s23108_s16 + $0x170] sm:$0xff]  }
 0x384   : > { %v18136_v16 = vpack.c.bf16 %v7973_v23, %v7972_v59  ;;  %v18041_v52 = vpack.c.bf16 %v4002_v33, %v4001_v49  ;;  %v3971_v25 = vadd.f32 %v25559_v28, %v3928_v56  ;;  %v7895_v19 = vmul.f32 %v25534_v22, %v7805_v21  ;;  %v20270_v34 = vpop.f32.mrb[34].mxu1  ;;  %v3839_v14 = vpop.f32.mrb[35].mxu0  ;;  %v25979_v49 = vld [vmem:[%s23108_s16 + $0x214] sm:$0xff]   ;;  %v26020_v21 = vld [vmem:[%s23108_s16 + $0x188] sm:$0xff]  }
 0x385   : > { %18342 = vst [vmem:[%s25629_s28 + $0x78] sm:$0xff] %v18046_v45   ;;  %v18131_v38 = vpack.c.bf16 %v7971_v32, %v7970_v47  ;;  %v3929_v3 = vmul.f32 %v19802_v4, %v25534_v22  ;;  %v7940_v24 = vadd.f32 %v25559_v28, %v7897_v36  ;;  %v3969_v8 = vadd.f32 %v25559_v28, %v3926_v55  ;;  %v7808_v35 = vpop.f32.mrb[35].mxu1  ;;  %v25982_v23 = vld [vmem:[%s23108_s16 + $0x178] sm:$0xff]   ;;  %v22759_v13 = vld [vmem:[%s27158_s1 + $0x110] sm:$0xff]   ;;  %v26017_v55 = vld [vmem:[%s23108_s16 + $0x224] sm:$0xff]  }
 0x386   : > { %18360 = vst [vmem:[%s25629_s28 + $0x108] sm:$0xff] %v18136_v16   ;;  %18341 = vst [vmem:[%s25629_s28 + $0x70] sm:$0xff] %v18041_v52   ;;  %v7898_v51 = vmul.f32 %v20270_v34, %v25534_v22  ;;  %v3927_v42 = vmul.f32 %v25534_v22, %v3839_v14  ;;  %v7938_v20 = vadd.f32 %v25559_v28, %v7895_v19  ;;  %v13411_v9 = vrot.slane %v25938_v5, 1  ;;  %v26012_v16 = vld [vmem:[%s23108_s16 + $0x180] sm:$0xff]   ;;  %v22766_v19 = vld [vmem:[%s27158_s1 + $0x118] sm:$0xff]  }
 0x387   : > { %18359 = vst [vmem:[%s25629_s28 + $0x100] sm:$0xff] %v18131_v38   ;;  %v3972_v44 = vadd.f32 %v25559_v28, %v3929_v3  ;;  %v7896_v2 = vmul.f32 %v25534_v22, %v7808_v35  ;;  %20424 = vmatmul.mubr.bf16.gmra.mrb[68].mxu0 %v25849_v30  ;;  %v4007_v37 = vmax.f32 %v3971_v25, 0.0  ;;  %v9443_v30 = vrot.slane %v25945_v10, 1  ;;  %v26024_v38 = vld [vmem:[%s23108_s16 + $0x22c] sm:$0xff]   ;;  %v22765_v25 = vld [vmem:[%s27158_s1 + $0x118] sm:$0xff]  }
 0x388   : > { %v7941_v31 = vadd.f32 %v25559_v28, %v7898_v51  ;;  %v3970_v48 = vadd.f32 %v25559_v28, %v3927_v42  ;;  %20892 = vmatmul.mubr.bf16.gmra.mrb[68].mxu1 %v12982_v41  ;;  %20443 = vmatprep.mubr.bf16.mxu0 %v9440_v63  ;;  %v7976_v57 = vmax.f32 %v7940_v24, 0.0  ;;  %v4005_v46 = vmax.f32 %v3969_v8, 0.0  ;;  %v22771_v8 = vld [vmem:[%s27158_s1 + $0x120] sm:$0xff]   ;;  %v26044_v35 = vld [vmem:[%s23108_s16 + $0x190] sm:$0xff]  }
 0x389   : > { %v4008_v17 = vmax.f32 %v3972_v44, 0.0  ;;  %v7939_v22 = vadd.f32 %v25559_v28, %v7896_v2  ;;  %20911 = vmatprep.mubr.bf16.mxu1 %v13410_v58  ;;  %v7974_v41 = vmax.f32 %v7938_v20, 0.0  ;;  %v13413_v63 = vrot.slane %v25959_v39, 1  ;;  %v22772_v51 = vld [vmem:[%s27158_s1 + $0x120] sm:$0xff]   ;;  %v26049_v2 = vld [vmem:[%s23108_s16 + $0x234] sm:$0xff]  }
 0x38a   : > { %v7977_v53 = vmax.f32 %v7941_v31, 0.0  ;;  %v4006_v54 = vmax.f32 %v3970_v48, 0.0  ;;  %v9442_v0 = vsel %vm1026_vm1, %v9439_v1, %v9441_v43  ;;  %v13412_v59 = vsel %vm1026_vm1, %v13409_v7, %v13411_v9  ;;  %v22753_v1 = vld [vmem:[%s27158_s1 + $0x108] sm:$0xff]   ;;  %v26052_v31 = vld [vmem:[%s23108_s16 + $0x198] sm:$0xff]  }
 0x38b   : > { %v18056_v50 = vpack.c.bf16 %v4008_v17, %v4007_v37  ;;  %v7975_v40 = vmax.f32 %v7939_v22, 0.0  ;;  %v9444_v33 = vsel %vm1026_vm1, %v9441_v43, %v9443_v30  ;;  %v13414_v47 = vsel %vm1026_vm1, %v13411_v9, %v13413_v63  ;;  %v22754_v7 = vld [vmem:[%s27158_s1 + $0x108] sm:$0xff]   ;;  %v26056_v43 = vld [vmem:[%s23108_s16 + $0x23c] sm:$0xff]  }
 0x38c   : > { %v18146_v27 = vpack.c.bf16 %v7977_v53, %v7976_v57  ;;  %v18051_v28 = vpack.c.bf16 %v4006_v54, %v4005_v46  ;;  %v9445_v45 = vrot.slane %v25972_v12, 1  ;;  %v13415_v32 = vrot.slane %v25979_v49, 1  ;;  %v22777_v9 = vld [vmem:[%s27158_s1 + $0x128] sm:$0xff]   ;;  %v22783_v46 = vld [vmem:[%s27158_s1 + $0x130] sm:$0xff]  }
 0x38d   : > { %18344 = vst [vmem:[%s25629_s28 + $0x88] sm:$0xff] %v18056_v50   ;;  %v18141_v58 = vpack.c.bf16 %v7975_v40, %v7974_v41  ;;  %v9447_v56 = vrot.slane %v25982_v23, 1  ;;  %v9449_v3 = vrot.slane %v26012_v16, 1  ;;  %v13419_v34 = vrot.slane %v26017_v55, 1  ;;  %v22778_v37 = vld [vmem:[%s27158_s1 + $0x128] sm:$0xff]   ;;  %v22784_v53 = vld [vmem:[%s27158_s1 + $0x130] sm:$0xff]  }
 0x38e   : > { %18362 = vst [vmem:[%s25629_s28 + $0x118] sm:$0xff] %v18146_v27   ;;  %18343 = vst [vmem:[%s25629_s28 + $0x80] sm:$0xff] %v18051_v28   ;;  %v9446_v15 = vsel %vm1026_vm1, %v9443_v30, %v9445_v45  ;;  %v13416_v52 = vsel %vm1026_vm1, %v13413_v63, %v13415_v32  ;;  %v9451_v14 = vrot.slane %v26020_v21, 1  ;;  %v13421_v24 = vrot.slane %v26024_v38, 1  ;;  %v26076_v41 = vld [vmem:[%s23108_s16 + $0x1a0] sm:$0xff]   ;;  %v26084_v27 = vld [vmem:[%s23108_s16 + $0x1a8] sm:$0xff]  }
 0x38f   : > { %18361 = vst [vmem:[%s25629_s28 + $0x110] sm:$0xff] %v18141_v58   ;;  %20444 = vmatmul.mubr.bf16.vlgmr.msra.gmra.mrb[36].mxu0 %v9442_v0  ;;  %v9448_v36 = vsel %vm1026_vm1, %v9445_v45, %v9447_v56  ;;  %v9450_v42 = vsel %vm1026_vm1, %v9447_v56, %v9449_v3  ;;  %v9453_v17 = vrot.slane %v26044_v35, 1  ;;  %v13423_v22 = vrot.slane %v26049_v2, 1  ;;  %v26081_v63 = vld [vmem:[%s23108_s16 + $0x244] sm:$0xff]   ;;  %v26088_v0 = vld [vmem:[%s23108_s16 + $0x24c] sm:$0xff]   ;;  %v22790_v58 = vld [vmem:[%s27158_s1 + $0x138] sm:$0xff]  }
 0x390   : > { %20912 = vmatmul.mubr.bf16.vlgmr.msra.gmra.mrb[36].mxu1 %v13412_v59  ;;  %20480 = vmatpush3.bf16.msra.mxu0 %v25783_v62  ;;  %v13417_v62 = vrot.slane %v25991_v11, 1  ;;  %v9452_v44 = vsel %vm1026_vm1, %v9449_v3, %v9451_v14  ;;  %v13422_v48 = vsel %vm1026_vm1, %v13419_v34, %v13421_v24  ;;  %v9455_v30 = vrot.slane %v26052_v31, 1  ;;  %v22792_v59 = vld [vmem:[%s27158_s1 + $0x138] sm:$0xff]   ;;  %v26103_v45 = vld [vmem:[%s27158_s1 + $0x140] sm:$0xff]  }
 0x391   : > { %20948 = vmatpush3.bf16.msra.mxu1 %v25794_v61  ;;  %20447 = vmatprep.mubr.bf16.mxu0 %v9444_v33  ;;  %v22760_v61 = vld [vmem:[%s27158_s1 + $0x110] sm:$0xff]   ;;  %v13425_v57 = vrot.slane %v26056_v43, 1  ;;  %v9454_v54 = vsel %vm1026_vm1, %v9451_v14, %v9453_v17  ;;  %v13424_v50 = vsel %vm1026_vm1, %v13421_v24, %v13423_v22  ;;  %v9457_v33 = vrot.slane %v26076_v41, 1  ;;  %v26134_v24 = vld [vmem:[%s23108_s16 + $0x1c0] sm:$0xff]  }
 0x392   : > { %20915 = vmatprep.mubr.bf16.mxu1 %v13414_v47  ;;  %20481 = vmatprep.subr.bf16.mxu0 %v22753_v1  ;;  %v13418_v4 = vsel %vm1026_vm1, %v13415_v32, %v13417_v62  ;;  %v13420_v20 = vsel %vm1026_vm1, %v13417_v62, %v13419_v34  ;;  %v9456_v40 = vsel %vm1026_vm1, %v9453_v17, %v9455_v30  ;;  %v9459_v47 = vrot.slane %v26084_v27, 1  ;;  %v26108_v32 = vld [vmem:[%s27158_s1 + $0x140] sm:$0xff]  }
 0x393   : > { %20949 = vmatprep.subr.bf16.mxu1 %v22754_v7  ;;  %v13426_v28 = vsel %vm1026_vm1, %v13423_v22, %v13425_v57  ;;  %v9458_v56 = vsel %vm1026_vm1, %v9455_v30, %v9457_v33  ;;  %v26153_v30 = vld [vmem:[%s23108_s16 + $0x1d0] sm:$0xff]  }
 0x394   : > { %20482 = vmatpush3.bf16.msra.mxu0 %v22753_v1  ;;  %v13427_v1 = vrot.slane %v26081_v63, 1 }
 0x395   : > { %20950 = vmatpush3.bf16.msra.mxu1 %v22754_v7  ;;  %20483 = vmatprep.subr.bf16.mxu0 %v22759_v13  ;;  %v13429_v7 = vrot.slane %v26088_v0, 1 }
 0x396   : > { %20951 = vmatprep.subr.bf16.mxu1 %v22760_v61  ;;  %v13428_v62 = vsel %vm1026_vm1, %v13425_v57, %v13427_v1 }
 0x397   : > { %20448 = vmatmul.mubr.bf16.gmra.mrb[40].mxu0 %v9446_v15  ;;  %v26117_v15 = vld [vmem:[%s23108_s16 + $0x254] sm:$0xff]  }
 0x398   : > { %20916 = vmatmul.mubr.bf16.gmra.mrb[40].mxu1 %v13416_v52  ;;  %20451 = vmatprep.mubr.bf16.mxu0 %v9448_v36  ;;  %v26120_v52 = vld [vmem:[%s23108_s16 + $0x1b8] sm:$0xff]   ;;  %v13430_v36 = vsel %vm1026_vm1, %v13427_v1, %v13429_v7 }
 0x399   : > { %20919 = vmatprep.mubr.bf16.mxu1 %v13418_v4  ;;  %20484 = vmatpush3.bf16.msra.mxu0 %v22759_v13  ;;  %v26112_v13 = vld [vmem:[%s23108_s16 + $0x1b0] sm:$0xff]   ;;  %v26124_v4 = vld [vmem:[%s23108_s16 + $0x25c] sm:$0xff]   ;;  %v9463_v3 = vrot.slane %v26120_v52, 1 }
 0x39a   : > { %20952 = vmatpush3.bf16.msra.mxu1 %v22760_v61  ;;  %20485 = vmatprep.subr.bf16.mxu0 %v22765_v25  ;;  %v9460_v61 = vsel %vm1026_vm1, %v9457_v33, %v9459_v47  ;;  %v13433_v34 = vrot.slane %v26124_v4, 1 }
 0x39b   : > { %20953 = vmatprep.subr.bf16.mxu1 %v22766_v19 }
 0x39d   : > { %20486 = vmatpush3.bf16.msra.mxu0 %v22765_v25  ;;  %v9461_v25 = vrot.slane %v26112_v13, 1 }
 0x39e   : > { %20954 = vmatpush3.bf16.msra.mxu1 %v22766_v19  ;;  %20487 = vmatprep.subr.bf16.mxu0 %v22771_v8  ;;  %v13431_v19 = vrot.slane %v26117_v15, 1 }
 0x39f   : > { %20452 = vmatmul.mubr.bf16.gmra.mrb[44].mxu0 %v9450_v42  ;;  %20955 = vmatprep.subr.bf16.mxu1 %v22772_v51  ;;  %v9462_v14 = vsel %vm1026_vm1, %v9459_v47, %v9461_v25  ;;  %v26139_v42 = vld [vmem:[%s23108_s16 + $0x264] sm:$0xff]   ;;  %v9775_v47 = vshrl.u32 %v25856_v60, 16 }
 0x3a0   : > { %20920 = vmatmul.mubr.bf16.gmra.mrb[44].mxu1 %v13420_v20  ;;  %20455 = vmatprep.mubr.bf16.mxu0 %v9452_v44  ;;  %v26142_v20 = vld [vmem:[%s23108_s16 + $0x1c8] sm:$0xff]   ;;  %v13434_v44 = vsel %vm1026_vm1, %v13431_v19, %v13433_v34 }
 0x3a1   : > { %20923 = vmatprep.mubr.bf16.mxu1 %v13422_v48  ;;  %20488 = vmatpush3.bf16.msra.mxu0 %v22771_v8  ;;  %v13432_v8 = vsel %vm1026_vm1, %v13429_v7, %v13431_v19  ;;  %v26146_v48 = vld [vmem:[%s23108_s16 + $0x26c] sm:$0xff]   ;;  %v9467_v17 = vrot.slane %v26142_v20, 1  ;;  %v9778_v7 = vshll.u32 %v25856_v60, 16  ;;  %v13756_v19 = vshll.u32 %v25869_v29, 16 }
 0x3a2   : > { %20956 = vmatpush3.bf16.msra.mxu1 %v22772_v51  ;;  %20489 = vmatprep.subr.bf16.mxu0 %v22777_v9  ;;  %v9464_v51 = vsel %vm1026_vm1, %v9461_v25, %v9463_v3  ;;  %v13437_v22 = vrot.slane %v26146_v48, 1  ;;  %v13753_v25 = vshrl.u32 %v25869_v29, 16  ;;  %v9792_v29 = vshrl.u32 %v25935_v26, 16 }
 0x3a3   : > { %20957 = vmatprep.subr.bf16.mxu1 %v22778_v37 }
 0x3a5   : > { %20490 = vmatpush3.bf16.msra.mxu0 %v22777_v9  ;;  %v9465_v9 = vrot.slane %v26134_v24, 1 }
 0x3a6   : > { %20958 = vmatpush3.bf16.msra.mxu1 %v22778_v37  ;;  %20491 = vmatprep.subr.bf16.mxu0 %v22783_v46  ;;  %v13435_v37 = vrot.slane %v26139_v42, 1 }
 0x3a7   : > { %20456 = vmatmul.mubr.bf16.gmra.mrb[48].mxu0 %v9454_v54  ;;  %20959 = vmatprep.subr.bf16.mxu1 %v22784_v53  ;;  %v9466_v57 = vsel %vm1026_vm1, %v9463_v3, %v9465_v9  ;;  %v26163_v54 = vld [vmem:[%s23108_s16 + $0x27c] sm:$0xff]  }
 0x3a8   : > { %20924 = vmatmul.mubr.bf16.gmra.mrb[48].mxu1 %v13424_v50  ;;  %20459 = vmatprep.mubr.bf16.mxu0 %v9456_v40  ;;  %v13436_v50 = vsel %vm1026_vm1, %v13433_v34, %v13435_v37  ;;  %v9468_v40 = vsel %vm1026_vm1, %v9465_v9, %v9467_v17  ;;  %v13441_v1 = vrot.slane %v26163_v54, 1 }
 0x3a9   : > { %20927 = vmatprep.mubr.bf16.mxu1 %v13426_v28  ;;  %20492 = vmatpush3.bf16.msra.mxu0 %v22783_v46  ;;  %v26157_v46 = vld [vmem:[%s23108_s16 + $0x274] sm:$0xff]   ;;  %v13438_v28 = vsel %vm1026_vm1, %v13435_v37, %v13437_v22 }
 0x3aa   : > { %20960 = vmatpush3.bf16.msra.mxu1 %v22784_v53  ;;  %20493 = vmatprep.subr.bf16.mxu0 %v22790_v58  ;;  %v26160_v53 = vld [vmem:[%s23108_s16 + $0x1d8] sm:$0xff]  }
 0x3ab   : > { %20961 = vmatprep.subr.bf16.mxu1 %v22792_v59  ;;  %v9471_v33 = vrot.slane %v26160_v53, 1 }
 0x3ad   : > { %20494 = vmatpush3.bf16.msra.mxu0 %v22790_v58  ;;  %v9469_v58 = vrot.slane %v26153_v30, 1 }
 0x3ae   : > { %20962 = vmatpush3.bf16.msra.mxu1 %v22792_v59  ;;  %20531 = vmatprep.subr.bf16.mxu0 %v26103_v45  ;;  %v13439_v59 = vrot.slane %v26157_v46, 1 }
 0x3af   : > { %20460 = vmatmul.mubr.bf16.gmra.mrb[52].mxu0 %v9458_v56  ;;  %20999 = vmatprep.subr.bf16.mxu1 %v26108_v32  ;;  %v9783_v56 = vshrl.u32 %v25866_v18, 16  ;;  %v9470_v3 = vsel %vm1026_vm1, %v9467_v17, %v9469_v58  ;;  %v9795_v17 = vshll.u32 %v25935_v26, 16  ;;  %v13771_v26 = vshrl.u32 %v25959_v39, 16 }
 0x3b0   : > { %20928 = vmatmul.mubr.bf16.gmra.mrb[52].mxu1 %v13428_v62  ;;  %20463 = vmatprep.mubr.bf16.mxu0 %v9460_v61  ;;  %v9786_v62 = vshll.u32 %v25866_v18, 16  ;;  %v13745_v61 = vshrl.u32 %v25860_v6, 16  ;;  %v13440_v34 = vsel %vm1026_vm1, %v13437_v22, %v13439_v59  ;;  %v13442_v60 = vsel %vm1026_vm1, %v13439_v59, %v13441_v1 }
 0x3b1   : > { %20931 = vmatprep.mubr.bf16.mxu1 %v13430_v36  ;;  %v13748_v36 = vshll.u32 %v25860_v6, 16  ;;  %v9780_v18 = vrot.slane %v9778_v7, 2  ;;  %v9785_v9 = vrot.slane %v9783_v56, 1  ;;  %v13765_v7 = vshll.u32 %v25938_v5, 16 }
 0x3b2   : > { %v9788_v37 = vrot.slane %v9786_v62, 2 }
 0x3b3   : > { %v13750_v6 = vrot.slane %v13748_v36, 2  ;;  %v9804_v36 = vshll.u32 %v25945_v10, 16 }
 0x3b4   : > { %v9789_v59 = vor.u32 %v9788_v37, %v9785_v9  ;;  %v13773_v9 = vrot.slane %v13771_v26, 1 }
 0x3b7   : > { %20464 = vmatmul.mubr.bf16.gmra.mrb[56].mxu0 %v9462_v14  ;;  %v9472_v14 = vsel %vm1026_vm1, %v9469_v58, %v9471_v33 }
 0x3b8   : > { %20932 = vmatmul.mubr.bf16.gmra.mrb[56].mxu1 %v13432_v8  ;;  %20467 = vmatprep.mubr.bf16.mxu0 %v9464_v51  ;;  %v22793_v8 = vld [vmem:[%s23108_s16 + $0x1e0] ss:$0 sps:$4 sm:$0x11]   ;;  %v22794_v51 = vld [vmem:[%s23108_s16 + $0x284] ss:$0 sps:$4 sm:$0x11]  }
 0x3b9   : > { %20935 = vmatprep.mubr.bf16.mxu1 %v13434_v44  ;;  %v9777_v44 = vrot.slane %v9775_v47, 1  ;;  %v9473_v22 = vrot.slane %v22793_v8, 1  ;;  %v13762_v47 = vshrl.u32 %v25938_v5, 16  ;;  %v13767_v5 = vrot.slane %v13765_v7, 2 }
 0x3bb   : > { %v9781_v58 = vor.u32 %v9780_v18, %v9777_v44  ;;  %v13764_v8 = vrot.slane %v13762_v47, 1  ;;  %v9806_v18 = vrot.slane %v9804_v36, 2 }
 0x3bf   : > { %20468 = vmatmul.mubr.bf16.gmra.mrb[60].mxu0 %v9466_v57  ;;  %v13747_v57 = vrot.slane %v13745_v61, 1  ;;  %v9801_v61 = vshrl.u32 %v25945_v10, 16 }
 0x3c0   : > { %20936 = vmatmul.mubr.bf16.gmra.mrb[60].mxu1 %v13436_v50  ;;  %20471 = vmatprep.mubr.bf16.mxu0 %v9468_v40  ;;  %v13755_v50 = vrot.slane %v13753_v25, 1  ;;  %v13758_v40 = vrot.slane %v13756_v19, 2  ;;  %v9794_v25 = vrot.slane %v9792_v29, 1  ;;  %v9797_v19 = vrot.slane %v9795_v17, 2 }
 0x3c1   : > { %20939 = vmatprep.mubr.bf16.mxu1 %v13438_v28  ;;  %v13443_v28 = vrot.slane %v22794_v51, 1  ;;  %v13751_v56 = vor.u32 %v13750_v6, %v13747_v57  ;;  %v9803_v44 = vrot.slane %v9801_v61, 1  ;;  %v13783_v57 = vshll.u32 %v25979_v49, 16 }
 0x3c2   : > { %v13759_v62 = vor.u32 %v13758_v40, %v13755_v50  ;;  %v9798_v10 = vor.u32 %v9797_v19, %v9794_v25  ;;  %v13768_v6 = vor.u32 %v13767_v5, %v13764_v8  ;;  %v9819_v50 = vshrl.u32 %v25982_v23, 16 }
 0x3c3   : > { %v9822_v40 = vshll.u32 %v25982_v23, 16  ;;  %v9807_v29 = vor.u32 %v9806_v18, %v9803_v44  ;;  %v13789_v17 = vshrl.u32 %v25991_v11, 16  ;;  %v22797_v23 = vld [vmem:[%s27158_s1 + $0x148] sm:$0xff]   ;;  %v13801_v5 = vshll.u32 %v26017_v55, 16 }
 0x3c4   : > { %v13760_v51 = vsel %vm1827_vm2, %v13751_v56, %v13759_v62  ;;  %v13785_v56 = vrot.slane %v13783_v57, 2  ;;  %v9821_v61 = vrot.slane %v9819_v50, 1  ;;  %v9837_v44 = vshrl.u32 %v26020_v21, 16 }
 0x3c5   : > { %v9824_v36 = vrot.slane %v9822_v40, 2  ;;  %v9808_v25 = vsel %vm1827_vm2, %v9798_v10, %v9807_v29  ;;  %v13791_v19 = vrot.slane %v13789_v17, 1  ;;  %v9840_v18 = vshll.u32 %v26020_v21, 16 }
 0x3c6   : > { %v13803_v50 = vrot.slane %v13801_v5, 2  ;;  %v9839_v40 = vrot.slane %v9837_v44, 1 }
 0x3c7   : > { %20472 = vmatmul.mubr.bf16.gmra.mrb[64].mxu0 %v9470_v3  ;;  %v13774_v3 = vshll.u32 %v25959_v39, 16  ;;  %v9810_v39 = vshrl.u32 %v25972_v12, 16  ;;  %v9825_v8 = vor.u32 %v9824_v36, %v9821_v61  ;;  %v9842_v17 = vrot.slane %v9840_v18, 2 }
 0x3c8   : > { %20940 = vmatmul.mubr.bf16.gmra.mrb[64].mxu1 %v13440_v34  ;;  %20475 = vmatprep.mubr.bf16.mxu0 %v9472_v14  ;;  %v9474_v34 = vsel %vm1026_vm1, %v9471_v33, %v9473_v22  ;;  %v13444_v14 = vsel %vm1026_vm1, %v13441_v1, %v13443_v28  ;;  %v9813_v33 = vshll.u32 %v25972_v12, 16  ;;  %v13780_v1 = vshrl.u32 %v25979_v49, 16 }
 0x3c9   : > { %20943 = vmatprep.mubr.bf16.mxu1 %v13442_v60  ;;  %v9790_v60 = vsel %vm1827_vm2, %v9781_v58, %v9789_v59  ;;  %v13776_v37 = vrot.slane %v13774_v3, 2  ;;  %v13792_v22 = vshll.u32 %v25991_v11, 16  ;;  %v9799_v28 = vsel %vm1827_vm2, %v9789_v59, %v9798_v10  ;;  %v22798_v59 = vld [vmem:[%s27158_s1 + $0x148] sm:$0xff]   ;;  %v22800_v10 = vld [vmem:[%s27158_s1 + $0x150] sm:$0xff]  }
 0x3ca   : > { %v9812_v47 = vrot.slane %v9810_v39, 1  ;;  %v9815_v12 = vrot.slane %v9813_v33, 2  ;;  %v13782_v7 = vrot.slane %v13780_v1, 1  ;;  %v13769_v49 = vsel %vm1827_vm2, %v13759_v62, %v13768_v6 }
 0x3cb   : > { %v13777_v58 = vor.u32 %v13776_v37, %v13773_v9  ;;  %v13794_v26 = vrot.slane %v13792_v22, 2  ;;  %v9828_v3 = vshrl.u32 %v26012_v16, 16  ;;  %v9831_v62 = vshll.u32 %v26012_v16, 16 }
 0x3cc   : > { %v13810_v9 = vshll.u32 %v26024_v38, 16  ;;  %v13819_v61 = vshll.u32 %v26049_v2, 16 }
 0x3cd   : > { %v13778_v11 = vsel %vm1827_vm2, %v13768_v6, %v13777_v58  ;;  %v9830_v37 = vrot.slane %v9828_v3, 1  ;;  %v9833_v39 = vrot.slane %v9831_v62, 2  ;;  %v22803_v3 = vld [vmem:[%s27158_s1 + $0x160] sm:$0xff]  }
 0x3cf   : > { %20476 = vmatmul.mubr.bf16.gmra.mrb[68].mxu0 %v9474_v34  ;;  %v9816_v34 = vor.u32 %v9815_v12, %v9812_v47  ;;  %v13812_v47 = vrot.slane %v13810_v9, 2  ;;  %v22802_v12 = vld [vmem:[%s27158_s1 + $0x158] sm:$0xff]  }
 0x3d0   : > { %20944 = vmatmul.mubr.bf16.gmra.mrb[68].mxu1 %v13444_v14  ;;  %20495 = vmatprep.mubr.bf16.mxu0 %v9790_v60  ;;  %v13786_v14 = vor.u32 %v13785_v56, %v13782_v7  ;;  %v13798_v60 = vshrl.u32 %v26017_v55, 16  ;;  %v9846_v7 = vshrl.u32 %v26044_v35, 16  ;;  %v9849_v56 = vshll.u32 %v26044_v35, 16 }
 0x3d1   : > { %20963 = vmatprep.mubr.bf16.mxu1 %v13760_v51  ;;  %v22799_v51 = vld [vmem:[%s27158_s1 + $0x150] sm:$0xff]   ;;  %v9817_v33 = vsel %vm1827_vm2, %v9807_v29, %v9816_v34  ;;  %v9826_v6 = vsel %vm1827_vm2, %v9816_v34, %v9825_v8  ;;  %v22801_v29 = vld [vmem:[%s27158_s1 + $0x158] sm:$0xff]   ;;  %v22804_v34 = vld [vmem:[%s27158_s1 + $0x160] sm:$0xff]  }
 0x3d2   : > { %v13787_v1 = vsel %vm1827_vm2, %v13777_v58, %v13786_v14  ;;  %v13800_v57 = vrot.slane %v13798_v60, 1  ;;  %v9834_v58 = vor.u32 %v9833_v39, %v9830_v37  ;;  %v9851_v60 = vrot.slane %v9849_v56, 2  ;;  %v22805_v39 = vld [vmem:[%s27158_s1 + $0x168] sm:$0xff]  }
 0x3d4   : > { %v13804_v36 = vor.u32 %v13803_v50, %v13800_v57  ;;  %v9835_v62 = vsel %vm1827_vm2, %v9825_v8, %v9834_v58  ;;  %v13834_v50 = vshrl.u32 %v26081_v63, 16 }
 0x3d7   : > { %20496 = vmatmul.mubr.bf16.vlgmr.msra.gmra.mrb[36].mxu0 %v9799_v28 }
 0x3d8   : > { %20964 = vmatmul.mubr.bf16.vlgmr.msra.gmra.mrb[36].mxu1 %v13769_v49  ;;  %20532 = vmatpush3.bf16.msra.mxu0 %v26103_v45  ;;  %v13795_v45 = vor.u32 %v13794_v26, %v13791_v19  ;;  %v13816_v49 = vshrl.u32 %v26049_v2, 16  ;;  %v9858_v19 = vshll.u32 %v26052_v31, 16 }
 0x3d9   : > { %21000 = vmatpush3.bf16.msra.mxu1 %v26108_v32  ;;  %20499 = vmatprep.mubr.bf16.mxu0 %v9808_v25  ;;  %v13807_v32 = vshrl.u32 %v26024_v38, 16  ;;  %v9843_v25 = vor.u32 %v9842_v17, %v9839_v40  ;;  %v13837_v17 = vshll.u32 %v26081_v63, 16 }
 0x3da   : > { %20967 = vmatprep.mubr.bf16.mxu1 %v13778_v11  ;;  %20533 = vmatprep.subr.bf16.mxu0 %v22797_v23  ;;  %v13796_v22 = vsel %vm1827_vm2, %v13786_v14, %v13795_v45  ;;  %v13825_v11 = vshrl.u32 %v26056_v43, 16  ;;  %v9848_v14 = vrot.slane %v9846_v7, 1  ;;  %v13818_v5 = vrot.slane %v13816_v49, 1  ;;  %v22808_v49 = vld [vmem:[%s27158_s1 + $0x170] sm:$0xff]  }
 0x3db   : > { %21001 = vmatprep.subr.bf16.mxu1 %v22798_v59  ;;  %v13809_v28 = vrot.slane %v13807_v32, 1  ;;  %v13805_v44 = vsel %vm1827_vm2, %v13795_v45, %v13804_v36  ;;  %v9844_v18 = vsel %vm1827_vm2, %v9834_v58, %v9843_v25  ;;  %v9860_v32 = vrot.slane %v9858_v19, 2 }
 0x3dc   : > { %20534 = vmatpush3.bf16.msra.mxu0 %v22797_v23  ;;  %v9855_v23 = vshrl.u32 %v26052_v31, 16  ;;  %v13827_v8 = vrot.slane %v13825_v11, 1  ;;  %v9867_v45 = vshll.u32 %v26076_v41, 16  ;;  %v9852_v57 = vor.u32 %v9851_v60, %v9848_v14  ;;  %v22809_v60 = vld [vmem:[%s27158_s1 + $0x178] sm:$0xff]  }
 0x3dd   : > { %21002 = vmatpush3.bf16.msra.mxu1 %v22798_v59  ;;  %20535 = vmatprep.subr.bf16.mxu0 %v22799_v51  ;;  %v13813_v26 = vor.u32 %v13812_v47, %v13809_v28  ;;  %v13828_v59 = vshll.u32 %v26056_v43, 16  ;;  %v9876_v28 = vshll.u32 %v26084_v27, 16  ;;  %v13846_v58 = vshll.u32 %v26088_v0, 16 }
 0x3de   : > { %21003 = vmatprep.subr.bf16.mxu1 %v22800_v10  ;;  %v9869_v56 = vrot.slane %v9867_v45, 2  ;;  %v13839_v11 = vrot.slane %v13837_v17, 2  ;;  %v26301_v45 = vld [vmem:[%s27158_s1 + $0x180] sm:$0xff]  }
 0x3df   : > { %20500 = vmatmul.mubr.bf16.gmra.mrb[40].mxu0 %v9817_v33  ;;  %v13814_v9 = vsel %vm1827_vm2, %v13804_v36, %v13813_v26  ;;  %v13830_v37 = vrot.slane %v13828_v59, 2  ;;  %v9864_v33 = vshrl.u32 %v26076_v41, 16  ;;  %v13848_v14 = vrot.slane %v13846_v58, 2 }
 0x3e0   : > { %20968 = vmatmul.mubr.bf16.gmra.mrb[40].mxu1 %v13787_v1  ;;  %20503 = vmatprep.mubr.bf16.mxu0 %v9826_v6  ;;  %v22806_v1 = vld [vmem:[%s27158_s1 + $0x168] sm:$0xff]  }
 0x3e1   : > { %20971 = vmatprep.mubr.bf16.mxu1 %v13796_v22  ;;  %20536 = vmatpush3.bf16.msra.mxu0 %v22799_v51  ;;  %v13821_v51 = vrot.slane %v13819_v61, 2  ;;  %v9873_v22 = vshrl.u32 %v26084_v27, 16  ;;  %v13831_v47 = vor.u32 %v13830_v37, %v13827_v8  ;;  %v9866_v7 = vrot.slane %v9864_v33, 1 }
 0x3e2   : > { %21004 = vmatpush3.bf16.msra.mxu1 %v22800_v10  ;;  %20537 = vmatprep.subr.bf16.mxu0 %v22801_v29  ;;  %v9857_v10 = vrot.slane %v9855_v23, 1  ;;  %v9853_v61 = vsel %vm1827_vm2, %v9843_v25, %v9852_v57  ;;  %v13836_v23 = vrot.slane %v13834_v50, 1  ;;  %v9894_v8 = vshll.u32 %v26120_v52, 16 }
 0x3e3   : > { %21005 = vmatprep.subr.bf16.mxu1 %v22802_v12  ;;  %v13822_v6 = vor.u32 %v13821_v51, %v13818_v5  ;;  %v9875_v59 = vrot.slane %v9873_v22, 1  ;;  %v9870_v25 = vor.u32 %v9869_v56, %v9866_v7  ;;  %v9882_v5 = vshrl.u32 %v26112_v13, 16 }
 0x3e4   : > { %v9861_v40 = vor.u32 %v9860_v32, %v9857_v10  ;;  %v9885_v51 = vshll.u32 %v26112_v13, 16  ;;  %v13840_v10 = vor.u32 %v13839_v11, %v13836_v23  ;;  %v13864_v33 = vshll.u32 %v26124_v4, 16 }
 0x3e5   : > { %20538 = vmatpush3.bf16.msra.mxu0 %v22801_v29  ;;  %v13843_v29 = vshrl.u32 %v26088_v0, 16  ;;  %v13823_v36 = vsel %vm1827_vm2, %v13813_v26, %v13822_v6  ;;  %v22810_v26 = vld [vmem:[%s27158_s1 + $0x178] sm:$0xff]   ;;  %v13870_v23 = vshrl.u32 %v26139_v42, 16  ;;  %v13873_v11 = vshll.u32 %v26139_v42, 16 }
 0x3e6   : > { %21006 = vmatpush3.bf16.msra.mxu1 %v22802_v12  ;;  %20539 = vmatprep.subr.bf16.mxu0 %v22803_v3  ;;  %v22807_v12 = vld [vmem:[%s27158_s1 + $0x170] sm:$0xff]   ;;  %v9862_v19 = vsel %vm1827_vm2, %v9852_v57, %v9861_v40  ;;  %v26307_v57 = vld [vmem:[%s27158_s1 + $0x180] sm:$0xff]   ;;  %v9887_v50 = vrot.slane %v9885_v51, 2  ;;  %v13866_v56 = vrot.slane %v13864_v33, 2 }
 0x3e7   : > { %20504 = vmatmul.mubr.bf16.gmra.mrb[44].mxu0 %v9835_v62  ;;  %21007 = vmatprep.subr.bf16.mxu1 %v22804_v34  ;;  %v13832_v62 = vsel %vm1827_vm2, %v13822_v6, %v13831_v47  ;;  %v9884_v6 = vrot.slane %v9882_v5, 1  ;;  %v13872_v51 = vrot.slane %v13870_v23, 1 }
 0x3e8   : > { %20972 = vmatmul.mubr.bf16.gmra.mrb[44].mxu1 %v13805_v44  ;;  %20507 = vmatprep.mubr.bf16.mxu0 %v9844_v18  ;;  %v13852_v44 = vshrl.u32 %v26117_v15, 16  ;;  %v13855_v18 = vshll.u32 %v26117_v15, 16 }
 0x3e9   : > { %20975 = vmatprep.mubr.bf16.mxu1 %v13814_v9  ;;  %20540 = vmatpush3.bf16.msra.mxu0 %v22803_v3  ;;  %v9878_v3 = vrot.slane %v9876_v28, 2  ;;  %v9891_v9 = vshrl.u32 %v26120_v52, 16  ;;  %v13841_v28 = vsel %vm1827_vm2, %v13831_v47, %v13840_v10  ;;  %v9888_v47 = vor.u32 %v9887_v50, %v9884_v6 }
 0x3ea   : > { %21008 = vmatpush3.bf16.msra.mxu1 %v22804_v34  ;;  %20541 = vmatprep.subr.bf16.mxu0 %v22805_v39  ;;  %v13845_v34 = vrot.slane %v13843_v29, 1  ;;  %v13854_v17 = vrot.slane %v13852_v44, 1  ;;  %v13857_v22 = vrot.slane %v13855_v18, 2  ;;  %v13875_v18 = vrot.slane %v13873_v11, 2 }
 0x3eb   : > { %21009 = vmatprep.subr.bf16.mxu1 %v22806_v1  ;;  %v9879_v32 = vor.u32 %v9878_v3, %v9875_v59  ;;  %v9893_v58 = vrot.slane %v9891_v9, 1  ;;  %v9909_v59 = vshrl.u32 %v26142_v20, 16  ;;  %v9912_v3 = vshll.u32 %v26142_v20, 16 }
 0x3ec   : > { %v13849_v37 = vor.u32 %v13848_v14, %v13845_v34  ;;  %v13879_v34 = vshrl.u32 %v26146_v48, 16  ;;  %v13882_v14 = vshll.u32 %v26146_v48, 16  ;;  %v9918_v6 = vshrl.u32 %v26153_v30, 16 }
 0x3ed   : > { %20542 = vmatpush3.bf16.msra.mxu0 %v22805_v39  ;;  %v13861_v39 = vshrl.u32 %v26124_v4, 16  ;;  %v9880_v29 = vsel %vm1827_vm2, %v9870_v25, %v9879_v32  ;;  %v9914_v9 = vrot.slane %v9912_v3, 2  ;;  %v13891_v50 = vshll.u32 %v26157_v46, 16 }
 0x3ee   : > { %21010 = vmatpush3.bf16.msra.mxu1 %v22806_v1  ;;  %20543 = vmatprep.subr.bf16.mxu0 %v22807_v12  ;;  %v9871_v1 = vsel %vm1827_vm2, %v9861_v40, %v9870_v25  ;;  %v13850_v7 = vsel %vm1827_vm2, %v13840_v10, %v13849_v37  ;;  %v9911_v10 = vrot.slane %v9909_v59, 1  ;;  %v13884_v33 = vrot.slane %v13882_v14, 2 }
 0x3ef   : > { %20508 = vmatmul.mubr.bf16.gmra.mrb[48].mxu0 %v9853_v61  ;;  %21011 = vmatprep.subr.bf16.mxu1 %v22808_v49  ;;  %v13863_v40 = vrot.slane %v13861_v39, 1  ;;  %v9903_v61 = vshll.u32 %v26134_v24, 16  ;;  %v13881_v39 = vrot.slane %v13879_v34, 1  ;;  %v26341_v34 = vld [vmem:[%s23108_s16 + $0x284] ss:$0 sps:$4 sm:$0x33]  }
 0x3f0   : > { %20976 = vmatmul.mubr.bf16.gmra.mrb[48].mxu1 %v13823_v36  ;;  %20511 = vmatprep.mubr.bf16.mxu0 %v9862_v19  ;;  %v13858_v36 = vor.u32 %v13857_v22, %v13854_v17  ;;  %v13876_v17 = vor.u32 %v13875_v18, %v13872_v51  ;;  %v9915_v22 = vor.u32 %v9914_v9, %v9911_v10  ;;  %v13909_v18 = vshll.u32 %v26341_v34, 16  ;;  %v17138_v9 = vld [vmem:[%s23108_s16 + $0x150] sm:$0xc] }
 0x3f1   : > { %20979 = vmatprep.mubr.bf16.mxu1 %v13832_v62  ;;  %20544 = vmatpush3.bf16.msra.mxu0 %v22807_v12  ;;  %v9896_v12 = vrot.slane %v9894_v8, 2  ;;  %v13867_v62 = vor.u32 %v13866_v56, %v13863_v40  ;;  %v9905_v25 = vrot.slane %v9903_v61, 2  ;;  %v26336_v56 = vld [vmem:[%s23108_s16 + $0x1e0] ss:$0 sps:$4 sm:$0x33]  }
 0x3f2   : > { %21012 = vmatpush3.bf16.msra.mxu1 %v22808_v49  ;;  %20545 = vmatprep.subr.bf16.mxu0 %v22809_v60  ;;  %v9900_v49 = vshrl.u32 %v26134_v24, 16  ;;  %v13859_v5 = vsel %vm1827_vm2, %v13849_v37, %v13858_v36  ;;  %v13888_v37 = vshrl.u32 %v26157_v46, 16 }
 0x3f3   : > { %21013 = vmatprep.subr.bf16.mxu1 %v22810_v26  ;;  %v9897_v19 = vor.u32 %v9896_v12, %v9893_v58  ;;  %v13868_v8 = vsel %vm1827_vm2, %v13858_v36, %v13867_v62  ;;  %v13885_v58 = vor.u32 %v13884_v33, %v13881_v39  ;;  %v13897_v12 = vshrl.u32 %v26163_v54, 16 }
 0x3f4   : > { %v13893_v36 = vrot.slane %v13891_v50, 2  ;;  %v13877_v23 = vsel %vm1827_vm2, %v13867_v62, %v13876_v17  ;;  %v9939_v62 = vshll.u32 %v26336_v56, 16  ;;  %v13911_v50 = vrot.slane %v13909_v18, 2 }
 0x3f5   : > { %20546 = vmatpush3.bf16.msra.mxu0 %v22809_v60  ;;  %v9902_v60 = vrot.slane %v9900_v49, 1  ;;  %v9898_v44 = vsel %vm1827_vm2, %v9888_v47, %v9897_v19  ;;  %v9920_v49 = vrot.slane %v9918_v6, 1  ;;  %v13886_v14 = vsel %vm1827_vm2, %v13876_v17, %v13885_v58  ;;  %v23015_v17 = vld [vmem:[%s23108_s16 + $0x154] sm:$0xf] }
 0x3f6   : > { %21014 = vmatpush3.bf16.msra.mxu1 %v22810_v26  ;;  %20583 = vmatprep.subr.bf16.mxu0 %v26301_v45  ;;  %v9889_v26 = vsel %vm1827_vm2, %v9879_v32, %v9888_v47  ;;  %v9921_v32 = vshll.u32 %v26153_v30, 16  ;;  %v13890_v47 = vrot.slane %v13888_v37, 1  ;;  %v9941_v6 = vrot.slane %v9939_v62, 2 }
 0x3f7   : > { %20512 = vmatmul.mubr.bf16.gmra.mrb[52].mxu0 %v9871_v1  ;;  %21051 = vmatprep.subr.bf16.mxu1 %v26307_v57  ;;  %v9906_v1 = vor.u32 %v9905_v25, %v9902_v60  ;;  %v13899_v60 = vrot.slane %v13897_v12, 1  ;;  %v23016_v12 = vld [vmem:[%s23108_s16 + $0x1f8] sm:$0xf] }
 0x3f8   : > { %20980 = vmatmul.mubr.bf16.gmra.mrb[52].mxu1 %v13841_v28  ;;  %20515 = vmatprep.mubr.bf16.mxu0 %v9880_v29  ;;  %v9927_v28 = vshrl.u32 %v26160_v53, 16  ;;  %v9930_v29 = vshll.u32 %v26160_v53, 16  ;;  %v9923_v61 = vrot.slane %v9921_v32, 2 }
 0x3f9   : > { %20983 = vmatprep.mubr.bf16.mxu1 %v13850_v7  ;;  %v13900_v7 = vshll.u32 %v26163_v54, 16  ;;  %v9907_v40 = vsel %vm1827_vm2, %v9897_v19, %v9906_v1  ;;  %v9916_v11 = vsel %vm1827_vm2, %v9906_v1, %v9915_v22 }
 0x3fa   : > { %v9929_v59 = vrot.slane %v9927_v28, 1  ;;  %v9932_v3 = vrot.slane %v9930_v29, 2  ;;  %v9924_v25 = vor.u32 %v9923_v61, %v9920_v49  ;;  %v17155_v28 = vcombine.low %v17138_v9, %v23015_v17  ;;  %v23017_v49 = vld [vmem:[%s23108_s16 + $0x158] sm:$0xff]  }
 0x3fb   : > { %v13902_v19 = vrot.slane %v13900_v7, 2  ;;  %v10244_v61 = vrot.slane %v23017_v49, 2  ;;  %v22822_v49 = vld [vmem:[%s27158_s1 + $0x198] sm:$0xff]  }
 0x3fc   : > { %v9933_v51 = vor.u32 %v9932_v3, %v9929_v59  ;;  %v9925_v39 = vsel %vm1827_vm2, %v9915_v22, %v9924_v25 }
 0x3fd   : > { %v13903_v10 = vor.u32 %v13902_v19, %v13899_v60  ;;  %v23019_v60 = vld [vmem:[%s23108_s16 + $0x160] sm:$0xff]  }
 0x3fe   : > { %v9934_v32 = vsel %vm1827_vm2, %v9924_v25, %v9933_v51  ;;  %v10246_v19 = vrot.slane %v23019_v60, 2  ;;  %v23020_v25 = vld [vmem:[%s23108_s16 + $0x204] sm:$0xff]   ;;  %v10258_v60 = vrot.slane %v26044_v35, 2 }
 0x3ff   : > { %20516 = vmatmul.mubr.bf16.gmra.mrb[56].mxu0 %v9889_v26  ;;  %v13894_v26 = vor.u32 %v13893_v36, %v13890_v47  ;;  %v23018_v36 = vld [vmem:[%s23108_s16 + $0x1fc] sm:$0xff]  }
 0x400   : > { %20984 = vmatmul.mubr.bf16.gmra.mrb[56].mxu1 %v13859_v5  ;;  %20519 = vmatprep.mubr.bf16.mxu0 %v9898_v44  ;;  %v9936_v5 = vshrl.u32 %v26336_v56, 16  ;;  %v13906_v44 = vshrl.u32 %v26341_v34, 16  ;;  %v10247_v18 = vsel %vm2298_vm3, %v10244_v61, %v10246_v19 }
 0x401   : > { %20987 = vmatprep.mubr.bf16.mxu1 %v13868_v8  ;;  %v17590_v8 = vld [vmem:[%s23108_s16 + $0x1f4] sm:$0xc]  ;;  %v13895_v33 = vsel %vm1827_vm2, %v13885_v58, %v13894_v26  ;;  %v13904_v29 = vsel %vm1827_vm2, %v13894_v26, %v13903_v10  ;;  %v14216_v26 = vrot.slane %v23020_v25, 2  ;;  %v10260_v25 = vrot.slane %v26052_v31, 2 }
 0x402   : > { %v9938_v1 = vrot.slane %v9936_v5, 1  ;;  %v13908_v37 = vrot.slane %v13906_v44, 1  ;;  %v17607_v7 = vcombine.low %v17590_v8, %v23016_v12  ;;  %v23021_v5 = vld [vmem:[%s23108_s16 + $0x168] sm:$0xff]  }
 0x403   : > { %v10248_v62 = vrot.slane %v23021_v5, 2  ;;  %v23022_v44 = vld [vmem:[%s23108_s16 + $0x20c] sm:$0xff]   ;;  %v10261_v31 = vsel %vm2298_vm3, %v10258_v60, %v10260_v25 }
 0x404   : > { %v9942_v22 = vor.u32 %v9941_v6, %v9938_v1  ;;  %v13912_v58 = vor.u32 %v13911_v50, %v13908_v37  ;;  %v14213_v47 = vrot.slane %v17607_v7, 2  ;;  %v22817_v8 = vld [vmem:[%s27158_s1 + $0x188] sm:$0xff]   ;;  %v23023_v1 = vld [vmem:[%s23108_s16 + $0x170] sm:$0xff]   ;;  %v23025_v50 = vld [vmem:[%s23108_s16 + $0x178] sm:$0xff]  }
 0x405   : > { %v10249_v9 = vsel %vm2298_vm3, %v10246_v19, %v10248_v62  ;;  %v10250_v6 = vrot.slane %v23023_v1, 2  ;;  %v10252_v17 = vrot.slane %v23025_v50, 2  ;;  %v14228_v19 = vrot.slane %v26049_v2, 2  ;;  %v22827_v5 = vld [vmem:[%s27158_s1 + $0x1b0] sm:$0xff]  }
 0x406   : > { %v13913_v59 = vsel %vm1827_vm2, %v13903_v10, %v13912_v58  ;;  %v10266_v1 = vrot.slane %v26112_v13, 2  ;;  %v10270_v13 = vrot.slane %v26134_v24, 2  ;;  %v10274_v24 = vrot.slane %v26153_v30, 2  ;;  %v26488_v30 = vld [vmem:[%s23108_s16 + $0x160] sm:$0xff]  }
 0x407   : > { %20520 = vmatmul.mubr.bf16.gmra.mrb[60].mxu0 %v9907_v40  ;;  %v10243_v40 = vrot.slane %v17155_v28, 2  ;;  %v22819_v28 = vld [vmem:[%s27158_s1 + $0x190] sm:$0xff]  }
 0x408   : > { %20988 = vmatmul.mubr.bf16.gmra.mrb[60].mxu1 %v13877_v23  ;;  %20523 = vmatprep.mubr.bf16.mxu0 %v9916_v11  ;;  %v14214_v23 = vrot.slane %v23018_v36, 2  ;;  %v9943_v11 = vsel %vm1827_vm2, %v9933_v51, %v9942_v22  ;;  %v14218_v51 = vrot.slane %v23022_v44, 2  ;;  %v10253_v22 = vsel %vm2298_vm3, %v10250_v6, %v10252_v17  ;;  %v22829_v44 = vld [vmem:[%s27158_s1 + $0x1b8] sm:$0xff]  }
 0x409   : > { %20991 = vmatprep.mubr.bf16.mxu1 %v13886_v14  ;;  %v10245_v3 = vsel %vm2298_vm3, %v10243_v40, %v10244_v61  ;;  %v22821_v40 = vld [vmem:[%s27158_s1 + $0x198] sm:$0xff]   ;;  %v10254_v61 = vrot.slane %v26012_v16, 2  ;;  %v10256_v36 = vrot.slane %v26020_v21, 2 }
 0x40a   : > { %v14215_v14 = vsel %vm2298_vm3, %v14213_v47, %v14214_v23  ;;  %v14217_v10 = vsel %vm2298_vm3, %v14214_v23, %v14216_v26  ;;  %v14224_v47 = vrot.slane %v26017_v55, 2  ;;  %v14226_v23 = vrot.slane %v26024_v38, 2  ;;  %v22825_v38 = vld [vmem:[%s27158_s1 + $0x1a8] sm:$0xff]  }
 0x40b   : > { %v10255_v16 = vsel %vm2298_vm3, %v10252_v17, %v10254_v61  ;;  %v10259_v35 = vsel %vm2298_vm3, %v10256_v36, %v10258_v60 }
 0x40c   : > { %v14227_v21 = vsel %vm2298_vm3, %v14224_v47, %v14226_v23  ;;  %v14229_v2 = vsel %vm2298_vm3, %v14226_v23, %v14228_v19 }
 0x40f   : > { %20524 = vmatmul.mubr.bf16.gmra.mrb[64].mxu0 %v9925_v39  ;;  %v14219_v39 = vsel %vm2298_vm3, %v14216_v26, %v14218_v51  ;;  %v14230_v26 = vrot.slane %v26056_v43, 2 }
 0x410   : > { %20992 = vmatmul.mubr.bf16.gmra.mrb[64].mxu1 %v13895_v33  ;;  %20527 = vmatprep.mubr.bf16.mxu0 %v9934_v32  ;;  %v22818_v33 = vld [vmem:[%s27158_s1 + $0x188] sm:$0xff]   ;;  %v23024_v32 = vld [vmem:[%s23108_s16 + $0x214] sm:$0xff]  }
 0x411   : > { %20995 = vmatprep.mubr.bf16.mxu1 %v13904_v29  ;;  %v14220_v37 = vrot.slane %v23024_v32, 2  ;;  %v23026_v29 = vld [vmem:[%s23108_s16 + $0x21c] sm:$0xff]   ;;  %v14231_v43 = vsel %vm2298_vm3, %v14228_v19, %v14230_v26  ;;  %v10268_v32 = vrot.slane %v26120_v52, 2  ;;  %v10272_v52 = vrot.slane %v26142_v20, 2  ;;  %v26509_v19 = vld [vmem:[%s23108_s16 + $0x20c] sm:$0xff]  }
 0x412   : > { %v14222_v12 = vrot.slane %v23026_v29, 2  ;;  %v10276_v20 = vrot.slane %v26160_v53, 2 }
 0x413   : > { %v14221_v7 = vsel %vm2298_vm3, %v14218_v51, %v14220_v37  ;;  %v22830_v51 = vld [vmem:[%s27158_s1 + $0x1b8] sm:$0xff]  }
 0x414   : > { %v14223_v58 = vsel %vm2298_vm3, %v14220_v37, %v14222_v12  ;;  %v14225_v55 = vsel %vm2298_vm3, %v14222_v12, %v14224_v47  ;;  %v14238_v37 = vrot.slane %v26124_v4, 2  ;;  %v14242_v4 = vrot.slane %v26146_v48, 2 }
 0x415   : > { %v10271_v12 = vsel %vm2298_vm3, %v10268_v32, %v10270_v13  ;;  %v14246_v48 = vrot.slane %v26163_v54, 2  ;;  %v26494_v54 = vld [vmem:[%s23108_s16 + $0x204] sm:$0xff]  }
 0x417   : > { %20528 = vmatmul.mubr.bf16.gmra.mrb[68].mxu0 %v9943_v11  ;;  %v22823_v11 = vld [vmem:[%s27158_s1 + $0x1a0] sm:$0xff]  }
 0x418   : > { %20996 = vmatmul.mubr.bf16.gmra.mrb[68].mxu1 %v13913_v59  ;;  %20547 = vmatprep.mubr.bf16.mxu0 %v10245_v3  ;;  %v22824_v59 = vld [vmem:[%s27158_s1 + $0x1a0] sm:$0xff]   ;;  %v10257_v3 = vsel %vm2298_vm3, %v10254_v61, %v10256_v36  ;;  %v10275_v61 = vsel %vm2298_vm3, %v10272_v52, %v10274_v24  ;;  %v10277_v36 = vsel %vm2298_vm3, %v10274_v24, %v10276_v20 }
 0x419   : > { %21015 = vmatprep.mubr.bf16.mxu1 %v14215_v14  ;;  %v22826_v14 = vld [vmem:[%s27158_s1 + $0x1a8] sm:$0xff]   ;;  %v22861_v24 = vld [vmem:[%s27158_s1 + $0x1e0] sm:$0xff]  }
 0x41f   : > { %20548 = vmatmul.mubr.bf16.vlgmr.msra.gmra.mrb[36].mxu0 %v10247_v18  ;;  %v10262_v18 = vrot.slane %v26076_v41, 2  ;;  %v26450_v41 = vld [vmem:[%s27158_s1 + $0x1c0] sm:$0xff]  }
 0x420   : > { %21016 = vmatmul.mubr.bf16.vlgmr.msra.gmra.mrb[36].mxu1 %v14217_v10  ;;  %20584 = vmatpush3.bf16.msra.mxu0 %v26301_v45  ;;  %v22820_v45 = vld [vmem:[%s27158_s1 + $0x190] sm:$0xff]   ;;  %v14232_v10 = vrot.slane %v26081_v63, 2 }
 0x421   : > { %21052 = vmatpush3.bf16.msra.mxu1 %v26307_v57  ;;  %20551 = vmatprep.mubr.bf16.mxu0 %v10249_v9  ;;  %v10251_v57 = vsel %vm2298_vm3, %v10248_v62, %v10250_v6  ;;  %v22828_v62 = vld [vmem:[%s27158_s1 + $0x1b0] sm:$0xff]   ;;  %v10264_v9 = vrot.slane %v26084_v27, 2  ;;  %v10263_v63 = vsel %vm2298_vm3, %v10260_v25, %v10262_v18  ;;  %v14236_v6 = vrot.slane %v26117_v15, 2 }
 0x422   : > { %21019 = vmatprep.mubr.bf16.mxu1 %v14219_v39  ;;  %20585 = vmatprep.subr.bf16.mxu0 %v22817_v8  ;;  %v26445_v39 = vld [vmem:[%s27158_s1 + $0x1c0] sm:$0xff]   ;;  %v14233_v27 = vsel %vm2298_vm3, %v14230_v26, %v14232_v10  ;;  %v14240_v15 = vrot.slane %v26139_v42, 2  ;;  %v14244_v42 = vrot.slane %v26157_v46, 2  ;;  %v26513_v25 = vld [vmem:[%s23108_s16 + $0x170] sm:$0xff]  }
 0x423   : > { %21053 = vmatprep.subr.bf16.mxu1 %v22818_v33  ;;  %v10267_v50 = vsel %vm2298_vm3, %v10264_v9, %v10266_v1  ;;  %v14239_v29 = vsel %vm2298_vm3, %v14236_v6, %v14238_v37  ;;  %v26516_v26 = vld [vmem:[%s23108_s16 + $0x214] sm:$0xff]  }
 0x424   : > { %20586 = vmatpush3.bf16.msra.mxu0 %v22817_v8  ;;  %v14234_v8 = vrot.slane %v26088_v0, 2  ;;  %v14245_v47 = vsel %vm2298_vm3, %v14242_v4, %v14244_v42  ;;  %v14247_v46 = vsel %vm2298_vm3, %v14244_v42, %v14246_v48  ;;  %v22862_v42 = vld [vmem:[%s27158_s1 + $0x1e0] sm:$0xff]  }
 0x425   : > { %21054 = vmatpush3.bf16.msra.mxu1 %v22818_v33  ;;  %20587 = vmatprep.subr.bf16.mxu0 %v22819_v28  ;;  %v10265_v33 = vsel %vm2298_vm3, %v10262_v18, %v10264_v9  ;;  %v26531_v18 = vld [vmem:[%s23108_s16 + $0x180] sm:$0xff]   ;;  %v22843_v9 = vld [vmem:[%s27158_s1 + $0x1c8] sm:$0xff]  }
 0x426   : > { %21055 = vmatprep.subr.bf16.mxu1 %v22820_v45  ;;  %v14235_v0 = vsel %vm2298_vm3, %v14232_v10, %v14234_v8  ;;  %v14237_v17 = vsel %vm2298_vm3, %v14234_v8, %v14236_v6  ;;  %v26538_v8 = vld [vmem:[%s23108_s16 + $0x224] sm:$0xff]   ;;  %v22849_v6 = vld [vmem:[%s27158_s1 + $0x1d0] sm:$0xff]  }
 0x427   : > { %20552 = vmatmul.mubr.bf16.gmra.mrb[40].mxu0 %v10251_v57  ;;  %v10273_v57 = vsel %vm2298_vm3, %v10270_v13, %v10272_v52  ;;  %v22855_v52 = vld [vmem:[%s27158_s1 + $0x1d8] sm:$0xff]  }
 0x428   : > { %21020 = vmatmul.mubr.bf16.gmra.mrb[40].mxu1 %v14221_v7  ;;  %20555 = vmatprep.mubr.bf16.mxu0 %v10253_v22  ;;  %v14243_v7 = vsel %vm2298_vm3, %v14240_v15, %v14242_v4  ;;  %v17164_v22 = vld [vmem:[%s23108_s16 + $0x158] sm:$0xc] }
 0x429   : > { %21023 = vmatprep.mubr.bf16.mxu1 %v14223_v58  ;;  %20588 = vmatpush3.bf16.msra.mxu0 %v22819_v28  ;;  %v10269_v28 = vsel %vm2298_vm3, %v10266_v1, %v10268_v32  ;;  %v17165_v58 = vld [vmem:[%s23108_s16 + $0x15c] sm:$0xf]  ;;  %v10714_v1 = vrot.slane %v26531_v18, 2 }
 0x42a   : > { %21056 = vmatpush3.bf16.msra.mxu1 %v22820_v45  ;;  %20589 = vmatprep.subr.bf16.mxu0 %v22821_v40  ;;  %v14241_v45 = vsel %vm2298_vm3, %v14238_v37, %v14240_v15  ;;  %v26485_v23 = vcombine.low %v17164_v22, %v17165_v58  ;;  %v26558_v37 = vld [vmem:[%s23108_s16 + $0x188] sm:$0xff]   ;;  %v26570_v15 = vld [vmem:[%s23108_s16 + $0x234] sm:$0xff]  }
 0x42b   : > { %21057 = vmatprep.subr.bf16.mxu1 %v22822_v49  ;;  %v22856_v4 = vld [vmem:[%s27158_s1 + $0x1d8] sm:$0xff]  }
 0x42d   : > { %20590 = vmatpush3.bf16.msra.mxu0 %v22821_v40  ;;  %v17616_v40 = vld [vmem:[%s23108_s16 + $0x1fc] sm:$0xc] }
 0x42e   : > { %21058 = vmatpush3.bf16.msra.mxu1 %v22822_v49  ;;  %20591 = vmatprep.subr.bf16.mxu0 %v22823_v11  ;;  %v17617_v49 = vld [vmem:[%s23108_s16 + $0x200] sm:$0xf] }
 0x42f   : > { %20556 = vmatmul.mubr.bf16.gmra.mrb[44].mxu0 %v10255_v16  ;;  %21059 = vmatprep.subr.bf16.mxu1 %v22824_v59  ;;  %v26491_v53 = vcombine.low %v17616_v40, %v17617_v49  ;;  %v10705_v16 = vrot.slane %v26485_v23, 2  ;;  %v26595_v40 = vld [vmem:[%s23108_s16 + $0x23c] sm:$0xff]  }
 0x430   : > { %21024 = vmatmul.mubr.bf16.gmra.mrb[44].mxu1 %v14225_v55  ;;  %20559 = vmatprep.mubr.bf16.mxu0 %v10257_v3  ;;  %v10706_v55 = vrot.slane %v26488_v30, 2  ;;  %v26598_v49 = vld [vmem:[%s23108_s16 + $0x1a0] sm:$0xff]  }
 0x431   : > { %21027 = vmatprep.mubr.bf16.mxu1 %v14227_v21  ;;  %20592 = vmatpush3.bf16.msra.mxu0 %v22823_v11  ;;  %v10278_v11 = vrot.slane %v26336_v56, 2  ;;  %v14675_v3 = vrot.slane %v26491_v53, 2  ;;  %v14676_v21 = vrot.slane %v26494_v54, 2 }
 0x432   : > { %21060 = vmatpush3.bf16.msra.mxu1 %v22824_v59  ;;  %20593 = vmatprep.subr.bf16.mxu0 %v22825_v38  ;;  %v14248_v59 = vrot.slane %v26341_v34, 2  ;;  %v10707_v56 = vsel %vm2298_vm3, %v10705_v16, %v10706_v55  ;;  %v10722_v16 = vrot.slane %v26598_v49, 2 }
 0x433   : > { %21061 = vmatprep.subr.bf16.mxu1 %v22826_v14  ;;  %v14677_v34 = vsel %vm2298_vm3, %v14675_v3, %v14676_v21  ;;  %v22873_v3 = vld [vmem:[%s27158_s1 + $0x1f0] sm:$0xff]  }
 0x434   : > { %v14249_v60 = vsel %vm2298_vm3, %v14246_v48, %v14248_v59  ;;  %v26590_v48 = vld [vmem:[%s23108_s16 + $0x198] sm:$0xff]   ;;  %v14690_v59 = vrot.slane %v26595_v40, 2 }
 0x435   : > { %20594 = vmatpush3.bf16.msra.mxu0 %v22825_v38  ;;  %v10279_v38 = vsel %vm2298_vm3, %v10276_v20, %v10278_v11  ;;  %v10720_v11 = vrot.slane %v26590_v48, 2 }
 0x436   : > { %21062 = vmatpush3.bf16.msra.mxu1 %v22826_v14  ;;  %20595 = vmatprep.subr.bf16.mxu0 %v22827_v5  ;;  %v26504_v14 = vld [vmem:[%s23108_s16 + $0x168] sm:$0xff]  }
 0x437   : > { %20560 = vmatmul.mubr.bf16.gmra.mrb[48].mxu0 %v10259_v35  ;;  %21063 = vmatprep.subr.bf16.mxu1 %v22828_v62  ;;  %v10710_v35 = vrot.slane %v26513_v25, 2 }
 0x438   : > { %21028 = vmatmul.mubr.bf16.gmra.mrb[48].mxu1 %v14229_v2  ;;  %20563 = vmatprep.mubr.bf16.mxu0 %v10261_v31  ;;  %v14680_v2 = vrot.slane %v26516_v26, 2 }
 0x439   : > { %21031 = vmatprep.mubr.bf16.mxu1 %v14231_v43  ;;  %20596 = vmatpush3.bf16.msra.mxu0 %v22827_v5  ;;  %v10708_v5 = vrot.slane %v26504_v14, 2  ;;  %v26524_v43 = vld [vmem:[%s23108_s16 + $0x178] sm:$0xff]  }
 0x43a   : > { %21064 = vmatpush3.bf16.msra.mxu1 %v22828_v62  ;;  %20597 = vmatprep.subr.bf16.mxu0 %v22829_v44  ;;  %v14678_v62 = vrot.slane %v26509_v19, 2 }
 0x43b   : > { %21065 = vmatprep.subr.bf16.mxu1 %v22830_v51  ;;  %v10709_v31 = vsel %vm2298_vm3, %v10706_v55, %v10708_v5  ;;  %v10711_v10 = vsel %vm2298_vm3, %v10708_v5, %v10710_v35  ;;  %v26627_v5 = vld [vmem:[%s23108_s16 + $0x24c] sm:$0xff]  }
 0x43d   : > { %20598 = vmatpush3.bf16.msra.mxu0 %v22829_v44  ;;  %v14679_v44 = vsel %vm2298_vm3, %v14676_v21, %v14678_v62  ;;  %v22874_v21 = vld [vmem:[%s27158_s1 + $0x1f0] sm:$0xff]  }
 0x43e   : > { %21066 = vmatpush3.bf16.msra.mxu1 %v22830_v51  ;;  %20635 = vmatprep.subr.bf16.mxu0 %v26445_v39  ;;  %v26528_v51 = vld [vmem:[%s23108_s16 + $0x21c] sm:$0xff]  }
 0x43f   : > { %20564 = vmatmul.mubr.bf16.gmra.mrb[52].mxu0 %v10263_v63  ;;  %21103 = vmatprep.subr.bf16.mxu1 %v26450_v41  ;;  %v14681_v63 = vsel %vm2298_vm3, %v14678_v62, %v14680_v2  ;;  %v26630_v62 = vld [vmem:[%s23108_s16 + $0x1b0] sm:$0xff]  }
 0x440   : > { %21032 = vmatmul.mubr.bf16.gmra.mrb[52].mxu1 %v14233_v27  ;;  %20567 = vmatprep.mubr.bf16.mxu0 %v10265_v33  ;;  %v22844_v27 = vld [vmem:[%s27158_s1 + $0x1c8] sm:$0xff]   ;;  %v10712_v33 = vrot.slane %v26524_v43, 2 }
 0x441   : > { %21035 = vmatprep.mubr.bf16.mxu1 %v14235_v0  ;;  %v14682_v0 = vrot.slane %v26528_v51, 2 }
 0x442   : > { %v10713_v32 = vsel %vm2298_vm3, %v10710_v35, %v10712_v33 }
 0x447   : > { %20568 = vmatmul.mubr.bf16.gmra.mrb[56].mxu0 %v10267_v50  ;;  %v14683_v50 = vsel %vm2298_vm3, %v14680_v2, %v14682_v0  ;;  %v26634_v2 = vld [vmem:[%s23108_s16 + $0x254] sm:$0xff]  }
 0x448   : > { %21036 = vmatmul.mubr.bf16.gmra.mrb[56].mxu1 %v14237_v17  ;;  %20571 = vmatprep.mubr.bf16.mxu0 %v10269_v28  ;;  %v10715_v17 = vsel %vm2298_vm3, %v10712_v33, %v10714_v1  ;;  %v26563_v28 = vld [vmem:[%s23108_s16 + $0x22c] sm:$0xff]   ;;  %v26649_v33 = vld [vmem:[%s27158_s1 + $0x200] sm:$0xff]  }
 0x449   : > { %21039 = vmatprep.mubr.bf16.mxu1 %v14239_v29  ;;  %v26566_v29 = vld [vmem:[%s23108_s16 + $0x190] sm:$0xff]  }
 0x44f   : > { %20572 = vmatmul.mubr.bf16.gmra.mrb[60].mxu0 %v10271_v12  ;;  %v10716_v12 = vrot.slane %v26558_v37, 2 }
 0x450   : > { %21040 = vmatmul.mubr.bf16.gmra.mrb[60].mxu1 %v14241_v45  ;;  %20575 = vmatprep.mubr.bf16.mxu0 %v10273_v57  ;;  %v14686_v45 = vrot.slane %v26563_v28, 2  ;;  %v10718_v57 = vrot.slane %v26566_v29, 2 }
 0x451   : > { %21043 = vmatprep.mubr.bf16.mxu1 %v14243_v7  ;;  %v14688_v7 = vrot.slane %v26570_v15, 2  ;;  %v10717_v20 = vsel %vm2298_vm3, %v10714_v1, %v10716_v12 }
 0x452   : > { %v10719_v58 = vsel %vm2298_vm3, %v10716_v12, %v10718_v57 }
 0x457   : > { %20576 = vmatmul.mubr.bf16.gmra.mrb[64].mxu0 %v10275_v61  ;;  %v14689_v61 = vsel %vm2298_vm3, %v14686_v45, %v14688_v7 }
 0x458   : > { %21044 = vmatmul.mubr.bf16.gmra.mrb[64].mxu1 %v14245_v47  ;;  %20579 = vmatprep.mubr.bf16.mxu0 %v10277_v36  ;;  %v26602_v47 = vld [vmem:[%s23108_s16 + $0x244] sm:$0xff]  }
 0x459   : > { %21047 = vmatprep.mubr.bf16.mxu1 %v14247_v46  ;;  %v22867_v36 = vld [vmem:[%s27158_s1 + $0x1e8] sm:$0xff]   ;;  %v14692_v55 = vrot.slane %v26602_v47, 2 }
 0x45a   : > { %v22868_v46 = vld [vmem:[%s27158_s1 + $0x1e8] sm:$0xff]  }
 0x45b   : > { %v14693_v35 = vsel %vm2298_vm3, %v14690_v59, %v14692_v55 }
 0x45f   : > { %20580 = vmatmul.mubr.bf16.gmra.mrb[68].mxu0 %v10279_v38  ;;  %v10721_v38 = vsel %vm2298_vm3, %v10718_v57, %v10720_v11 }
 0x460   : > { %21048 = vmatmul.mubr.bf16.gmra.mrb[68].mxu1 %v14249_v60  ;;  %20599 = vmatprep.mubr.bf16.mxu0 %v10707_v56  ;;  %v26622_v60 = vld [vmem:[%s23108_s16 + $0x1a8] sm:$0xff]   ;;  %v14691_v56 = vsel %vm2298_vm3, %v14688_v7, %v14690_v59 }
 0x461   : > { %21067 = vmatprep.mubr.bf16.mxu1 %v14677_v34  ;;  %v10723_v34 = vsel %vm2298_vm3, %v10720_v11, %v10722_v16  ;;  %v26680_v7 = vld [vmem:[%s23108_s16 + $0x1c8] sm:$0xff]  }
 0x467   : > { %20600 = vmatmul.mubr.bf16.vlgmr.msra.gmra.mrb[36].mxu0 %v10709_v31  ;;  %v22880_v31 = vld [vmem:[%s27158_s1 + $0x1f8] sm:$0xff]  }
 0x468   : > { %21068 = vmatmul.mubr.bf16.vlgmr.msra.gmra.mrb[36].mxu1 %v14679_v44  ;;  %20636 = vmatpush3.bf16.msra.mxu0 %v26445_v39  ;;  %v14684_v39 = vrot.slane %v26538_v8, 2  ;;  %v22882_v44 = vld [vmem:[%s27158_s1 + $0x1f8] sm:$0xff]  }
 0x469   : > { %21104 = vmatpush3.bf16.msra.mxu1 %v26450_v41  ;;  %20603 = vmatprep.mubr.bf16.mxu0 %v10711_v10  ;;  %v22850_v41 = vld [vmem:[%s27158_s1 + $0x1d0] sm:$0xff]   ;;  %v10724_v10 = vrot.slane %v26622_v60, 2 }
 0x46a   : > { %21071 = vmatprep.mubr.bf16.mxu1 %v14681_v63  ;;  %20637 = vmatprep.subr.bf16.mxu0 %v22843_v9  ;;  %v14685_v13 = vsel %vm2298_vm3, %v14682_v0, %v14684_v39  ;;  %v14687_v22 = vsel %vm2298_vm3, %v14684_v39, %v14686_v45  ;;  %v10726_v63 = vrot.slane %v26630_v62, 2  ;;  %v26654_v0 = vld [vmem:[%s27158_s1 + $0x200] sm:$0xff]  }
 0x46b   : > { %21105 = vmatprep.subr.bf16.mxu1 %v22844_v27  ;;  %v10725_v1 = vsel %vm2298_vm3, %v10722_v16, %v10724_v10  ;;  %v26699_v16 = vld [vmem:[%s23108_s16 + $0x1d8] sm:$0xff]  }
 0x46c   : > { %20638 = vmatpush3.bf16.msra.mxu0 %v22843_v9  ;;  %v14694_v9 = vrot.slane %v26627_v5, 2 }
 0x46d   : > { %21106 = vmatpush3.bf16.msra.mxu1 %v22844_v27  ;;  %20639 = vmatprep.subr.bf16.mxu0 %v22849_v6  ;;  %v14696_v27 = vrot.slane %v26634_v2, 2 }
 0x46e   : > { %21107 = vmatprep.subr.bf16.mxu1 %v22850_v41  ;;  %v14695_v39 = vsel %vm2298_vm3, %v14692_v55, %v14694_v9 }
 0x46f   : > { %20604 = vmatmul.mubr.bf16.gmra.mrb[40].mxu0 %v10713_v32  ;;  %v26663_v32 = vld [vmem:[%s23108_s16 + $0x25c] sm:$0xff]  }
 0x470   : > { %21072 = vmatmul.mubr.bf16.gmra.mrb[40].mxu1 %v14683_v50  ;;  %20607 = vmatprep.mubr.bf16.mxu0 %v10715_v17  ;;  %v26666_v50 = vld [vmem:[%s23108_s16 + $0x1c0] sm:$0xff]   ;;  %v14697_v17 = vsel %vm2298_vm3, %v14694_v9, %v14696_v27 }
 0x471   : > { %21075 = vmatprep.mubr.bf16.mxu1 %v14685_v13  ;;  %20640 = vmatpush3.bf16.msra.mxu0 %v22849_v6  ;;  %v26658_v6 = vld [vmem:[%s23108_s16 + $0x1b8] sm:$0xff]   ;;  %v26670_v13 = vld [vmem:[%s23108_s16 + $0x264] sm:$0xff]   ;;  %v10730_v12 = vrot.slane %v26666_v50, 2 }
 0x472   : > { %21108 = vmatpush3.bf16.msra.mxu1 %v22850_v41  ;;  %20641 = vmatprep.subr.bf16.mxu0 %v22855_v52  ;;  %v10727_v41 = vsel %vm2298_vm3, %v10724_v10, %v10726_v63  ;;  %v14700_v45 = vrot.slane %v26670_v13, 2 }
 0x473   : > { %21109 = vmatprep.subr.bf16.mxu1 %v22856_v4 }
 0x475   : > { %20642 = vmatpush3.bf16.msra.mxu0 %v22855_v52  ;;  %v10728_v52 = vrot.slane %v26658_v6, 2 }
 0x476   : > { %21110 = vmatpush3.bf16.msra.mxu1 %v22856_v4  ;;  %20643 = vmatprep.subr.bf16.mxu0 %v22861_v24  ;;  %v14698_v4 = vrot.slane %v26663_v32, 2 }
 0x477   : > { %20608 = vmatmul.mubr.bf16.gmra.mrb[44].mxu0 %v10717_v20  ;;  %21111 = vmatprep.subr.bf16.mxu1 %v22862_v42  ;;  %v10729_v57 = vsel %vm2298_vm3, %v10726_v63, %v10728_v52  ;;  %v26685_v20 = vld [vmem:[%s23108_s16 + $0x26c] sm:$0xff]   ;;  %v11042_v63 = vshrl.u32 %v26485_v23, 16 }
 0x478   : > { %21076 = vmatmul.mubr.bf16.gmra.mrb[44].mxu1 %v14687_v22  ;;  %20611 = vmatprep.mubr.bf16.mxu0 %v10719_v58  ;;  %v26688_v22 = vld [vmem:[%s23108_s16 + $0x1d0] sm:$0xff]   ;;  %v14701_v58 = vsel %vm2298_vm3, %v14698_v4, %v14700_v45 }
 0x479   : > { %21079 = vmatprep.mubr.bf16.mxu1 %v14689_v61  ;;  %20644 = vmatpush3.bf16.msra.mxu0 %v22861_v24  ;;  %v14699_v24 = vsel %vm2298_vm3, %v14696_v27, %v14698_v4  ;;  %v26692_v61 = vld [vmem:[%s23108_s16 + $0x274] sm:$0xff]   ;;  %v10734_v11 = vrot.slane %v26688_v22, 2  ;;  %v11045_v27 = vshll.u32 %v26485_v23, 16  ;;  %v15023_v4 = vshll.u32 %v26494_v54, 16 }
 0x47a   : > { %21112 = vmatpush3.bf16.msra.mxu1 %v22862_v42  ;;  %20645 = vmatprep.subr.bf16.mxu0 %v22867_v36  ;;  %v10731_v42 = vsel %vm2298_vm3, %v10728_v52, %v10730_v12  ;;  %v14704_v59 = vrot.slane %v26692_v61, 2  ;;  %v15020_v52 = vshrl.u32 %v26494_v54, 16 }
 0x47b   : > { %21113 = vmatprep.subr.bf16.mxu1 %v22868_v46 }
 0x47d   : > { %20646 = vmatpush3.bf16.msra.mxu0 %v22867_v36  ;;  %v10732_v36 = vrot.slane %v26680_v7, 2 }
 0x47e   : > { %21114 = vmatpush3.bf16.msra.mxu1 %v22868_v46  ;;  %20647 = vmatprep.subr.bf16.mxu0 %v22873_v3  ;;  %v14702_v46 = vrot.slane %v26685_v20, 2 }
 0x47f   : > { %20612 = vmatmul.mubr.bf16.gmra.mrb[48].mxu0 %v10721_v38  ;;  %21115 = vmatprep.subr.bf16.mxu1 %v22874_v21  ;;  %v10733_v55 = vsel %vm2298_vm3, %v10730_v12, %v10732_v36  ;;  %v26709_v38 = vld [vmem:[%s23108_s16 + $0x284] sm:$0xff]  }
 0x480   : > { %21080 = vmatmul.mubr.bf16.gmra.mrb[48].mxu1 %v14691_v56  ;;  %20615 = vmatprep.mubr.bf16.mxu0 %v10723_v34  ;;  %v14703_v56 = vsel %vm2298_vm3, %v14700_v45, %v14702_v46  ;;  %v10735_v34 = vsel %vm2298_vm3, %v10732_v36, %v10734_v11  ;;  %v14708_v9 = vrot.slane %v26709_v38, 2 }
 0x481   : > { %21083 = vmatprep.mubr.bf16.mxu1 %v14693_v35  ;;  %20648 = vmatpush3.bf16.msra.mxu0 %v22873_v3  ;;  %v26703_v3 = vld [vmem:[%s23108_s16 + $0x27c] sm:$0xff]   ;;  %v14705_v35 = vsel %vm2298_vm3, %v14702_v46, %v14704_v59 }
 0x482   : > { %21116 = vmatpush3.bf16.msra.mxu1 %v22874_v21  ;;  %20649 = vmatprep.subr.bf16.mxu0 %v22880_v31  ;;  %v26706_v21 = vld [vmem:[%s23108_s16 + $0x1e0] sm:$0xff]  }
 0x483   : > { %21117 = vmatprep.subr.bf16.mxu1 %v22882_v44  ;;  %v10738_v10 = vrot.slane %v26706_v21, 2 }
 0x485   : > { %20650 = vmatpush3.bf16.msra.mxu0 %v22880_v31  ;;  %v10736_v31 = vrot.slane %v26699_v16, 2 }
 0x486   : > { %21118 = vmatpush3.bf16.msra.mxu1 %v22882_v44  ;;  %20687 = vmatprep.subr.bf16.mxu0 %v26649_v33  ;;  %v14706_v44 = vrot.slane %v26703_v3, 2 }
 0x487   : > { %20616 = vmatmul.mubr.bf16.gmra.mrb[52].mxu0 %v10725_v1  ;;  %21155 = vmatprep.subr.bf16.mxu1 %v26654_v0  ;;  %v11050_v1 = vshrl.u32 %v26488_v30, 16  ;;  %v10737_v12 = vsel %vm2298_vm3, %v10734_v11, %v10736_v31 }
 0x488   : > { %21084 = vmatmul.mubr.bf16.gmra.mrb[52].mxu1 %v14695_v39  ;;  %20619 = vmatprep.mubr.bf16.mxu0 %v10727_v41  ;;  %v11053_v39 = vshll.u32 %v26488_v30, 16  ;;  %v15012_v41 = vshrl.u32 %v26491_v53, 16  ;;  %v14707_v45 = vsel %vm2298_vm3, %v14704_v59, %v14706_v44  ;;  %v14709_v23 = vsel %vm2298_vm3, %v14706_v44, %v14708_v9 }
 0x489   : > { %21087 = vmatprep.mubr.bf16.mxu1 %v14697_v17  ;;  %v15015_v17 = vshll.u32 %v26491_v53, 16  ;;  %v11047_v30 = vrot.slane %v11045_v27, 3  ;;  %v11052_v36 = vrot.slane %v11050_v1, 2  ;;  %v11059_v59 = vshrl.u32 %v26504_v14, 16 }
 0x48a   : > { %v11055_v46 = vrot.slane %v11053_v39, 3  ;;  %v15032_v27 = vshll.u32 %v26509_v19, 16 }
 0x48b   : > { %v15017_v53 = vrot.slane %v15015_v17, 3  ;;  %v11071_v17 = vshll.u32 %v26513_v25, 16 }
 0x48c   : > { %v11056_v44 = vor.u32 %v11055_v46, %v11052_v36 }
 0x48d   : > { %v11073_v46 = vrot.slane %v11071_v17, 3 }
 0x48f   : > { %20620 = vmatmul.mubr.bf16.gmra.mrb[56].mxu0 %v10729_v57  ;;  %v10739_v57 = vsel %vm2298_vm3, %v10736_v31, %v10738_v10 }
 0x490   : > { %21088 = vmatmul.mubr.bf16.gmra.mrb[56].mxu1 %v14699_v24  ;;  %20623 = vmatprep.mubr.bf16.mxu0 %v10731_v42  ;;  %v22883_v24 = vld [vmem:[%s23108_s16 + $0x1e8] ss:$0 sps:$4 sm:$0x33]   ;;  %v22884_v42 = vld [vmem:[%s23108_s16 + $0x28c] ss:$0 sps:$4 sm:$0x33]  }
 0x491   : > { %21091 = vmatprep.mubr.bf16.mxu1 %v14701_v58  ;;  %v11044_v58 = vrot.slane %v11042_v63, 2  ;;  %v10740_v54 = vrot.slane %v22883_v24, 2  ;;  %v14710_v11 = vrot.slane %v22884_v42, 2  ;;  %v15029_v63 = vshrl.u32 %v26509_v19, 16 }
 0x493   : > { %v11048_v31 = vor.u32 %v11047_v30, %v11044_v58  ;;  %v15031_v42 = vrot.slane %v15029_v63, 2  ;;  %v15034_v58 = vrot.slane %v15032_v27, 3  ;;  %v15056_v63 = vshrl.u32 %v26538_v8, 16 }
 0x494   : > { %v15059_v27 = vshll.u32 %v26538_v8, 16 }
 0x495   : > { %v11057_v24 = vsel %vm3099_vm4, %v11048_v31, %v11056_v44 }
 0x497   : > { %20624 = vmatmul.mubr.bf16.gmra.mrb[60].mxu0 %v10733_v55  ;;  %v15014_v55 = vrot.slane %v15012_v41, 2  ;;  %v11068_v41 = vshrl.u32 %v26513_v25, 16 }
 0x498   : > { %21092 = vmatmul.mubr.bf16.gmra.mrb[60].mxu1 %v14703_v56  ;;  %20627 = vmatprep.mubr.bf16.mxu0 %v10735_v34  ;;  %v15022_v56 = vrot.slane %v15020_v52, 2  ;;  %v15025_v34 = vrot.slane %v15023_v4, 3  ;;  %v15038_v52 = vshrl.u32 %v26516_v26, 16  ;;  %v15041_v4 = vshll.u32 %v26516_v26, 16 }
 0x499   : > { %21095 = vmatprep.mubr.bf16.mxu1 %v14705_v35  ;;  %v11062_v35 = vshll.u32 %v26504_v14, 16  ;;  %v15018_v1 = vor.u32 %v15017_v53, %v15014_v55  ;;  %v11070_v36 = vrot.slane %v11068_v41, 2 }
 0x49a   : > { %v15026_v39 = vor.u32 %v15025_v34, %v15022_v56  ;;  %v15040_v55 = vrot.slane %v15038_v52, 2  ;;  %v15043_v53 = vrot.slane %v15041_v4, 3  ;;  %v11077_v56 = vshrl.u32 %v26524_v43, 16 }
 0x49b   : > { %v11080_v34 = vshll.u32 %v26524_v43, 16  ;;  %v11074_v31 = vor.u32 %v11073_v46, %v11070_v36 }
 0x49c   : > { %v15027_v30 = vsel %vm3099_vm4, %v15018_v1, %v15026_v39  ;;  %v15044_v1 = vor.u32 %v15043_v53, %v15040_v55  ;;  %v11079_v41 = vrot.slane %v11077_v56, 2  ;;  %v11095_v55 = vshrl.u32 %v26558_v37, 16 }
 0x49d   : > { %v11082_v17 = vrot.slane %v11080_v34, 3  ;;  %v11098_v53 = vshll.u32 %v26558_v37, 16  ;;  %v15065_v56 = vshrl.u32 %v26563_v28, 16 }
 0x49f   : > { %20628 = vmatmul.mubr.bf16.gmra.mrb[64].mxu0 %v10737_v12  ;;  %v10741_v12 = vsel %vm2298_vm3, %v10738_v10, %v10740_v54  ;;  %v15050_v54 = vshll.u32 %v26528_v51, 16  ;;  %v11083_v46 = vor.u32 %v11082_v17, %v11079_v41  ;;  %v11097_v41 = vrot.slane %v11095_v55, 2 }
 0x4a0   : > { %21096 = vmatmul.mubr.bf16.gmra.mrb[64].mxu1 %v14707_v45  ;;  %20631 = vmatprep.mubr.bf16.mxu0 %v10739_v57  ;;  %v11061_v45 = vrot.slane %v11059_v59, 2  ;;  %v11064_v57 = vrot.slane %v11062_v35, 3  ;;  %v11086_v59 = vshrl.u32 %v26531_v18, 16  ;;  %v11089_v35 = vshll.u32 %v26531_v18, 16 }
 0x4a1   : > { %21099 = vmatprep.mubr.bf16.mxu1 %v14709_v23  ;;  %v14711_v23 = vsel %vm2298_vm3, %v14708_v9, %v14710_v11  ;;  %v15047_v9 = vshrl.u32 %v26528_v51, 16  ;;  %v15035_v11 = vor.u32 %v15034_v58, %v15031_v42  ;;  %v22887_v42 = vld [vmem:[%s27158_s1 + $0x208] sm:$0xff]   ;;  %v15058_v58 = vrot.slane %v15056_v63, 2 }
 0x4a2   : > { %v11065_v10 = vor.u32 %v11064_v57, %v11061_v45  ;;  %v11088_v57 = vrot.slane %v11086_v59, 2  ;;  %v22890_v59 = vld [vmem:[%s27158_s1 + $0x210] sm:$0xff]   ;;  %v11084_v63 = vsel %vm3099_vm4, %v11074_v31, %v11083_v46  ;;  %v11100_v17 = vrot.slane %v11098_v53, 3 }
 0x4a3   : > { %v15049_v4 = vrot.slane %v15047_v9, 2  ;;  %v15036_v45 = vsel %vm3099_vm4, %v15026_v39, %v15035_v11  ;;  %v15045_v36 = vsel %vm3099_vm4, %v15035_v11, %v15044_v1  ;;  %v22889_v9 = vld [vmem:[%s27158_s1 + $0x210] sm:$0xff]   ;;  %v11122_v53 = vshrl.u32 %v26598_v49, 16 }
 0x4a4   : > { %v11066_v52 = vsel %vm3099_vm4, %v11056_v44, %v11065_v10  ;;  %v22888_v44 = vld [vmem:[%s27158_s1 + $0x208] sm:$0xff]  }
 0x4a7   : > { %20632 = vmatmul.mubr.bf16.gmra.mrb[68].mxu0 %v10741_v12  ;;  %v15052_v12 = vrot.slane %v15050_v54, 3  ;;  %v11104_v54 = vshrl.u32 %v26566_v29, 16 }
 0x4a8   : > { %21100 = vmatmul.mubr.bf16.gmra.mrb[68].mxu1 %v14711_v23  ;;  %20651 = vmatprep.mubr.bf16.mxu0 %v11057_v24  ;;  %v11091_v23 = vrot.slane %v11089_v35, 3  ;;  %v11075_v24 = vsel %vm3099_vm4, %v11065_v10, %v11074_v31  ;;  %v15068_v10 = vshll.u32 %v26563_v28, 16  ;;  %v15077_v35 = vshll.u32 %v26570_v15, 16  ;;  %v22891_v31 = vld [vmem:[%s27158_s1 + $0x218] sm:$0xff]  }
 0x4a9   : > { %21119 = vmatprep.mubr.bf16.mxu1 %v15027_v30  ;;  %v15061_v30 = vrot.slane %v15059_v27, 3  ;;  %v15053_v39 = vor.u32 %v15052_v12, %v15049_v4 }
 0x4aa   : > { %v11092_v34 = vor.u32 %v11091_v23, %v11088_v57  ;;  %v15070_v12 = vrot.slane %v15068_v10, 3 }
 0x4ab   : > { %v15062_v11 = vor.u32 %v15061_v30, %v15058_v58  ;;  %v15054_v27 = vsel %vm3099_vm4, %v15044_v1, %v15053_v39  ;;  %v15079_v58 = vrot.slane %v15077_v35, 3  ;;  %v11113_v1 = vshrl.u32 %v26590_v48, 16  ;;  %v22892_v30 = vld [vmem:[%s27158_s1 + $0x218] sm:$0xff]  }
 0x4ac   : > { %v11093_v4 = vsel %vm3099_vm4, %v11083_v46, %v11092_v34  ;;  %v15083_v46 = vshrl.u32 %v26595_v40, 16 }
 0x4ad   : > { %v15063_v23 = vsel %vm3099_vm4, %v15053_v39, %v15062_v11  ;;  %v11115_v35 = vrot.slane %v11113_v1, 2  ;;  %v11134_v1 = vshll.u32 %v26622_v60, 16 }
 0x4af   : > { %20652 = vmatmul.mubr.bf16.vlgmr.msra.gmra.mrb[36].mxu0 %v11066_v52  ;;  %v15067_v52 = vrot.slane %v15065_v56, 2  ;;  %v11125_v56 = vshll.u32 %v26598_v49, 16 }
 0x4b0   : > { %21120 = vmatmul.mubr.bf16.vlgmr.msra.gmra.mrb[36].mxu1 %v15036_v45  ;;  %20688 = vmatpush3.bf16.msra.mxu0 %v26649_v33  ;;  %v11107_v33 = vshll.u32 %v26566_v29, 16  ;;  %v11106_v45 = vrot.slane %v11104_v54, 2  ;;  %v15092_v54 = vshrl.u32 %v26602_v47, 16 }
 0x4b1   : > { %21156 = vmatpush3.bf16.msra.mxu1 %v26654_v0  ;;  %20655 = vmatprep.mubr.bf16.mxu0 %v11075_v24  ;;  %v15074_v0 = vshrl.u32 %v26570_v15, 16  ;;  %v15071_v39 = vor.u32 %v15070_v12, %v15067_v52  ;;  %v11127_v12 = vrot.slane %v11125_v56, 3  ;;  %v15113_v56 = vshll.u32 %v26634_v2, 16 }
 0x4b2   : > { %21123 = vmatprep.mubr.bf16.mxu1 %v15045_v36  ;;  %20689 = vmatprep.subr.bf16.mxu0 %v22887_v42  ;;  %v11109_v57 = vrot.slane %v11107_v33, 3  ;;  %v11101_v36 = vor.u32 %v11100_v17, %v11097_v41  ;;  %v15095_v33 = vshll.u32 %v26602_v47, 16 }
 0x4b3   : > { %21157 = vmatprep.subr.bf16.mxu1 %v22888_v44  ;;  %v15076_v24 = vrot.slane %v15074_v0, 2  ;;  %v22893_v0 = vld [vmem:[%s27158_s1 + $0x220] sm:$0xff]   ;;  %v15072_v17 = vsel %vm3099_vm4, %v15062_v11, %v15071_v39  ;;  %v22896_v11 = vld [vmem:[%s27158_s1 + $0x228] sm:$0xff]  }
 0x4b4   : > { %20690 = vmatpush3.bf16.msra.mxu0 %v22887_v42  ;;  %v11116_v42 = vshll.u32 %v26590_v48, 16  ;;  %v11110_v55 = vor.u32 %v11109_v57, %v11106_v45  ;;  %v15094_v57 = vrot.slane %v15092_v54, 2  ;;  %v22897_v54 = vld [vmem:[%s27158_s1 + $0x230] sm:$0xff]  }
 0x4b5   : > { %21158 = vmatpush3.bf16.msra.mxu1 %v22888_v44  ;;  %20691 = vmatprep.subr.bf16.mxu0 %v22889_v9  ;;  %v15086_v44 = vshll.u32 %v26595_v40, 16  ;;  %v15080_v10 = vor.u32 %v15079_v58, %v15076_v24  ;;  %v22895_v24 = vld [vmem:[%s27158_s1 + $0x228] sm:$0xff]  }
 0x4b6   : > { %21159 = vmatprep.subr.bf16.mxu1 %v22890_v59  ;;  %v11111_v52 = vsel %vm3099_vm4, %v11101_v36, %v11110_v55 }
 0x4b7   : > { %20656 = vmatmul.mubr.bf16.gmra.mrb[40].mxu0 %v11084_v63  ;;  %v11118_v63 = vrot.slane %v11116_v42, 3  ;;  %v15088_v41 = vrot.slane %v15086_v44, 3  ;;  %v15081_v45 = vsel %vm3099_vm4, %v15071_v39, %v15080_v10  ;;  %v15101_v42 = vshrl.u32 %v26627_v5, 16 }
 0x4b8   : > { %21124 = vmatmul.mubr.bf16.gmra.mrb[40].mxu1 %v15054_v27  ;;  %20659 = vmatprep.mubr.bf16.mxu0 %v11093_v4  ;;  %v11102_v27 = vsel %vm3099_vm4, %v11092_v34, %v11101_v36  ;;  %v11124_v4 = vrot.slane %v11122_v53, 2  ;;  %v15104_v36 = vshll.u32 %v26627_v5, 16  ;;  %v11143_v44 = vshll.u32 %v26630_v62, 16 }
 0x4b9   : > { %21127 = vmatprep.mubr.bf16.mxu1 %v15063_v23  ;;  %20692 = vmatpush3.bf16.msra.mxu0 %v22889_v9  ;;  %v22894_v9 = vld [vmem:[%s27158_s1 + $0x220] sm:$0xff]   ;;  %v15097_v23 = vrot.slane %v15095_v33, 3  ;;  %v11119_v34 = vor.u32 %v11118_v63, %v11115_v35  ;;  %v15110_v53 = vshrl.u32 %v26634_v2, 16 }
 0x4ba   : > { %21160 = vmatpush3.bf16.msra.mxu1 %v22890_v59  ;;  %20693 = vmatprep.subr.bf16.mxu0 %v22891_v31  ;;  %v15085_v59 = vrot.slane %v15083_v46, 2  ;;  %v11140_v46 = vshrl.u32 %v26630_v62, 16 }
 0x4bb   : > { %21161 = vmatprep.subr.bf16.mxu1 %v22892_v30  ;;  %v15098_v39 = vor.u32 %v15097_v23, %v15094_v57  ;;  %v11120_v33 = vsel %vm3099_vm4, %v11110_v55, %v11119_v34  ;;  %v15115_v55 = vrot.slane %v15113_v56, 3  ;;  %v11152_v57 = vshll.u32 %v26658_v6, 16  ;;  %v22900_v23 = vld [vmem:[%s27158_s1 + $0x238] sm:$0xff]  }
 0x4bc   : > { %v15089_v58 = vor.u32 %v15088_v41, %v15085_v59  ;;  %v15106_v41 = vrot.slane %v15104_v36, 3 }
 0x4bd   : > { %20694 = vmatpush3.bf16.msra.mxu0 %v22891_v31  ;;  %v11131_v31 = vshrl.u32 %v26622_v60, 16  ;;  %v11154_v56 = vrot.slane %v11152_v57, 3  ;;  %v11179_v57 = vshll.u32 %v26688_v22, 16 }
 0x4be   : > { %21162 = vmatpush3.bf16.msra.mxu1 %v22892_v30  ;;  %20695 = vmatprep.subr.bf16.mxu0 %v22893_v0  ;;  %v11128_v30 = vor.u32 %v11127_v12, %v11124_v4  ;;  %v15090_v35 = vsel %vm3099_vm4, %v15080_v10, %v15089_v58  ;;  %v15099_v4 = vsel %vm3099_vm4, %v15089_v58, %v15098_v39  ;;  %v15112_v12 = vrot.slane %v15110_v53, 2 }
 0x4bf   : > { %20660 = vmatmul.mubr.bf16.gmra.mrb[44].mxu0 %v11102_v27  ;;  %21163 = vmatprep.subr.bf16.mxu1 %v22894_v9  ;;  %v11133_v63 = vrot.slane %v11131_v31, 2  ;;  %v15103_v27 = vrot.slane %v15101_v42, 2  ;;  %v11149_v10 = vshrl.u32 %v26658_v6, 16  ;;  %v11161_v42 = vshll.u32 %v26666_v50, 16 }
 0x4c0   : > { %21128 = vmatmul.mubr.bf16.gmra.mrb[44].mxu1 %v15072_v17  ;;  %20663 = vmatprep.mubr.bf16.mxu0 %v11111_v52  ;;  %v11129_v59 = vsel %vm3099_vm4, %v11119_v34, %v11128_v30  ;;  %v11142_v17 = vrot.slane %v11140_v46, 2  ;;  %v11145_v52 = vrot.slane %v11143_v44, 3  ;;  %v15119_v34 = vshrl.u32 %v26663_v32, 16 }
 0x4c1   : > { %21131 = vmatprep.mubr.bf16.mxu1 %v15081_v45  ;;  %20696 = vmatpush3.bf16.msra.mxu0 %v22893_v0  ;;  %v22898_v0 = vld [vmem:[%s27158_s1 + $0x230] sm:$0xff]   ;;  %v22899_v45 = vld [vmem:[%s27158_s1 + $0x238] sm:$0xff]   ;;  %v15107_v58 = vor.u32 %v15106_v41, %v15103_v27  ;;  %v15116_v36 = vor.u32 %v15115_v55, %v15112_v12  ;;  %v15128_v46 = vshrl.u32 %v26670_v13, 16  ;;  %v15131_v44 = vshll.u32 %v26670_v13, 16 }
 0x4c2   : > { %21164 = vmatpush3.bf16.msra.mxu1 %v22894_v9  ;;  %20697 = vmatprep.subr.bf16.mxu0 %v22895_v24  ;;  %v11136_v9 = vrot.slane %v11134_v1, 3  ;;  %v11146_v31 = vor.u32 %v11145_v52, %v11142_v17  ;;  %v11158_v1 = vshrl.u32 %v26666_v50, 16  ;;  %v11151_v53 = vrot.slane %v11149_v10, 2 }
 0x4c3   : > { %21165 = vmatprep.subr.bf16.mxu1 %v22896_v11  ;;  %v15117_v41 = vsel %vm3099_vm4, %v15107_v58, %v15116_v36  ;;  %v15130_v17 = vrot.slane %v15128_v46, 2  ;;  %v15133_v52 = vrot.slane %v15131_v44, 3  ;;  %v11170_v12 = vshll.u32 %v26680_v7, 16 }
 0x4c4   : > { %v11176_v10 = vshrl.u32 %v26688_v22, 16 }
 0x4c5   : > { %20698 = vmatpush3.bf16.msra.mxu0 %v22895_v24  ;;  %v11137_v24 = vor.u32 %v11136_v9, %v11133_v63  ;;  %v15108_v9 = vsel %vm3099_vm4, %v15098_v39, %v15107_v58  ;;  %v15137_v39 = vshrl.u32 %v26685_v20, 16 }
 0x4c6   : > { %21166 = vmatpush3.bf16.msra.mxu1 %v22896_v11  ;;  %20699 = vmatprep.subr.bf16.mxu0 %v22897_v54  ;;  %v15122_v11 = vshll.u32 %v26663_v32, 16 }
 0x4c7   : > { %20664 = vmatmul.mubr.bf16.gmra.mrb[48].mxu0 %v11120_v33  ;;  %21167 = vmatprep.subr.bf16.mxu1 %v22898_v0  ;;  %v11138_v33 = vsel %vm3099_vm4, %v11128_v30, %v11137_v24  ;;  %v11147_v27 = vsel %vm3099_vm4, %v11137_v24, %v11146_v31  ;;  %v11167_v30 = vshrl.u32 %v26680_v7, 16  ;;  %v15146_v24 = vshrl.u32 %v26692_v61, 16 }
 0x4c8   : > { %21132 = vmatmul.mubr.bf16.gmra.mrb[48].mxu1 %v15090_v35  ;;  %20667 = vmatprep.mubr.bf16.mxu0 %v11129_v59  ;;  %v15121_v35 = vrot.slane %v15119_v34, 2  ;;  %v15124_v63 = vrot.slane %v15122_v11, 3  ;;  %v11160_v59 = vrot.slane %v11158_v1, 2  ;;  %v15149_v34 = vshll.u32 %v26692_v61, 16 }
 0x4c9   : > { %21135 = vmatprep.mubr.bf16.mxu1 %v15099_v4  ;;  %20700 = vmatpush3.bf16.msra.mxu0 %v22897_v54  ;;  %v11163_v54 = vrot.slane %v11161_v42, 3  ;;  %v11169_v1 = vrot.slane %v11167_v30, 2  ;;  %v11172_v42 = vrot.slane %v11170_v12, 3  ;;  %v15139_v46 = vrot.slane %v15137_v39, 2 }
 0x4ca   : > { %21168 = vmatpush3.bf16.msra.mxu1 %v22898_v0  ;;  %20701 = vmatprep.subr.bf16.mxu0 %v22899_v45  ;;  %v11155_v0 = vor.u32 %v11154_v56, %v11151_v53  ;;  %v15125_v4 = vor.u32 %v15124_v63, %v15121_v35  ;;  %v11178_v56 = vrot.slane %v11176_v10, 2  ;;  %v15148_v63 = vrot.slane %v15146_v24, 2 }
 0x4cb   : > { %21169 = vmatprep.subr.bf16.mxu1 %v22900_v23  ;;  %v11164_v55 = vor.u32 %v11163_v54, %v11160_v59  ;;  %v15155_v59 = vshrl.u32 %v26703_v3, 16  ;;  %v15158_v54 = vshll.u32 %v26703_v3, 16  ;;  %v15164_v30 = vshrl.u32 %v26709_v38, 16 }
 0x4cc   : > { %v11156_v11 = vsel %vm3099_vm4, %v11146_v31, %v11155_v0  ;;  %v15126_v58 = vsel %vm3099_vm4, %v15116_v36, %v15125_v4  ;;  %v11173_v31 = vor.u32 %v11172_v42, %v11169_v1  ;;  %v11188_v36 = vshll.u32 %v26699_v16, 16 }
 0x4cd   : > { %20702 = vmatpush3.bf16.msra.mxu0 %v22899_v45  ;;  %v15140_v45 = vshll.u32 %v26685_v20, 16  ;;  %v11165_v44 = vsel %vm3099_vm4, %v11155_v0, %v11164_v55  ;;  %v11197_v0 = vshll.u32 %v26706_v21, 16  ;;  %v15167_v12 = vshll.u32 %v26709_v38, 16 }
 0x4ce   : > { %21170 = vmatpush3.bf16.msra.mxu1 %v22900_v23  ;;  %v15134_v23 = vor.u32 %v15133_v52, %v15130_v17  ;;  %v11194_v52 = vshrl.u32 %v26706_v21, 16  ;;  %v11190_v10 = vrot.slane %v11188_v36, 3  ;;  %v15160_v24 = vrot.slane %v15158_v54, 3  ;;  %v17270_v36 = vld [vmem:[%s23108_s16 + $0x158] sm:$0x8] }
 0x4cf   : > { %20668 = vmatmul.mubr.bf16.gmra.mrb[52].mxu0 %v11138_v33  ;;  %v15142_v53 = vrot.slane %v15140_v45, 3  ;;  %v11181_v33 = vrot.slane %v11179_v57, 3  ;;  %v11174_v45 = vsel %vm3099_vm4, %v11164_v55, %v11173_v31  ;;  %v15157_v57 = vrot.slane %v15155_v59, 2  ;;  %v17722_v59 = vld [vmem:[%s23108_s16 + $0x1fc] sm:$0x8] }
 0x4d0   : > { %21136 = vmatmul.mubr.bf16.gmra.mrb[52].mxu1 %v15108_v9  ;;  %20671 = vmatprep.mubr.bf16.mxu0 %v11147_v27  ;;  %v15135_v35 = vsel %vm3099_vm4, %v15125_v4, %v15134_v23  ;;  %v15151_v9 = vrot.slane %v15149_v34, 3  ;;  %v11185_v27 = vshrl.u32 %v26699_v16, 16  ;;  %v26870_v34 = vld [vmem:[%s23108_s16 + $0x1e8] ss:$0 sps:$4 sm:$0x77]   ;;  %v11196_v1 = vrot.slane %v11194_v52, 2 }
 0x4d1   : > { %21139 = vmatprep.mubr.bf16.mxu1 %v15117_v41  ;;  %v15143_v41 = vor.u32 %v15142_v53, %v15139_v46  ;;  %v11182_v17 = vor.u32 %v11181_v33, %v11178_v56  ;;  %v11199_v42 = vrot.slane %v11197_v0, 3  ;;  %v26875_v46 = vld [vmem:[%s23108_s16 + $0x28c] ss:$0 sps:$4 sm:$0x77]   ;;  %v15166_v53 = vrot.slane %v15164_v30, 2 }
 0x4d2   : > { %v15152_v4 = vor.u32 %v15151_v9, %v15148_v63  ;;  %v11187_v39 = vrot.slane %v11185_v27, 2  ;;  %v15169_v56 = vrot.slane %v15167_v12, 3  ;;  %v15161_v33 = vor.u32 %v15160_v24, %v15157_v57  ;;  %v23028_v24 = vld [vmem:[%s23108_s16 + $0x200] sm:$0xf] }
 0x4d3   : > { %v11200_v63 = vor.u32 %v11199_v42, %v11196_v1  ;;  %v15173_v9 = vshrl.u32 %v26875_v46, 16  ;;  %v15176_v27 = vshll.u32 %v26875_v46, 16  ;;  %v23029_v1 = vld [vmem:[%s23108_s16 + $0x160] sm:$0xff]  }
 0x4d4   : > { %v11191_v55 = vor.u32 %v11190_v10, %v11187_v39  ;;  %v11511_v42 = vrot.slane %v23029_v1, 3 }
 0x4d5   : > { %v15175_v12 = vrot.slane %v15173_v9, 2  ;;  %v15178_v39 = vrot.slane %v15176_v27, 3  ;;  %v11513_v9 = vrot.slane %v26504_v14, 3  ;;  %v15483_v27 = vrot.slane %v26509_v19, 3 }
 0x4d6   : > { %v11192_v54 = vsel %vm3099_vm4, %v11182_v17, %v11191_v55  ;;  %v11201_v30 = vsel %vm3099_vm4, %v11191_v55, %v11200_v63  ;;  %v11517_v14 = vrot.slane %v26524_v43, 3  ;;  %v15487_v19 = vrot.slane %v26528_v51, 3 }
 0x4d7   : > { %20672 = vmatmul.mubr.bf16.gmra.mrb[56].mxu0 %v11156_v11  ;;  %v15144_v11 = vsel %vm3099_vm4, %v15134_v23, %v15143_v41  ;;  %v11206_v23 = vshll.u32 %v26870_v34, 16  ;;  %v11521_v43 = vrot.slane %v26558_v37, 3  ;;  %v15491_v51 = vrot.slane %v26563_v28, 3 }
 0x4d8   : > { %21140 = vmatmul.mubr.bf16.gmra.mrb[56].mxu1 %v15126_v58  ;;  %20675 = vmatprep.mubr.bf16.mxu0 %v11165_v44  ;;  %v11183_v58 = vsel %vm3099_vm4, %v11173_v31, %v11182_v17  ;;  %v15153_v44 = vsel %vm3099_vm4, %v15143_v41, %v15152_v4  ;;  %v15170_v31 = vor.u32 %v15169_v56, %v15166_v53  ;;  %v23030_v53 = vld [vmem:[%s23108_s16 + $0x204] sm:$0xff]   ;;  %v11525_v37 = vrot.slane %v26590_v48, 3 }
 0x4d9   : > { %21143 = vmatprep.mubr.bf16.mxu1 %v15135_v35  ;;  %v11203_v35 = vshrl.u32 %v26870_v34, 16  ;;  %v15162_v41 = vsel %vm3099_vm4, %v15152_v4, %v15161_v33  ;;  %v11208_v0 = vrot.slane %v11206_v23, 3  ;;  %v15179_v4 = vor.u32 %v15178_v39, %v15175_v12 }
 0x4da   : > { %v15171_v57 = vsel %vm3099_vm4, %v15161_v33, %v15170_v31  ;;  %v15481_v56 = vrot.slane %v23030_v53, 3  ;;  %v15495_v28 = vrot.slane %v26595_v40, 3  ;;  %v11529_v48 = vrot.slane %v26622_v60, 3 }
 0x4db   : > { %v11205_v52 = vrot.slane %v11203_v35, 2  ;;  %v15180_v35 = vsel %vm3099_vm4, %v15170_v31, %v15179_v4  ;;  %v15499_v40 = vrot.slane %v26627_v5, 3  ;;  %v11533_v60 = vrot.slane %v26658_v6, 3 }
 0x4dc   : > { %v15484_v31 = vsel %vm3570_vm5, %v15481_v56, %v15483_v27  ;;  %v15503_v5 = vrot.slane %v26663_v32, 3  ;;  %v11537_v6 = vrot.slane %v26680_v7, 3  ;;  %v15507_v32 = vrot.slane %v26685_v20, 3 }
 0x4dd   : > { %v11209_v17 = vor.u32 %v11208_v0, %v11205_v52  ;;  %v11541_v7 = vrot.slane %v26699_v16, 3  ;;  %v15511_v20 = vrot.slane %v26703_v3, 3  ;;  %v11545_v16 = vrot.slane %v26870_v34, 3 }
 0x4de   : > { %v15515_v3 = vrot.slane %v26875_v46, 3 }
 0x4df   : > { %20676 = vmatmul.mubr.bf16.gmra.mrb[60].mxu0 %v11174_v45  ;;  %v23027_v45 = vld [vmem:[%s23108_s16 + $0x15c] sm:$0xf]  ;;  %v11210_v55 = vsel %vm3099_vm4, %v11200_v63, %v11209_v17  ;;  %v11514_v63 = vsel %vm3570_vm5, %v11511_v42, %v11513_v9 }
 0x4e0   : > { %21144 = vmatmul.mubr.bf16.gmra.mrb[60].mxu1 %v15144_v11  ;;  %20679 = vmatprep.mubr.bf16.mxu0 %v11183_v58  ;;  %v17287_v10 = vcombine.low %v17270_v36, %v23027_v45  ;;  %v17739_v11 = vcombine.low %v17722_v59, %v23028_v24  ;;  %v11515_v36 = vrot.slane %v26513_v25, 3  ;;  %v15485_v59 = vrot.slane %v26516_v26, 3 }
 0x4e1   : > { %21147 = vmatprep.mubr.bf16.mxu1 %v15153_v44  ;;  %v11519_v25 = vrot.slane %v26531_v18, 3  ;;  %v15489_v26 = vrot.slane %v26538_v8, 3  ;;  %v11523_v18 = vrot.slane %v26566_v29, 3  ;;  %v15493_v8 = vrot.slane %v26570_v15, 3 }
 0x4e2   : > { %v11510_v58 = vrot.slane %v17287_v10, 3  ;;  %v15480_v44 = vrot.slane %v17739_v11, 3  ;;  %v11518_v52 = vsel %vm3570_vm5, %v11515_v36, %v11517_v14  ;;  %v15488_v0 = vsel %vm3570_vm5, %v15485_v59, %v15487_v19 }
 0x4e3   : > { %v15490_v12 = vsel %vm3570_vm5, %v15487_v19, %v15489_v26  ;;  %v11522_v39 = vsel %vm3570_vm5, %v11519_v25, %v11521_v43  ;;  %v15492_v45 = vsel %vm3570_vm5, %v15489_v26, %v15491_v51  ;;  %v11524_v10 = vsel %vm3570_vm5, %v11521_v43, %v11523_v18 }
 0x4e4   : > { %v11512_v33 = vsel %vm3570_vm5, %v11510_v58, %v11511_v42  ;;  %v15482_v23 = vsel %vm3570_vm5, %v15480_v44, %v15481_v56  ;;  %v11527_v29 = vrot.slane %v26598_v49, 3  ;;  %v15497_v15 = vrot.slane %v26602_v47, 3 }
 0x4e5   : > { %v11526_v24 = vsel %vm3570_vm5, %v11523_v18, %v11525_v37  ;;  %v15496_v11 = vsel %vm3570_vm5, %v15493_v8, %v15495_v28  ;;  %v11531_v49 = vrot.slane %v26630_v62, 3  ;;  %v15501_v47 = vrot.slane %v26634_v2, 3 }
 0x4e6   : > { %v11528_v17 = vsel %vm3570_vm5, %v11525_v37, %v11527_v29  ;;  %v15498_v4 = vsel %vm3570_vm5, %v15495_v28, %v15497_v15  ;;  %v11530_v58 = vsel %vm3570_vm5, %v11527_v29, %v11529_v48  ;;  %v15500_v1 = vsel %vm3570_vm5, %v15497_v15, %v15499_v40 }
 0x4e7   : > { %20680 = vmatmul.mubr.bf16.gmra.mrb[64].mxu0 %v11192_v54  ;;  %v11516_v54 = vsel %vm3570_vm5, %v11513_v9, %v11515_v36  ;;  %v11532_v42 = vsel %vm3570_vm5, %v11529_v48, %v11531_v49  ;;  %v15502_v44 = vsel %vm3570_vm5, %v15499_v40, %v15501_v47  ;;  %v11535_v62 = vrot.slane %v26666_v50, 3 }
 0x4e8   : > { %21148 = vmatmul.mubr.bf16.gmra.mrb[64].mxu1 %v15162_v41  ;;  %20683 = vmatprep.mubr.bf16.mxu0 %v11201_v30  ;;  %v15486_v41 = vsel %vm3570_vm5, %v15483_v27, %v15485_v59  ;;  %v11520_v30 = vsel %vm3570_vm5, %v11517_v14, %v11519_v25  ;;  %v15505_v2 = vrot.slane %v26670_v13, 3  ;;  %v11534_v53 = vsel %vm3570_vm5, %v11531_v49, %v11533_v60  ;;  %v26972_v14 = vld [vmem:[%s27160_s3] ss:$0 sm:$0xff] }
 0x4e9   : > { %21151 = vmatprep.mubr.bf16.mxu1 %v15171_v57  ;;  %v15494_v57 = vsel %vm3570_vm5, %v15491_v51, %v15493_v8  ;;  %v15504_v56 = vsel %vm3570_vm5, %v15501_v47, %v15503_v5  ;;  %v11539_v50 = vrot.slane %v26688_v22, 3  ;;  %v15509_v13 = vrot.slane %v26692_v61, 3 }
 0x4ea   : > { %v11543_v22 = vrot.slane %v26706_v21, 3  ;;  %v15513_v61 = vrot.slane %v26709_v38, 3 }
 0x4eb   : > { %v11540_v9 = vsel %vm3570_vm5, %v11537_v6, %v11539_v50  ;;  %v15510_v27 = vsel %vm3570_vm5, %v15507_v32, %v15509_v13  ;;  %v11542_v36 = vsel %vm3570_vm5, %v11539_v50, %v11541_v7  ;;  %v15512_v59 = vsel %vm3570_vm5, %v15509_v13, %v15511_v20 }
 0x4ec   : > { %v11546_v21 = vsel %vm3570_vm5, %v11543_v22, %v11545_v16  ;;  %v15516_v38 = vsel %vm3570_vm5, %v15513_v61, %v15515_v3 }
 0x4ef   : > { %20684 = vmatmul.mubr.bf16.gmra.mrb[68].mxu0 %v11210_v55  ;;  %v11536_v55 = vsel %vm3570_vm5, %v11533_v60, %v11535_v62 }
 0x4f0   : > { %21152 = vmatmul.mubr.bf16.gmra.mrb[68].mxu1 %v15180_v35  ;;  %20703 = vmatprep.mubr.bf16.mxu0 %v11512_v33  ;;  %v15506_v35 = vsel %vm3570_vm5, %v15503_v5, %v15505_v2  ;;  %v11538_v33 = vsel %vm3570_vm5, %v11535_v62, %v11537_v6 }
 0x4f1   : > { %21171 = vmatprep.mubr.bf16.mxu1 %v15482_v23  ;;  %v15508_v23 = vsel %vm3570_vm5, %v15505_v2, %v15507_v32 }
 0x4f7   : > { %20704 = vmatmul.mubr.bf16.vlgmr.msra.gmra.mrb[36].mxu0 %v11514_v63  ;;  %v11544_v63 = vsel %vm3570_vm5, %v11541_v7, %v11543_v22 }
 0x4f8   : > { %21172 = vmatmul.mubr.bf16.vlgmr.msra.gmra.mrb[36].mxu1 %v15484_v31  ;;  %20707 = vmatprep.mubr.bf16.mxu0 %v11516_v54  ;;  %v15514_v31 = vsel %vm3570_vm5, %v15511_v20, %v15513_v61  ;;  %v26967_v54 = vld [vmem:[%s27159_s2] ss:$0 sm:$0xff] }
 0x4f9   : > { %21175 = vmatprep.mubr.bf16.mxu1 %v15486_v41 }
 0x4ff   : > { %20708 = vmatmul.mubr.bf16.gmra.mrb[40].mxu0 %v11518_v52 }
 0x500   : > { %21176 = vmatmul.mubr.bf16.gmra.mrb[40].mxu1 %v15488_v0  ;;  %20711 = vmatprep.mubr.bf16.mxu0 %v11520_v30 }
 0x501   : > { %21179 = vmatprep.mubr.bf16.mxu1 %v15490_v12 }
 0x507   : > { %20712 = vmatmul.mubr.bf16.gmra.mrb[44].mxu0 %v11522_v39 }
 0x508   : > { %21180 = vmatmul.mubr.bf16.gmra.mrb[44].mxu1 %v15492_v45  ;;  %20715 = vmatprep.mubr.bf16.mxu0 %v11524_v10 }
 0x509   : > { %21183 = vmatprep.mubr.bf16.mxu1 %v15494_v57 }
 0x50f   : > { %20716 = vmatmul.mubr.bf16.gmra.mrb[48].mxu0 %v11526_v24 }
 0x510   : > { %21184 = vmatmul.mubr.bf16.gmra.mrb[48].mxu1 %v15496_v11  ;;  %20719 = vmatprep.mubr.bf16.mxu0 %v11528_v17 }
 0x511   : > { %21187 = vmatprep.mubr.bf16.mxu1 %v15498_v4 }
 0x517   : > { %20720 = vmatmul.mubr.bf16.gmra.mrb[52].mxu0 %v11530_v58 }
 0x518   : > { %21188 = vmatmul.mubr.bf16.gmra.mrb[52].mxu1 %v15500_v1  ;;  %20723 = vmatprep.mubr.bf16.mxu0 %v11532_v42 }
 0x519   : > { %21191 = vmatprep.mubr.bf16.mxu1 %v15502_v44 }
 0x51f   : > { %20724 = vmatmul.mubr.bf16.gmra.mrb[56].mxu0 %v11534_v53 }
 0x520   : > { %21192 = vmatmul.mubr.bf16.gmra.mrb[56].mxu1 %v15504_v56  ;;  %20727 = vmatprep.mubr.bf16.mxu0 %v11536_v55 }
 0x521   : > { %21195 = vmatprep.mubr.bf16.mxu1 %v15506_v35 }
 0x527   : > { %20728 = vmatmul.mubr.bf16.gmra.mrb[60].mxu0 %v11538_v33 }
 0x528   : > { %21196 = vmatmul.mubr.bf16.gmra.mrb[60].mxu1 %v15508_v23  ;;  %20731 = vmatprep.mubr.bf16.mxu0 %v11540_v9 }
 0x529   : > { %21199 = vmatprep.mubr.bf16.mxu1 %v15510_v27 }
 0x52f   : > { %20732 = vmatmul.mubr.bf16.gmra.mrb[64].mxu0 %v11542_v36 }
 0x530   : > { %21200 = vmatmul.mubr.bf16.gmra.mrb[64].mxu1 %v15512_v59  ;;  %20735 = vmatprep.mubr.bf16.mxu0 %v11544_v63 }
 0x531   : > { %21203 = vmatprep.mubr.bf16.mxu1 %v15514_v31 }
 0x537   : > { %20736 = vmatmul.mubr.bf16.gmra.mrb[68].mxu0 %v11546_v21 }
 0x538   : > { %21204 = vmatmul.mubr.bf16.gmra.mrb[68].mxu1 %v15516_v38 }
 0x5ca   : > { %v20705_v41 = vpop.f32.mrb[36].mxu0 }
 0x5cb   : > { %v11835_v34 = vmul.f32 %v20705_v41, %v26967_v54  ;;  %v21173_v46 = vpop.f32.mrb[36].mxu1  ;;  %v11647_v19 = vpop.f32.mrb[37].mxu0 }
 0x5cc   : > { %v15805_v25 = vmul.f32 %v21173_v46, %v26967_v54  ;;  %v11833_v26 = vmul.f32 %v26967_v54, %v11647_v19  ;;  %v15617_v52 = vpop.f32.mrb[37].mxu1  ;;  %v20706_v0 = vpop.f32.mrb[38].mxu0 }
 0x5cd   : > { %v11878_v30 = vadd.f32 %v26972_v14, %v11835_v34  ;;  %v15803_v12 = vmul.f32 %v26967_v54, %v15617_v52  ;;  %v11836_v43 = vmul.f32 %v20706_v0, %v26967_v54  ;;  %v21174_v51 = vpop.f32.mrb[38].mxu1  ;;  %v11650_v18 = vpop.f32.mrb[39].mxu0 }
 0x5ce   : > { %v15848_v8 = vadd.f32 %v26972_v14, %v15805_v25  ;;  %v11876_v39 = vadd.f32 %v26972_v14, %v11833_v26  ;;  %v15806_v45 = vmul.f32 %v21174_v51, %v26967_v54  ;;  %v11834_v10 = vmul.f32 %v26967_v54, %v11650_v18  ;;  %v15620_v57 = vpop.f32.mrb[39].mxu1 }
 0x5cf   : > { %v15846_v37 = vadd.f32 %v26972_v14, %v15803_v12  ;;  %v11879_v28 = vadd.f32 %v26972_v14, %v11836_v43  ;;  %v15804_v29 = vmul.f32 %v26967_v54, %v15620_v57  ;;  %v11914_v11 = vmax.f32 %v11878_v30, 0.0 }
 0x5d0   : > { %v15849_v15 = vadd.f32 %v26972_v14, %v15806_v45  ;;  %v11877_v24 = vadd.f32 %v26972_v14, %v11834_v10  ;;  %v15884_v48 = vmax.f32 %v15848_v8, 0.0  ;;  %v11912_v40 = vmax.f32 %v11876_v39, 0.0 }
 0x5d1   : > { %v11915_v17 = vmax.f32 %v11879_v28, 0.0  ;;  %v15847_v4 = vadd.f32 %v26972_v14, %v15804_v29  ;;  %v15882_v1 = vmax.f32 %v15846_v37, 0.0 }
 0x5d2   : > { %v15885_v49 = vmax.f32 %v15849_v15, 0.0  ;;  %v11913_v47 = vmax.f32 %v11877_v24, 0.0  ;;  %v20709_v58 = vpop.f32.mrb[40].mxu0 }
 0x5d3   : > { %v18156_v42 = vpack.c.bf16 %v11915_v17, %v11914_v11  ;;  %v15883_v44 = vmax.f32 %v15847_v4, 0.0  ;;  %v11839_v60 = vmul.f32 %v20709_v58, %v26967_v54  ;;  %v21177_v5 = vpop.f32.mrb[40].mxu1  ;;  %v11663_v62 = vpop.f32.mrb[41].mxu0 }
 0x5d4   : > { %v18246_v2 = vpack.c.bf16 %v15885_v49, %v15884_v48  ;;  %v18151_v53 = vpack.c.bf16 %v11913_v47, %v11912_v40  ;;  %v15809_v56 = vmul.f32 %v21177_v5, %v26967_v54  ;;  %v11837_v55 = vmul.f32 %v26967_v54, %v11663_v62  ;;  %v15633_v35 = vpop.f32.mrb[41].mxu1  ;;  %v20710_v6 = vpop.f32.mrb[42].mxu0 }
 0x5d5   : > { %18364 = vst [vmem:[%s25629_s28 + $0x128] sm:$0xff] %v18156_v42   ;;  %v18241_v32 = vpack.c.bf16 %v15883_v44, %v15882_v1  ;;  %v11882_v50 = vadd.f32 %v26972_v14, %v11839_v60  ;;  %v15807_v13 = vmul.f32 %v26967_v54, %v15633_v35  ;;  %v11840_v33 = vmul.f32 %v20710_v6, %v26967_v54  ;;  %v21178_v23 = vpop.f32.mrb[42].mxu1  ;;  %v11666_v9 = vpop.f32.mrb[43].mxu0 }
 0x5d6   : > { %18382 = vst [vmem:[%s25629_s28 + $0x1b8] sm:$0xff] %v18246_v2   ;;  %18363 = vst [vmem:[%s25629_s28 + $0x120] sm:$0xff] %v18151_v53   ;;  %v15852_v27 = vadd.f32 %v26972_v14, %v15809_v56  ;;  %v11880_v7 = vadd.f32 %v26972_v14, %v11837_v55  ;;  %v15810_v20 = vmul.f32 %v21178_v23, %v26967_v54  ;;  %v15636_v61 = vpop.f32.mrb[43].mxu1 }
 0x5d7   : > { %v11838_v22 = vmul.f32 %v26967_v54, %v11666_v9  ;;  %18381 = vst [vmem:[%s25629_s28 + $0x1b0] sm:$0xff] %v18241_v32   ;;  %v15850_v36 = vadd.f32 %v26972_v14, %v15807_v13  ;;  %v11883_v59 = vadd.f32 %v26972_v14, %v11840_v33  ;;  %v15808_v63 = vmul.f32 %v26967_v54, %v15636_v61 }
 0x5d8   : > { %v15853_v31 = vadd.f32 %v26972_v14, %v15810_v20  ;;  %v11918_v3 = vmax.f32 %v11882_v50, 0.0  ;;  %v15888_v41 = vmax.f32 %v15852_v27, 0.0  ;;  %v11916_v34 = vmax.f32 %v11880_v7, 0.0 }
 0x5d9   : > { %v11881_v16 = vadd.f32 %v26972_v14, %v11838_v22  ;;  %v11919_v21 = vmax.f32 %v11883_v59, 0.0  ;;  %v15851_v38 = vadd.f32 %v26972_v14, %v15808_v63  ;;  %v15886_v26 = vmax.f32 %v15850_v36, 0.0 }
 0x5da   : > { %v15889_v46 = vmax.f32 %v15853_v31, 0.0  ;;  %v20713_v25 = vpop.f32.mrb[44].mxu0 }
 0x5db   : > { %v11917_v19 = vmax.f32 %v11881_v16, 0.0  ;;  %v18166_v52 = vpack.c.bf16 %v11919_v21, %v11918_v3  ;;  %v15887_v0 = vmax.f32 %v15851_v38, 0.0  ;;  %v11843_v30 = vmul.f32 %v20713_v25, %v26967_v54  ;;  %v21181_v12 = vpop.f32.mrb[44].mxu1  ;;  %v11679_v43 = vpop.f32.mrb[45].mxu0 }
 0x5dc   : > { %v18256_v51 = vpack.c.bf16 %v15889_v46, %v15888_v41  ;;  %v15813_v8 = vmul.f32 %v21181_v12, %v26967_v54  ;;  %v11841_v39 = vmul.f32 %v26967_v54, %v11679_v43  ;;  %v15649_v45 = vpop.f32.mrb[45].mxu1  ;;  %v20714_v10 = vpop.f32.mrb[46].mxu0 }
 0x5dd   : > { %v18161_v18 = vpack.c.bf16 %v11917_v19, %v11916_v34  ;;  %18366 = vst [vmem:[%s25629_s28 + $0x138] sm:$0xff] %v18166_v52   ;;  %v18251_v57 = vpack.c.bf16 %v15887_v0, %v15886_v26  ;;  %v11886_v37 = vadd.f32 %v26972_v14, %v11843_v30  ;;  %v15811_v28 = vmul.f32 %v26967_v54, %v15649_v45  ;;  %v21182_v15 = vpop.f32.mrb[46].mxu1  ;;  %v11682_v24 = vpop.f32.mrb[47].mxu0 }
 0x5de   : > { %v11844_v29 = vmul.f32 %v20714_v10, %v26967_v54  ;;  %18384 = vst [vmem:[%s25629_s28 + $0x1c8] sm:$0xff] %v18256_v51   ;;  %v15856_v11 = vadd.f32 %v26972_v14, %v15813_v8  ;;  %v11884_v17 = vadd.f32 %v26972_v14, %v11841_v39  ;;  %v15814_v4 = vmul.f32 %v21182_v15, %v26967_v54  ;;  %v15652_v40 = vpop.f32.mrb[47].mxu1 }
 0x5df   : > { %18365 = vst [vmem:[%s25629_s28 + $0x130] sm:$0xff] %v18161_v18   ;;  %v11842_v48 = vmul.f32 %v26967_v54, %v11682_v24  ;;  %18383 = vst [vmem:[%s25629_s28 + $0x1c0] sm:$0xff] %v18251_v57   ;;  %v15854_v49 = vadd.f32 %v26972_v14, %v15811_v28  ;;  %v15812_v58 = vmul.f32 %v26967_v54, %v15652_v40  ;;  %v11922_v44 = vmax.f32 %v11886_v37, 0.0 }
 0x5e0   : > { %v11887_v47 = vadd.f32 %v26972_v14, %v11844_v29  ;;  %v15857_v1 = vadd.f32 %v26972_v14, %v15814_v4  ;;  %v15892_v62 = vmax.f32 %v15856_v11, 0.0  ;;  %v11920_v2 = vmax.f32 %v11884_v17, 0.0 }
 0x5e1   : > { %v11885_v42 = vadd.f32 %v26972_v14, %v11842_v48  ;;  %v15855_v5 = vadd.f32 %v26972_v14, %v15812_v58  ;;  %v15890_v35 = vmax.f32 %v15854_v49, 0.0 }
 0x5e2   : > { %v11923_v60 = vmax.f32 %v11887_v47, 0.0  ;;  %v15893_v53 = vmax.f32 %v15857_v1, 0.0  ;;  %v20717_v55 = vpop.f32.mrb[48].mxu0 }
 0x5e3   : > { %v11921_v56 = vmax.f32 %v11885_v42, 0.0  ;;  %v15891_v32 = vmax.f32 %v15855_v5, 0.0  ;;  %v11847_v50 = vmul.f32 %v20717_v55, %v26967_v54  ;;  %v21185_v13 = vpop.f32.mrb[48].mxu1  ;;  %v11695_v33 = vpop.f32.mrb[49].mxu0 }
 0x5e4   : > { %v18176_v6 = vpack.c.bf16 %v11923_v60, %v11922_v44  ;;  %v18266_v23 = vpack.c.bf16 %v15893_v53, %v15892_v62  ;;  %v15817_v27 = vmul.f32 %v21185_v13, %v26967_v54  ;;  %v11845_v7 = vmul.f32 %v26967_v54, %v11695_v33  ;;  %v15665_v20 = vpop.f32.mrb[49].mxu1  ;;  %v20718_v22 = vpop.f32.mrb[50].mxu0 }
 0x5e5   : > { %v18171_v9 = vpack.c.bf16 %v11921_v56, %v11920_v2  ;;  %v18261_v61 = vpack.c.bf16 %v15891_v32, %v15890_v35  ;;  %v11890_v36 = vadd.f32 %v26972_v14, %v11847_v50  ;;  %v15815_v59 = vmul.f32 %v26967_v54, %v15665_v20  ;;  %v21186_v31 = vpop.f32.mrb[50].mxu1  ;;  %v11698_v16 = vpop.f32.mrb[51].mxu0 }
 0x5e6   : > { %18368 = vst [vmem:[%s25629_s28 + $0x148] sm:$0xff] %v18176_v6   ;;  %v11848_v63 = vmul.f32 %v20718_v22, %v26967_v54  ;;  %18386 = vst [vmem:[%s25629_s28 + $0x1d8] sm:$0xff] %v18266_v23   ;;  %v15860_v3 = vadd.f32 %v26972_v14, %v15817_v27  ;;  %v11888_v21 = vadd.f32 %v26972_v14, %v11845_v7  ;;  %v15668_v34 = vpop.f32.mrb[51].mxu1 }
 0x5e7   : > { %18367 = vst [vmem:[%s25629_s28 + $0x140] sm:$0xff] %v18171_v9   ;;  %v15818_v38 = vmul.f32 %v21186_v31, %v26967_v54  ;;  %v11846_v41 = vmul.f32 %v26967_v54, %v11698_v16  ;;  %18385 = vst [vmem:[%s25629_s28 + $0x1d0] sm:$0xff] %v18261_v61   ;;  %v15858_v46 = vadd.f32 %v26972_v14, %v15815_v59  ;;  %v11926_v0 = vmax.f32 %v11890_v36, 0.0 }
 0x5e8   : > { %v11891_v19 = vadd.f32 %v26972_v14, %v11848_v63  ;;  %v15816_v25 = vmul.f32 %v26967_v54, %v15668_v34  ;;  %v15896_v43 = vmax.f32 %v15860_v3, 0.0  ;;  %v11924_v51 = vmax.f32 %v11888_v21, 0.0 }
 0x5e9   : > { %v15861_v26 = vadd.f32 %v26972_v14, %v15818_v38  ;;  %v11889_v52 = vadd.f32 %v26972_v14, %v11846_v41  ;;  %v15894_v45 = vmax.f32 %v15858_v46, 0.0 }
 0x5ea   : > { %v11927_v30 = vmax.f32 %v11891_v19, 0.0  ;;  %v15859_v12 = vadd.f32 %v26972_v14, %v15816_v25  ;;  %v20721_v39 = vpop.f32.mrb[52].mxu0 }
 0x5eb   : > { %v15897_v18 = vmax.f32 %v15861_v26, 0.0  ;;  %v11925_v8 = vmax.f32 %v11889_v52, 0.0  ;;  %v11851_v37 = vmul.f32 %v20721_v39, %v26967_v54  ;;  %v21189_v28 = vpop.f32.mrb[52].mxu1  ;;  %v11711_v29 = vpop.f32.mrb[53].mxu0 }
 0x5ec   : > { %v18186_v10 = vpack.c.bf16 %v11927_v30, %v11926_v0  ;;  %v15895_v57 = vmax.f32 %v15859_v12, 0.0  ;;  %v15821_v11 = vmul.f32 %v21189_v28, %v26967_v54  ;;  %v11849_v17 = vmul.f32 %v26967_v54, %v11711_v29  ;;  %v15681_v4 = vpop.f32.mrb[53].mxu1  ;;  %v20722_v48 = vpop.f32.mrb[54].mxu0 }
 0x5ed   : > { %v18276_v15 = vpack.c.bf16 %v15897_v18, %v15896_v43  ;;  %v18181_v24 = vpack.c.bf16 %v11925_v8, %v11924_v51  ;;  %v11894_v49 = vadd.f32 %v26972_v14, %v11851_v37  ;;  %v15819_v47 = vmul.f32 %v26967_v54, %v15681_v4  ;;  %v21190_v1 = vpop.f32.mrb[54].mxu1  ;;  %v11714_v42 = vpop.f32.mrb[55].mxu0 }
 0x5ee   : > { %18370 = vst [vmem:[%s25629_s28 + $0x158] sm:$0xff] %v18186_v10   ;;  %v18271_v40 = vpack.c.bf16 %v15895_v57, %v15894_v45  ;;  %v11852_v58 = vmul.f32 %v20722_v48, %v26967_v54  ;;  %v15864_v44 = vadd.f32 %v26972_v14, %v15821_v11  ;;  %v11892_v60 = vadd.f32 %v26972_v14, %v11849_v17  ;;  %v15684_v2 = vpop.f32.mrb[55].mxu1 }
 0x5ef   : > { %18388 = vst [vmem:[%s25629_s28 + $0x1e8] sm:$0xff] %v18276_v15   ;;  %18369 = vst [vmem:[%s25629_s28 + $0x150] sm:$0xff] %v18181_v24   ;;  %v15822_v5 = vmul.f32 %v21190_v1, %v26967_v54  ;;  %v11850_v62 = vmul.f32 %v26967_v54, %v11714_v42  ;;  %v15862_v53 = vadd.f32 %v26972_v14, %v15819_v47  ;;  %v11930_v32 = vmax.f32 %v11894_v49, 0.0 }
 0x5f0   : > { %18387 = vst [vmem:[%s25629_s28 + $0x1e0] sm:$0xff] %v18271_v40   ;;  %v11895_v56 = vadd.f32 %v26972_v14, %v11852_v58  ;;  %v15820_v55 = vmul.f32 %v26967_v54, %v15684_v2  ;;  %v15900_v33 = vmax.f32 %v15864_v44, 0.0  ;;  %v11928_v23 = vmax.f32 %v11892_v60, 0.0 }
 0x5f1   : > { %v15865_v35 = vadd.f32 %v26972_v14, %v15822_v5  ;;  %v11893_v6 = vadd.f32 %v26972_v14, %v11850_v62  ;;  %v15898_v20 = vmax.f32 %v15862_v53, 0.0 }
 0x5f2   : > { %v11931_v50 = vmax.f32 %v11895_v56, 0.0  ;;  %v15863_v13 = vadd.f32 %v26972_v14, %v15820_v55  ;;  %v20725_v7 = vpop.f32.mrb[56].mxu0 }
 0x5f3   : > { %v15901_v9 = vmax.f32 %v15865_v35, 0.0  ;;  %v11929_v27 = vmax.f32 %v11893_v6, 0.0  ;;  %v11855_v36 = vmul.f32 %v20725_v7, %v26967_v54  ;;  %v21193_v59 = vpop.f32.mrb[56].mxu1  ;;  %v11727_v63 = vpop.f32.mrb[57].mxu0 }
 0x5f4   : > { %v18196_v22 = vpack.c.bf16 %v11931_v50, %v11930_v32  ;;  %v15899_v61 = vmax.f32 %v15863_v13, 0.0  ;;  %v15825_v3 = vmul.f32 %v21193_v59, %v26967_v54  ;;  %v11853_v21 = vmul.f32 %v26967_v54, %v11727_v63  ;;  %v15697_v38 = vpop.f32.mrb[57].mxu1  ;;  %v20726_v41 = vpop.f32.mrb[58].mxu0 }
 0x5f5   : > { %v18286_v31 = vpack.c.bf16 %v15901_v9, %v15900_v33  ;;  %v18191_v16 = vpack.c.bf16 %v11929_v27, %v11928_v23  ;;  %v11898_v46 = vadd.f32 %v26972_v14, %v11855_v36  ;;  %v15823_v19 = vmul.f32 %v26967_v54, %v15697_v38  ;;  %v21194_v26 = vpop.f32.mrb[58].mxu1  ;;  %v11730_v52 = vpop.f32.mrb[59].mxu0 }
 0x5f6   : > { %18372 = vst [vmem:[%s25629_s28 + $0x168] sm:$0xff] %v18196_v22   ;;  %v18281_v34 = vpack.c.bf16 %v15899_v61, %v15898_v20  ;;  %v11856_v25 = vmul.f32 %v20726_v41, %v26967_v54  ;;  %v15868_v0 = vadd.f32 %v26972_v14, %v15825_v3  ;;  %v11896_v30 = vadd.f32 %v26972_v14, %v11853_v21  ;;  %v15700_v51 = vpop.f32.mrb[59].mxu1 }
 0x5f7   : > { %18390 = vst [vmem:[%s25629_s28 + $0x1f8] sm:$0xff] %v18286_v31   ;;  %18371 = vst [vmem:[%s25629_s28 + $0x160] sm:$0xff] %v18191_v16   ;;  %v15826_v12 = vmul.f32 %v21194_v26, %v26967_v54  ;;  %v11854_v43 = vmul.f32 %v26967_v54, %v11730_v52  ;;  %v15866_v18 = vadd.f32 %v26972_v14, %v15823_v19  ;;  %v11934_v57 = vmax.f32 %v11898_v46, 0.0 }
 0x5f8   : > { %18389 = vst [vmem:[%s25629_s28 + $0x1f0] sm:$0xff] %v18281_v34   ;;  %v11899_v8 = vadd.f32 %v26972_v14, %v11856_v25  ;;  %v15824_v39 = vmul.f32 %v26967_v54, %v15700_v51  ;;  %v15904_v29 = vmax.f32 %v15868_v0, 0.0  ;;  %v11932_v15 = vmax.f32 %v11896_v30, 0.0 }
 0x5f9   : > { %v15869_v45 = vadd.f32 %v26972_v14, %v15826_v12  ;;  %v11897_v10 = vadd.f32 %v26972_v14, %v11854_v43  ;;  %v15902_v4 = vmax.f32 %v15866_v18, 0.0 }
 0x5fa   : > { %v11935_v37 = vmax.f32 %v11899_v8, 0.0  ;;  %v15867_v28 = vadd.f32 %v26972_v14, %v15824_v39  ;;  %v20729_v17 = vpop.f32.mrb[60].mxu0 }
 0x5fb   : > { %v15905_v24 = vmax.f32 %v15869_v45, 0.0  ;;  %v11933_v11 = vmax.f32 %v11897_v10, 0.0  ;;  %v11859_v49 = vmul.f32 %v20729_v17, %v26967_v54  ;;  %v21197_v47 = vpop.f32.mrb[60].mxu1  ;;  %v11743_v58 = vpop.f32.mrb[61].mxu0 }
 0x5fc   : > { %v18206_v48 = vpack.c.bf16 %v11935_v37, %v11934_v57  ;;  %v15903_v40 = vmax.f32 %v15867_v28, 0.0  ;;  %v15829_v44 = vmul.f32 %v21197_v47, %v26967_v54  ;;  %v11857_v60 = vmul.f32 %v26967_v54, %v11743_v58  ;;  %v15713_v5 = vpop.f32.mrb[61].mxu1  ;;  %v20730_v62 = vpop.f32.mrb[62].mxu0 }
 0x5fd   : > { %v18296_v1 = vpack.c.bf16 %v15905_v24, %v15904_v29  ;;  %v18201_v42 = vpack.c.bf16 %v11933_v11, %v11932_v15  ;;  %v11902_v53 = vadd.f32 %v26972_v14, %v11859_v49  ;;  %v15827_v56 = vmul.f32 %v26967_v54, %v15713_v5  ;;  %v21198_v35 = vpop.f32.mrb[62].mxu1  ;;  %v11746_v6 = vpop.f32.mrb[63].mxu0 }
 0x5fe   : > { %18374 = vst [vmem:[%s25629_s28 + $0x178] sm:$0xff] %v18206_v48   ;;  %v18291_v2 = vpack.c.bf16 %v15903_v40, %v15902_v4  ;;  %v11860_v55 = vmul.f32 %v20730_v62, %v26967_v54  ;;  %v15872_v32 = vadd.f32 %v26972_v14, %v15829_v44  ;;  %v11900_v50 = vadd.f32 %v26972_v14, %v11857_v60  ;;  %v15716_v23 = vpop.f32.mrb[63].mxu1 }
 0x5ff   : > { %18392 = vst [vmem:[%s25629_s28 + $0x208] sm:$0xff] %v18296_v1   ;;  %18373 = vst [vmem:[%s25629_s28 + $0x170] sm:$0xff] %v18201_v42   ;;  %v15830_v13 = vmul.f32 %v21198_v35, %v26967_v54  ;;  %v11858_v33 = vmul.f32 %v26967_v54, %v11746_v6  ;;  %v15870_v9 = vadd.f32 %v26972_v14, %v15827_v56  ;;  %v11938_v61 = vmax.f32 %v11902_v53, 0.0 }
 0x600   : > { %18391 = vst [vmem:[%s25629_s28 + $0x200] sm:$0xff] %v18291_v2   ;;  %v11903_v27 = vadd.f32 %v26972_v14, %v11860_v55  ;;  %v15828_v7 = vmul.f32 %v26967_v54, %v15716_v23  ;;  %v15908_v63 = vmax.f32 %v15872_v32, 0.0  ;;  %v11936_v31 = vmax.f32 %v11900_v50, 0.0 }
 0x601   : > { %v15873_v20 = vadd.f32 %v26972_v14, %v15830_v13  ;;  %v11901_v22 = vadd.f32 %v26972_v14, %v11858_v33  ;;  %v15906_v38 = vmax.f32 %v15870_v9, 0.0 }
 0x602   : > { %v11939_v36 = vmax.f32 %v11903_v27, 0.0  ;;  %v15871_v59 = vadd.f32 %v26972_v14, %v15828_v7  ;;  %v20733_v21 = vpop.f32.mrb[64].mxu0 }
 0x603   : > { %v15909_v16 = vmax.f32 %v15873_v20, 0.0  ;;  %v11937_v3 = vmax.f32 %v11901_v22, 0.0  ;;  %v11863_v46 = vmul.f32 %v20733_v21, %v26967_v54  ;;  %v21201_v19 = vpop.f32.mrb[64].mxu1  ;;  %v11759_v25 = vpop.f32.mrb[65].mxu0 }
 0x604   : > { %v18216_v41 = vpack.c.bf16 %v11939_v36, %v11938_v61  ;;  %v15907_v34 = vmax.f32 %v15871_v59, 0.0  ;;  %v15833_v0 = vmul.f32 %v21201_v19, %v26967_v54  ;;  %v11861_v30 = vmul.f32 %v26967_v54, %v11759_v25  ;;  %v15729_v12 = vpop.f32.mrb[65].mxu1  ;;  %v20734_v43 = vpop.f32.mrb[66].mxu0 }
 0x605   : > { %v18306_v26 = vpack.c.bf16 %v15909_v16, %v15908_v63  ;;  %v18211_v52 = vpack.c.bf16 %v11937_v3, %v11936_v31  ;;  %v11906_v18 = vadd.f32 %v26972_v14, %v11863_v46  ;;  %v15831_v8 = vmul.f32 %v26967_v54, %v15729_v12  ;;  %v21202_v45 = vpop.f32.mrb[66].mxu1  ;;  %v11762_v10 = vpop.f32.mrb[67].mxu0 }
 0x606   : > { %18376 = vst [vmem:[%s25629_s28 + $0x188] sm:$0xff] %v18216_v41   ;;  %v18301_v51 = vpack.c.bf16 %v15907_v34, %v15906_v38  ;;  %v11864_v39 = vmul.f32 %v20734_v43, %v26967_v54  ;;  %v15876_v57 = vadd.f32 %v26972_v14, %v15833_v0  ;;  %v11904_v37 = vadd.f32 %v26972_v14, %v11861_v30  ;;  %v15732_v15 = vpop.f32.mrb[67].mxu1 }
 0x607   : > { %18394 = vst [vmem:[%s25629_s28 + $0x218] sm:$0xff] %v18306_v26   ;;  %18375 = vst [vmem:[%s25629_s28 + $0x180] sm:$0xff] %v18211_v52   ;;  %v15834_v28 = vmul.f32 %v21202_v45, %v26967_v54  ;;  %v11862_v29 = vmul.f32 %v26967_v54, %v11762_v10  ;;  %v15874_v24 = vadd.f32 %v26972_v14, %v15831_v8  ;;  %v11942_v40 = vmax.f32 %v11906_v18, 0.0 }
 0x608   : > { %18393 = vst [vmem:[%s25629_s28 + $0x210] sm:$0xff] %v18301_v51   ;;  %v11907_v11 = vadd.f32 %v26972_v14, %v11864_v39  ;;  %v15832_v17 = vmul.f32 %v26967_v54, %v15732_v15  ;;  %v15912_v58 = vmax.f32 %v15876_v57, 0.0  ;;  %v11940_v1 = vmax.f32 %v11904_v37, 0.0 }
 0x609   : > { %v15877_v4 = vadd.f32 %v26972_v14, %v15834_v28  ;;  %v11905_v48 = vadd.f32 %v26972_v14, %v11862_v29  ;;  %v15910_v5 = vmax.f32 %v15874_v24, 0.0 }
 0x60a   : > { %v11943_v49 = vmax.f32 %v11907_v11, 0.0  ;;  %v15875_v47 = vadd.f32 %v26972_v14, %v15832_v17  ;;  %v20737_v60 = vpop.f32.mrb[68].mxu0 }
 0x60b   : > { %v15913_v42 = vmax.f32 %v15877_v4, 0.0  ;;  %v11941_v44 = vmax.f32 %v11905_v48, 0.0  ;;  %v11867_v53 = vmul.f32 %v20737_v60, %v26967_v54  ;;  %v21205_v56 = vpop.f32.mrb[68].mxu1  ;;  %v11775_v55 = vpop.f32.mrb[69].mxu0 }
 0x60c   : > { %v18226_v62 = vpack.c.bf16 %v11943_v49, %v11942_v40  ;;  %v15911_v2 = vmax.f32 %v15875_v47, 0.0  ;;  %v15837_v32 = vmul.f32 %v21205_v56, %v26967_v54  ;;  %v11865_v50 = vmul.f32 %v26967_v54, %v11775_v55  ;;  %v15745_v13 = vpop.f32.mrb[69].mxu1  ;;  %v20738_v33 = vpop.f32.mrb[70].mxu0 }
 0x60d   : > { %v18316_v35 = vpack.c.bf16 %v15913_v42, %v15912_v58  ;;  %v18221_v6 = vpack.c.bf16 %v11941_v44, %v11940_v1  ;;  %v11910_v9 = vadd.f32 %v26972_v14, %v11867_v53  ;;  %v15835_v27 = vmul.f32 %v26967_v54, %v15745_v13  ;;  %v21206_v20 = vpop.f32.mrb[70].mxu1  ;;  %v11778_v22 = vpop.f32.mrb[71].mxu0 }
 0x60e   : > { %18378 = vst [vmem:[%s25629_s28 + $0x198] sm:$0xff] %v18226_v62   ;;  %v18311_v23 = vpack.c.bf16 %v15911_v2, %v15910_v5  ;;  %v11868_v7 = vmul.f32 %v20738_v33, %v26967_v54  ;;  %v15880_v61 = vadd.f32 %v26972_v14, %v15837_v32  ;;  %v11908_v36 = vadd.f32 %v26972_v14, %v11865_v50  ;;  %v15748_v31 = vpop.f32.mrb[71].mxu1 }
 0x60f   : > { %18396 = vst [vmem:[%s25629_s28 + $0x228] sm:$0xff] %v18316_v35   ;;  %18377 = vst [vmem:[%s25629_s28 + $0x190] sm:$0xff] %v18221_v6   ;;  %v15838_v59 = vmul.f32 %v21206_v20, %v26967_v54  ;;  %v11866_v63 = vmul.f32 %v26967_v54, %v11778_v22  ;;  %v15878_v16 = vadd.f32 %v26972_v14, %v15835_v27  ;;  %v11946_v34 = vmax.f32 %v11910_v9, 0.0 }
 0x610   : > { %18395 = vst [vmem:[%s25629_s28 + $0x220] sm:$0xff] %v18311_v23   ;;  %v11911_v3 = vadd.f32 %v26972_v14, %v11868_v7  ;;  %v15836_v21 = vmul.f32 %v26967_v54, %v15748_v31  ;;  %v15916_v25 = vmax.f32 %v15880_v61, 0.0  ;;  %v11944_v26 = vmax.f32 %v11908_v36, 0.0 }
 0x611   : > { %v15881_v38 = vadd.f32 %v26972_v14, %v15838_v59  ;;  %v11909_v41 = vadd.f32 %v26972_v14, %v11866_v63  ;;  %v15914_v30 = vmax.f32 %v15878_v16, 0.0 }
 0x612   : > { %v11947_v46 = vmax.f32 %v11911_v3, 0.0  ;;  %v15879_v19 = vadd.f32 %v26972_v14, %v15836_v21 }
 0x613   : > { %v15917_v52 = vmax.f32 %v15881_v38, 0.0  ;;  %v11945_v0 = vmax.f32 %v11909_v41, 0.0 }
 0x614   : > { %v18236_v12 = vpack.c.bf16 %v11947_v46, %v11946_v34  ;;  %v15915_v43 = vmax.f32 %v15879_v19, 0.0 }
 0x615   : > { %v18326_v51 = vpack.c.bf16 %v15917_v52, %v15916_v25  ;;  %v18231_v54 = vpack.c.bf16 %v11945_v0, %v11944_v26 }
 0x616   : > { %18380 = vst [vmem:[%s25629_s28 + $0x1a8] sm:$0xff] %v18236_v12   ;;  %v18321_v18 = vpack.c.bf16 %v15915_v43, %v15914_v30 }
 0x617   : > { %18398 = vst [vmem:[%s25629_s28 + $0x238] sm:$0xff] %v18326_v51   ;;  %18379 = vst [vmem:[%s25629_s28 + $0x1a0] sm:$0xff] %v18231_v54  }
 0x618   : > { %18397 = vst [vmem:[%s25629_s28 + $0x230] sm:$0xff] %v18321_v18  }
 0x619 PF: > { %s14_s15 = sadd.s32 1, %s23037_s15  }
 0x61a   : > { %p11_p4 = scmp.ge.s32.totalorder %s14_s15, 6  }
 0x61c   :  { %13 = sbr.rel (!%p11_p4) target bundleno = 1 (0x1), region = 80 }

// kernel: spatio_temporal_res_block.7
= control target key start
LH: loop header
LB: loop body
LE: loop exit
PB: predicated region body
PF: predicated region fallthrough
CT: control target
= control target key end

     0   :  { %s2573_s24 = smov 0   ;;  %s2575_s25 = smov 0   ;;  %s2978_s0 = inlined_call_operand.vmem [shape: bf16[20,256,128], index: 0, kind: input, shape index: {}, may-alias: {0,1,2}]   ;;  %s2979_s1 = inlined_call_operand.vmem [shape: bf16[20,256,128], index: 1, kind: input, shape index: {}, may-alias: {0,1,2}]   ;;  %s2980_s2 = inlined_call_operand.vmem [shape: bf16[20,256,128], index: 2, kind: input, shape index: {}, may-alias: {0,1,2}]   ;;  %s2981_s3 = inlined_call_operand.vmem [shape: bf16[3,128,128], index: 3, kind: input, shape index: {}]   ;;  %s2982_s4 = inlined_call_operand.vmem [shape: f32[1,128], index: 4, kind: input, shape index: {}]   ;;  %s2983_s5 = inlined_call_operand.vmem [shape: f32[1,128], index: 5, kind: input, shape index: {}]   ;;  %s2984_s6 = inlined_call_operand.vmem [shape: bf16[16,256,128], index: 6, kind: input, shape index: {}]   ;;  %s2985_s7 = inlined_call_operand.vmem [shape: f32[16,256,128], index: 7, kind: output, shape index: {}]  }
   0x1   :  { %s2577_s26 = smov 0   ;;  %s2579_s27 = smov 0  }
   0x2   :  { %s2581_s28 = smov 0  }
   0x3 LB: > { %s26_s29 = sadd.s32 1, %s2523_s26  ;;  %s29_s30 = sadd.s32 1, %s2527_s27  ;;  %s2531_s28 = sphi %s2581_s28, %s17_s28   ;;  %s2527_s27 = sphi %s2579_s27, %s2989_s27   ;;  %s2523_s26 = sphi %s2577_s26, %s2988_s26   ;;  %s2519_s25 = sphi %s2575_s25, %s2987_s25   ;;  %s2515_s24 = sphi %s2573_s24, %s2986_s24  }
   0x4   : > { %p27_p0 = scmp.ge.s32.totalorder %s26_s29, 8  ;;  %p1880_p1 = scmp.ge.s32.totalorder %s2531_s28, 1 }
   0x5   : > { %p323_p2 = scmp.lt.s32.totalorder %s2531_s28, 17 }
   0x6   : > { %s2991_s29 = smov (%p27_p0, %s26_s29), 0  ;;  %s2993_s30 = smov (!%p27_p0, %s29_s30), %s2527_s27 }
   0x7   : > { %p324_p3 = pnand %p1880_p1, %p323_p2  ;;  %p31_p4 = scmp.ge.s32.totalorder %s2993_s30, 2 }
   0x8   : > { %v2421_v0 = vld [vmem:[%s2981_s3 + $0x40] sm:$0xff] (!%p324_p3)   ;;  %s382_s10 = smul.u32 (!%p324_p3), 10, %s2519_s25  ;;  %v2423_v2 = vld [vmem:[%s2981_s3 + $0x48] sm:$0xff] (!%p324_p3)   ;;  %v2425_v4 = vld [vmem:[%s2981_s3 + $0x50] sm:$0xff] (!%p324_p3)  }
   0x9   : > { %s2995_s30 = smov (%p31_p4, %s2993_s30), 0  ;;  %327 = sbr.rel (%p324_p3) target bundleno = 357 (0x165), region = 48 }
   0xa   : > { %v2614_v1 = vld [vmem:[%s2981_s3] sm:$0xff] (!%p324_p3)   ;;  %2157 = vmatprep.subr.bf16.mxu1 (!%p324_p3), %v2421_v0  ;;  %s2620_s15 = sadd.s32 (!%p324_p3), %s2515_s24, %s382_s10  ;;  %v2626_v3 = vld [vmem:[%s2981_s3 + $0x8] sm:$0xff] (!%p324_p3)   ;;  %v2637_v5 = vld [vmem:[%s2981_s3 + $0x10] sm:$0xff] (!%p324_p3)  }
   0xb   : > { %2205 = vmatprep.subr.bf16.mxu0 (!%p324_p3), %v2614_v1  ;;  %2158 = vmatpush3.bf16.msra.mxu1 (!%p324_p3), %v2421_v0  ;;  %s393_s18 = sadd.s32 (!%p324_p3), 1, %s2620_s15  ;;  %p384_p6 = scmp.lt.s32.totalorder (!%p324_p3), %s2620_s15, 19  ;;  %v2427_v6 = vld [vmem:[%s2981_s3 + $0x58] sm:$0xff] (!%p324_p3)   ;;  %v2429_v8 = vld [vmem:[%s2981_s3 + $0x60] sm:$0xff] (!%p324_p3)   ;;  %v2431_v10 = vld [vmem:[%s2981_s3 + $0x68] sm:$0xff] (!%p324_p3)  }
   0xc   : > { %2206 = vmatpush3.bf16.msra.mxu0 (!%p324_p3), %v2614_v1  ;;  %2159 = vmatprep.subr.bf16.mxu1 (!%p324_p3), %v2423_v2  ;;  %p394_p5 = scmp.lt.s32.totalorder (!%p324_p3), %s393_s18, 19  ;;  %v2649_v7 = vld [vmem:[%s2981_s3 + $0x18] sm:$0xff] (!%p324_p3)   ;;  %v2659_v9 = vld [vmem:[%s2981_s3 + $0x20] sm:$0xff] (!%p324_p3)   ;;  %v2677_v11 = vld [vmem:[%s2981_s3 + $0x28] sm:$0xff] (!%p324_p3)  }
   0xd   : > { %2207 = vmatprep.subr.bf16.mxu0 (!%p324_p3), %v2626_v3  ;;  %v2433_v14 = vld [vmem:[%s2981_s3 + $0x70] sm:$0xff] (!%p324_p3)   ;;  %v2435_v16 = vld [vmem:[%s2981_s3 + $0x78] sm:$0xff] (!%p324_p3)   ;;  %v2441_v19 = vld [vmem:[%s2981_s3 + $0x80] sm:$0xff] (!%p324_p3)  }
   0xe   : > { %v2691_v15 = vld [vmem:[%s2981_s3 + $0x30] sm:$0xff] (!%p324_p3)   ;;  %v2701_v17 = vld [vmem:[%s2981_s3 + $0x38] sm:$0xff] (!%p324_p3)   ;;  %v2442_v21 = vld [vmem:[%s2981_s3 + $0x88] sm:$0xff] (!%p324_p3)  }
   0xf   : > { %2160 = vmatpush3.bf16.msra.mxu1 (!%p324_p3), %v2423_v2  ;;  %v2447_v25 = vld [vmem:[%s2981_s3 + $0x90] sm:$0xff] (!%p324_p3)   ;;  %v2448_v29 = vld [vmem:[%s2981_s3 + $0x98] sm:$0xff] (!%p324_p3)   ;;  %v2453_v31 = vld [vmem:[%s2981_s3 + $0xa0] sm:$0xff] (!%p324_p3)  }
  0x10   : > { %s2997_s18 = smov (!%p394_p5, %s393_s18), 19  ;;  %2208 = vmatpush3.bf16.msra.mxu0 %v2626_v3  ;;  %2161 = vmatprep.subr.bf16.mxu1 %v2425_v4  ;;  %v2454_v35 = vld [vmem:[%s2981_s3 + $0xa8] sm:$0xff]   ;;  %v2459_v37 = vld [vmem:[%s2981_s3 + $0xb0] sm:$0xff]   ;;  %v2460_v41 = vld [vmem:[%s2981_s3 + $0xb8] sm:$0xff]  }
  0x11   : > { %s385_s23 = scalar_select %p384_p6, %s2620_s15, 19  ;;  %2209 = vmatprep.subr.bf16.mxu0 %v2637_v5 }
  0x12   : > { %s2002_s12 = sshll.u32 %s2997_s18, 7 }
  0x13   : > { %2162 = vmatpush3.bf16.msra.mxu1 %v2425_v4  ;;  %s2001_s13 = sshll.u32 %s385_s23, 7  ;;  %s2664_s18 = scalar_lea.vmem %s2979_s1, %s2002_s12 }
  0x14   : > { %2210 = vmatpush3.bf16.msra.mxu0 %v2637_v5  ;;  %2163 = vmatprep.subr.bf16.mxu1 %v2427_v6  ;;  %s2672_s10 = scalar_lea.vmem %s2978_s0, %s2001_s13  ;;  %v2437_v12 = vld [vmem:[%s2664_s18] sm:$0xff]   ;;  %s404_s23 = sadd.s32 2, %s2620_s15  ;;  %v2439_v18 = vld [vmem:[%s2664_s18 + $0x8] sm:$0xff]   ;;  %v2443_v22 = vld [vmem:[%s2664_s18 + $0x10] sm:$0xff]  }
  0x15   : > { %2211 = vmatprep.subr.bf16.mxu0 %v2649_v7  ;;  %v2438_v13 = vld [vmem:[%s2672_s10] sm:$0xff]   ;;  %2173 = vmatprep.mubr.bf16.mxu1 %v2437_v12  ;;  %p405_p7 = scmp.lt.s32.totalorder %s404_s23, 19  ;;  %v2440_v20 = vld [vmem:[%s2672_s10 + $0x8] sm:$0xff]   ;;  %v2444_v23 = vld [vmem:[%s2672_s10 + $0x10] sm:$0xff]  }
  0x16   : > { %2221 = vmatprep.mubr.bf16.mxu0 %v2438_v13  ;;  %v2445_v24 = vld [vmem:[%s2664_s18 + $0x18] sm:$0xff]   ;;  %v2449_v27 = vld [vmem:[%s2664_s18 + $0x20] sm:$0xff]   ;;  %v2451_v30 = vld [vmem:[%s2664_s18 + $0x28] sm:$0xff]  }
  0x17   : > { %2164 = vmatpush3.bf16.msra.mxu1 %v2427_v6  ;;  %s2999_s23 = smov (!%p405_p7, %s404_s23), 19  ;;  %v2446_v26 = vld [vmem:[%s2672_s10 + $0x18] sm:$0xff]   ;;  %v2450_v28 = vld [vmem:[%s2672_s10 + $0x20] sm:$0xff]   ;;  %v2452_v32 = vld [vmem:[%s2672_s10 + $0x28] sm:$0xff]  }
  0x18   : > { %2212 = vmatpush3.bf16.msra.mxu0 %v2649_v7  ;;  %2165 = vmatprep.subr.bf16.mxu1 %v2429_v8  ;;  %s2003_s13 = sshll.u32 %s2999_s23, 7  ;;  %v2455_v33 = vld [vmem:[%s2664_s18 + $0x30] sm:$0xff]   ;;  %v2457_v36 = vld [vmem:[%s2664_s18 + $0x38] sm:$0xff]   ;;  %v2461_v39 = vld [vmem:[%s2664_s18 + $0x40] sm:$0xff]  }
  0x19   : > { %2213 = vmatprep.subr.bf16.mxu0 %v2659_v9  ;;  %s2732_s19 = scalar_lea.vmem %s2980_s2, %s2003_s13  ;;  %v2456_v34 = vld [vmem:[%s2672_s10 + $0x30] sm:$0xff]   ;;  %v2458_v38 = vld [vmem:[%s2672_s10 + $0x38] sm:$0xff]   ;;  %v2463_v42 = vld [vmem:[%s2664_s18 + $0x48] sm:$0xff]  }
  0x1a   : > { %v2462_v40 = vld [vmem:[%s2732_s19] sm:$0xff]   ;;  %v2464_v43 = vld [vmem:[%s2732_s19 + $0x8] sm:$0xff]   ;;  %v2465_v44 = vld [vmem:[%s2664_s18 + $0x50] sm:$0xff]  }
  0x1b   : > { %2166 = vmatpush3.bf16.msra.mxu1 %v2429_v8  ;;  %v2466_v45 = vld [vmem:[%s2732_s19 + $0x10] sm:$0xff]   ;;  %v2467_v46 = vld [vmem:[%s2664_s18 + $0x58] sm:$0xff]   ;;  %v2469_v48 = vld [vmem:[%s2664_s18 + $0x60] sm:$0xff]  }
  0x1c   : > { %2214 = vmatpush3.bf16.msra.mxu0 %v2659_v9  ;;  %2167 = vmatprep.subr.bf16.mxu1 %v2431_v10  ;;  %v2468_v47 = vld [vmem:[%s2732_s19 + $0x18] sm:$0xff]   ;;  %v2470_v49 = vld [vmem:[%s2732_s19 + $0x20] sm:$0xff]   ;;  %v2471_v50 = vld [vmem:[%s2664_s18 + $0x68] sm:$0xff]  }
  0x1d   : > { %2215 = vmatprep.subr.bf16.mxu0 %v2677_v11  ;;  %v2472_v51 = vld [vmem:[%s2732_s19 + $0x28] sm:$0xff]   ;;  %v2473_v52 = vld [vmem:[%s2664_s18 + $0x70] sm:$0xff]   ;;  %v2475_v54 = vld [vmem:[%s2664_s18 + $0x78] sm:$0xff]   ;;  %s1887_s18 = sshll.u32 %s2519_s25, 3 }
  0x1e   : > { %v2474_v53 = vld [vmem:[%s2732_s19 + $0x30] sm:$0xff]   ;;  %v2476_v55 = vld [vmem:[%s2732_s19 + $0x38] sm:$0xff]   ;;  %v2477_v56 = vld [vmem:[%s2672_s10 + $0x40] sm:$0xff]   ;;  %s414_s13 = sadd.s32 %s2515_s24, %s1887_s18 }
  0x1f   : > { %2168 = vmatpush3.bf16.msra.mxu1 %v2431_v10  ;;  %v2478_v57 = vld [vmem:[%s2732_s19 + $0x40] sm:$0xff]   ;;  %v2479_v58 = vld [vmem:[%s2672_s10 + $0x48] sm:$0xff]   ;;  %v2481_v60 = vld [vmem:[%s2672_s10 + $0x50] sm:$0xff]   ;;  %p415_p8 = scmp.lt.s32.totalorder %s414_s13, 15 }
  0x20   : > { %2216 = vmatpush3.bf16.msra.mxu0 %v2677_v11  ;;  %2169 = vmatprep.subr.bf16.mxu1 %v2433_v14  ;;  %v2480_v59 = vld [vmem:[%s2732_s19 + $0x48] sm:$0xff]   ;;  %v2482_v61 = vld [vmem:[%s2732_s19 + $0x50] sm:$0xff]   ;;  %v2483_v62 = vld [vmem:[%s2672_s10 + $0x58] sm:$0xff]  }
  0x21   : > { %2217 = vmatprep.subr.bf16.mxu0 %v2691_v15  ;;  %v2484_v63 = vld [vmem:[%s2732_s19 + $0x58] sm:$0xff]   ;;  %v2485_v0 = vld [vmem:[%s2672_s10 + $0x60] sm:$0xff]   ;;  %v2487_v2 = vld [vmem:[%s2672_s10 + $0x68] sm:$0xff]   ;;  %s3001_s13 = smov (!%p415_p8, %s414_s13), 15 }
  0x22   : > { %v2489_v4 = vld [vmem:[%s2672_s10 + $0x70] sm:$0xff]   ;;  %v2491_v6 = vld [vmem:[%s2672_s10 + $0x78] sm:$0xff]   ;;  %s2004_s25 = sshll.u32 %s3001_s13, 7  ;;  %s2005_s22 = sshll.u32 %s3001_s13, 8 }
  0x23   : > { %2170 = vmatpush3.bf16.msra.mxu1 %v2433_v14  ;;  %s2824_s16 = scalar_lea.vmem %s2984_s6, %s2004_s25  ;;  %s2849_s9 = scalar_lea.vmem %s2985_s7, %s2005_s22 }
  0x24   : > { %2218 = vmatpush3.bf16.msra.mxu0 %v2691_v15  ;;  %2171 = vmatprep.subr.bf16.mxu1 %v2435_v16 }
  0x25   : > { %2219 = vmatprep.subr.bf16.mxu0 %v2701_v17 }
  0x27   : > { %2172 = vmatpush3.bf16.msra.mxu1 %v2435_v16 }
  0x28   : > { %2220 = vmatpush3.bf16.msra.mxu0 %v2701_v17  ;;  %2301 = vmatprep.subr.bf16.mxu1 %v2614_v1 }
  0x29   : > { %2253 = vmatprep.subr.bf16.mxu0 %v2441_v19 }
  0x2a   : > { %2174 = vmatmul.mubr.bf16.vlgmr.msra.gmra.mrb[0].mxu1 %v2439_v18 }
  0x2b   : > { %2222 = vmatmul.mubr.bf16.vlgmr.msra.gmra.mrb[0].mxu0 %v2440_v20  ;;  %2309 = vmatpush3.bf16.msra.mxu1 %v2614_v1  ;;  %v2486_v1 = vld [vmem:[%s2732_s19 + $0x60] sm:$0xff]  }
  0x2c   : > { %2254 = vmatpush3.bf16.msra.mxu0 %v2441_v19  ;;  %2177 = vmatprep.mubr.bf16.mxu1 %v2443_v22 }
  0x2d   : > { %2255 = vmatprep.subr.bf16.mxu0 %v2442_v21  ;;  %2225 = vmatprep.mubr.bf16.mxu0 %v2444_v23 }
  0x2e   : > { %2302 = vmatprep.subr.bf16.mxu1 %v2626_v3 }
  0x2f   : > { %2310 = vmatpush3.bf16.msra.mxu1 %v2626_v3  ;;  %v2488_v3 = vld [vmem:[%s2732_s19 + $0x68] sm:$0xff]  }
  0x30   : > { %2256 = vmatpush3.bf16.msra.mxu0 %v2442_v21  ;;  %2303 = vmatprep.subr.bf16.mxu1 %v2637_v5 }
  0x31   : > { %2257 = vmatprep.subr.bf16.mxu0 %v2447_v25 }
  0x32   : > { %2178 = vmatmul.mubr.bf16.gmra.mrb[4].mxu1 %v2445_v24 }
  0x33   : > { %2226 = vmatmul.mubr.bf16.gmra.mrb[4].mxu0 %v2446_v26  ;;  %2181 = vmatprep.mubr.bf16.mxu1 %v2449_v27  ;;  %v2070_v26 = vld [vmem:[%s2824_s16 + $0x8] sm:$0xff]  }
  0x34   : > { %2258 = vmatpush3.bf16.msra.mxu0 %v2447_v25  ;;  %2229 = vmatprep.mubr.bf16.mxu0 %v2450_v28  ;;  %v2829_v25 = vld [vmem:[%s2982_s4] ss:$0 sm:$0xff] }
  0x35   : > { %2259 = vmatprep.subr.bf16.mxu0 %v2448_v29  ;;  %2311 = vmatpush3.bf16.msra.mxu1 %v2637_v5  ;;  %v2490_v5 = vld [vmem:[%s2732_s19 + $0x70] sm:$0xff]  }
  0x36   : > { %2304 = vmatprep.subr.bf16.mxu1 %v2649_v7 }
  0x38   : > { %2260 = vmatpush3.bf16.msra.mxu0 %v2448_v29  ;;  %v2007_v29 = vld [vmem:[%s2824_s16] sm:$0xff]  }
  0x39   : > { %2261 = vmatprep.subr.bf16.mxu0 %v2453_v31  ;;  %2312 = vmatpush3.bf16.msra.mxu1 %v2649_v7  ;;  %v2492_v7 = vld [vmem:[%s2732_s19 + $0x78] sm:$0xff]  }
  0x3a   : > { %2182 = vmatmul.mubr.bf16.gmra.mrb[8].mxu1 %v2451_v30  ;;  %2305 = vmatprep.subr.bf16.mxu1 %v2659_v9  ;;  %v2836_v30 = vld [vmem:[%s2983_s5] ss:$0 sm:$0xff] }
  0x3b   : > { %2230 = vmatmul.mubr.bf16.gmra.mrb[8].mxu0 %v2452_v32  ;;  %2185 = vmatprep.mubr.bf16.mxu1 %v2455_v33 }
  0x3c   : > { %2262 = vmatpush3.bf16.msra.mxu0 %v2453_v31  ;;  %2233 = vmatprep.mubr.bf16.mxu0 %v2456_v34  ;;  %v2012_v34 = vunpack.c.l.bf16 %v2070_v26 }
  0x3d   : > { %2263 = vmatprep.subr.bf16.mxu0 %v2454_v35  ;;  %2313 = vmatpush3.bf16.msra.mxu1 %v2659_v9 }
  0x3e   : > { %2306 = vmatprep.subr.bf16.mxu1 %v2677_v11 }
  0x40   : > { %2264 = vmatpush3.bf16.msra.mxu0 %v2454_v35 }
  0x41   : > { %2265 = vmatprep.subr.bf16.mxu0 %v2459_v37  ;;  %2314 = vmatpush3.bf16.msra.mxu1 %v2677_v11 }
  0x42   : > { %2186 = vmatmul.mubr.bf16.gmra.mrb[12].mxu1 %v2457_v36  ;;  %2307 = vmatprep.subr.bf16.mxu1 %v2691_v15 }
  0x43   : > { %2234 = vmatmul.mubr.bf16.gmra.mrb[12].mxu0 %v2458_v38  ;;  %2189 = vmatprep.mubr.bf16.mxu1 %v2461_v39  ;;  %v2008_v38 = vunpack.c.l.bf16 %v2007_v29 }
  0x44   : > { %2266 = vmatpush3.bf16.msra.mxu0 %v2459_v37  ;;  %2269 = vmatprep.mubr.bf16.mxu0 %v2462_v40 }
  0x45   : > { %2267 = vmatprep.subr.bf16.mxu0 %v2460_v41  ;;  %2315 = vmatpush3.bf16.msra.mxu1 %v2691_v15 }
  0x46   : > { %2308 = vmatprep.subr.bf16.mxu1 %v2701_v17 }
  0x48   : > { %2268 = vmatpush3.bf16.msra.mxu0 %v2460_v41 }
  0x49   : > { %2316 = vmatpush3.bf16.msra.mxu1 %v2701_v17 }
  0x4a   : > { %2190 = vmatmul.mubr.bf16.gmra.mrb[16].mxu1 %v2463_v42  ;;  %v2013_v42 = vunpack.c.h.bf16 %v2070_v26  ;;  %v2074_v26 = vld [vmem:[%s2824_s16 + $0x28] sm:$0xff]  }
  0x4b   : > { %2270 = vmatmul.mubr.bf16.vlgmr.msra.gmra.mrb[0].mxu0 %v2464_v43  ;;  %2193 = vmatprep.mubr.bf16.mxu1 %v2465_v44 }
  0x4c   : > { %2273 = vmatprep.mubr.bf16.mxu0 %v2466_v45  ;;  %v2009_v45 = vunpack.c.h.bf16 %v2007_v29 }
  0x52   : > { %2194 = vmatmul.mubr.bf16.gmra.mrb[20].mxu1 %v2467_v46 }
  0x53   : > { %2274 = vmatmul.mubr.bf16.gmra.mrb[4].mxu0 %v2468_v47  ;;  %2197 = vmatprep.mubr.bf16.mxu1 %v2469_v48 }
  0x54   : > { %2277 = vmatprep.mubr.bf16.mxu0 %v2470_v49 }
  0x5a   : > { %2198 = vmatmul.mubr.bf16.gmra.mrb[24].mxu1 %v2471_v50 }
  0x5b   : > { %2278 = vmatmul.mubr.bf16.gmra.mrb[8].mxu0 %v2472_v51  ;;  %2201 = vmatprep.mubr.bf16.mxu1 %v2473_v52  ;;  %v2072_v51 = vld [vmem:[%s2824_s16 + $0x18] sm:$0xff]  }
  0x5c   : > { %2281 = vmatprep.mubr.bf16.mxu0 %v2474_v53 }
  0x62   : > { %2202 = vmatmul.mubr.bf16.gmra.mrb[28].mxu1 %v2475_v54 }
  0x63   : > { %2282 = vmatmul.mubr.bf16.gmra.mrb[12].mxu0 %v2476_v55  ;;  %2237 = vmatprep.mubr.bf16.mxu1 %v2477_v56  ;;  %v2071_v56 = vld [vmem:[%s2824_s16 + $0x10] sm:$0xff]  }
  0x64   : > { %2285 = vmatprep.mubr.bf16.mxu0 %v2478_v57 }
  0x6a   : > { %2238 = vmatmul.mubr.bf16.vlgmr.msra.gmra.mrb[16].mxu1 %v2479_v58 }
  0x6b   : > { %2286 = vmatmul.mubr.bf16.gmra.mrb[16].mxu0 %v2480_v59  ;;  %2241 = vmatprep.mubr.bf16.mxu1 %v2481_v60 }
  0x6c   : > { %2289 = vmatprep.mubr.bf16.mxu0 %v2482_v61 }
  0x72   : > { %2242 = vmatmul.mubr.bf16.gmra.mrb[20].mxu1 %v2483_v62 }
  0x73   : > { %2290 = vmatmul.mubr.bf16.gmra.mrb[20].mxu0 %v2484_v63  ;;  %2245 = vmatprep.mubr.bf16.mxu1 %v2485_v0  ;;  %v2020_v63 = vunpack.c.l.bf16 %v2072_v51 }
  0x74   : > { %2293 = vmatprep.mubr.bf16.mxu0 %v2486_v1 }
  0x7a   : > { %2246 = vmatmul.mubr.bf16.gmra.mrb[24].mxu1 %v2487_v2 }
  0x7b   : > { %2294 = vmatmul.mubr.bf16.gmra.mrb[24].mxu0 %v2488_v3  ;;  %2249 = vmatprep.mubr.bf16.mxu1 %v2489_v4  ;;  %v2016_v4 = vunpack.c.l.bf16 %v2071_v56 }
  0x7c   : > { %2297 = vmatprep.mubr.bf16.mxu0 %v2490_v5 }
  0x82   : > { %2250 = vmatmul.mubr.bf16.gmra.mrb[28].mxu1 %v2491_v6 }
  0x83   : > { %2298 = vmatmul.mubr.bf16.gmra.mrb[28].mxu0 %v2492_v7 }
  0xfd   : > { %v2175_v8 = vpop.f32.mrb[0].mxu1 }
  0xfe   : > { %v707_v9 = vpop.f32.mrb[1].mxu1 }
  0xff   : > { %v2176_v10 = vpop.f32.mrb[2].mxu1 }
 0x100   : > { %v710_v11 = vpop.f32.mrb[3].mxu1 }
 0x105   : > { %v2179_v12 = vpop.f32.mrb[4].mxu1 }
 0x106   : > { %v723_v13 = vpop.f32.mrb[5].mxu1 }
 0x107   : > { %v2180_v14 = vpop.f32.mrb[6].mxu1 }
 0x108   : > { %v2798_v15 = vpop.f32.mrb[7].mxu1 }
 0x10d   : > { %v2801_v16 = vpop.f32.mrb[8].mxu1 }
 0x10e   : > { %v2804_v17 = vpop.f32.mrb[9].mxu1 }
 0x10f   : > { %v2806_v18 = vpop.f32.mrb[10].mxu1 }
 0x110   : > { %v2808_v19 = vpop.f32.mrb[11].mxu1 }
 0x115   : > { %v2812_v20 = vpop.f32.mrb[12].mxu1 }
 0x116   : > { %v2814_v21 = vpop.f32.mrb[13].mxu1 }
 0x117   : > { %v2816_v22 = vpop.f32.mrb[14].mxu1 }
 0x118   : > { %v2818_v23 = vpop.f32.mrb[15].mxu1 }
 0x11e   : > { %v2271_v24 = vpop.f32.mrb[0].mxu0 }
 0x11f   : > { %v2317_v27 = vadd.f32 %v2271_v24, %v2175_v8  ;;  %v1366_v28 = vpop.f32.mrb[1].mxu0  ;;  %v2021_v8 = vunpack.c.h.bf16 %v2072_v51 }
 0x120   : > { %v2318_v31 = vadd.f32 %v1366_v28, %v707_v9  ;;  %v2272_v32 = vpop.f32.mrb[2].mxu0 }
 0x121   : > { %v1534_v33 = vmul.f32 %v2317_v27, %v2829_v25  ;;  %v2319_v35 = vadd.f32 %v2272_v32, %v2176_v10  ;;  %v1369_v36 = vpop.f32.mrb[3].mxu0  ;;  %v2073_v32 = vld [vmem:[%s2824_s16 + $0x20] sm:$0xff]  }
 0x122   : > { %v1532_v37 = vmul.f32 %v2318_v31, %v2829_v25  ;;  %v2320_v39 = vadd.f32 %v1369_v36, %v710_v11  ;;  %v2017_v11 = vunpack.c.h.bf16 %v2071_v56 }
 0x123   : > { %v1573_v40 = vadd.f32 %v2836_v30, %v1534_v33  ;;  %v1535_v41 = vmul.f32 %v2319_v35, %v2829_v25 }
 0x124   : > { %v1571_v43 = vadd.f32 %v2836_v30, %v1532_v37  ;;  %v1533_v44 = vmul.f32 %v2320_v39, %v2829_v25  ;;  %v2028_v39 = vunpack.c.l.bf16 %v2074_v26 }
 0x125   : > { %v1669_v46 = vadd.f32 %v2012_v34, %v1573_v40  ;;  %v1574_v47 = vadd.f32 %v2836_v30, %v1535_v41 }
 0x126   : > { %v1667_v48 = vadd.f32 %v2008_v38, %v1571_v43  ;;  %v1572_v49 = vadd.f32 %v2836_v30, %v1533_v44  ;;  %v2275_v50 = vpop.f32.mrb[4].mxu0  ;;  %v2024_v43 = vunpack.c.l.bf16 %v2073_v32 }
 0x127   : > { %v1701_v52 = vmax.f32 %v1669_v46, 0.0  ;;  %v1670_v53 = vadd.f32 %v2013_v42, %v1574_v47  ;;  %v2321_v54 = vadd.f32 %v2275_v50, %v2179_v12  ;;  %v1382_v55 = vpop.f32.mrb[5].mxu0  ;;  %v2029_v46 = vunpack.c.h.bf16 %v2074_v26 }
 0x128   : > { %v1699_v57 = vmax.f32 %v1667_v48, 0.0  ;;  %v1668_v58 = vadd.f32 %v2009_v45, %v1572_v49  ;;  %v2322_v59 = vadd.f32 %v1382_v55, %v723_v13  ;;  %v2276_v60 = vpop.f32.mrb[6].mxu0  ;;  %v2025_v48 = vunpack.c.h.bf16 %v2073_v32  ;;  %v2077_v32 = vld [vmem:[%s2824_s16 + $0x40] sm:$0xff]  }
 0x129   : > { %1733 = vst [vmem:[%s2849_s9 + $0x10] sm:$0xff] %v1701_v52  ;;  %v1702_v61 = vmax.f32 %v1670_v53, 0.0  ;;  %v1538_v62 = vmul.f32 %v2321_v54, %v2829_v25  ;;  %v2323_v0 = vadd.f32 %v2276_v60, %v2180_v14  ;;  %v1385_v1 = vpop.f32.mrb[7].mxu0  ;;  %v2076_v53 = vld [vmem:[%s2824_s16 + $0x38] sm:$0xff]  }
 0x12a   : > { %1731 = vst [vmem:[%s2849_s9] sm:$0xff] %v1699_v57  ;;  %v1700_v2 = vmax.f32 %v1668_v58, 0.0  ;;  %v1536_v3 = vmul.f32 %v2322_v59, %v2829_v25  ;;  %v2324_v5 = vadd.f32 %v1385_v1, %v2798_v15  ;;  %v2075_v58 = vld [vmem:[%s2824_s16 + $0x30] sm:$0xff]   ;;  %v2036_v1 = vunpack.c.l.bf16 %v2076_v53 }
 0x12b   : > { %1734 = vst [vmem:[%s2849_s9 + $0x18] sm:$0xff] %v1702_v61  ;;  %v1577_v6 = vadd.f32 %v2836_v30, %v1538_v62  ;;  %v1539_v7 = vmul.f32 %v2323_v0, %v2829_v25 }
 0x12c   : > { %1732 = vst [vmem:[%s2849_s9 + $0x8] sm:$0xff] %v1700_v2  ;;  %v1575_v9 = vadd.f32 %v2836_v30, %v1536_v3  ;;  %v1537_v10 = vmul.f32 %v2324_v5, %v2829_v25  ;;  %v2032_v5 = vunpack.c.l.bf16 %v2075_v58 }
 0x12d   : > { %v1673_v12 = vadd.f32 %v2020_v63, %v1577_v6  ;;  %v1578_v13 = vadd.f32 %v2836_v30, %v1539_v7 }
 0x12e   : > { %v1671_v14 = vadd.f32 %v2016_v4, %v1575_v9  ;;  %v1576_v15 = vadd.f32 %v2836_v30, %v1537_v10  ;;  %v2279_v24 = vpop.f32.mrb[8].mxu0  ;;  %v2033_v10 = vunpack.c.h.bf16 %v2075_v58 }
 0x12f   : > { %v1705_v27 = vmax.f32 %v1673_v12, 0.0  ;;  %v1674_v28 = vadd.f32 %v2021_v8, %v1578_v13  ;;  %v2325_v29 = vadd.f32 %v2279_v24, %v2801_v16  ;;  %v1398_v31 = vpop.f32.mrb[9].mxu0  ;;  %v2037_v8 = vunpack.c.h.bf16 %v2076_v53  ;;  %v2078_v24 = vld [vmem:[%s2824_s16 + $0x48] sm:$0xff]  }
 0x130   : > { %v1703_v33 = vmax.f32 %v1671_v14, 0.0  ;;  %v1672_v34 = vadd.f32 %v2017_v11, %v1576_v15  ;;  %v2326_v35 = vadd.f32 %v1398_v31, %v2804_v17  ;;  %v2280_v36 = vpop.f32.mrb[10].mxu0 }
 0x131   : > { %1737 = vst [vmem:[%s2849_s9 + $0x30] sm:$0xff] %v1705_v27  ;;  %v1706_v37 = vmax.f32 %v1674_v28, 0.0  ;;  %v1542_v38 = vmul.f32 %v2325_v29, %v2829_v25  ;;  %v2327_v40 = vadd.f32 %v2280_v36, %v2806_v18  ;;  %v1401_v41 = vpop.f32.mrb[11].mxu0 }
 0x132   : > { %1735 = vst [vmem:[%s2849_s9 + $0x20] sm:$0xff] %v1703_v33  ;;  %v1704_v42 = vmax.f32 %v1672_v34, 0.0  ;;  %v1540_v16 = vmul.f32 %v2326_v35, %v2829_v25  ;;  %v2328_v44 = vadd.f32 %v1401_v41, %v2808_v19  ;;  %v2044_v41 = vunpack.c.l.bf16 %v2078_v24 }
 0x133   : > { %1738 = vst [vmem:[%s2849_s9 + $0x38] sm:$0xff] %v1706_v37  ;;  %v1581_v17 = vadd.f32 %v2836_v30, %v1542_v38  ;;  %v1543_v45 = vmul.f32 %v2327_v40, %v2829_v25 }
 0x134   : > { %1736 = vst [vmem:[%s2849_s9 + $0x28] sm:$0xff] %v1704_v42  ;;  %v1579_v47 = vadd.f32 %v2836_v30, %v1540_v16  ;;  %v1541_v18 = vmul.f32 %v2328_v44, %v2829_v25 }
 0x135   : > { %v1677_v49 = vadd.f32 %v2028_v39, %v1581_v17  ;;  %v1582_v50 = vadd.f32 %v2836_v30, %v1543_v45  ;;  %v2040_v17 = vunpack.c.l.bf16 %v2077_v32 }
 0x136   : > { %v1675_v51 = vadd.f32 %v2024_v43, %v1579_v47  ;;  %v1580_v19 = vadd.f32 %v2836_v30, %v1541_v18  ;;  %v2283_v52 = vpop.f32.mrb[12].mxu0  ;;  %v2045_v18 = vunpack.c.h.bf16 %v2078_v24 }
 0x137   : > { %v1709_v54 = vmax.f32 %v1677_v49, 0.0  ;;  %v1678_v55 = vadd.f32 %v2029_v46, %v1582_v50  ;;  %v2329_v56 = vadd.f32 %v2283_v52, %v2812_v20  ;;  %v1414_v57 = vpop.f32.mrb[13].mxu0  ;;  %v2041_v50 = vunpack.c.h.bf16 %v2077_v32  ;;  %v2082_v32 = vld [vmem:[%s2824_s16 + $0x68] sm:$0xff]  }
 0x138   : > { %v1707_v59 = vmax.f32 %v1675_v51, 0.0  ;;  %v1676_v60 = vadd.f32 %v2025_v48, %v1580_v19  ;;  %v2330_v61 = vadd.f32 %v1414_v57, %v2814_v21  ;;  %v2284_v62 = vpop.f32.mrb[14].mxu0 }
 0x139   : > { %1741 = vst [vmem:[%s2849_s9 + $0x50] sm:$0xff] %v1709_v54  ;;  %v1710_v63 = vmax.f32 %v1678_v55, 0.0  ;;  %v1546_v0 = vmul.f32 %v2329_v56, %v2829_v25  ;;  %v2331_v2 = vadd.f32 %v2284_v62, %v2816_v22  ;;  %v1417_v3 = vpop.f32.mrb[15].mxu0  ;;  %v2080_v56 = vld [vmem:[%s2824_s16 + $0x58] sm:$0xff]   ;;  %v2079_v62 = vld [vmem:[%s2824_s16 + $0x50] sm:$0xff]  }
 0x13a   : > { %1739 = vst [vmem:[%s2849_s9 + $0x40] sm:$0xff] %v1707_v59  ;;  %v1708_v4 = vmax.f32 %v1676_v60, 0.0  ;;  %v1544_v20 = vmul.f32 %v2330_v61, %v2829_v25  ;;  %v2332_v6 = vadd.f32 %v1417_v3, %v2818_v23 }
 0x13b   : > { %1742 = vst [vmem:[%s2849_s9 + $0x58] sm:$0xff] %v1710_v63  ;;  %v1585_v21 = vadd.f32 %v2836_v30, %v1546_v0  ;;  %v1547_v7 = vmul.f32 %v2331_v2, %v2829_v25 }
 0x13c   : > { %1740 = vst [vmem:[%s2849_s9 + $0x48] sm:$0xff] %v1708_v4  ;;  %v1583_v9 = vadd.f32 %v2836_v30, %v1544_v20  ;;  %v1545_v22 = vmul.f32 %v2332_v6, %v2829_v25  ;;  %v2052_v6 = vunpack.c.l.bf16 %v2080_v56 }
 0x13d   : > { %v1681_v11 = vadd.f32 %v2036_v1, %v1585_v21  ;;  %v1586_v12 = vadd.f32 %v2836_v30, %v1547_v7  ;;  %v2239_v13 = vpop.f32.mrb[16].mxu1 }
 0x13e   : > { %v1679_v14 = vadd.f32 %v2032_v5, %v1583_v9  ;;  %v1584_v23 = vadd.f32 %v2836_v30, %v1545_v22  ;;  %v2287_v15 = vpop.f32.mrb[16].mxu0  ;;  %v1076_v26 = vpop.f32.mrb[17].mxu1  ;;  %v2048_v22 = vunpack.c.l.bf16 %v2079_v62 }
 0x13f   : > { %v1713_v27 = vmax.f32 %v1681_v11, 0.0  ;;  %v1682_v28 = vadd.f32 %v2037_v8, %v1586_v12  ;;  %v2333_v29 = vadd.f32 %v2287_v15, %v2239_v13  ;;  %v1430_v31 = vpop.f32.mrb[17].mxu0  ;;  %v2240_v33 = vpop.f32.mrb[18].mxu1  ;;  %v2053_v13 = vunpack.c.h.bf16 %v2080_v56 }
 0x140   : > { %v1711_v34 = vmax.f32 %v1679_v14, 0.0  ;;  %v1680_v35 = vadd.f32 %v2033_v10, %v1584_v23  ;;  %v2334_v36 = vadd.f32 %v1430_v31, %v1076_v26  ;;  %v2288_v37 = vpop.f32.mrb[18].mxu0  ;;  %v1079_v38 = vpop.f32.mrb[19].mxu1  ;;  %v2049_v15 = vunpack.c.h.bf16 %v2079_v62  ;;  %v2084_v62 = vld [vmem:[%s2824_s16 + $0x78] sm:$0xff]  }
 0x141   : > { %1745 = vst [vmem:[%s2849_s9 + $0x70] sm:$0xff] %v1713_v27  ;;  %v1714_v39 = vmax.f32 %v1682_v28, 0.0  ;;  %v1550_v40 = vmul.f32 %v2333_v29, %v2829_v25  ;;  %v2335_v42 = vadd.f32 %v2288_v37, %v2240_v33  ;;  %v1433_v16 = vpop.f32.mrb[19].mxu0 }
 0x142   : > { %1743 = vst [vmem:[%s2849_s9 + $0x60] sm:$0xff] %v1711_v34  ;;  %v1712_v43 = vmax.f32 %v1680_v35, 0.0  ;;  %v1548_v44 = vmul.f32 %v2334_v36, %v2829_v25  ;;  %v2336_v45 = vadd.f32 %v1433_v16, %v1079_v38  ;;  %v2081_v38 = vld [vmem:[%s2824_s16 + $0x60] sm:$0xff]  }
 0x143   : > { %1746 = vst [vmem:[%s2849_s9 + $0x78] sm:$0xff] %v1714_v39  ;;  %v1589_v46 = vadd.f32 %v2836_v30, %v1550_v40  ;;  %v1551_v47 = vmul.f32 %v2335_v42, %v2829_v25 }
 0x144   : > { %1744 = vst [vmem:[%s2849_s9 + $0x68] sm:$0xff] %v1712_v43  ;;  %v1587_v48 = vadd.f32 %v2836_v30, %v1548_v44  ;;  %v1549_v49 = vmul.f32 %v2336_v45, %v2829_v25  ;;  %v2060_v45 = vunpack.c.l.bf16 %v2082_v32 }
 0x145   : > { %v1685_v51 = vadd.f32 %v2044_v41, %v1589_v46  ;;  %v1590_v19 = vadd.f32 %v2836_v30, %v1551_v47  ;;  %v2243_v52 = vpop.f32.mrb[20].mxu1 }
 0x146   : > { %v1683_v53 = vadd.f32 %v2040_v17, %v1587_v48  ;;  %v1588_v54 = vadd.f32 %v2836_v30, %v1549_v49  ;;  %v2291_v55 = vpop.f32.mrb[20].mxu0  ;;  %v1092_v57 = vpop.f32.mrb[21].mxu1  ;;  %v2056_v49 = vunpack.c.l.bf16 %v2081_v38 }
 0x147   : > { %v1717_v58 = vmax.f32 %v1685_v51, 0.0  ;;  %v1686_v59 = vadd.f32 %v2045_v18, %v1590_v19  ;;  %v2337_v60 = vadd.f32 %v2291_v55, %v2243_v52  ;;  %v1446_v61 = vpop.f32.mrb[21].mxu0  ;;  %v2244_v63 = vpop.f32.mrb[22].mxu1  ;;  %v2061_v52 = vunpack.c.h.bf16 %v2082_v32 }
 0x148   : > { %v1715_v0 = vmax.f32 %v1683_v53, 0.0  ;;  %v1684_v1 = vadd.f32 %v2041_v50, %v1588_v54  ;;  %v2338_v2 = vadd.f32 %v1446_v61, %v1092_v57  ;;  %v2292_v3 = vpop.f32.mrb[22].mxu0  ;;  %v1095_v4 = vpop.f32.mrb[23].mxu1  ;;  %v2057_v55 = vunpack.c.h.bf16 %v2081_v38 }
 0x149   : > { %1749 = vst [vmem:[%s2849_s9 + $0x90] sm:$0xff] %v1717_v58  ;;  %v1718_v20 = vmax.f32 %v1686_v59, 0.0  ;;  %v1554_v5 = vmul.f32 %v2337_v60, %v2829_v25  ;;  %v2339_v21 = vadd.f32 %v2292_v3, %v2244_v63  ;;  %v1449_v7 = vpop.f32.mrb[23].mxu0 }
 0x14a   : > { %1747 = vst [vmem:[%s2849_s9 + $0x80] sm:$0xff] %v1715_v0  ;;  %v1716_v8 = vmax.f32 %v1684_v1, 0.0  ;;  %v1552_v9 = vmul.f32 %v2338_v2, %v2829_v25  ;;  %v2340_v10 = vadd.f32 %v1449_v7, %v1095_v4  ;;  %v2083_v4 = vld [vmem:[%s2824_s16 + $0x70] sm:$0xff]  }
 0x14b   : > { %1750 = vst [vmem:[%s2849_s9 + $0x98] sm:$0xff] %v1718_v20  ;;  %v1593_v11 = vadd.f32 %v2836_v30, %v1554_v5  ;;  %v1555_v12 = vmul.f32 %v2339_v21, %v2829_v25 }
 0x14c   : > { %1748 = vst [vmem:[%s2849_s9 + $0x88] sm:$0xff] %v1716_v8  ;;  %v1591_v14 = vadd.f32 %v2836_v30, %v1552_v9  ;;  %v1553_v23 = vmul.f32 %v2340_v10, %v2829_v25  ;;  %v2068_v10 = vunpack.c.l.bf16 %v2084_v62 }
 0x14d   : > { %v1689_v24 = vadd.f32 %v2052_v6, %v1593_v11  ;;  %v1594_v26 = vadd.f32 %v2836_v30, %v1555_v12  ;;  %v2247_v27 = vpop.f32.mrb[24].mxu1 }
 0x14e   : > { %v1687_v28 = vadd.f32 %v2048_v22, %v1591_v14  ;;  %v1592_v29 = vadd.f32 %v2836_v30, %v1553_v23  ;;  %v2295_v31 = vpop.f32.mrb[24].mxu0  ;;  %v1108_v33 = vpop.f32.mrb[25].mxu1  ;;  %v2064_v23 = vunpack.c.l.bf16 %v2083_v4 }
 0x14f   : > { %v1721_v34 = vmax.f32 %v1689_v24, 0.0  ;;  %v1690_v35 = vadd.f32 %v2053_v13, %v1594_v26  ;;  %v2341_v36 = vadd.f32 %v2295_v31, %v2247_v27  ;;  %v1462_v37 = vpop.f32.mrb[25].mxu0  ;;  %v2248_v39 = vpop.f32.mrb[26].mxu1  ;;  %v2069_v27 = vunpack.c.h.bf16 %v2084_v62 }
 0x150   : > { %v1719_v40 = vmax.f32 %v1687_v28, 0.0  ;;  %v1688_v41 = vadd.f32 %v2049_v15, %v1592_v29  ;;  %v2342_v42 = vadd.f32 %v1462_v37, %v1108_v33  ;;  %v2296_v16 = vpop.f32.mrb[26].mxu0  ;;  %v1111_v43 = vpop.f32.mrb[27].mxu1  ;;  %v2065_v31 = vunpack.c.h.bf16 %v2083_v4 }
 0x151   : > { %1753 = vst [vmem:[%s2849_s9 + $0xb0] sm:$0xff] %v1721_v34  ;;  %v1722_v44 = vmax.f32 %v1690_v35, 0.0  ;;  %v1558_v17 = vmul.f32 %v2341_v36, %v2829_v25  ;;  %v2343_v46 = vadd.f32 %v2296_v16, %v2248_v39  ;;  %v1465_v47 = vpop.f32.mrb[27].mxu0 }
 0x152   : > { %1751 = vst [vmem:[%s2849_s9 + $0xa0] sm:$0xff] %v1719_v40  ;;  %v1720_v18 = vmax.f32 %v1688_v41, 0.0  ;;  %v1556_v48 = vmul.f32 %v2342_v42, %v2829_v25  ;;  %v2344_v50 = vadd.f32 %v1465_v47, %v1111_v43 }
 0x153   : > { %1754 = vst [vmem:[%s2849_s9 + $0xb8] sm:$0xff] %v1722_v44  ;;  %v1597_v51 = vadd.f32 %v2836_v30, %v1558_v17  ;;  %v1559_v19 = vmul.f32 %v2343_v46, %v2829_v25 }
 0x154   : > { %1752 = vst [vmem:[%s2849_s9 + $0xa8] sm:$0xff] %v1720_v18  ;;  %v1595_v53 = vadd.f32 %v2836_v30, %v1556_v48  ;;  %v1557_v54 = vmul.f32 %v2344_v50, %v2829_v25 }
 0x155   : > { %v1693_v56 = vadd.f32 %v2060_v45, %v1597_v51  ;;  %v1598_v57 = vadd.f32 %v2836_v30, %v1559_v19  ;;  %v2251_v58 = vpop.f32.mrb[28].mxu1 }
 0x156   : > { %v1691_v59 = vadd.f32 %v2056_v49, %v1595_v53  ;;  %v1596_v60 = vadd.f32 %v2836_v30, %v1557_v54  ;;  %v2299_v61 = vpop.f32.mrb[28].mxu0  ;;  %v1124_v63 = vpop.f32.mrb[29].mxu1 }
 0x157   : > { %v1725_v0 = vmax.f32 %v1693_v56, 0.0  ;;  %v1694_v1 = vadd.f32 %v2061_v52, %v1598_v57  ;;  %v2345_v2 = vadd.f32 %v2299_v61, %v2251_v58  ;;  %v1478_v3 = vpop.f32.mrb[29].mxu0  ;;  %v2252_v20 = vpop.f32.mrb[30].mxu1 }
 0x158   : > { %v1723_v5 = vmax.f32 %v1691_v59, 0.0  ;;  %v1692_v6 = vadd.f32 %v2057_v55, %v1596_v60  ;;  %v2346_v21 = vadd.f32 %v1478_v3, %v1124_v63  ;;  %v2300_v7 = vpop.f32.mrb[30].mxu0  ;;  %v1127_v8 = vpop.f32.mrb[31].mxu1 }
 0x159   : > { %1757 = vst [vmem:[%s2849_s9 + $0xd0] sm:$0xff] %v1725_v0  ;;  %v1726_v9 = vmax.f32 %v1694_v1, 0.0  ;;  %v1562_v22 = vmul.f32 %v2345_v2, %v2829_v25  ;;  %v2347_v11 = vadd.f32 %v2300_v7, %v2252_v20  ;;  %v1481_v12 = vpop.f32.mrb[31].mxu0 }
 0x15a   : > { %1755 = vst [vmem:[%s2849_s9 + $0xc0] sm:$0xff] %v1723_v5  ;;  %v1724_v13 = vmax.f32 %v1692_v6, 0.0  ;;  %v1560_v14 = vmul.f32 %v2346_v21, %v2829_v25  ;;  %v2348_v15 = vadd.f32 %v1481_v12, %v1127_v8 }
 0x15b   : > { %1758 = vst [vmem:[%s2849_s9 + $0xd8] sm:$0xff] %v1726_v9  ;;  %v1601_v24 = vadd.f32 %v2836_v30, %v1562_v22  ;;  %v1563_v26 = vmul.f32 %v2347_v11, %v2829_v25 }
 0x15c   : > { %1756 = vst [vmem:[%s2849_s9 + $0xc8] sm:$0xff] %v1724_v13  ;;  %v1599_v28 = vadd.f32 %v2836_v30, %v1560_v14  ;;  %v1561_v29 = vmul.f32 %v2348_v15, %v2829_v25 }
 0x15d   : > { %v1697_v32 = vadd.f32 %v2068_v10, %v1601_v24  ;;  %v1602_v33 = vadd.f32 %v2836_v30, %v1563_v26 }
 0x15e   : > { %v1695_v34 = vadd.f32 %v2064_v23, %v1599_v28  ;;  %v1600_v35 = vadd.f32 %v2836_v30, %v1561_v29 }
 0x15f   : > { %v1729_v36 = vmax.f32 %v1697_v32, 0.0  ;;  %v1698_v37 = vadd.f32 %v2069_v27, %v1602_v33 }
 0x160   : > { %v1727_v38 = vmax.f32 %v1695_v34, 0.0  ;;  %v1696_v39 = vadd.f32 %v2065_v31, %v1600_v35 }
 0x161   : > { %1761 = vst [vmem:[%s2849_s9 + $0xf0] sm:$0xff] %v1729_v36  ;;  %v1730_v40 = vmax.f32 %v1698_v37, 0.0 }
 0x162   : > { %1759 = vst [vmem:[%s2849_s9 + $0xe0] sm:$0xff] %v1727_v38  ;;  %v1728_v41 = vmax.f32 %v1696_v39, 0.0 }
 0x163   : > { %1762 = vst [vmem:[%s2849_s9 + $0xf8] sm:$0xff] %v1730_v40 }
 0x164   : > { %1760 = vst [vmem:[%s2849_s9 + $0xe8] sm:$0xff] %v1728_v41 }
 0x165 PF: > { %s17_s28 = sadd.s32 1, %s2531_s28   ;;  %s2986_s24 = smov %s2523_s26 }
 0x166   : > { %p14_p9 = scmp.ge.s32.totalorder %s17_s28, 18   ;;  %s2987_s25 = smov %s2527_s27 }
 0x167   : > { %s2988_s26 = smov %s2991_s29  ;;  %s2989_s27 = smov %s2995_s30 }
 0x168   :  { %16 = sbr.rel (!%p14_p9) target bundleno = 3 (0x3), region = 89 }

</bundles_post_ra>
